<compile_context>
chip_gen: v7x
topology: tpu7x:2x2x1
jax: 0.10.0
libtpu: 0.0.40
codegen_flags: <defaults>
</compile_context>

<pallas_src>
import functools

import jax
import jax.numpy as jnp
from jax.experimental import pallas as pl
from jax.experimental.pallas import tpu as pltpu


_LANES = 128
_NUM_GATES = 9   # column blocks: [i_s | f_s | o_s | alpha | i_p | f_p | o_p | g_s | g_p]


def _round_up(x, m):
    return ((x + m - 1) // m) * m


# ---------------------------------------------------------------------------
# Pallas kernel: one grid step == one block of TB timesteps of the recurrence
# ---------------------------------------------------------------------------
def _duality_lstm_kernel(
    hc0_ref,     # [Bt, 2*Hp]       initial (h | c), zero-padded
    pre_ref,     # [TB, Bt, 9*Hp]   hoisted x-projections (+ biases), f32
    w_hbm_ref,   # [2*Hp, 9*Hp]     fused recurrent weights, left in HBM (pl.ANY)
    out_ref,     # [TB, Bt, 2*Hp]   per-step (h | c) slab (lane-dense)
    h_sc,        # [Bt, Hp]         recurrent carry (persists across grid steps)
    c_sc,        # [Bt, Hp]
    w_sc,        # [2*Hp, 9*Hp]     single-buffered resident weights
    *, hidden_pad, time_block, epsilon,
):
    Hp = hidden_pad
    t_blk = pl.program_id(1)   # serial ("arbitrary") time-block axis

    @pl.when(t_blk == 0)
    def _():
        # One-time HBM -> VMEM copy of the recurrent weights (single-buffered
        # residency instead of BlockSpec double-buffering).
        pltpu.sync_copy(w_hbm_ref, w_sc)
        hc0 = hc0_ref[...]
        h_sc[...] = hc0[:, :Hp]
        c_sc[...] = hc0[:, Hp:]

    def one_step(i, carry):
        h = h_sc[...]
        c = c_sc[...]

        # Single fused recurrent matmul per step: [h | log(h+eps)] against the
        # block-diagonal [2*Hp, 9*Hp] weight.  x contributions and biases were
        # hoisted into pre_ref outside the kernel.
        hl = jnp.concatenate([h, jnp.log(h + epsilon)], axis=-1)       # [Bt, 2*Hp]
        gates = (
            jnp.dot(hl.astype(w_sc.dtype), w_sc[...],
                    preferred_element_type=jnp.float32)
            + pre_ref[i]
        )                                                              # [Bt, 9*Hp]

        # Gate blocks are 128-lane aligned: one sigmoid pass over the 7 sigmoid
        # gates and one tanh pass over the 2 tanh gates, on whole vregs.
        sig = jax.nn.sigmoid(gates[:, : 7 * Hp])
        tnh = jnp.tanh(gates[:, 7 * Hp:])
        i_s = sig[:, 0 * Hp:1 * Hp]
        f_s = sig[:, 1 * Hp:2 * Hp]
        o_s = sig[:, 2 * Hp:3 * Hp]
        alpha = sig[:, 3 * Hp:4 * Hp]
        i_p = sig[:, 4 * Hp:5 * Hp]
        f_p = sig[:, 5 * Hp:6 * Hp]
        o_p = sig[:, 6 * Hp:7 * Hp]
        g_s = tnh[:, :Hp]
        g_p = tnh[:, Hp:]

        c_sum = f_s * c + i_s * g_s
        c_prod = f_p * c + i_p * g_p
        h_sum = o_s * jnp.tanh(c_sum)
        h_prod = o_p * jnp.tanh(c_prod)

        # Duality blend (FMA form): a + alpha * (b - a).
        c_new = c_prod + alpha * (c_sum - c_prod)
        h_new = h_prod + alpha * (h_sum - h_prod)

        h_sc[...] = h_new
        c_sc[...] = c_new
        # 128-aligned, lane-dense stores; no concatenate on the store path.
        out_ref[i, :, :Hp] = h_new
        out_ref[i, :, Hp:] = c_new
        return carry

    jax.lax.fori_loop(0, time_block, one_step, None, unroll=True)


# ---------------------------------------------------------------------------
# Wrappers
# ---------------------------------------------------------------------------
def duality_lstm_sequence(xs, h0, c0, packed, *, epsilon=1e-6, time_block=None):
    """Apply the DualityLSTM cell over a sequence inside ONE pallas_call.

    xs: [T, B, I]; h0, c0: [B, H]. Returns (h_seq, c_seq), each [T, B, H],
    where step t equals the module's forward applied recurrently.
    """
    T, B, I = xs.shape
    H = packed["hidden_size"]
    Hp = packed["hidden_pad"]
    NG = _NUM_GATES
    w_x, w_h, bias = packed["w_x"], packed["w_h"], packed["b"]

    # --- time blocking: largest divisor of T that is <= 16 ------------------
    if time_block is None:
        time_block = 1
        for cand in range(min(T, 16), 0, -1):
            if T % cand == 0:
                time_block = cand
                break
    assert T % time_block == 0, (T, time_block)
    n_tblocks = T // time_block

    # --- batch tiling: use both v7x TensorCores when B splits by sublanes ---
    n_btiles = 2 if (B % 16 == 0) else 1
    b_tile = B // n_btiles

    # --- hoisted, time-parallel x-projection (one big MXU matmul) -----------
    x2 = xs.reshape(T * B, I)
    xlog = jnp.concatenate([x2, jnp.log(x2 + epsilon)], axis=-1)       # [T*B, 2I]
    pre = (
        jnp.dot(xlog.astype(w_x.dtype), w_x, preferred_element_type=jnp.float32)
        + bias
    ).reshape(T, B, NG * Hp)

    # --- padded initial state ------------------------------------------------
    hc0 = jnp.zeros((B, 2 * Hp), jnp.float32)
    hc0 = hc0.at[:, :H].set(h0).at[:, Hp:Hp + H].set(c0)

    # --- explicit VMEM budget + advisory cost estimate -----------------------
    est_vmem = (
        w_h.size * w_h.dtype.itemsize                       # resident weights (single buffer)
        + 2 * time_block * b_tile * (NG * Hp) * 4           # pre (double-buffered)
        + 2 * time_block * b_tile * (2 * Hp) * 4            # out (double-buffered)
        + 2 * b_tile * (2 * Hp) * 4                         # hc0
        + 2 * b_tile * Hp * 4                               # h/c carries
    )
    vmem_limit = int(min(2 * est_vmem + (16 << 20), 64 << 20))

    flops = 2 * T * B * (2 * Hp) * (NG * Hp)
    transcendentals = T * B * 12 * Hp
    bytes_accessed = (
        4 * (pre.size + T * B * 2 * Hp + hc0.size) + w_h.size * w_h.dtype.itemsize
    )

    grid_spec = pltpu.PrefetchScalarGridSpec(
        num_scalar_prefetch=0,
        grid=(n_btiles, n_tblocks),
        in_specs=[
            pl.BlockSpec((b_tile, 2 * Hp), lambda b, s: (b, 0)),                 # hc0
            pl.BlockSpec((time_block, b_tile, NG * Hp), lambda b, s: (s, b, 0)),  # pre
            pl.BlockSpec(memory_space=pl.ANY),                                   # w_h (HBM)
        ],
        out_specs=pl.BlockSpec((time_block, b_tile, 2 * Hp), lambda b, s: (s, b, 0)),
        scratch_shapes=[
            pltpu.VMEM((b_tile, Hp), jnp.float32),       # h carry
            pltpu.VMEM((b_tile, Hp), jnp.float32),       # c carry
            pltpu.VMEM((2 * Hp, NG * Hp), w_h.dtype),    # resident recurrent weights
        ],
    )

    hc_seq = pl.pallas_call(
        functools.partial(
            _duality_lstm_kernel,
            hidden_pad=Hp, time_block=time_block, epsilon=epsilon,
        ),
        out_shape=jax.ShapeDtypeStruct((T, B, 2 * Hp), jnp.float32),
        grid_spec=grid_spec,
        compiler_params=pltpu.CompilerParams(
            dimension_semantics=("parallel", "arbitrary"),
            vmem_limit_bytes=vmem_limit,
        ),
        cost_estimate=pl.CostEstimate(
            flops=int(flops),
            transcendentals=int(transcendentals),
            bytes_accessed=int(bytes_accessed),
        ),
    )(hc0, pre, w_h)

    return hc_seq[:, :, :H], hc_seq[:, :, Hp:Hp + H]


def duality_lstm_forward(x, h, c, packed, *, epsilon=1e-6):
    """Single-step call matching the PyTorch module: returns (h', (h', c'))."""
    h_seq, c_seq = duality_lstm_sequence(x[None], h, c, packed, epsilon=epsilon)
    return h_seq[0], (h_seq[0], c_seq[0])


# ---------------------------------------------------------------------------
# Parameters (mirrors the module's reset_parameters, with test-only knobs)
# ---------------------------------------------------------------------------
def init_params(key, input_size, hidden_size, *, weight_scale=1.0,
                extra_gate_bias=0.0, alpha_scale=0.0):
    """Defaults mirror the PyTorch module's init (LSTMCell uniform, orthogonal
    product weights, product forget-gate bias 1, zero alpha params).

    weight_scale / extra_gate_bias / alpha_scale are test-only knobs used in
    __main__ to keep the recurrent hidden state strictly positive over a
    multi-step rollout (the module's product path takes log(h + eps), so it
    implicitly requires h > 0).
    """
    H, I = hidden_size, input_size
    k = 1.0 / jnp.sqrt(jnp.float32(H))
    keys = jax.random.split(key, 9)

    wih_sum = weight_scale * jax.random.uniform(keys[0], (4 * H, I), jnp.float32, -k, k)
    whh_sum = weight_scale * jax.random.uniform(keys[1], (4 * H, H), jnp.float32, -k, k)
    bih_sum = weight_scale * jax.random.uniform(keys[2], (4 * H,), jnp.float32, -k, k)
    bhh_sum = weight_scale * jax.random.uniform(keys[3], (4 * H,), jnp.float32, -k, k)

    ortho = jax.nn.initializers.orthogonal()
    wih_prod = weight_scale * ortho(keys[4], (4 * H, I), jnp.float32)
    whh_prod = weight_scale * ortho(keys[5], (4 * H, H), jnp.float32)
    bih_prod = jnp.zeros((4 * H,), jnp.float32).at[H:2 * H].set(1.0)   # forget gate
    bhh_prod = jnp.zeros((4 * H,), jnp.float32)

    wih_alpha = alpha_scale * jax.random.uniform(keys[6], (H, I), jnp.float32, -1.0, 1.0)
    whh_alpha = alpha_scale * jax.random.uniform(keys[7], (H, H), jnp.float32, -1.0, 1.0)
    b_alpha = alpha_scale * jax.random.uniform(keys[8], (H,), jnp.float32, -1.0, 1.0)

    b_sum = bih_sum + bhh_sum
    b_prod = bih_prod + bhh_prod
    if extra_gate_bias:
        boost = jnp.zeros((4 * H,), jnp.float32)
        boost = boost.at[:H].set(extra_gate_bias)            # i gate
        boost = boost.at[2 * H:3 * H].set(extra_gate_bias)   # g gate
        boost = boost.at[3 * H:].set(extra_gate_bias)        # o gate
        b_sum = b_sum + boost
        b_prod = b_prod + boost

    return dict(
        wih_sum_t=wih_sum.T, whh_sum_t=whh_sum.T, b_sum=b_sum.reshape(1, 4 * H),
        wih_prod_t=wih_prod.T, whh_prod_t=whh_prod.T, b_prod=b_prod.reshape(1, 4 * H),
        wih_alpha_t=wih_alpha.T, whh_alpha_t=whh_alpha.T, b_alpha=b_alpha.reshape(1, H),
    )


def pack_params(p, *, weight_dtype=jnp.float32):
    """Pack module parameters into the fused, 128-lane-padded kernel layout.

      w_x : [2*I, 9*Hp]   rows [x | log(x+eps)]   (hoisted input projection)
      w_h : [2*Hp, 9*Hp]  rows [h | log(h+eps)]   (block-diagonal recurrent)
      b   : [1, 9*Hp]     fused biases (kept f32)

    Gate column order (each block Hp wide, first H columns real, rest zero):
      [i_s | f_s | o_s | alpha | i_p | f_p | o_p | g_s | g_p]
    so the 7 sigmoid gates are contiguous and the 2 tanh gates come last.
    Zero pad rows/columns keep the padded hidden lanes exactly zero.
    Use weight_dtype=jnp.bfloat16 on v6e/v7x to halve VMEM residency.
    """
    I = p["wih_sum_t"].shape[0]
    H = p["whh_sum_t"].shape[0]
    Hp = _round_up(max(H, 1), _LANES)
    NG = _NUM_GATES

    def gate(w, k):                      # torch LSTM gate order (i, f, g, o)
        return w[:, k * H:(k + 1) * H]

    def put(mat, row0, slot, block):
        r = block.shape[0]
        return mat.at[row0:row0 + r, slot * Hp:slot * Hp + H].set(block)

    # Hoisted input-projection weight: rows 0:I act on x, rows I:2I on log(x+eps).
    w_x = jnp.zeros((2 * I, NG * Hp), jnp.float32)
    w_x = put(w_x, 0, 0, gate(p["wih_sum_t"], 0))     # i_s
    w_x = put(w_x, 0, 1, gate(p["wih_sum_t"], 1))     # f_s
    w_x = put(w_x, 0, 2, gate(p["wih_sum_t"], 3))     # o_s
    w_x = put(w_x, 0, 3, p["wih_alpha_t"])            # alpha
    w_x = put(w_x, 0, 7, gate(p["wih_sum_t"], 2))     # g_s
    w_x = put(w_x, I, 4, gate(p["wih_prod_t"], 0))    # i_p
    w_x = put(w_x, I, 5, gate(p["wih_prod_t"], 1))    # f_p
    w_x = put(w_x, I, 6, gate(p["wih_prod_t"], 3))    # o_p
    w_x = put(w_x, I, 8, gate(p["wih_prod_t"], 2))    # g_p

    # Fused recurrent weight: rows 0:Hp act on h, rows Hp:2Hp on log(h+eps).
    w_h = jnp.zeros((2 * Hp, NG * Hp), jnp.float32)
    w_h = put(w_h, 0, 0, gate(p["whh_sum_t"], 0))
    w_h = put(w_h, 0, 1, gate(p["whh_sum_t"], 1))
    w_h = put(w_h, 0, 2, gate(p["whh_sum_t"], 3))
    w_h = put(w_h, 0, 3, p["whh_alpha_t"])
    w_h = put(w_h, 0, 7, gate(p["whh_sum_t"], 2))
    w_h = put(w_h, Hp, 4, gate(p["whh_prod_t"], 0))
    w_h = put(w_h, Hp, 5, gate(p["whh_prod_t"], 1))
    w_h = put(w_h, Hp, 6, gate(p["whh_prod_t"], 3))
    w_h = put(w_h, Hp, 8, gate(p["whh_prod_t"], 2))

    # Fused bias (f32; folded into the hoisted projection in the wrapper).
    b = jnp.zeros((1, NG * Hp), jnp.float32)

    def putb(mat, slot, vec):
        return mat.at[:, slot * Hp:slot * Hp + H].set(vec.reshape(1, H))

    bs, bp = p["b_sum"], p["b_prod"]
    b = putb(b, 0, bs[0, 0 * H:1 * H])
    b = putb(b, 1, bs[0, 1 * H:2 * H])
    b = putb(b, 2, bs[0, 3 * H:4 * H])
    b = putb(b, 7, bs[0, 2 * H:3 * H])
    b = putb(b, 3, p["b_alpha"][0])
    b = putb(b, 4, bp[0, 0 * H:1 * H])
    b = putb(b, 5, bp[0, 1 * H:2 * H])
    b = putb(b, 6, bp[0, 3 * H:4 * H])
    b = putb(b, 8, bp[0, 2 * H:3 * H])

    return dict(
        w_x=w_x.astype(weight_dtype),
        w_h=w_h.astype(weight_dtype),
        b=b,
        hidden_size=H,
        hidden_pad=Hp,
        input_size=I,
    )


# ---------------------------------------------------------------------------
# Pure-JAX reference (original module math, unpacked weights, original order)
# ---------------------------------------------------------------------------
def reference_step(x, h, c, p, *, hidden_size, epsilon=1e-6):
    H = hidden_size

    g_s = x @ p["wih_sum_t"] + h @ p["whh_sum_t"] + p["b_sum"]
    i_s = jax.nn.sigmoid(g_s[:, :H]); f_s = jax.nn.sigmoid(g_s[:, H:2 * H])
    gg_s = jnp.tanh(g_s[:, 2 * H:3 * H]); o_s = jax.nn.sigmoid(g_s[:, 3 * H:])
    c_sum = f_s * c + i_s * gg_s
    h_sum = o_s * jnp.tanh(c_sum)

    g_p = (jnp.log(x + epsilon) @ p["wih_prod_t"]
           + jnp.log(h + epsilon) @ p["whh_prod_t"] + p["b_prod"])
    i_p = jax.nn.sigmoid(g_p[:, :H]); f_p = jax.nn.sigmoid(g_p[:, H:2 * H])
    gg_p = jnp.tanh(g_p[:, 2 * H:3 * H]); o_p = jax.nn.sigmoid(g_p[:, 3 * H:])
    c_prod = f_p * c + i_p * gg_p
    h_prod = o_p * jnp.tanh(c_prod)

    alpha = jax.nn.sigmoid(x @ p["wih_alpha_t"] + h @ p["whh_alpha_t"] + p["b_alpha"])
    c_new = alpha * c_sum + (1 - alpha) * c_prod
    h_new = alpha * h_sum + (1 - alpha) * h_prod
    return h_new, c_new


# ---------------------------------------------------------------------------
if __name__ == "__main__":
    INPUT_SIZE, HIDDEN_SIZE, BATCH, SEQ = 16, 32, 8, 8

    key = jax.random.PRNGKey(0)
    k_param, k_x, k_h, k_c = jax.random.split(key, 4)

    # Test parameters: small weights + positive (i, g, o) gate biases keep h
    # strictly positive across the rollout so log(h + eps) stays well-defined
    # (the reference module's implicit precondition).
    params = init_params(k_param, INPUT_SIZE, HIDDEN_SIZE,
                         weight_scale=0.05, extra_gate_bias=3.0, alpha_scale=0.1)
    packed = pack_params(params)   # f32 weights for the tight-tolerance check

    xs = jax.random.uniform(k_x, (SEQ, BATCH, INPUT_SIZE), jnp.float32, 0.05, 1.0)
    h0 = jax.random.uniform(k_h, (BATCH, HIDDEN_SIZE), jnp.float32, 0.05, 1.0)
    c0 = jax.random.uniform(k_c, (BATCH, HIDDEN_SIZE), jnp.float32, 0.05, 1.0)

    # Time-fused kernel over the whole sequence.
    h_seq, c_seq = duality_lstm_sequence(xs, h0, c0, packed)
    jax.block_until_ready((h_seq, c_seq))
    assert h_seq.shape == (SEQ, BATCH, HIDDEN_SIZE)
    assert bool(jnp.all(jnp.isfinite(h_seq))) and bool(jnp.all(jnp.isfinite(c_seq)))

    # Pure-JAX reference rollout.
    h_ref, c_ref = h0, c0
    for t in range(SEQ):
        h_ref, c_ref = reference_step(xs[t], h_ref, c_ref, params,
                                      hidden_size=HIDDEN_SIZE)
        assert jnp.allclose(h_seq[t], h_ref, atol=1e-4, rtol=1e-4), f"h mismatch t={t}"
        assert jnp.allclose(c_seq[t], c_ref, atol=1e-4, rtol=1e-4), f"c mismatch t={t}"

    # Single-step call matching the module's forward signature.
    h1, (h1b, c1) = duality_lstm_forward(xs[0], h0, c0, packed)
    h1_ref, c1_ref = reference_step(xs[0], h0, c0, params, hidden_size=HIDDEN_SIZE)
    assert jnp.allclose(h1, h1_ref, atol=1e-5, rtol=1e-5)
    assert jnp.allclose(c1, c1_ref, atol=1e-5, rtol=1e-5)

    # bf16 weight packing (v6e/v7x VMEM-residency recommendation): f32
    # accumulation, looser tolerance vs the f32 kernel.
    packed_bf16 = pack_params(params, weight_dtype=jnp.bfloat16)
    h_bf, c_bf = duality_lstm_sequence(xs, h0, c0, packed_bf16)
    jax.block_until_ready((h_bf, c_bf))
    assert jnp.allclose(h_bf, h_seq, atol=5e-2, rtol=5e-2)
    assert jnp.allclose(c_bf, c_seq, atol=5e-2, rtol=5e-2)

    print("KERNEL_OK")
</pallas_src>

<mosaic_0001>
module attributes {stable_mosaic.version = 11 : i64} {
  func.func @_duality_lstm_kernel(%arg0: i32, %arg1: i32, %arg2: memref<8x256xf32, #tpu.memory_space<vmem>>, %arg3: memref<8x8x1152xf32, #tpu.memory_space<vmem>>, %arg4: memref<256x1152xf32, #tpu.memory_space<any>>, %arg5: memref<8x8x256xf32, #tpu.memory_space<vmem>>, %arg6: memref<8x128xf32, #tpu.memory_space<vmem>>, %arg7: memref<8x128xf32, #tpu.memory_space<vmem>>, %arg8: memref<256x1152xf32, #tpu.memory_space<vmem>>) attributes {dimension_semantics = [#tpu.dimension_semantics<parallel>, #tpu.dimension_semantics<arbitrary>], iteration_bounds = array<i64: 1, 1>, scalar_prefetch = 0 : i64, scratch_operands = 3 : i64, tpu.core_type = #tpu.core_type<tc>, window_params = [{transform_indices = @transform_0, window_bounds = array<i64: 8, 256>}, {transform_indices = @transform_1, window_bounds = array<i64: 8, 8, 1152>}, {}, {transform_indices = @transform_3, window_bounds = array<i64: 8, 8, 256>}]} {
    %c0_i32 = arith.constant 0 : i32
    %0 = arith.cmpi eq, %arg1, %c0_i32 : i32
    %1 = arith.extui %0 : i1 to i32
    %c0_i32_0 = arith.constant 0 : i32
    %2 = arith.cmpi ne, %1, %c0_i32_0 : i32
    scf.if %2 {
      "tpu.region"() ({
        %448 = tpu.sem_alloc : memref<!tpu.dma_semaphore, #tpu.memory_space<semaphore_mem>>
        tpu.enqueue_dma source(%arg4 : memref<256x1152xf32, #tpu.memory_space<any>>) target(%arg8 : memref<256x1152xf32, #tpu.memory_space<vmem>>) target_semaphore(%448 : memref<!tpu.dma_semaphore, #tpu.memory_space<semaphore_mem>>)
        tpu.wait_dma2 semaphore(%448 : memref<!tpu.dma_semaphore, #tpu.memory_space<semaphore_mem>>) src(%arg4 : memref<256x1152xf32, #tpu.memory_space<any>>) dst(%arg8 : memref<256x1152xf32, #tpu.memory_space<vmem>>)
        tpu.yield
      }) : () -> ()
      %c0_151 = arith.constant 0 : index
      %c0_152 = arith.constant 0 : index
      %443 = vector.load %arg2[%c0_151, %c0_152] : memref<8x256xf32, #tpu.memory_space<vmem>>, vector<8x256xf32>
      %444 = vector.extract_strided_slice %443 {offsets = [0, 0], sizes = [8, 128], strides = [1, 1]} : vector<8x256xf32> to vector<8x128xf32>
      %c0_153 = arith.constant 0 : index
      %c0_154 = arith.constant 0 : index
      %445 = vector.load %arg6[%c0_153, %c0_154] : memref<8x128xf32, #tpu.memory_space<vmem>>, vector<8x128xf32>
      tpu.vector_store %arg6[%c0_153, %c0_154], %444 {strides = array<i32>} : memref<8x128xf32, #tpu.memory_space<vmem>>, vector<8x128xf32>,
      %446 = vector.extract_strided_slice %443 {offsets = [0, 128], sizes = [8, 128], strides = [1, 1]} : vector<8x256xf32> to vector<8x128xf32>
      %c0_155 = arith.constant 0 : index
      %c0_156 = arith.constant 0 : index
      %447 = vector.load %arg7[%c0_155, %c0_156] : memref<8x128xf32, #tpu.memory_space<vmem>>, vector<8x128xf32>
      tpu.vector_store %arg7[%c0_155, %c0_156], %446 {strides = array<i32>} : memref<8x128xf32, #tpu.memory_space<vmem>>, vector<8x128xf32>,
    } else {
    }
    %c0_i32_1 = arith.constant 0 : i32
    %c0 = arith.constant 0 : index
    %c0_2 = arith.constant 0 : index
    %3 = vector.load %arg6[%c0, %c0_2] : memref<8x128xf32, #tpu.memory_space<vmem>>, vector<8x128xf32>
    %c0_3 = arith.constant 0 : index
    %c0_4 = arith.constant 0 : index
    %4 = vector.load %arg7[%c0_3, %c0_4] : memref<8x128xf32, #tpu.memory_space<vmem>>, vector<8x128xf32>
    %cst = arith.constant 9.99999997E-7 : f32
    %5 = vector.broadcast %cst : f32 to vector<8x128xf32>
    %6 = arith.addf %3, %5 : vector<8x128xf32>
    %7 = math.log %6 : vector<8x128xf32>
    %8 = tpu.concatenate %3, %7 in 1 : vector<8x128xf32>, vector<8x128xf32> -> vector<8x256xf32>
    %c0_5 = arith.constant 0 : index
    %c0_6 = arith.constant 0 : index
    %9 = vector.load %arg8[%c0_5, %c0_6] : memref<256x1152xf32, #tpu.memory_space<vmem>>, vector<256x1152xf32>
    %cst_7 = arith.constant dense<0.000000e+00> : vector<8x1152xf32>
    %10 = tpu.matmul %8, %9, %cst_7 {dimension_numbers = #tpu.dot_dimension_numbers<[1], [0], [0], [1], [0, 0, 1, 1], [], []>} : vector<8x256xf32>, vector<256x1152xf32>, vector<8x1152xf32> -> vector<8x1152xf32>
    %11 = arith.index_cast %c0_i32_1 : i32 to index
    %c0_8 = arith.constant 0 : index
    %c0_9 = arith.constant 0 : index
    %12 = vector.load %arg3[%11, %c0_8, %c0_9] : memref<8x8x1152xf32, #tpu.memory_space<vmem>>, vector<1x8x1152xf32>
    %13 = vector.shape_cast %12 : vector<1x8x1152xf32> to vector<8x1152xf32>
    %14 = arith.addf %10, %13 : vector<8x1152xf32>
    %15 = vector.extract_strided_slice %14 {offsets = [0, 0], sizes = [8, 896], strides = [1, 1]} : vector<8x1152xf32> to vector<8x896xf32>
    %16 = arith.negf %15 : vector<8x896xf32>
    %17 = math.exp %16 : vector<8x896xf32>
    %cst_10 = arith.constant 1.000000e+00 : f32
    %18 = vector.broadcast %cst_10 : f32 to vector<8x896xf32>
    %19 = arith.addf %18, %17 : vector<8x896xf32>
    %20 = arith.divf %18, %19 : vector<8x896xf32>
    %21 = vector.extract_strided_slice %14 {offsets = [0, 896], sizes = [8, 256], strides = [1, 1]} : vector<8x1152xf32> to vector<8x256xf32>
    %22 = math.tanh %21 : vector<8x256xf32>
    %23 = vector.extract_strided_slice %20 {offsets = [0, 0], sizes = [8, 128], strides = [1, 1]} : vector<8x896xf32> to vector<8x128xf32>
    %24 = vector.extract_strided_slice %20 {offsets = [0, 128], sizes = [8, 128], strides = [1, 1]} : vector<8x896xf32> to vector<8x128xf32>
    %25 = vector.extract_strided_slice %20 {offsets = [0, 256], sizes = [8, 128], strides = [1, 1]} : vector<8x896xf32> to vector<8x128xf32>
    %26 = vector.extract_strided_slice %20 {offsets = [0, 384], sizes = [8, 128], strides = [1, 1]} : vector<8x896xf32> to vector<8x128xf32>
    %27 = vector.extract_strided_slice %20 {offsets = [0, 512], sizes = [8, 128], strides = [1, 1]} : vector<8x896xf32> to vector<8x128xf32>
    %28 = vector.extract_strided_slice %20 {offsets = [0, 640], sizes = [8, 128], strides = [1, 1]} : vector<8x896xf32> to vector<8x128xf32>
    %29 = vector.extract_strided_slice %20 {offsets = [0, 768], sizes = [8, 128], strides = [1, 1]} : vector<8x896xf32> to vector<8x128xf32>
    %30 = vector.extract_strided_slice %22 {offsets = [0, 0], sizes = [8, 128], strides = [1, 1]} : vector<8x256xf32> to vector<8x128xf32>
    %31 = vector.extract_strided_slice %22 {offsets = [0, 128], sizes = [8, 128], strides = [1, 1]} : vector<8x256xf32> to vector<8x128xf32>
    %32 = arith.mulf %24, %4 : vector<8x128xf32>
    %33 = arith.mulf %23, %30 : vector<8x128xf32>
    %34 = arith.addf %32, %33 : vector<8x128xf32>
    %35 = arith.mulf %28, %4 : vector<8x128xf32>
    %36 = arith.mulf %27, %31 : vector<8x128xf32>
    %37 = arith.addf %35, %36 : vector<8x128xf32>
    %38 = math.tanh %34 : vector<8x128xf32>
    %39 = arith.mulf %25, %38 : vector<8x128xf32>
    %40 = math.tanh %37 : vector<8x128xf32>
    %41 = arith.mulf %29, %40 : vector<8x128xf32>
    %42 = arith.subf %34, %37 : vector<8x128xf32>
    %43 = arith.mulf %26, %42 : vector<8x128xf32>
    %44 = arith.addf %37, %43 : vector<8x128xf32>
    %45 = arith.subf %39, %41 : vector<8x128xf32>
    %46 = arith.mulf %26, %45 : vector<8x128xf32>
    %47 = arith.addf %41, %46 : vector<8x128xf32>
    %c0_11 = arith.constant 0 : index
    %c0_12 = arith.constant 0 : index
    %48 = vector.load %arg6[%c0_11, %c0_12] : memref<8x128xf32, #tpu.memory_space<vmem>>, vector<8x128xf32>
    tpu.vector_store %arg6[%c0_11, %c0_12], %47 {strides = array<i32>} : memref<8x128xf32, #tpu.memory_space<vmem>>, vector<8x128xf32>,
    %c0_13 = arith.constant 0 : index
    %c0_14 = arith.constant 0 : index
    %49 = vector.load %arg7[%c0_13, %c0_14] : memref<8x128xf32, #tpu.memory_space<vmem>>, vector<8x128xf32>
    tpu.vector_store %arg7[%c0_13, %c0_14], %44 {strides = array<i32>} : memref<8x128xf32, #tpu.memory_space<vmem>>, vector<8x128xf32>,
    %50 = arith.index_cast %c0_i32_1 : i32 to index
    %c0_15 = arith.constant 0 : index
    %c0_16 = arith.constant 0 : index
    %51 = vector.load %arg5[%50, %c0_15, %c0_16] : memref<8x8x256xf32, #tpu.memory_space<vmem>>, vector<1x8x128xf32>
    %52 = vector.shape_cast %51 : vector<1x8x128xf32> to vector<8x128xf32>
    %53 = vector.shape_cast %47 : vector<8x128xf32> to vector<1x8x128xf32>
    tpu.vector_store %arg5[%50, %c0_15, %c0_16], %53 {strides = array<i32>} : memref<8x8x256xf32, #tpu.memory_space<vmem>>, vector<1x8x128xf32>,
    %54 = arith.index_cast %c0_i32_1 : i32 to index
    %c0_17 = arith.constant 0 : index
    %c128 = arith.constant 128 : index
    %55 = vector.load %arg5[%54, %c0_17, %c128] : memref<8x8x256xf32, #tpu.memory_space<vmem>>, vector<1x8x128xf32>
    %56 = vector.shape_cast %55 : vector<1x8x128xf32> to vector<8x128xf32>
    %57 = vector.shape_cast %44 : vector<8x128xf32> to vector<1x8x128xf32>
    tpu.vector_store %arg5[%54, %c0_17, %c128], %57 {strides = array<i32>} : memref<8x8x256xf32, #tpu.memory_space<vmem>>, vector<1x8x128xf32>,
    %c1_i32 = arith.constant 1 : i32
    %c0_18 = arith.constant 0 : index
    %c0_19 = arith.constant 0 : index
    %58 = vector.load %arg6[%c0_18, %c0_19] : memref<8x128xf32, #tpu.memory_space<vmem>>, vector<8x128xf32>
    %c0_20 = arith.constant 0 : index
    %c0_21 = arith.constant 0 : index
    %59 = vector.load %arg7[%c0_20, %c0_21] : memref<8x128xf32, #tpu.memory_space<vmem>>, vector<8x128xf32>
    %cst_22 = arith.constant 9.99999997E-7 : f32
    %60 = vector.broadcast %cst_22 : f32 to vector<8x128xf32>
    %61 = arith.addf %58, %60 : vector<8x128xf32>
    %62 = math.log %61 : vector<8x128xf32>
    %63 = tpu.concatenate %58, %62 in 1 : vector<8x128xf32>, vector<8x128xf32> -> vector<8x256xf32>
    %c0_23 = arith.constant 0 : index
    %c0_24 = arith.constant 0 : index
    %64 = vector.load %arg8[%c0_23, %c0_24] : memref<256x1152xf32, #tpu.memory_space<vmem>>, vector<256x1152xf32>
    %cst_25 = arith.constant dense<0.000000e+00> : vector<8x1152xf32>
    %65 = tpu.matmul %63, %64, %cst_25 {dimension_numbers = #tpu.dot_dimension_numbers<[1], [0], [0], [1], [0, 0, 1, 1], [], []>} : vector<8x256xf32>, vector<256x1152xf32>, vector<8x1152xf32> -> vector<8x1152xf32>
    %66 = arith.index_cast %c1_i32 : i32 to index
    %c0_26 = arith.constant 0 : index
    %c0_27 = arith.constant 0 : index
    %67 = vector.load %arg3[%66, %c0_26, %c0_27] : memref<8x8x1152xf32, #tpu.memory_space<vmem>>, vector<1x8x1152xf32>
    %68 = vector.shape_cast %67 : vector<1x8x1152xf32> to vector<8x1152xf32>
    %69 = arith.addf %65, %68 : vector<8x1152xf32>
    %70 = vector.extract_strided_slice %69 {offsets = [0, 0], sizes = [8, 896], strides = [1, 1]} : vector<8x1152xf32> to vector<8x896xf32>
    %71 = arith.negf %70 : vector<8x896xf32>
    %72 = math.exp %71 : vector<8x896xf32>
    %cst_28 = arith.constant 1.000000e+00 : f32
    %73 = vector.broadcast %cst_28 : f32 to vector<8x896xf32>
    %74 = arith.addf %73, %72 : vector<8x896xf32>
    %75 = arith.divf %73, %74 : vector<8x896xf32>
    %76 = vector.extract_strided_slice %69 {offsets = [0, 896], sizes = [8, 256], strides = [1, 1]} : vector<8x1152xf32> to vector<8x256xf32>
    %77 = math.tanh %76 : vector<8x256xf32>
    %78 = vector.extract_strided_slice %75 {offsets = [0, 0], sizes = [8, 128], strides = [1, 1]} : vector<8x896xf32> to vector<8x128xf32>
    %79 = vector.extract_strided_slice %75 {offsets = [0, 128], sizes = [8, 128], strides = [1, 1]} : vector<8x896xf32> to vector<8x128xf32>
    %80 = vector.extract_strided_slice %75 {offsets = [0, 256], sizes = [8, 128], strides = [1, 1]} : vector<8x896xf32> to vector<8x128xf32>
    %81 = vector.extract_strided_slice %75 {offsets = [0, 384], sizes = [8, 128], strides = [1, 1]} : vector<8x896xf32> to vector<8x128xf32>
    %82 = vector.extract_strided_slice %75 {offsets = [0, 512], sizes = [8, 128], strides = [1, 1]} : vector<8x896xf32> to vector<8x128xf32>
    %83 = vector.extract_strided_slice %75 {offsets = [0, 640], sizes = [8, 128], strides = [1, 1]} : vector<8x896xf32> to vector<8x128xf32>
    %84 = vector.extract_strided_slice %75 {offsets = [0, 768], sizes = [8, 128], strides = [1, 1]} : vector<8x896xf32> to vector<8x128xf32>
    %85 = vector.extract_strided_slice %77 {offsets = [0, 0], sizes = [8, 128], strides = [1, 1]} : vector<8x256xf32> to vector<8x128xf32>
    %86 = vector.extract_strided_slice %77 {offsets = [0, 128], sizes = [8, 128], strides = [1, 1]} : vector<8x256xf32> to vector<8x128xf32>
    %87 = arith.mulf %79, %59 : vector<8x128xf32>
    %88 = arith.mulf %78, %85 : vector<8x128xf32>
    %89 = arith.addf %87, %88 : vector<8x128xf32>
    %90 = arith.mulf %83, %59 : vector<8x128xf32>
    %91 = arith.mulf %82, %86 : vector<8x128xf32>
    %92 = arith.addf %90, %91 : vector<8x128xf32>
    %93 = math.tanh %89 : vector<8x128xf32>
    %94 = arith.mulf %80, %93 : vector<8x128xf32>
    %95 = math.tanh %92 : vector<8x128xf32>
    %96 = arith.mulf %84, %95 : vector<8x128xf32>
    %97 = arith.subf %89, %92 : vector<8x128xf32>
    %98 = arith.mulf %81, %97 : vector<8x128xf32>
    %99 = arith.addf %92, %98 : vector<8x128xf32>
    %100 = arith.subf %94, %96 : vector<8x128xf32>
    %101 = arith.mulf %81, %100 : vector<8x128xf32>
    %102 = arith.addf %96, %101 : vector<8x128xf32>
    %c0_29 = arith.constant 0 : index
    %c0_30 = arith.constant 0 : index
    %103 = vector.load %arg6[%c0_29, %c0_30] : memref<8x128xf32, #tpu.memory_space<vmem>>, vector<8x128xf32>
    tpu.vector_store %arg6[%c0_29, %c0_30], %102 {strides = array<i32>} : memref<8x128xf32, #tpu.memory_space<vmem>>, vector<8x128xf32>,
    %c0_31 = arith.constant 0 : index
    %c0_32 = arith.constant 0 : index
    %104 = vector.load %arg7[%c0_31, %c0_32] : memref<8x128xf32, #tpu.memory_space<vmem>>, vector<8x128xf32>
    tpu.vector_store %arg7[%c0_31, %c0_32], %99 {strides = array<i32>} : memref<8x128xf32, #tpu.memory_space<vmem>>, vector<8x128xf32>,
    %105 = arith.index_cast %c1_i32 : i32 to index
    %c0_33 = arith.constant 0 : index
    %c0_34 = arith.constant 0 : index
    %106 = vector.load %arg5[%105, %c0_33, %c0_34] : memref<8x8x256xf32, #tpu.memory_space<vmem>>, vector<1x8x128xf32>
    %107 = vector.shape_cast %106 : vector<1x8x128xf32> to vector<8x128xf32>
    %108 = vector.shape_cast %102 : vector<8x128xf32> to vector<1x8x128xf32>
    tpu.vector_store %arg5[%105, %c0_33, %c0_34], %108 {strides = array<i32>} : memref<8x8x256xf32, #tpu.memory_space<vmem>>, vector<1x8x128xf32>,
    %109 = arith.index_cast %c1_i32 : i32 to index
    %c0_35 = arith.constant 0 : index
    %c128_36 = arith.constant 128 : index
    %110 = vector.load %arg5[%109, %c0_35, %c128_36] : memref<8x8x256xf32, #tpu.memory_space<vmem>>, vector<1x8x128xf32>
    %111 = vector.shape_cast %110 : vector<1x8x128xf32> to vector<8x128xf32>
    %112 = vector.shape_cast %99 : vector<8x128xf32> to vector<1x8x128xf32>
    tpu.vector_store %arg5[%109, %c0_35, %c128_36], %112 {strides = array<i32>} : memref<8x8x256xf32, #tpu.memory_space<vmem>>, vector<1x8x128xf32>,
    %c2_i32 = arith.constant 2 : i32
    %c0_37 = arith.constant 0 : index
    %c0_38 = arith.constant 0 : index
    %113 = vector.load %arg6[%c0_37, %c0_38] : memref<8x128xf32, #tpu.memory_space<vmem>>, vector<8x128xf32>
    %c0_39 = arith.constant 0 : index
    %c0_40 = arith.constant 0 : index
    %114 = vector.load %arg7[%c0_39, %c0_40] : memref<8x128xf32, #tpu.memory_space<vmem>>, vector<8x128xf32>
    %cst_41 = arith.constant 9.99999997E-7 : f32
    %115 = vector.broadcast %cst_41 : f32 to vector<8x128xf32>
    %116 = arith.addf %113, %115 : vector<8x128xf32>
    %117 = math.log %116 : vector<8x128xf32>
    %118 = tpu.concatenate %113, %117 in 1 : vector<8x128xf32>, vector<8x128xf32> -> vector<8x256xf32>
    %c0_42 = arith.constant 0 : index
    %c0_43 = arith.constant 0 : index
    %119 = vector.load %arg8[%c0_42, %c0_43] : memref<256x1152xf32, #tpu.memory_space<vmem>>, vector<256x1152xf32>
    %cst_44 = arith.constant dense<0.000000e+00> : vector<8x1152xf32>
    %120 = tpu.matmul %118, %119, %cst_44 {dimension_numbers = #tpu.dot_dimension_numbers<[1], [0], [0], [1], [0, 0, 1, 1], [], []>} : vector<8x256xf32>, vector<256x1152xf32>, vector<8x1152xf32> -> vector<8x1152xf32>
    %121 = arith.index_cast %c2_i32 : i32 to index
    %c0_45 = arith.constant 0 : index
    %c0_46 = arith.constant 0 : index
    %122 = vector.load %arg3[%121, %c0_45, %c0_46] : memref<8x8x1152xf32, #tpu.memory_space<vmem>>, vector<1x8x1152xf32>
    %123 = vector.shape_cast %122 : vector<1x8x1152xf32> to vector<8x1152xf32>
    %124 = arith.addf %120, %123 : vector<8x1152xf32>
    %125 = vector.extract_strided_slice %124 {offsets = [0, 0], sizes = [8, 896], strides = [1, 1]} : vector<8x1152xf32> to vector<8x896xf32>
    %126 = arith.negf %125 : vector<8x896xf32>
    %127 = math.exp %126 : vector<8x896xf32>
    %cst_47 = arith.constant 1.000000e+00 : f32
    %128 = vector.broadcast %cst_47 : f32 to vector<8x896xf32>
    %129 = arith.addf %128, %127 : vector<8x896xf32>
    %130 = arith.divf %128, %129 : vector<8x896xf32>
    %131 = vector.extract_strided_slice %124 {offsets = [0, 896], sizes = [8, 256], strides = [1, 1]} : vector<8x1152xf32> to vector<8x256xf32>
    %132 = math.tanh %131 : vector<8x256xf32>
    %133 = vector.extract_strided_slice %130 {offsets = [0, 0], sizes = [8, 128], strides = [1, 1]} : vector<8x896xf32> to vector<8x128xf32>
    %134 = vector.extract_strided_slice %130 {offsets = [0, 128], sizes = [8, 128], strides = [1, 1]} : vector<8x896xf32> to vector<8x128xf32>
    %135 = vector.extract_strided_slice %130 {offsets = [0, 256], sizes = [8, 128], strides = [1, 1]} : vector<8x896xf32> to vector<8x128xf32>
    %136 = vector.extract_strided_slice %130 {offsets = [0, 384], sizes = [8, 128], strides = [1, 1]} : vector<8x896xf32> to vector<8x128xf32>
    %137 = vector.extract_strided_slice %130 {offsets = [0, 512], sizes = [8, 128], strides = [1, 1]} : vector<8x896xf32> to vector<8x128xf32>
    %138 = vector.extract_strided_slice %130 {offsets = [0, 640], sizes = [8, 128], strides = [1, 1]} : vector<8x896xf32> to vector<8x128xf32>
    %139 = vector.extract_strided_slice %130 {offsets = [0, 768], sizes = [8, 128], strides = [1, 1]} : vector<8x896xf32> to vector<8x128xf32>
    %140 = vector.extract_strided_slice %132 {offsets = [0, 0], sizes = [8, 128], strides = [1, 1]} : vector<8x256xf32> to vector<8x128xf32>
    %141 = vector.extract_strided_slice %132 {offsets = [0, 128], sizes = [8, 128], strides = [1, 1]} : vector<8x256xf32> to vector<8x128xf32>
    %142 = arith.mulf %134, %114 : vector<8x128xf32>
    %143 = arith.mulf %133, %140 : vector<8x128xf32>
    %144 = arith.addf %142, %143 : vector<8x128xf32>
    %145 = arith.mulf %138, %114 : vector<8x128xf32>
    %146 = arith.mulf %137, %141 : vector<8x128xf32>
    %147 = arith.addf %145, %146 : vector<8x128xf32>
    %148 = math.tanh %144 : vector<8x128xf32>
    %149 = arith.mulf %135, %148 : vector<8x128xf32>
    %150 = math.tanh %147 : vector<8x128xf32>
    %151 = arith.mulf %139, %150 : vector<8x128xf32>
    %152 = arith.subf %144, %147 : vector<8x128xf32>
    %153 = arith.mulf %136, %152 : vector<8x128xf32>
    %154 = arith.addf %147, %153 : vector<8x128xf32>
    %155 = arith.subf %149, %151 : vector<8x128xf32>
    %156 = arith.mulf %136, %155 : vector<8x128xf32>
    %157 = arith.addf %151, %156 : vector<8x128xf32>
    %c0_48 = arith.constant 0 : index
    %c0_49 = arith.constant 0 : index
    %158 = vector.load %arg6[%c0_48, %c0_49] : memref<8x128xf32, #tpu.memory_space<vmem>>, vector<8x128xf32>
    tpu.vector_store %arg6[%c0_48, %c0_49], %157 {strides = array<i32>} : memref<8x128xf32, #tpu.memory_space<vmem>>, vector<8x128xf32>,
    %c0_50 = arith.constant 0 : index
    %c0_51 = arith.constant 0 : index
    %159 = vector.load %arg7[%c0_50, %c0_51] : memref<8x128xf32, #tpu.memory_space<vmem>>, vector<8x128xf32>
    tpu.vector_store %arg7[%c0_50, %c0_51], %154 {strides = array<i32>} : memref<8x128xf32, #tpu.memory_space<vmem>>, vector<8x128xf32>,
    %160 = arith.index_cast %c2_i32 : i32 to index
    %c0_52 = arith.constant 0 : index
    %c0_53 = arith.constant 0 : index
    %161 = vector.load %arg5[%160, %c0_52, %c0_53] : memref<8x8x256xf32, #tpu.memory_space<vmem>>, vector<1x8x128xf32>
    %162 = vector.shape_cast %161 : vector<1x8x128xf32> to vector<8x128xf32>
    %163 = vector.shape_cast %157 : vector<8x128xf32> to vector<1x8x128xf32>
    tpu.vector_store %arg5[%160, %c0_52, %c0_53], %163 {strides = array<i32>} : memref<8x8x256xf32, #tpu.memory_space<vmem>>, vector<1x8x128xf32>,
    %164 = arith.index_cast %c2_i32 : i32 to index
    %c0_54 = arith.constant 0 : index
    %c128_55 = arith.constant 128 : index
    %165 = vector.load %arg5[%164, %c0_54, %c128_55] : memref<8x8x256xf32, #tpu.memory_space<vmem>>, vector<1x8x128xf32>
    %166 = vector.shape_cast %165 : vector<1x8x128xf32> to vector<8x128xf32>
    %167 = vector.shape_cast %154 : vector<8x128xf32> to vector<1x8x128xf32>
    tpu.vector_store %arg5[%164, %c0_54, %c128_55], %167 {strides = array<i32>} : memref<8x8x256xf32, #tpu.memory_space<vmem>>, vector<1x8x128xf32>,
    %c3_i32 = arith.constant 3 : i32
    %c0_56 = arith.constant 0 : index
    %c0_57 = arith.constant 0 : index
    %168 = vector.load %arg6[%c0_56, %c0_57] : memref<8x128xf32, #tpu.memory_space<vmem>>, vector<8x128xf32>
    %c0_58 = arith.constant 0 : index
    %c0_59 = arith.constant 0 : index
    %169 = vector.load %arg7[%c0_58, %c0_59] : memref<8x128xf32, #tpu.memory_space<vmem>>, vector<8x128xf32>
    %cst_60 = arith.constant 9.99999997E-7 : f32
    %170 = vector.broadcast %cst_60 : f32 to vector<8x128xf32>
    %171 = arith.addf %168, %170 : vector<8x128xf32>
    %172 = math.log %171 : vector<8x128xf32>
    %173 = tpu.concatenate %168, %172 in 1 : vector<8x128xf32>, vector<8x128xf32> -> vector<8x256xf32>
    %c0_61 = arith.constant 0 : index
    %c0_62 = arith.constant 0 : index
    %174 = vector.load %arg8[%c0_61, %c0_62] : memref<256x1152xf32, #tpu.memory_space<vmem>>, vector<256x1152xf32>
    %cst_63 = arith.constant dense<0.000000e+00> : vector<8x1152xf32>
    %175 = tpu.matmul %173, %174, %cst_63 {dimension_numbers = #tpu.dot_dimension_numbers<[1], [0], [0], [1], [0, 0, 1, 1], [], []>} : vector<8x256xf32>, vector<256x1152xf32>, vector<8x1152xf32> -> vector<8x1152xf32>
    %176 = arith.index_cast %c3_i32 : i32 to index
    %c0_64 = arith.constant 0 : index
    %c0_65 = arith.constant 0 : index
    %177 = vector.load %arg3[%176, %c0_64, %c0_65] : memref<8x8x1152xf32, #tpu.memory_space<vmem>>, vector<1x8x1152xf32>
    %178 = vector.shape_cast %177 : vector<1x8x1152xf32> to vector<8x1152xf32>
    %179 = arith.addf %175, %178 : vector<8x1152xf32>
    %180 = vector.extract_strided_slice %179 {offsets = [0, 0], sizes = [8, 896], strides = [1, 1]} : vector<8x1152xf32> to vector<8x896xf32>
    %181 = arith.negf %180 : vector<8x896xf32>
    %182 = math.exp %181 : vector<8x896xf32>
    %cst_66 = arith.constant 1.000000e+00 : f32
    %183 = vector.broadcast %cst_66 : f32 to vector<8x896xf32>
    %184 = arith.addf %183, %182 : vector<8x896xf32>
    %185 = arith.divf %183, %184 : vector<8x896xf32>
    %186 = vector.extract_strided_slice %179 {offsets = [0, 896], sizes = [8, 256], strides = [1, 1]} : vector<8x1152xf32> to vector<8x256xf32>
    %187 = math.tanh %186 : vector<8x256xf32>
    %188 = vector.extract_strided_slice %185 {offsets = [0, 0], sizes = [8, 128], strides = [1, 1]} : vector<8x896xf32> to vector<8x128xf32>
    %189 = vector.extract_strided_slice %185 {offsets = [0, 128], sizes = [8, 128], strides = [1, 1]} : vector<8x896xf32> to vector<8x128xf32>
    %190 = vector.extract_strided_slice %185 {offsets = [0, 256], sizes = [8, 128], strides = [1, 1]} : vector<8x896xf32> to vector<8x128xf32>
    %191 = vector.extract_strided_slice %185 {offsets = [0, 384], sizes = [8, 128], strides = [1, 1]} : vector<8x896xf32> to vector<8x128xf32>
    %192 = vector.extract_strided_slice %185 {offsets = [0, 512], sizes = [8, 128], strides = [1, 1]} : vector<8x896xf32> to vector<8x128xf32>
    %193 = vector.extract_strided_slice %185 {offsets = [0, 640], sizes = [8, 128], strides = [1, 1]} : vector<8x896xf32> to vector<8x128xf32>
    %194 = vector.extract_strided_slice %185 {offsets = [0, 768], sizes = [8, 128], strides = [1, 1]} : vector<8x896xf32> to vector<8x128xf32>
    %195 = vector.extract_strided_slice %187 {offsets = [0, 0], sizes = [8, 128], strides = [1, 1]} : vector<8x256xf32> to vector<8x128xf32>
    %196 = vector.extract_strided_slice %187 {offsets = [0, 128], sizes = [8, 128], strides = [1, 1]} : vector<8x256xf32> to vector<8x128xf32>
    %197 = arith.mulf %189, %169 : vector<8x128xf32>
    %198 = arith.mulf %188, %195 : vector<8x128xf32>
    %199 = arith.addf %197, %198 : vector<8x128xf32>
    %200 = arith.mulf %193, %169 : vector<8x128xf32>
    %201 = arith.mulf %192, %196 : vector<8x128xf32>
    %202 = arith.addf %200, %201 : vector<8x128xf32>
    %203 = math.tanh %199 : vector<8x128xf32>
    %204 = arith.mulf %190, %203 : vector<8x128xf32>
    %205 = math.tanh %202 : vector<8x128xf32>
    %206 = arith.mulf %194, %205 : vector<8x128xf32>
    %207 = arith.subf %199, %202 : vector<8x128xf32>
    %208 = arith.mulf %191, %207 : vector<8x128xf32>
    %209 = arith.addf %202, %208 : vector<8x128xf32>
    %210 = arith.subf %204, %206 : vector<8x128xf32>
    %211 = arith.mulf %191, %210 : vector<8x128xf32>
    %212 = arith.addf %206, %211 : vector<8x128xf32>
    %c0_67 = arith.constant 0 : index
    %c0_68 = arith.constant 0 : index
    %213 = vector.load %arg6[%c0_67, %c0_68] : memref<8x128xf32, #tpu.memory_space<vmem>>, vector<8x128xf32>
    tpu.vector_store %arg6[%c0_67, %c0_68], %212 {strides = array<i32>} : memref<8x128xf32, #tpu.memory_space<vmem>>, vector<8x128xf32>,
    %c0_69 = arith.constant 0 : index
    %c0_70 = arith.constant 0 : index
    %214 = vector.load %arg7[%c0_69, %c0_70] : memref<8x128xf32, #tpu.memory_space<vmem>>, vector<8x128xf32>
    tpu.vector_store %arg7[%c0_69, %c0_70], %209 {strides = array<i32>} : memref<8x128xf32, #tpu.memory_space<vmem>>, vector<8x128xf32>,
    %215 = arith.index_cast %c3_i32 : i32 to index
    %c0_71 = arith.constant 0 : index
    %c0_72 = arith.constant 0 : index
    %216 = vector.load %arg5[%215, %c0_71, %c0_72] : memref<8x8x256xf32, #tpu.memory_space<vmem>>, vector<1x8x128xf32>
    %217 = vector.shape_cast %216 : vector<1x8x128xf32> to vector<8x128xf32>
    %218 = vector.shape_cast %212 : vector<8x128xf32> to vector<1x8x128xf32>
    tpu.vector_store %arg5[%215, %c0_71, %c0_72], %218 {strides = array<i32>} : memref<8x8x256xf32, #tpu.memory_space<vmem>>, vector<1x8x128xf32>,
    %219 = arith.index_cast %c3_i32 : i32 to index
    %c0_73 = arith.constant 0 : index
    %c128_74 = arith.constant 128 : index
    %220 = vector.load %arg5[%219, %c0_73, %c128_74] : memref<8x8x256xf32, #tpu.memory_space<vmem>>, vector<1x8x128xf32>
    %221 = vector.shape_cast %220 : vector<1x8x128xf32> to vector<8x128xf32>
    %222 = vector.shape_cast %209 : vector<8x128xf32> to vector<1x8x128xf32>
    tpu.vector_store %arg5[%219, %c0_73, %c128_74], %222 {strides = array<i32>} : memref<8x8x256xf32, #tpu.memory_space<vmem>>, vector<1x8x128xf32>,
    %c4_i32 = arith.constant 4 : i32
    %c0_75 = arith.constant 0 : index
    %c0_76 = arith.constant 0 : index
    %223 = vector.load %arg6[%c0_75, %c0_76] : memref<8x128xf32, #tpu.memory_space<vmem>>, vector<8x128xf32>
    %c0_77 = arith.constant 0 : index
    %c0_78 = arith.constant 0 : index
    %224 = vector.load %arg7[%c0_77, %c0_78] : memref<8x128xf32, #tpu.memory_space<vmem>>, vector<8x128xf32>
    %cst_79 = arith.constant 9.99999997E-7 : f32
    %225 = vector.broadcast %cst_79 : f32 to vector<8x128xf32>
    %226 = arith.addf %223, %225 : vector<8x128xf32>
    %227 = math.log %226 : vector<8x128xf32>
    %228 = tpu.concatenate %223, %227 in 1 : vector<8x128xf32>, vector<8x128xf32> -> vector<8x256xf32>
    %c0_80 = arith.constant 0 : index
    %c0_81 = arith.constant 0 : index
    %229 = vector.load %arg8[%c0_80, %c0_81] : memref<256x1152xf32, #tpu.memory_space<vmem>>, vector<256x1152xf32>
    %cst_82 = arith.constant dense<0.000000e+00> : vector<8x1152xf32>
    %230 = tpu.matmul %228, %229, %cst_82 {dimension_numbers = #tpu.dot_dimension_numbers<[1], [0], [0], [1], [0, 0, 1, 1], [], []>} : vector<8x256xf32>, vector<256x1152xf32>, vector<8x1152xf32> -> vector<8x1152xf32>
    %231 = arith.index_cast %c4_i32 : i32 to index
    %c0_83 = arith.constant 0 : index
    %c0_84 = arith.constant 0 : index
    %232 = vector.load %arg3[%231, %c0_83, %c0_84] : memref<8x8x1152xf32, #tpu.memory_space<vmem>>, vector<1x8x1152xf32>
    %233 = vector.shape_cast %232 : vector<1x8x1152xf32> to vector<8x1152xf32>
    %234 = arith.addf %230, %233 : vector<8x1152xf32>
    %235 = vector.extract_strided_slice %234 {offsets = [0, 0], sizes = [8, 896], strides = [1, 1]} : vector<8x1152xf32> to vector<8x896xf32>
    %236 = arith.negf %235 : vector<8x896xf32>
    %237 = math.exp %236 : vector<8x896xf32>
    %cst_85 = arith.constant 1.000000e+00 : f32
    %238 = vector.broadcast %cst_85 : f32 to vector<8x896xf32>
    %239 = arith.addf %238, %237 : vector<8x896xf32>
    %240 = arith.divf %238, %239 : vector<8x896xf32>
    %241 = vector.extract_strided_slice %234 {offsets = [0, 896], sizes = [8, 256], strides = [1, 1]} : vector<8x1152xf32> to vector<8x256xf32>
    %242 = math.tanh %241 : vector<8x256xf32>
    %243 = vector.extract_strided_slice %240 {offsets = [0, 0], sizes = [8, 128], strides = [1, 1]} : vector<8x896xf32> to vector<8x128xf32>
    %244 = vector.extract_strided_slice %240 {offsets = [0, 128], sizes = [8, 128], strides = [1, 1]} : vector<8x896xf32> to vector<8x128xf32>
    %245 = vector.extract_strided_slice %240 {offsets = [0, 256], sizes = [8, 128], strides = [1, 1]} : vector<8x896xf32> to vector<8x128xf32>
    %246 = vector.extract_strided_slice %240 {offsets = [0, 384], sizes = [8, 128], strides = [1, 1]} : vector<8x896xf32> to vector<8x128xf32>
    %247 = vector.extract_strided_slice %240 {offsets = [0, 512], sizes = [8, 128], strides = [1, 1]} : vector<8x896xf32> to vector<8x128xf32>
    %248 = vector.extract_strided_slice %240 {offsets = [0, 640], sizes = [8, 128], strides = [1, 1]} : vector<8x896xf32> to vector<8x128xf32>
    %249 = vector.extract_strided_slice %240 {offsets = [0, 768], sizes = [8, 128], strides = [1, 1]} : vector<8x896xf32> to vector<8x128xf32>
    %250 = vector.extract_strided_slice %242 {offsets = [0, 0], sizes = [8, 128], strides = [1, 1]} : vector<8x256xf32> to vector<8x128xf32>
    %251 = vector.extract_strided_slice %242 {offsets = [0, 128], sizes = [8, 128], strides = [1, 1]} : vector<8x256xf32> to vector<8x128xf32>
    %252 = arith.mulf %244, %224 : vector<8x128xf32>
    %253 = arith.mulf %243, %250 : vector<8x128xf32>
    %254 = arith.addf %252, %253 : vector<8x128xf32>
    %255 = arith.mulf %248, %224 : vector<8x128xf32>
    %256 = arith.mulf %247, %251 : vector<8x128xf32>
    %257 = arith.addf %255, %256 : vector<8x128xf32>
    %258 = math.tanh %254 : vector<8x128xf32>
    %259 = arith.mulf %245, %258 : vector<8x128xf32>
    %260 = math.tanh %257 : vector<8x128xf32>
    %261 = arith.mulf %249, %260 : vector<8x128xf32>
    %262 = arith.subf %254, %257 : vector<8x128xf32>
    %263 = arith.mulf %246, %262 : vector<8x128xf32>
    %264 = arith.addf %257, %263 : vector<8x128xf32>
    %265 = arith.subf %259, %261 : vector<8x128xf32>
    %266 = arith.mulf %246, %265 : vector<8x128xf32>
    %267 = arith.addf %261, %266 : vector<8x128xf32>
    %c0_86 = arith.constant 0 : index
    %c0_87 = arith.constant 0 : index
    %268 = vector.load %arg6[%c0_86, %c0_87] : memref<8x128xf32, #tpu.memory_space<vmem>>, vector<8x128xf32>
    tpu.vector_store %arg6[%c0_86, %c0_87], %267 {strides = array<i32>} : memref<8x128xf32, #tpu.memory_space<vmem>>, vector<8x128xf32>,
    %c0_88 = arith.constant 0 : index
    %c0_89 = arith.constant 0 : index
    %269 = vector.load %arg7[%c0_88, %c0_89] : memref<8x128xf32, #tpu.memory_space<vmem>>, vector<8x128xf32>
    tpu.vector_store %arg7[%c0_88, %c0_89], %264 {strides = array<i32>} : memref<8x128xf32, #tpu.memory_space<vmem>>, vector<8x128xf32>,
    %270 = arith.index_cast %c4_i32 : i32 to index
    %c0_90 = arith.constant 0 : index
    %c0_91 = arith.constant 0 : index
    %271 = vector.load %arg5[%270, %c0_90, %c0_91] : memref<8x8x256xf32, #tpu.memory_space<vmem>>, vector<1x8x128xf32>
    %272 = vector.shape_cast %271 : vector<1x8x128xf32> to vector<8x128xf32>
    %273 = vector.shape_cast %267 : vector<8x128xf32> to vector<1x8x128xf32>
    tpu.vector_store %arg5[%270, %c0_90, %c0_91], %273 {strides = array<i32>} : memref<8x8x256xf32, #tpu.memory_space<vmem>>, vector<1x8x128xf32>,
    %274 = arith.index_cast %c4_i32 : i32 to index
    %c0_92 = arith.constant 0 : index
    %c128_93 = arith.constant 128 : index
    %275 = vector.load %arg5[%274, %c0_92, %c128_93] : memref<8x8x256xf32, #tpu.memory_space<vmem>>, vector<1x8x128xf32>
    %276 = vector.shape_cast %275 : vector<1x8x128xf32> to vector<8x128xf32>
    %277 = vector.shape_cast %264 : vector<8x128xf32> to vector<1x8x128xf32>
    tpu.vector_store %arg5[%274, %c0_92, %c128_93], %277 {strides = array<i32>} : memref<8x8x256xf32, #tpu.memory_space<vmem>>, vector<1x8x128xf32>,
    %c5_i32 = arith.constant 5 : i32
    %c0_94 = arith.constant 0 : index
    %c0_95 = arith.constant 0 : index
    %278 = vector.load %arg6[%c0_94, %c0_95] : memref<8x128xf32, #tpu.memory_space<vmem>>, vector<8x128xf32>
    %c0_96 = arith.constant 0 : index
    %c0_97 = arith.constant 0 : index
    %279 = vector.load %arg7[%c0_96, %c0_97] : memref<8x128xf32, #tpu.memory_space<vmem>>, vector<8x128xf32>
    %cst_98 = arith.constant 9.99999997E-7 : f32
    %280 = vector.broadcast %cst_98 : f32 to vector<8x128xf32>
    %281 = arith.addf %278, %280 : vector<8x128xf32>
    %282 = math.log %281 : vector<8x128xf32>
    %283 = tpu.concatenate %278, %282 in 1 : vector<8x128xf32>, vector<8x128xf32> -> vector<8x256xf32>
    %c0_99 = arith.constant 0 : index
    %c0_100 = arith.constant 0 : index
    %284 = vector.load %arg8[%c0_99, %c0_100] : memref<256x1152xf32, #tpu.memory_space<vmem>>, vector<256x1152xf32>
    %cst_101 = arith.constant dense<0.000000e+00> : vector<8x1152xf32>
    %285 = tpu.matmul %283, %284, %cst_101 {dimension_numbers = #tpu.dot_dimension_numbers<[1], [0], [0], [1], [0, 0, 1, 1], [], []>} : vector<8x256xf32>, vector<256x1152xf32>, vector<8x1152xf32> -> vector<8x1152xf32>
    %286 = arith.index_cast %c5_i32 : i32 to index
    %c0_102 = arith.constant 0 : index
    %c0_103 = arith.constant 0 : index
    %287 = vector.load %arg3[%286, %c0_102, %c0_103] : memref<8x8x1152xf32, #tpu.memory_space<vmem>>, vector<1x8x1152xf32>
    %288 = vector.shape_cast %287 : vector<1x8x1152xf32> to vector<8x1152xf32>
    %289 = arith.addf %285, %288 : vector<8x1152xf32>
    %290 = vector.extract_strided_slice %289 {offsets = [0, 0], sizes = [8, 896], strides = [1, 1]} : vector<8x1152xf32> to vector<8x896xf32>
    %291 = arith.negf %290 : vector<8x896xf32>
    %292 = math.exp %291 : vector<8x896xf32>
    %cst_104 = arith.constant 1.000000e+00 : f32
    %293 = vector.broadcast %cst_104 : f32 to vector<8x896xf32>
    %294 = arith.addf %293, %292 : vector<8x896xf32>
    %295 = arith.divf %293, %294 : vector<8x896xf32>
    %296 = vector.extract_strided_slice %289 {offsets = [0, 896], sizes = [8, 256], strides = [1, 1]} : vector<8x1152xf32> to vector<8x256xf32>
    %297 = math.tanh %296 : vector<8x256xf32>
    %298 = vector.extract_strided_slice %295 {offsets = [0, 0], sizes = [8, 128], strides = [1, 1]} : vector<8x896xf32> to vector<8x128xf32>
    %299 = vector.extract_strided_slice %295 {offsets = [0, 128], sizes = [8, 128], strides = [1, 1]} : vector<8x896xf32> to vector<8x128xf32>
    %300 = vector.extract_strided_slice %295 {offsets = [0, 256], sizes = [8, 128], strides = [1, 1]} : vector<8x896xf32> to vector<8x128xf32>
    %301 = vector.extract_strided_slice %295 {offsets = [0, 384], sizes = [8, 128], strides = [1, 1]} : vector<8x896xf32> to vector<8x128xf32>
    %302 = vector.extract_strided_slice %295 {offsets = [0, 512], sizes = [8, 128], strides = [1, 1]} : vector<8x896xf32> to vector<8x128xf32>
    %303 = vector.extract_strided_slice %295 {offsets = [0, 640], sizes = [8, 128], strides = [1, 1]} : vector<8x896xf32> to vector<8x128xf32>
    %304 = vector.extract_strided_slice %295 {offsets = [0, 768], sizes = [8, 128], strides = [1, 1]} : vector<8x896xf32> to vector<8x128xf32>
    %305 = vector.extract_strided_slice %297 {offsets = [0, 0], sizes = [8, 128], strides = [1, 1]} : vector<8x256xf32> to vector<8x128xf32>
    %306 = vector.extract_strided_slice %297 {offsets = [0, 128], sizes = [8, 128], strides = [1, 1]} : vector<8x256xf32> to vector<8x128xf32>
    %307 = arith.mulf %299, %279 : vector<8x128xf32>
    %308 = arith.mulf %298, %305 : vector<8x128xf32>
    %309 = arith.addf %307, %308 : vector<8x128xf32>
    %310 = arith.mulf %303, %279 : vector<8x128xf32>
    %311 = arith.mulf %302, %306 : vector<8x128xf32>
    %312 = arith.addf %310, %311 : vector<8x128xf32>
    %313 = math.tanh %309 : vector<8x128xf32>
    %314 = arith.mulf %300, %313 : vector<8x128xf32>
    %315 = math.tanh %312 : vector<8x128xf32>
    %316 = arith.mulf %304, %315 : vector<8x128xf32>
    %317 = arith.subf %309, %312 : vector<8x128xf32>
    %318 = arith.mulf %301, %317 : vector<8x128xf32>
    %319 = arith.addf %312, %318 : vector<8x128xf32>
    %320 = arith.subf %314, %316 : vector<8x128xf32>
    %321 = arith.mulf %301, %320 : vector<8x128xf32>
    %322 = arith.addf %316, %321 : vector<8x128xf32>
    %c0_105 = arith.constant 0 : index
    %c0_106 = arith.constant 0 : index
    %323 = vector.load %arg6[%c0_105, %c0_106] : memref<8x128xf32, #tpu.memory_space<vmem>>, vector<8x128xf32>
    tpu.vector_store %arg6[%c0_105, %c0_106], %322 {strides = array<i32>} : memref<8x128xf32, #tpu.memory_space<vmem>>, vector<8x128xf32>,
    %c0_107 = arith.constant 0 : index
    %c0_108 = arith.constant 0 : index
    %324 = vector.load %arg7[%c0_107, %c0_108] : memref<8x128xf32, #tpu.memory_space<vmem>>, vector<8x128xf32>
    tpu.vector_store %arg7[%c0_107, %c0_108], %319 {strides = array<i32>} : memref<8x128xf32, #tpu.memory_space<vmem>>, vector<8x128xf32>,
    %325 = arith.index_cast %c5_i32 : i32 to index
    %c0_109 = arith.constant 0 : index
    %c0_110 = arith.constant 0 : index
    %326 = vector.load %arg5[%325, %c0_109, %c0_110] : memref<8x8x256xf32, #tpu.memory_space<vmem>>, vector<1x8x128xf32>
    %327 = vector.shape_cast %326 : vector<1x8x128xf32> to vector<8x128xf32>
    %328 = vector.shape_cast %322 : vector<8x128xf32> to vector<1x8x128xf32>
    tpu.vector_store %arg5[%325, %c0_109, %c0_110], %328 {strides = array<i32>} : memref<8x8x256xf32, #tpu.memory_space<vmem>>, vector<1x8x128xf32>,
    %329 = arith.index_cast %c5_i32 : i32 to index
    %c0_111 = arith.constant 0 : index
    %c128_112 = arith.constant 128 : index
    %330 = vector.load %arg5[%329, %c0_111, %c128_112] : memref<8x8x256xf32, #tpu.memory_space<vmem>>, vector<1x8x128xf32>
    %331 = vector.shape_cast %330 : vector<1x8x128xf32> to vector<8x128xf32>
    %332 = vector.shape_cast %319 : vector<8x128xf32> to vector<1x8x128xf32>
    tpu.vector_store %arg5[%329, %c0_111, %c128_112], %332 {strides = array<i32>} : memref<8x8x256xf32, #tpu.memory_space<vmem>>, vector<1x8x128xf32>,
    %c6_i32 = arith.constant 6 : i32
    %c0_113 = arith.constant 0 : index
    %c0_114 = arith.constant 0 : index
    %333 = vector.load %arg6[%c0_113, %c0_114] : memref<8x128xf32, #tpu.memory_space<vmem>>, vector<8x128xf32>
    %c0_115 = arith.constant 0 : index
    %c0_116 = arith.constant 0 : index
    %334 = vector.load %arg7[%c0_115, %c0_116] : memref<8x128xf32, #tpu.memory_space<vmem>>, vector<8x128xf32>
    %cst_117 = arith.constant 9.99999997E-7 : f32
    %335 = vector.broadcast %cst_117 : f32 to vector<8x128xf32>
    %336 = arith.addf %333, %335 : vector<8x128xf32>
    %337 = math.log %336 : vector<8x128xf32>
    %338 = tpu.concatenate %333, %337 in 1 : vector<8x128xf32>, vector<8x128xf32> -> vector<8x256xf32>
    %c0_118 = arith.constant 0 : index
    %c0_119 = arith.constant 0 : index
    %339 = vector.load %arg8[%c0_118, %c0_119] : memref<256x1152xf32, #tpu.memory_space<vmem>>, vector<256x1152xf32>
    %cst_120 = arith.constant dense<0.000000e+00> : vector<8x1152xf32>
    %340 = tpu.matmul %338, %339, %cst_120 {dimension_numbers = #tpu.dot_dimension_numbers<[1], [0], [0], [1], [0, 0, 1, 1], [], []>} : vector<8x256xf32>, vector<256x1152xf32>, vector<8x1152xf32> -> vector<8x1152xf32>
    %341 = arith.index_cast %c6_i32 : i32 to index
    %c0_121 = arith.constant 0 : index
    %c0_122 = arith.constant 0 : index
    %342 = vector.load %arg3[%341, %c0_121, %c0_122] : memref<8x8x1152xf32, #tpu.memory_space<vmem>>, vector<1x8x1152xf32>
    %343 = vector.shape_cast %342 : vector<1x8x1152xf32> to vector<8x1152xf32>
    %344 = arith.addf %340, %343 : vector<8x1152xf32>
    %345 = vector.extract_strided_slice %344 {offsets = [0, 0], sizes = [8, 896], strides = [1, 1]} : vector<8x1152xf32> to vector<8x896xf32>
    %346 = arith.negf %345 : vector<8x896xf32>
    %347 = math.exp %346 : vector<8x896xf32>
    %cst_123 = arith.constant 1.000000e+00 : f32
    %348 = vector.broadcast %cst_123 : f32 to vector<8x896xf32>
    %349 = arith.addf %348, %347 : vector<8x896xf32>
    %350 = arith.divf %348, %349 : vector<8x896xf32>
    %351 = vector.extract_strided_slice %344 {offsets = [0, 896], sizes = [8, 256], strides = [1, 1]} : vector<8x1152xf32> to vector<8x256xf32>
    %352 = math.tanh %351 : vector<8x256xf32>
    %353 = vector.extract_strided_slice %350 {offsets = [0, 0], sizes = [8, 128], strides = [1, 1]} : vector<8x896xf32> to vector<8x128xf32>
    %354 = vector.extract_strided_slice %350 {offsets = [0, 128], sizes = [8, 128], strides = [1, 1]} : vector<8x896xf32> to vector<8x128xf32>
    %355 = vector.extract_strided_slice %350 {offsets = [0, 256], sizes = [8, 128], strides = [1, 1]} : vector<8x896xf32> to vector<8x128xf32>
    %356 = vector.extract_strided_slice %350 {offsets = [0, 384], sizes = [8, 128], strides = [1, 1]} : vector<8x896xf32> to vector<8x128xf32>
    %357 = vector.extract_strided_slice %350 {offsets = [0, 512], sizes = [8, 128], strides = [1, 1]} : vector<8x896xf32> to vector<8x128xf32>
    %358 = vector.extract_strided_slice %350 {offsets = [0, 640], sizes = [8, 128], strides = [1, 1]} : vector<8x896xf32> to vector<8x128xf32>
    %359 = vector.extract_strided_slice %350 {offsets = [0, 768], sizes = [8, 128], strides = [1, 1]} : vector<8x896xf32> to vector<8x128xf32>
    %360 = vector.extract_strided_slice %352 {offsets = [0, 0], sizes = [8, 128], strides = [1, 1]} : vector<8x256xf32> to vector<8x128xf32>
    %361 = vector.extract_strided_slice %352 {offsets = [0, 128], sizes = [8, 128], strides = [1, 1]} : vector<8x256xf32> to vector<8x128xf32>
    %362 = arith.mulf %354, %334 : vector<8x128xf32>
    %363 = arith.mulf %353, %360 : vector<8x128xf32>
    %364 = arith.addf %362, %363 : vector<8x128xf32>
    %365 = arith.mulf %358, %334 : vector<8x128xf32>
    %366 = arith.mulf %357, %361 : vector<8x128xf32>
    %367 = arith.addf %365, %366 : vector<8x128xf32>
    %368 = math.tanh %364 : vector<8x128xf32>
    %369 = arith.mulf %355, %368 : vector<8x128xf32>
    %370 = math.tanh %367 : vector<8x128xf32>
    %371 = arith.mulf %359, %370 : vector<8x128xf32>
    %372 = arith.subf %364, %367 : vector<8x128xf32>
    %373 = arith.mulf %356, %372 : vector<8x128xf32>
    %374 = arith.addf %367, %373 : vector<8x128xf32>
    %375 = arith.subf %369, %371 : vector<8x128xf32>
    %376 = arith.mulf %356, %375 : vector<8x128xf32>
    %377 = arith.addf %371, %376 : vector<8x128xf32>
    %c0_124 = arith.constant 0 : index
    %c0_125 = arith.constant 0 : index
    %378 = vector.load %arg6[%c0_124, %c0_125] : memref<8x128xf32, #tpu.memory_space<vmem>>, vector<8x128xf32>
    tpu.vector_store %arg6[%c0_124, %c0_125], %377 {strides = array<i32>} : memref<8x128xf32, #tpu.memory_space<vmem>>, vector<8x128xf32>,
    %c0_126 = arith.constant 0 : index
    %c0_127 = arith.constant 0 : index
    %379 = vector.load %arg7[%c0_126, %c0_127] : memref<8x128xf32, #tpu.memory_space<vmem>>, vector<8x128xf32>
    tpu.vector_store %arg7[%c0_126, %c0_127], %374 {strides = array<i32>} : memref<8x128xf32, #tpu.memory_space<vmem>>, vector<8x128xf32>,
    %380 = arith.index_cast %c6_i32 : i32 to index
    %c0_128 = arith.constant 0 : index
    %c0_129 = arith.constant 0 : index
    %381 = vector.load %arg5[%380, %c0_128, %c0_129] : memref<8x8x256xf32, #tpu.memory_space<vmem>>, vector<1x8x128xf32>
    %382 = vector.shape_cast %381 : vector<1x8x128xf32> to vector<8x128xf32>
    %383 = vector.shape_cast %377 : vector<8x128xf32> to vector<1x8x128xf32>
    tpu.vector_store %arg5[%380, %c0_128, %c0_129], %383 {strides = array<i32>} : memref<8x8x256xf32, #tpu.memory_space<vmem>>, vector<1x8x128xf32>,
    %384 = arith.index_cast %c6_i32 : i32 to index
    %c0_130 = arith.constant 0 : index
    %c128_131 = arith.constant 128 : index
    %385 = vector.load %arg5[%384, %c0_130, %c128_131] : memref<8x8x256xf32, #tpu.memory_space<vmem>>, vector<1x8x128xf32>
    %386 = vector.shape_cast %385 : vector<1x8x128xf32> to vector<8x128xf32>
    %387 = vector.shape_cast %374 : vector<8x128xf32> to vector<1x8x128xf32>
    tpu.vector_store %arg5[%384, %c0_130, %c128_131], %387 {strides = array<i32>} : memref<8x8x256xf32, #tpu.memory_space<vmem>>, vector<1x8x128xf32>,
    %c7_i32 = arith.constant 7 : i32
    %c0_132 = arith.constant 0 : index
    %c0_133 = arith.constant 0 : index
    %388 = vector.load %arg6[%c0_132, %c0_133] : memref<8x128xf32, #tpu.memory_space<vmem>>, vector<8x128xf32>
    %c0_134 = arith.constant 0 : index
    %c0_135 = arith.constant 0 : index
    %389 = vector.load %arg7[%c0_134, %c0_135] : memref<8x128xf32, #tpu.memory_space<vmem>>, vector<8x128xf32>
    %cst_136 = arith.constant 9.99999997E-7 : f32
    %390 = vector.broadcast %cst_136 : f32 to vector<8x128xf32>
    %391 = arith.addf %388, %390 : vector<8x128xf32>
    %392 = math.log %391 : vector<8x128xf32>
    %393 = tpu.concatenate %388, %392 in 1 : vector<8x128xf32>, vector<8x128xf32> -> vector<8x256xf32>
    %c0_137 = arith.constant 0 : index
    %c0_138 = arith.constant 0 : index
    %394 = vector.load %arg8[%c0_137, %c0_138] : memref<256x1152xf32, #tpu.memory_space<vmem>>, vector<256x1152xf32>
    %cst_139 = arith.constant dense<0.000000e+00> : vector<8x1152xf32>
    %395 = tpu.matmul %393, %394, %cst_139 {dimension_numbers = #tpu.dot_dimension_numbers<[1], [0], [0], [1], [0, 0, 1, 1], [], []>} : vector<8x256xf32>, vector<256x1152xf32>, vector<8x1152xf32> -> vector<8x1152xf32>
    %396 = arith.index_cast %c7_i32 : i32 to index
    %c0_140 = arith.constant 0 : index
    %c0_141 = arith.constant 0 : index
    %397 = vector.load %arg3[%396, %c0_140, %c0_141] : memref<8x8x1152xf32, #tpu.memory_space<vmem>>, vector<1x8x1152xf32>
    %398 = vector.shape_cast %397 : vector<1x8x1152xf32> to vector<8x1152xf32>
    %399 = arith.addf %395, %398 : vector<8x1152xf32>
    %400 = vector.extract_strided_slice %399 {offsets = [0, 0], sizes = [8, 896], strides = [1, 1]} : vector<8x1152xf32> to vector<8x896xf32>
    %401 = arith.negf %400 : vector<8x896xf32>
    %402 = math.exp %401 : vector<8x896xf32>
    %cst_142 = arith.constant 1.000000e+00 : f32
    %403 = vector.broadcast %cst_142 : f32 to vector<8x896xf32>
    %404 = arith.addf %403, %402 : vector<8x896xf32>
    %405 = arith.divf %403, %404 : vector<8x896xf32>
    %406 = vector.extract_strided_slice %399 {offsets = [0, 896], sizes = [8, 256], strides = [1, 1]} : vector<8x1152xf32> to vector<8x256xf32>
    %407 = math.tanh %406 : vector<8x256xf32>
    %408 = vector.extract_strided_slice %405 {offsets = [0, 0], sizes = [8, 128], strides = [1, 1]} : vector<8x896xf32> to vector<8x128xf32>
    %409 = vector.extract_strided_slice %405 {offsets = [0, 128], sizes = [8, 128], strides = [1, 1]} : vector<8x896xf32> to vector<8x128xf32>
    %410 = vector.extract_strided_slice %405 {offsets = [0, 256], sizes = [8, 128], strides = [1, 1]} : vector<8x896xf32> to vector<8x128xf32>
    %411 = vector.extract_strided_slice %405 {offsets = [0, 384], sizes = [8, 128], strides = [1, 1]} : vector<8x896xf32> to vector<8x128xf32>
    %412 = vector.extract_strided_slice %405 {offsets = [0, 512], sizes = [8, 128], strides = [1, 1]} : vector<8x896xf32> to vector<8x128xf32>
    %413 = vector.extract_strided_slice %405 {offsets = [0, 640], sizes = [8, 128], strides = [1, 1]} : vector<8x896xf32> to vector<8x128xf32>
    %414 = vector.extract_strided_slice %405 {offsets = [0, 768], sizes = [8, 128], strides = [1, 1]} : vector<8x896xf32> to vector<8x128xf32>
    %415 = vector.extract_strided_slice %407 {offsets = [0, 0], sizes = [8, 128], strides = [1, 1]} : vector<8x256xf32> to vector<8x128xf32>
    %416 = vector.extract_strided_slice %407 {offsets = [0, 128], sizes = [8, 128], strides = [1, 1]} : vector<8x256xf32> to vector<8x128xf32>
    %417 = arith.mulf %409, %389 : vector<8x128xf32>
    %418 = arith.mulf %408, %415 : vector<8x128xf32>
    %419 = arith.addf %417, %418 : vector<8x128xf32>
    %420 = arith.mulf %413, %389 : vector<8x128xf32>
    %421 = arith.mulf %412, %416 : vector<8x128xf32>
    %422 = arith.addf %420, %421 : vector<8x128xf32>
    %423 = math.tanh %419 : vector<8x128xf32>
    %424 = arith.mulf %410, %423 : vector<8x128xf32>
    %425 = math.tanh %422 : vector<8x128xf32>
    %426 = arith.mulf %414, %425 : vector<8x128xf32>
    %427 = arith.subf %419, %422 : vector<8x128xf32>
    %428 = arith.mulf %411, %427 : vector<8x128xf32>
    %429 = arith.addf %422, %428 : vector<8x128xf32>
    %430 = arith.subf %424, %426 : vector<8x128xf32>
    %431 = arith.mulf %411, %430 : vector<8x128xf32>
    %432 = arith.addf %426, %431 : vector<8x128xf32>
    %c0_143 = arith.constant 0 : index
    %c0_144 = arith.constant 0 : index
    %433 = vector.load %arg6[%c0_143, %c0_144] : memref<8x128xf32, #tpu.memory_space<vmem>>, vector<8x128xf32>
    tpu.vector_store %arg6[%c0_143, %c0_144], %432 {strides = array<i32>} : memref<8x128xf32, #tpu.memory_space<vmem>>, vector<8x128xf32>,
    %c0_145 = arith.constant 0 : index
    %c0_146 = arith.constant 0 : index
    %434 = vector.load %arg7[%c0_145, %c0_146] : memref<8x128xf32, #tpu.memory_space<vmem>>, vector<8x128xf32>
    tpu.vector_store %arg7[%c0_145, %c0_146], %429 {strides = array<i32>} : memref<8x128xf32, #tpu.memory_space<vmem>>, vector<8x128xf32>,
    %435 = arith.index_cast %c7_i32 : i32 to index
    %c0_147 = arith.constant 0 : index
    %c0_148 = arith.constant 0 : index
    %436 = vector.load %arg5[%435, %c0_147, %c0_148] : memref<8x8x256xf32, #tpu.memory_space<vmem>>, vector<1x8x128xf32>
    %437 = vector.shape_cast %436 : vector<1x8x128xf32> to vector<8x128xf32>
    %438 = vector.shape_cast %432 : vector<8x128xf32> to vector<1x8x128xf32>
    tpu.vector_store %arg5[%435, %c0_147, %c0_148], %438 {strides = array<i32>} : memref<8x8x256xf32, #tpu.memory_space<vmem>>, vector<1x8x128xf32>,
    %439 = arith.index_cast %c7_i32 : i32 to index
    %c0_149 = arith.constant 0 : index
    %c128_150 = arith.constant 128 : index
    %440 = vector.load %arg5[%439, %c0_149, %c128_150] : memref<8x8x256xf32, #tpu.memory_space<vmem>>, vector<1x8x128xf32>
    %441 = vector.shape_cast %440 : vector<1x8x128xf32> to vector<8x128xf32>
    %442 = vector.shape_cast %429 : vector<8x128xf32> to vector<1x8x128xf32>
    tpu.vector_store %arg5[%439, %c0_149, %c128_150], %442 {strides = array<i32>} : memref<8x8x256xf32, #tpu.memory_space<vmem>>, vector<1x8x128xf32>,
    %c8_i32 = arith.constant 8 : i32
    return
  }
  func.func @transform_0(%arg0: i32, %arg1: i32) -> (i32, i32) {
    %c0_i32 = arith.constant 0 : i32
    %c0_i32_0 = arith.constant 0 : i32
    return %arg0, %c0_i32 : i32, i32
  }
  func.func @transform_1(%arg0: i32, %arg1: i32) -> (i32, i32, i32) {
    %c0_i32 = arith.constant 0 : i32
    %c0_i32_0 = arith.constant 0 : i32
    return %arg1, %arg0, %c0_i32 : i32, i32, i32
  }
  func.func @transform_3(%arg0: i32, %arg1: i32) -> (i32, i32, i32) {
    %c0_i32 = arith.constant 0 : i32
    %c0_i32_0 = arith.constant 0 : i32
    return %arg1, %arg0, %c0_i32 : i32, i32, i32
  }
}

</mosaic_0001>

<bundles_post_ra>
// kernel: tpu_custom_call.1
= control target key start
LH: loop header
LB: loop body
LE: loop exit
PB: predicated region body
PF: predicated region fallthrough
CT: control target
= control target key end

     0   :  { %8 = vsyncpa [#allocation6], 0  ;;  %s9207_s0 = inlined_call_operand.hbm [shape: f32[8,256], index: 0, kind: input, shape index: {}]   ;;  %s9208_s1 = inlined_call_operand.hbm [shape: f32[8,8,1152], index: 1, kind: input, shape index: {}]   ;;  %s9209_s2 = inlined_call_operand.hbm [shape: f32[256,1152], index: 2, kind: input, shape index: {}]   ;;  %s9210_s3 = inlined_call_operand.hbm [shape: f32[8,8,256], index: 3, kind: output, shape index: {}]  }
   0x1   :  { %9 = vsyncpa [#allocation9], 0 }
   0x2   :  { %10 = vsyncpa [#allocation7], 0  ;;  %s8908_s12 = smov [#allocation5]   ;;  %s8909_s14 = smov [#allocation8]  }
   0x3   :  { %s17_s13 = sshll.u32 %s8908_s12, 4  ;;  %s26_s15 = sshll.u32 %s8909_s14, 4  ;;  %s18_s13 = int_to_ptr.vmem [resolvable:$true] %s17_s13  ;;  %s8936_s15 = int_to_ptr.vmem [resolvable:$true] %s26_s15 }
   0x4   :  { %s8812_s18 = scalar_lea.hbm %s9207_s0, 256 }
   0x5   :  { %p8813_p0 = scmp.ne.s32.totalorder %s9207_s0, %s8812_s18  ;;  %p8816_p1 = scmp.lt.u32.totalorder %s8812_s18, %s9207_s0 }
   0x7   :  { %p8818_p2 = pnand %p8816_p1, %p8813_p0 }
   0x9   :  { %8821 = shalt.err (!%p8818_p2)
}
   0xa   :  { %s8822_s23 = scalar_lea.vmem %s18_s13, 256  ;;  %p8827_p4 = scmp.lt.s32.totalorder %s18_s13, %s18_s13 }
   0xb   :  { %p8823_p3 = scmp.ne.s32.totalorder %s18_s13, %s8822_s23  ;;  %p8828_p5 = scmp.lt.s32.totalorder %s8822_s23, %s8822_s23 }
   0xd   :  { %p8829_p6 = por %p8828_p5, %p8827_p4 }
   0xf   :  { %p8830_p7 = pnand %p8829_p6, %p8823_p3 }
  0x11   :  { %8833 = shalt.err (!%p8830_p7)
}
  0x12   :  { %20 = dma.hbm_to_vmem [thread:$0]  %s9207_s0, 256, %s18_s13, [#allocation6]  }
  0x13   :  { %s8834_s28 = scalar_lea.hbm %s9208_s1, 9216 }
  0x14   :  { %p8835_p8 = scmp.ne.s32.totalorder %s9208_s1, %s8834_s28  ;;  %p8838_p9 = scmp.lt.u32.totalorder %s8834_s28, %s9208_s1 }
  0x16   :  { %p8840_p10 = pnand %p8838_p9, %p8835_p8 }
  0x18   :  { %8843 = shalt.err (!%p8840_p10)
}
  0x19   :  { %s8844_s6 = scalar_lea.vmem %s8936_s15, 9216  ;;  %p8849_p12 = scmp.lt.s32.totalorder %s8936_s15, %s8936_s15 }
  0x1a   :  { %p8845_p11 = scmp.ne.s32.totalorder %s8936_s15, %s8844_s6  ;;  %p8850_p13 = scmp.lt.s32.totalorder %s8844_s6, %s8844_s6 }
  0x1c   :  { %p8851_p0 = por %p8850_p13, %p8849_p12 }
  0x1e   :  { %p8852_p1 = pnand %p8851_p0, %p8845_p11 }
  0x20   :  { %8855 = shalt.err (!%p8852_p1)
}
  0x21   :  { %s8910_s0 = smov 1152   ;;  %s8911_s7 = smov 72  }
  0x22   :  { %32 = dma.hbm_to_vmem [thread:$0]  %s9208_s1, 9216, %s8936_s15, [#allocation9], %s8910_s0, %s8910_s0, %s8911_s7  }
  0x23   :  { %8900 = dma.done.wait [#allocation6], 256  }
  0x24   :  { %8901 = vsyncadd [#allocation6], 4294967040 }
  0x25   :  { %8902 = dma.done.wait [#allocation9], 9216  }
  0x26   :  { %8903 = vsyncadd [#allocation9], 4294958080 }
  0x27   :  { %s8912_s10 = smov [#allocation4]   ;;  %s8856_s14 = scalar_lea.hbm %s9209_s2, 36864 }
  0x28   :  { %s50_s11 = sshll.u32 %s8912_s10, 4  ;;  %p8857_p2 = scmp.ne.s32.totalorder %s9209_s2, %s8856_s14  ;;  %s51_s11 = int_to_ptr.vmem [resolvable:$true] %s50_s11 }
  0x29   :  { %p8860_p3 = scmp.lt.u32.totalorder %s8856_s14, %s9209_s2 }
  0x2b   :  { %p8862_p4 = pnand %p8860_p3, %p8857_p2 }
  0x2d   :  { %8865 = shalt.err (!%p8862_p4)  }
  0x2e   :  { %s8866_s1 = scalar_lea.vmem %s51_s11, 36864  ;;  %p8871_p6 = scmp.lt.s32.totalorder %s51_s11, %s51_s11 }
  0x2f   :  { %p8867_p5 = scmp.ne.s32.totalorder %s51_s11, %s8866_s1  ;;  %p8872_p7 = scmp.lt.s32.totalorder %s8866_s1, %s8866_s1 }
  0x31   :  { %p8873_p8 = por %p8872_p7, %p8871_p6 }
  0x33   :  { %p8874_p9 = pnand %p8873_p8, %p8867_p5 }
  0x35   :  { %8877 = shalt.err (!%p8874_p9)  }
  0x36   :  { %53 = dma.hbm_to_vmem [thread:$0]  %s9209_s2, 36864, %s51_s11, [#allocation11] }
  0x37   :  { %8904 = dma.done.wait [#allocation11], 36864 }
  0x38   :  { %8905 = vsyncadd [#allocation11], 4294930432  ;;  %v68_v0 = vld [vmem:[#allocation4 + $0x8] sm:$0xff]  ;;  %v77_v1 = vld [vmem:[#allocation4 + $0x50] sm:$0xff]  ;;  %s8913_s2 = smov [#allocation10]  }
  0x39   :  { %v70_v2 = vld [vmem:[#allocation4 + $0x18] sm:$0xff]  ;;  %v6190_v3 = vpack.c.bf16 %v77_v1, %v68_v0  ;;  %v79_v4 = vld [vmem:[#allocation4 + $0x60] sm:$0xff]  ;;  %v76_v6 = vld [vmem:[#allocation4 + $0x48] sm:$0xff]  ;;  %s5841_s21 = sshll.u32 %s8913_s2, 4  ;;  %s5842_s21 = int_to_ptr.vmem [resolvable:$true] %s5841_s21 }
  0x3a   :  { %v67_v5 = vld [vmem:[#allocation4] sm:$0xff]  ;;  %v6254_v7 = vpack.c.bf16 %v79_v4, %v70_v2  ;;  %v69_v9 = vld [vmem:[#allocation4 + $0x10] sm:$0xff]  ;;  %v78_v10 = vld [vmem:[#allocation4 + $0x58] sm:$0xff]  ;;  %s8878_s22 = scalar_lea.vmem %s5842_s21, 2048  ;;  %p8883_p11 = scmp.lt.s32.totalorder %s5842_s21, %s5842_s21 }
  0x3b   :  { %v6192_v8 = vpack.c.bf16 %v76_v6, %v67_v5  ;;  %v86_v11 = vld [vmem:[#allocation4 + $0x98] sm:$0xff]  ;;  %6191 = vmatprep.subr.bf16.mxu0 %v6190_v3  ;;  %v6256_v12 = vpack.c.bf16 %v78_v10, %v69_v9  ;;  %v95_v13 = vld [vmem:[#allocation4 + $0xe0] sm:$0xff]  ;;  %v88_v14 = vld [vmem:[#allocation4 + $0xa8] sm:$0xff]  ;;  %p8879_p10 = scmp.ne.s32.totalorder %s5842_s21, %s8878_s22  ;;  %p8884_p12 = scmp.lt.s32.totalorder %s8878_s22, %s8878_s22 }
  0x3c   :  { %v97_v15 = vld [vmem:[#allocation4 + $0xf0] sm:$0xff]  ;;  %6255 = vmatprep.subr.bf16.mxu1 %v6254_v7  ;;  %v6194_v16 = vpack.c.bf16 %v95_v13, %v86_v11  ;;  %v94_v19 = vld [vmem:[#allocation4 + $0xd8] sm:$0xff]  ;;  %v87_v20 = vld [vmem:[#allocation4 + $0xa0] sm:$0xff] }
  0x3d   :  { %6193 = vmatpush1.bf16.msra.mxu0 %v6192_v8  ;;  %v6258_v17 = vpack.c.bf16 %v97_v15, %v88_v14  ;;  %v85_v18 = vld [vmem:[#allocation4 + $0x90] sm:$0xff]  ;;  %6257 = vmatpush1.bf16.msra.mxu1 %v6256_v12  ;;  %v96_v22 = vld [vmem:[#allocation4 + $0xe8] sm:$0xff]  ;;  %v106_v27 = vld [vmem:[#allocation4 + $0x138] sm:$0xff]  ;;  %p8885_p13 = por %p8884_p12, %p8883_p11 }
  0x3e   :  { %v6196_v21 = vpack.c.bf16 %v94_v19, %v85_v18  ;;  %v104_v23 = vld [vmem:[#allocation4 + $0x128] sm:$0xff]  ;;  %v113_v24 = vld [vmem:[#allocation4 + $0x170] sm:$0xff]  ;;  %6195 = vmatprep.subr.bf16.mxu0 %v6194_v16  ;;  %v6260_v25 = vpack.c.bf16 %v96_v22, %v87_v20  ;;  %v115_v28 = vld [vmem:[#allocation4 + $0x180] sm:$0xff] }
  0x3f   :  { %6259 = vmatprep.subr.bf16.mxu1 %v6258_v17  ;;  %v6198_v26 = vpack.c.bf16 %v113_v24, %v104_v23  ;;  %v103_v29 = vld [vmem:[#allocation4 + $0x120] sm:$0xff]  ;;  %v6262_v30 = vpack.c.bf16 %v115_v28, %v106_v27  ;;  %v112_v31 = vld [vmem:[#allocation4 + $0x168] sm:$0xff]  ;;  %v105_v32 = vld [vmem:[#allocation4 + $0x130] sm:$0xff]  ;;  %p8886_p0 = pnand %p8885_p13, %p8879_p10 }
  0x40   :  { %v114_v33 = vld [vmem:[#allocation4 + $0x178] sm:$0xff]  ;;  %v6200_v34 = vpack.c.bf16 %v112_v31, %v103_v29  ;;  %v131_v36 = vld [vmem:[#allocation4 + $0x200] sm:$0xff]  ;;  %v124_v37 = vld [vmem:[#allocation4 + $0x1c8] sm:$0xff] }
  0x41   :  { %6197 = vmatpush1.bf16.msra.mxu0 %v6196_v21  ;;  %v122_v35 = vld [vmem:[#allocation4 + $0x1b8] sm:$0xff]  ;;  %6261 = vmatpush1.bf16.msra.mxu1 %v6260_v25  ;;  %v6264_v38 = vpack.c.bf16 %v114_v33, %v105_v32  ;;  %v133_v40 = vld [vmem:[#allocation4 + $0x210] sm:$0xff]  ;;  %v123_v44 = vld [vmem:[#allocation4 + $0x1c0] sm:$0xff] }
  0x42   :  { %6199 = vmatprep.subr.bf16.mxu0 %v6198_v26  ;;  %v6202_v39 = vpack.c.bf16 %v131_v36, %v122_v35  ;;  %v121_v41 = vld [vmem:[#allocation4 + $0x1b0] sm:$0xff]  ;;  %v130_v42 = vld [vmem:[#allocation4 + $0x1f8] sm:$0xff]  ;;  %6263 = vmatprep.subr.bf16.mxu1 %v6262_v30  ;;  %v6266_v43 = vpack.c.bf16 %v133_v40, %v124_v37  ;;  %v132_v45 = vld [vmem:[#allocation4 + $0x208] sm:$0xff] }
  0x43   :  { %v140_v46 = vld [vmem:[#allocation4 + $0x248] sm:$0xff]  ;;  %v149_v47 = vld [vmem:[#allocation4 + $0x290] sm:$0xff]  ;;  %v142_v48 = vld [vmem:[#allocation4 + $0x258] sm:$0xff]  ;;  %v6204_v50 = vpack.c.bf16 %v130_v42, %v121_v41  ;;  %v6268_v51 = vpack.c.bf16 %v132_v45, %v123_v44 }
  0x44   :  { %v151_v49 = vld [vmem:[#allocation4 + $0x2a0] sm:$0xff]  ;;  %v6206_v52 = vpack.c.bf16 %v149_v47, %v140_v46  ;;  %v148_v54 = vld [vmem:[#allocation4 + $0x288] sm:$0xff]  ;;  %v141_v55 = vld [vmem:[#allocation4 + $0x250] sm:$0xff] }
  0x45   :  { %6201 = vmatpush1.bf16.msra.mxu0 %v6200_v34  ;;  %6265 = vmatpush1.bf16.msra.mxu1 %v6264_v38  ;;  %v139_v53 = vld [vmem:[#allocation4 + $0x240] sm:$0xff]  ;;  %v6270_v56 = vpack.c.bf16 %v151_v49, %v142_v48  ;;  %v150_v57 = vld [vmem:[#allocation4 + $0x298] sm:$0xff]  ;;  %v160_v60 = vld [vmem:[#allocation4 + $0x2e8] sm:$0xff] }
  0x46   :  { %6203 = vmatprep.subr.bf16.mxu0 %v6202_v39  ;;  %6267 = vmatprep.subr.bf16.mxu1 %v6266_v43  ;;  %v158_v58 = vld [vmem:[#allocation4 + $0x2d8] sm:$0xff]  ;;  %v167_v59 = vld [vmem:[#allocation4 + $0x320] sm:$0xff]  ;;  %v169_v61 = vld [vmem:[#allocation4 + $0x330] sm:$0xff]  ;;  %v6208_v62 = vpack.c.bf16 %v148_v54, %v139_v53  ;;  %v6272_v63 = vpack.c.bf16 %v150_v57, %v141_v55 }
  0x47   :  { %v6210_v0 = vpack.c.bf16 %v167_v59, %v158_v58  ;;  %v157_v1 = vld [vmem:[#allocation4 + $0x2d0] sm:$0xff]  ;;  %v166_v2 = vld [vmem:[#allocation4 + $0x318] sm:$0xff]  ;;  %v159_v3 = vld [vmem:[#allocation4 + $0x2e0] sm:$0xff]  ;;  %v6274_v4 = vpack.c.bf16 %v169_v61, %v160_v60 }
  0x48   :  { %v168_v5 = vld [vmem:[#allocation4 + $0x328] sm:$0xff]  ;;  %v185_v7 = vld [vmem:[#allocation4 + $0x3b0] sm:$0xff]  ;;  %v178_v8 = vld [vmem:[#allocation4 + $0x378] sm:$0xff]  ;;  %v6212_v10 = vpack.c.bf16 %v166_v2, %v157_v1 }
  0x49   :  { %6205 = vmatpush1.bf16.msra.mxu0 %v6204_v50  ;;  %6269 = vmatpush1.bf16.msra.mxu1 %v6268_v51  ;;  %v176_v6 = vld [vmem:[#allocation4 + $0x368] sm:$0xff]  ;;  %v187_v9 = vld [vmem:[#allocation4 + $0x3c0] sm:$0xff]  ;;  %v6276_v11 = vpack.c.bf16 %v168_v5, %v159_v3  ;;  %v177_v15 = vld [vmem:[#allocation4 + $0x370] sm:$0xff] }
  0x4a   :  { %6207 = vmatprep.subr.bf16.mxu0 %v6206_v52  ;;  %6271 = vmatprep.subr.bf16.mxu1 %v6270_v56  ;;  %v6214_v12 = vpack.c.bf16 %v185_v7, %v176_v6  ;;  %v175_v13 = vld [vmem:[#allocation4 + $0x360] sm:$0xff]  ;;  %v184_v14 = vld [vmem:[#allocation4 + $0x3a8] sm:$0xff]  ;;  %v6278_v16 = vpack.c.bf16 %v187_v9, %v178_v8  ;;  %v186_v17 = vld [vmem:[#allocation4 + $0x3b8] sm:$0xff] }
  0x4b   :  { %v194_v18 = vld [vmem:[#allocation4 + $0x3f8] sm:$0xff]  ;;  %v203_v19 = vld [vmem:[#allocation4 + $0x440] sm:$0xff]  ;;  %v196_v20 = vld [vmem:[#allocation4 + $0x408] sm:$0xff]  ;;  %v6216_v22 = vpack.c.bf16 %v184_v14, %v175_v13  ;;  %v6280_v23 = vpack.c.bf16 %v186_v17, %v177_v15 }
  0x4c   :  { %v205_v21 = vld [vmem:[#allocation4 + $0x450] sm:$0xff]  ;;  %v6218_v24 = vpack.c.bf16 %v203_v19, %v194_v18  ;;  %v202_v26 = vld [vmem:[#allocation4 + $0x438] sm:$0xff]  ;;  %v195_v27 = vld [vmem:[#allocation4 + $0x400] sm:$0xff] }
  0x4d   :  { %6209 = vmatpush1.bf16.msra.mxu0 %v6208_v62  ;;  %6273 = vmatpush1.bf16.msra.mxu1 %v6272_v63  ;;  %v193_v25 = vld [vmem:[#allocation4 + $0x3f0] sm:$0xff]  ;;  %v6282_v28 = vpack.c.bf16 %v205_v21, %v196_v20  ;;  %v204_v29 = vld [vmem:[#allocation4 + $0x448] sm:$0xff]  ;;  %v214_v32 = vld [vmem:[#allocation4 + $0x498] sm:$0xff] }
  0x4e   :  { %6211 = vmatprep.subr.bf16.mxu0 %v6210_v0  ;;  %6275 = vmatprep.subr.bf16.mxu1 %v6274_v4  ;;  %v212_v30 = vld [vmem:[#allocation4 + $0x488] sm:$0xff]  ;;  %v221_v31 = vld [vmem:[#allocation4 + $0x4d0] sm:$0xff]  ;;  %v223_v33 = vld [vmem:[#allocation4 + $0x4e0] sm:$0xff]  ;;  %v6220_v34 = vpack.c.bf16 %v202_v26, %v193_v25  ;;  %v6284_v35 = vpack.c.bf16 %v204_v29, %v195_v27 }
  0x4f   :  { %v6222_v36 = vpack.c.bf16 %v221_v31, %v212_v30  ;;  %v211_v37 = vld [vmem:[#allocation4 + $0x480] sm:$0xff]  ;;  %v220_v38 = vld [vmem:[#allocation4 + $0x4c8] sm:$0xff]  ;;  %v213_v39 = vld [vmem:[#allocation4 + $0x490] sm:$0xff]  ;;  %v6286_v40 = vpack.c.bf16 %v223_v33, %v214_v32 }
  0x50   :  { %v222_v41 = vld [vmem:[#allocation4 + $0x4d8] sm:$0xff]  ;;  %v239_v43 = vld [vmem:[#allocation4 + $0x560] sm:$0xff]  ;;  %v232_v44 = vld [vmem:[#allocation4 + $0x528] sm:$0xff]  ;;  %v6224_v46 = vpack.c.bf16 %v220_v38, %v211_v37 }
  0x51   :  { %6213 = vmatpush1.bf16.msra.mxu0 %v6212_v10  ;;  %6277 = vmatpush1.bf16.msra.mxu1 %v6276_v11  ;;  %v230_v42 = vld [vmem:[#allocation4 + $0x518] sm:$0xff]  ;;  %v241_v45 = vld [vmem:[#allocation4 + $0x570] sm:$0xff]  ;;  %v6288_v47 = vpack.c.bf16 %v222_v41, %v213_v39  ;;  %v231_v51 = vld [vmem:[#allocation4 + $0x520] sm:$0xff] }
  0x52   :  { %6215 = vmatprep.subr.bf16.mxu0 %v6214_v12  ;;  %6279 = vmatprep.subr.bf16.mxu1 %v6278_v16  ;;  %v6226_v48 = vpack.c.bf16 %v239_v43, %v230_v42  ;;  %v229_v49 = vld [vmem:[#allocation4 + $0x510] sm:$0xff]  ;;  %v238_v50 = vld [vmem:[#allocation4 + $0x558] sm:$0xff]  ;;  %v6290_v52 = vpack.c.bf16 %v241_v45, %v232_v44  ;;  %v240_v53 = vld [vmem:[#allocation4 + $0x568] sm:$0xff] }
  0x53   :  { %v248_v54 = vld [vmem:[#allocation4 + $0x5a8] sm:$0xff]  ;;  %v257_v55 = vld [vmem:[#allocation4 + $0x5f0] sm:$0xff]  ;;  %v250_v56 = vld [vmem:[#allocation4 + $0x5b8] sm:$0xff]  ;;  %v6228_v58 = vpack.c.bf16 %v238_v50, %v229_v49  ;;  %v6292_v59 = vpack.c.bf16 %v240_v53, %v231_v51 }
  0x54   :  { %v259_v57 = vld [vmem:[#allocation4 + $0x600] sm:$0xff]  ;;  %v6230_v60 = vpack.c.bf16 %v257_v55, %v248_v54  ;;  %v256_v62 = vld [vmem:[#allocation4 + $0x5e8] sm:$0xff]  ;;  %v249_v63 = vld [vmem:[#allocation4 + $0x5b0] sm:$0xff] }
  0x55   :  { %6217 = vmatpush1.bf16.msra.mxu0 %v6216_v22  ;;  %6281 = vmatpush1.bf16.msra.mxu1 %v6280_v23  ;;  %v247_v61 = vld [vmem:[#allocation4 + $0x5a0] sm:$0xff]  ;;  %v6294_v0 = vpack.c.bf16 %v259_v57, %v250_v56  ;;  %v258_v1 = vld [vmem:[#allocation4 + $0x5f8] sm:$0xff]  ;;  %v268_v4 = vld [vmem:[#allocation4 + $0x648] sm:$0xff] }
  0x56   :  { %6219 = vmatprep.subr.bf16.mxu0 %v6218_v24  ;;  %6283 = vmatprep.subr.bf16.mxu1 %v6282_v28  ;;  %v266_v2 = vld [vmem:[#allocation4 + $0x638] sm:$0xff]  ;;  %v275_v3 = vld [vmem:[#allocation4 + $0x680] sm:$0xff]  ;;  %v277_v5 = vld [vmem:[#allocation4 + $0x690] sm:$0xff]  ;;  %v6232_v6 = vpack.c.bf16 %v256_v62, %v247_v61  ;;  %v6296_v8 = vpack.c.bf16 %v258_v1, %v249_v63 }
  0x57   :  { %v265_v7 = vld [vmem:[#allocation4 + $0x630] sm:$0xff]  ;;  %v6234_v9 = vpack.c.bf16 %v275_v3, %v266_v2  ;;  %v274_v10 = vld [vmem:[#allocation4 + $0x678] sm:$0xff]  ;;  %v267_v11 = vld [vmem:[#allocation4 + $0x640] sm:$0xff]  ;;  %v6298_v13 = vpack.c.bf16 %v277_v5, %v268_v4 }
  0x58   :  { %v276_v12 = vld [vmem:[#allocation4 + $0x688] sm:$0xff]  ;;  %v293_v15 = vld [vmem:[#allocation4 + $0x710] sm:$0xff]  ;;  %v8979_v16 = vld [vmem:[#allocation5] sm:$0xff]  ;;  %v6236_v20 = vpack.c.bf16 %v274_v10, %v265_v7 }
  0x59   :  { %6221 = vmatpush1.bf16.msra.mxu0 %v6220_v34  ;;  %6285 = vmatpush1.bf16.msra.mxu1 %v6284_v35  ;;  %v284_v14 = vld [vmem:[#allocation4 + $0x6c8] sm:$0xff]  ;;  %v286_v17 = vld [vmem:[#allocation4 + $0x6d8] sm:$0xff]  ;;  %v295_v18 = vld [vmem:[#allocation4 + $0x720] sm:$0xff]  ;;  %v64_v19 = vadd.f32 1e-06, %v8979_v16  ;;  %v6300_v21 = vpack.c.bf16 %v276_v12, %v267_v11 }
  0x5a   :  { %6223 = vmatprep.subr.bf16.mxu0 %v6222_v36  ;;  %6287 = vmatprep.subr.bf16.mxu1 %v6286_v40  ;;  %v6238_v22 = vpack.c.bf16 %v293_v15, %v284_v14  ;;  %v283_v23 = vld [vmem:[#allocation4 + $0x6c0] sm:$0xff]  ;;  %v292_v24 = vld [vmem:[#allocation4 + $0x708] sm:$0xff]  ;;  %v285_v25 = vld [vmem:[#allocation4 + $0x6d0] sm:$0xff]  ;;  %v6302_v26 = vpack.c.bf16 %v295_v18, %v286_v17 }
  0x5b   :  { %8502 = vlog2.f32 %v64_v19  ;;  %v294_v27 = vld [vmem:[#allocation4 + $0x718] sm:$0xff]  ;;  %v311_v29 = vld [vmem:[#allocation4 + $0x7a0] sm:$0xff]  ;;  %v304_v30 = vld [vmem:[#allocation4 + $0x768] sm:$0xff]  ;;  %v6240_v32 = vpack.c.bf16 %v292_v24, %v283_v23 }
  0x5c   :  { %v302_v28 = vld [vmem:[#allocation4 + $0x758] sm:$0xff]  ;;  %v313_v31 = vld [vmem:[#allocation4 + $0x7b0] sm:$0xff]  ;;  %v6304_v33 = vpack.c.bf16 %v294_v27, %v285_v25  ;;  %v303_v37 = vld [vmem:[#allocation4 + $0x760] sm:$0xff] }
  0x5d   :  { %6225 = vmatpush1.bf16.msra.mxu0 %v6224_v46  ;;  %6289 = vmatpush1.bf16.msra.mxu1 %v6288_v47  ;;  %v6242_v34 = vpack.c.bf16 %v311_v29, %v302_v28  ;;  %v301_v35 = vld [vmem:[#allocation4 + $0x750] sm:$0xff]  ;;  %v310_v36 = vld [vmem:[#allocation4 + $0x798] sm:$0xff]  ;;  %v6306_v38 = vpack.c.bf16 %v313_v31, %v304_v30  ;;  %v312_v39 = vld [vmem:[#allocation4 + $0x7a8] sm:$0xff] }
  0x5e   :  { %6227 = vmatprep.subr.bf16.mxu0 %v6226_v48  ;;  %6291 = vmatprep.subr.bf16.mxu1 %v6290_v52  ;;  %v320_v40 = vld [vmem:[#allocation4 + $0x7e8] sm:$0xff]  ;;  %v329_v41 = vld [vmem:[#allocation4 + $0x830] sm:$0xff]  ;;  %v322_v42 = vld [vmem:[#allocation4 + $0x7f8] sm:$0xff]  ;;  %v6244_v44 = vpack.c.bf16 %v310_v36, %v301_v35  ;;  %v6308_v45 = vpack.c.bf16 %v312_v39, %v303_v37 }
  0x5f   :  { %v331_v43 = vld [vmem:[#allocation4 + $0x840] sm:$0xff]  ;;  %v6246_v46 = vpack.c.bf16 %v329_v41, %v320_v40  ;;  %v328_v48 = vld [vmem:[#allocation4 + $0x828] sm:$0xff]  ;;  %v321_v49 = vld [vmem:[#allocation4 + $0x7f0] sm:$0xff] }
  0x60   :  { %v319_v47 = vld [vmem:[#allocation4 + $0x7e0] sm:$0xff]  ;;  %v6310_v50 = vpack.c.bf16 %v331_v43, %v322_v42  ;;  %v330_v51 = vld [vmem:[#allocation4 + $0x838] sm:$0xff]  ;;  %v340_v55 = vld [vmem:[#allocation4 + $0x888] sm:$0xff] }
  0x61   :  { %6229 = vmatpush1.bf16.msra.mxu0 %v6228_v58  ;;  %6293 = vmatpush1.bf16.msra.mxu1 %v6292_v59  ;;  %v338_v52 = vld [vmem:[#allocation4 + $0x878] sm:$0xff]  ;;  %v347_v53 = vld [vmem:[#allocation4 + $0x8c0] sm:$0xff]  ;;  %v349_v56 = vld [vmem:[#allocation4 + $0x8d0] sm:$0xff]  ;;  %v6248_v57 = vpack.c.bf16 %v328_v48, %v319_v47  ;;  %v6312_v59 = vpack.c.bf16 %v330_v51, %v321_v49 }
  0x62   :  { %6231 = vmatprep.subr.bf16.mxu0 %v6230_v60  ;;  %6295 = vmatprep.subr.bf16.mxu1 %v6294_v0  ;;  %v6250_v60 = vpack.c.bf16 %v347_v53, %v338_v52  ;;  %v337_v61 = vld [vmem:[#allocation4 + $0x870] sm:$0xff]  ;;  %v346_v62 = vld [vmem:[#allocation4 + $0x8b8] sm:$0xff]  ;;  %v339_v63 = vld [vmem:[#allocation4 + $0x880] sm:$0xff]  ;;  %v6314_v0 = vpack.c.bf16 %v349_v56, %v340_v55 }
  0x63   :  { %v348_v1 = vld [vmem:[#allocation4 + $0x8c8] sm:$0xff]  ;;  %v81_v3 = vld [vmem:[#allocation4 + $0x70] sm:$0xff]  ;;  %v74_v4 = vld [vmem:[#allocation4 + $0x38] sm:$0xff] }
  0x64   :  { %v72_v2 = vld [vmem:[#allocation4 + $0x28] sm:$0xff]  ;;  %v83_v5 = vld [vmem:[#allocation4 + $0x80] sm:$0xff]  ;;  %v6316_v7 = vpack.c.bf16 %v348_v1, %v339_v63  ;;  %v73_v11 = vld [vmem:[#allocation4 + $0x30] sm:$0xff] }
  0x65   :  { %6233 = vmatpush1.bf16.msra.mxu0 %v6232_v6  ;;  %6297 = vmatpush1.bf16.msra.mxu1 %v6296_v8  ;;  %v8503_v54 = vpop.eup %8502  ;;  %v6252_v6 = vpack.c.bf16 %v346_v62, %v337_v61  ;;  %v6318_v8 = vpack.c.bf16 %v81_v3, %v72_v2  ;;  %v80_v10 = vld [vmem:[#allocation4 + $0x68] sm:$0xff]  ;;  %v6382_v12 = vpack.c.bf16 %v83_v5, %v74_v4  ;;  %v90_v14 = vld [vmem:[#allocation4 + $0xb8] sm:$0xff]  ;;  %v99_v15 = vld [vmem:[#allocation4 + $0x100] sm:$0xff] }
  0x66   :  { %6235 = vmatprep.subr.bf16.mxu0 %v6234_v9  ;;  %6299 = vmatprep.subr.bf16.mxu1 %v6298_v13  ;;  %v8982_v58 = vmul.f32 0.6931472, %v8503_v54  ;;  %v71_v9 = vld [vmem:[#allocation4 + $0x20] sm:$0xff]  ;;  %v82_v13 = vld [vmem:[#allocation4 + $0x78] sm:$0xff]  ;;  %v92_v17 = vld [vmem:[#allocation4 + $0xc8] sm:$0xff] }
  0x67   :  { %v101_v18 = vld [vmem:[#allocation4 + $0x110] sm:$0xff]  ;;  %v6320_v19 = vpack.c.bf16 %v80_v10, %v71_v9  ;;  %v98_v23 = vld [vmem:[#allocation4 + $0xf8] sm:$0xff]  ;;  %v91_v24 = vld [vmem:[#allocation4 + $0xc0] sm:$0xff] }
  0x68   :  { %428 = vmatprep.mubr.f32.mxu0 %v8982_v58  ;;  %499 = vmatprep.mubr.f32.mxu1 %v8982_v58  ;;  %v6386_v25 = vpack.c.bf16 %v101_v18, %v92_v17  ;;  %v108_v27 = vld [vmem:[#allocation4 + $0x148] sm:$0xff]  ;;  %v117_v28 = vld [vmem:[#allocation4 + $0x190] sm:$0xff]  ;;  %v110_v29 = vld [vmem:[#allocation4 + $0x158] sm:$0xff] }
  0x69   :  { %6237 = vmatpush1.bf16.msra.mxu0 %v6236_v20  ;;  %6301 = vmatpush1.bf16.msra.mxu1 %v6300_v21  ;;  %v6384_v20 = vpack.c.bf16 %v82_v13, %v73_v11  ;;  %v6322_v21 = vpack.c.bf16 %v99_v15, %v90_v14  ;;  %v119_v30 = vld [vmem:[#allocation4 + $0x1a0] sm:$0xff]  ;;  %v116_v35 = vld [vmem:[#allocation4 + $0x188] sm:$0xff]  ;;  %v109_v36 = vld [vmem:[#allocation4 + $0x150] sm:$0xff] }
  0x6a   :  { %6239 = vmatprep.subr.bf16.mxu0 %v6238_v22  ;;  %6303 = vmatprep.subr.bf16.mxu1 %v6302_v26  ;;  %v89_v22 = vld [vmem:[#allocation4 + $0xb0] sm:$0xff]  ;;  %v100_v26 = vld [vmem:[#allocation4 + $0x108] sm:$0xff]  ;;  %v6390_v37 = vpack.c.bf16 %v119_v30, %v110_v29  ;;  %v126_v39 = vld [vmem:[#allocation4 + $0x1d8] sm:$0xff] }
  0x6b   :  { %v6324_v31 = vpack.c.bf16 %v98_v23, %v89_v22  ;;  %v135_v40 = vld [vmem:[#allocation4 + $0x220] sm:$0xff]  ;;  %v128_v41 = vld [vmem:[#allocation4 + $0x1e8] sm:$0xff]  ;;  %v137_v42 = vld [vmem:[#allocation4 + $0x230] sm:$0xff] }
  0x6c   :  { %v134_v47 = vld [vmem:[#allocation4 + $0x218] sm:$0xff]  ;;  %v127_v48 = vld [vmem:[#allocation4 + $0x1e0] sm:$0xff]  ;;  %v6394_v49 = vpack.c.bf16 %v137_v42, %v128_v41  ;;  %v144_v51 = vld [vmem:[#allocation4 + $0x268] sm:$0xff] }
  0x6d   :  { %6241 = vmatpush1.bf16.msra.mxu0 %v6240_v32  ;;  %6305 = vmatpush1.bf16.msra.mxu1 %v6304_v33  ;;  %v6388_v32 = vpack.c.bf16 %v100_v26, %v91_v24  ;;  %v6326_v33 = vpack.c.bf16 %v117_v28, %v108_v27  ;;  %v153_v52 = vld [vmem:[#allocation4 + $0x2b0] sm:$0xff]  ;;  %v146_v53 = vld [vmem:[#allocation4 + $0x278] sm:$0xff]  ;;  %v155_v54 = vld [vmem:[#allocation4 + $0x2c0] sm:$0xff] }
  0x6e   :  { %6243 = vmatprep.subr.bf16.mxu0 %v6242_v34  ;;  %6307 = vmatprep.subr.bf16.mxu1 %v6306_v38  ;;  %v107_v34 = vld [vmem:[#allocation4 + $0x140] sm:$0xff]  ;;  %v118_v38 = vld [vmem:[#allocation4 + $0x198] sm:$0xff]  ;;  %v145_v61 = vld [vmem:[#allocation4 + $0x270] sm:$0xff]  ;;  %v6398_v62 = vpack.c.bf16 %v155_v54, %v146_v53 }
  0x6f   :  { %v6328_v43 = vpack.c.bf16 %v116_v35, %v107_v34  ;;  %v154_v63 = vld [vmem:[#allocation4 + $0x2b8] sm:$0xff]  ;;  %v171_v1 = vld [vmem:[#allocation4 + $0x340] sm:$0xff]  ;;  %v164_v2 = vld [vmem:[#allocation4 + $0x308] sm:$0xff] }
  0x70   :  { %v173_v3 = vld [vmem:[#allocation4 + $0x350] sm:$0xff]  ;;  %v6400_v5 = vpack.c.bf16 %v154_v63, %v145_v61  ;;  %v163_v9 = vld [vmem:[#allocation4 + $0x300] sm:$0xff]  ;;  %v172_v11 = vld [vmem:[#allocation4 + $0x348] sm:$0xff] }
  0x71   :  { %6245 = vmatpush1.bf16.msra.mxu0 %v6244_v44  ;;  %6309 = vmatpush1.bf16.msra.mxu1 %v6308_v45  ;;  %v6392_v44 = vpack.c.bf16 %v118_v38, %v109_v36  ;;  %v6330_v45 = vpack.c.bf16 %v135_v40, %v126_v39  ;;  %v6402_v10 = vpack.c.bf16 %v173_v3, %v164_v2  ;;  %v189_v13 = vld [vmem:[#allocation4 + $0x3d0] sm:$0xff]  ;;  %v182_v14 = vld [vmem:[#allocation4 + $0x398] sm:$0xff]  ;;  %v191_v15 = vld [vmem:[#allocation4 + $0x3e0] sm:$0xff] }
  0x72   :  { %6247 = vmatprep.subr.bf16.mxu0 %v6246_v46  ;;  %6311 = vmatprep.subr.bf16.mxu1 %v6310_v50  ;;  %v125_v46 = vld [vmem:[#allocation4 + $0x1d0] sm:$0xff]  ;;  %v136_v50 = vld [vmem:[#allocation4 + $0x228] sm:$0xff]  ;;  %v6404_v18 = vpack.c.bf16 %v172_v11, %v163_v9  ;;  %v6406_v23 = vpack.c.bf16 %v191_v15, %v182_v14  ;;  %v190_v24 = vld [vmem:[#allocation4 + $0x3d8] sm:$0xff] }
  0x73   :  { %v6332_v55 = vpack.c.bf16 %v134_v47, %v125_v46  ;;  %v6396_v56 = vpack.c.bf16 %v136_v50, %v127_v48  ;;  %v181_v22 = vld [vmem:[#allocation4 + $0x390] sm:$0xff]  ;;  %v207_v26 = vld [vmem:[#allocation4 + $0x460] sm:$0xff]  ;;  %v200_v27 = vld [vmem:[#allocation4 + $0x428] sm:$0xff] }
  0x74   :  { %v209_v28 = vld [vmem:[#allocation4 + $0x470] sm:$0xff]  ;;  %v6408_v30 = vpack.c.bf16 %v190_v24, %v181_v22  ;;  %v199_v34 = vld [vmem:[#allocation4 + $0x420] sm:$0xff]  ;;  %v208_v36 = vld [vmem:[#allocation4 + $0x468] sm:$0xff] }
  0x75   :  { %6249 = vmatpush1.bf16.msra.mxu0 %v6248_v57  ;;  %6313 = vmatpush1.bf16.msra.mxu1 %v6312_v59  ;;  %v6334_v57 = vpack.c.bf16 %v153_v52, %v144_v51  ;;  %v143_v59 = vld [vmem:[#allocation4 + $0x260] sm:$0xff]  ;;  %v6410_v35 = vpack.c.bf16 %v209_v28, %v200_v27  ;;  %v225_v38 = vld [vmem:[#allocation4 + $0x4f0] sm:$0xff]  ;;  %v218_v39 = vld [vmem:[#allocation4 + $0x4b8] sm:$0xff]  ;;  %v6412_v42 = vpack.c.bf16 %v208_v36, %v199_v34 }
  0x76   :  { %6251 = vmatprep.subr.bf16.mxu0 %v6250_v60  ;;  %6315 = vmatprep.subr.bf16.mxu1 %v6314_v0  ;;  %v152_v60 = vld [vmem:[#allocation4 + $0x2a8] sm:$0xff]  ;;  %v162_v0 = vld [vmem:[#allocation4 + $0x2f8] sm:$0xff]  ;;  %v227_v40 = vld [vmem:[#allocation4 + $0x500] sm:$0xff] }
  0x77   :  { %v6336_v4 = vpack.c.bf16 %v152_v60, %v143_v59  ;;  %v217_v46 = vld [vmem:[#allocation4 + $0x4b0] sm:$0xff]  ;;  %v6414_v47 = vpack.c.bf16 %v227_v40, %v218_v39  ;;  %v226_v48 = vld [vmem:[#allocation4 + $0x4f8] sm:$0xff]  ;;  %v243_v50 = vld [vmem:[#allocation4 + $0x580] sm:$0xff] }
  0x78   :  { %v236_v51 = vld [vmem:[#allocation4 + $0x548] sm:$0xff]  ;;  %v245_v52 = vld [vmem:[#allocation4 + $0x590] sm:$0xff]  ;;  %v6416_v54 = vpack.c.bf16 %v226_v48, %v217_v46  ;;  %v235_v59 = vld [vmem:[#allocation4 + $0x540] sm:$0xff] }
  0x79   :  { %6253 = vmatpush1.bf16.msra.mxu0 %v6252_v6  ;;  %6317 = vmatpush1.bf16.msra.mxu1 %v6316_v7  ;;  %v6338_v6 = vpack.c.bf16 %v171_v1, %v162_v0  ;;  %v161_v7 = vld [vmem:[#allocation4 + $0x2f0] sm:$0xff]  ;;  %v6418_v60 = vpack.c.bf16 %v245_v52, %v236_v51  ;;  %v244_v61 = vld [vmem:[#allocation4 + $0x588] sm:$0xff]  ;;  %v254_v0 = vld [vmem:[#allocation4 + $0x5d8] sm:$0xff] }
  0x7a   :  { %6319 = vmatprep.subr.bf16.mxu0 %v6318_v8  ;;  %6383 = vmatprep.subr.bf16.mxu1 %v6382_v12  ;;  %v170_v8 = vld [vmem:[#allocation4 + $0x338] sm:$0xff]  ;;  %v180_v12 = vld [vmem:[#allocation4 + $0x388] sm:$0xff]  ;;  %v261_v63 = vld [vmem:[#allocation4 + $0x610] sm:$0xff]  ;;  %v6420_v3 = vpack.c.bf16 %v244_v61, %v235_v59 }
  0x7b   :  { %v6340_v17 = vpack.c.bf16 %v170_v8, %v161_v7  ;;  %v263_v1 = vld [vmem:[#allocation4 + $0x620] sm:$0xff]  ;;  %v253_v7 = vld [vmem:[#allocation4 + $0x5d0] sm:$0xff]  ;;  %v262_v9 = vld [vmem:[#allocation4 + $0x618] sm:$0xff] }
  0x7c   :  { %429 = vmatmul.mubr.f32.vlgmr.msra.gmra.mrb[0].mxu0 %v8979_v16  ;;  %500 = vmatmul.mubr.f32.vlgmr.msra.gmra.mrb[0].mxu1 %v8979_v16  ;;  %v6422_v8 = vpack.c.bf16 %v263_v1, %v254_v0  ;;  %v279_v11 = vld [vmem:[#allocation4 + $0x6a0] sm:$0xff]  ;;  %v6424_v15 = vpack.c.bf16 %v262_v9, %v253_v7  ;;  %v280_v22 = vld [vmem:[#allocation4 + $0x6a8] sm:$0xff]  ;;  %v297_v24 = vld [vmem:[#allocation4 + $0x730] sm:$0xff] }
  0x7d   :  { %6321 = vmatpush1.bf16.msra.mxu0 %v6320_v19  ;;  %6385 = vmatpush1.bf16.msra.mxu1 %v6384_v20  ;;  %v6342_v19 = vpack.c.bf16 %v189_v13, %v180_v12  ;;  %v179_v20 = vld [vmem:[#allocation4 + $0x380] sm:$0xff]  ;;  %v272_v12 = vld [vmem:[#allocation4 + $0x668] sm:$0xff]  ;;  %v281_v13 = vld [vmem:[#allocation4 + $0x6b0] sm:$0xff] }
  0x7e   :  { %6323 = vmatprep.subr.bf16.mxu0 %v6322_v21  ;;  %6387 = vmatprep.subr.bf16.mxu1 %v6386_v25  ;;  %v188_v21 = vld [vmem:[#allocation4 + $0x3c8] sm:$0xff]  ;;  %v198_v25 = vld [vmem:[#allocation4 + $0x418] sm:$0xff]  ;;  %v315_v36 = vld [vmem:[#allocation4 + $0x7c0] sm:$0xff] }
  0x7f   :  { %570 = vmatprep.mubr.f32.mxu0 %v8982_v58  ;;  %641 = vmatprep.mubr.f32.mxu1 %v8982_v58  ;;  %v6344_v29 = vpack.c.bf16 %v188_v21, %v179_v20  ;;  %v271_v20 = vld [vmem:[#allocation4 + $0x660] sm:$0xff]  ;;  %v6426_v21 = vpack.c.bf16 %v281_v13, %v272_v12  ;;  %v298_v34 = vld [vmem:[#allocation4 + $0x738] sm:$0xff]  ;;  %v316_v46 = vld [vmem:[#allocation4 + $0x7c8] sm:$0xff] }
  0x80   :  { %v6428_v28 = vpack.c.bf16 %v280_v22, %v271_v20  ;;  %v333_v48 = vld [vmem:[#allocation4 + $0x850] sm:$0xff]  ;;  %v334_v59 = vld [vmem:[#allocation4 + $0x858] sm:$0xff]  ;;  %v351_v61 = vld [vmem:[#allocation4 + $0x8e0] sm:$0xff] }
  0x81   :  { %6325 = vmatpush1.bf16.msra.mxu0 %v6324_v31  ;;  %6389 = vmatpush1.bf16.msra.mxu1 %v6388_v32  ;;  %v6346_v31 = vpack.c.bf16 %v207_v26, %v198_v25  ;;  %v197_v32 = vld [vmem:[#allocation4 + $0x410] sm:$0xff]  ;;  %v290_v25 = vld [vmem:[#allocation4 + $0x6f8] sm:$0xff]  ;;  %v299_v26 = vld [vmem:[#allocation4 + $0x740] sm:$0xff] }
  0x82   :  { %6327 = vmatprep.subr.bf16.mxu0 %v6326_v33  ;;  %6391 = vmatprep.subr.bf16.mxu1 %v6390_v37  ;;  %v206_v33 = vld [vmem:[#allocation4 + $0x458] sm:$0xff]  ;;  %v216_v37 = vld [vmem:[#allocation4 + $0x4a8] sm:$0xff]  ;;  %v75_v13 = vld [vmem:[#allocation4 + $0x40] sm:$0xff] }
  0x83   :  { %v6348_v41 = vpack.c.bf16 %v206_v33, %v197_v32  ;;  %v289_v32 = vld [vmem:[#allocation4 + $0x6f0] sm:$0xff]  ;;  %v6430_v33 = vpack.c.bf16 %v299_v26, %v290_v25  ;;  %v352_v7 = vld [vmem:[#allocation4 + $0x8e8] sm:$0xff]  ;;  %v255_v22 = vld [vmem:[#allocation4 + $0x5e0] sm:$0xff] }
  0x84   :  { %v6432_v40 = vpack.c.bf16 %v298_v34, %v289_v32  ;;  %v228_v9 = vld [vmem:[#allocation4 + $0x508] sm:$0xff]  ;;  %v93_v20 = vld [vmem:[#allocation4 + $0xd0] sm:$0xff]  ;;  %v111_v26 = vld [vmem:[#allocation4 + $0x160] sm:$0xff] }
  0x85   :  { %6329 = vmatpush1.bf16.msra.mxu0 %v6328_v43  ;;  %6393 = vmatpush1.bf16.msra.mxu1 %v6392_v44  ;;  %v6350_v43 = vpack.c.bf16 %v225_v38, %v216_v37  ;;  %v215_v44 = vld [vmem:[#allocation4 + $0x4a0] sm:$0xff]  ;;  %v308_v37 = vld [vmem:[#allocation4 + $0x788] sm:$0xff]  ;;  %v317_v38 = vld [vmem:[#allocation4 + $0x7d0] sm:$0xff] }
  0x86   :  { %6331 = vmatprep.subr.bf16.mxu0 %v6330_v45  ;;  %6395 = vmatprep.subr.bf16.mxu1 %v6394_v49  ;;  %v224_v45 = vld [vmem:[#allocation4 + $0x4e8] sm:$0xff]  ;;  %v234_v49 = vld [vmem:[#allocation4 + $0x538] sm:$0xff]  ;;  %v129_v32 = vld [vmem:[#allocation4 + $0x1f0] sm:$0xff] }
  0x87   :  { %v6352_v53 = vpack.c.bf16 %v224_v45, %v215_v44  ;;  %v307_v44 = vld [vmem:[#allocation4 + $0x780] sm:$0xff]  ;;  %v6434_v45 = vpack.c.bf16 %v317_v38, %v308_v37 }
  0x88   :  { %v6436_v52 = vpack.c.bf16 %v316_v46, %v307_v44  ;;  %v291_v34 = vld [vmem:[#allocation4 + $0x700] sm:$0xff]  ;;  %v174_v44 = vld [vmem:[#allocation4 + $0x358] sm:$0xff]  ;;  %v336_v46 = vld [vmem:[#allocation4 + $0x868] sm:$0xff] }
  0x89   :  { %6333 = vmatpush1.bf16.msra.mxu0 %v6332_v55  ;;  %6397 = vmatpush1.bf16.msra.mxu1 %v6396_v56  ;;  %v6354_v55 = vpack.c.bf16 %v243_v50, %v234_v49  ;;  %v233_v56 = vld [vmem:[#allocation4 + $0x530] sm:$0xff]  ;;  %v326_v49 = vld [vmem:[#allocation4 + $0x818] sm:$0xff]  ;;  %v335_v50 = vld [vmem:[#allocation4 + $0x860] sm:$0xff] }
  0x8a   :  { %6335 = vmatprep.subr.bf16.mxu0 %v6334_v57  ;;  %6399 = vmatprep.subr.bf16.mxu1 %v6398_v62  ;;  %v242_v57 = vld [vmem:[#allocation4 + $0x578] sm:$0xff]  ;;  %v252_v62 = vld [vmem:[#allocation4 + $0x5c8] sm:$0xff]  ;;  %v147_v38 = vld [vmem:[#allocation4 + $0x280] sm:$0xff] }
  0x8b   :  { %v6356_v2 = vpack.c.bf16 %v242_v57, %v233_v56  ;;  %v325_v56 = vld [vmem:[#allocation4 + $0x810] sm:$0xff]  ;;  %v6438_v57 = vpack.c.bf16 %v335_v50, %v326_v49  ;;  %v183_v49 = vld [vmem:[#allocation4 + $0x3a0] sm:$0xff]  ;;  %v192_v50 = vld [vmem:[#allocation4 + $0x3e8] sm:$0xff] }
  0x8c   :  { %v6440_v1 = vpack.c.bf16 %v334_v59, %v325_v56  ;;  %v210_v56 = vld [vmem:[#allocation4 + $0x478] sm:$0xff]  ;;  %v788_v59 = vld [vmem:[#allocation4 + $0x8] sm:$0xff] }
  0x8d   :  { %6337 = vmatpush1.bf16.msra.mxu0 %v6336_v4  ;;  %6401 = vmatpush1.bf16.msra.mxu1 %v6400_v5  ;;  %v6358_v4 = vpack.c.bf16 %v261_v63, %v252_v62  ;;  %v251_v5 = vld [vmem:[#allocation4 + $0x5c0] sm:$0xff]  ;;  %v344_v62 = vld [vmem:[#allocation4 + $0x8a8] sm:$0xff]  ;;  %v353_v63 = vld [vmem:[#allocation4 + $0x8f0] sm:$0xff] }
  0x8e   :  { %6339 = vmatprep.subr.bf16.mxu0 %v6338_v6  ;;  %6403 = vmatprep.subr.bf16.mxu1 %v6402_v10  ;;  %v260_v6 = vld [vmem:[#allocation4 + $0x608] sm:$0xff]  ;;  %v270_v10 = vld [vmem:[#allocation4 + $0x658] sm:$0xff] }
  0x8f   :  { %v6360_v14 = vpack.c.bf16 %v260_v6, %v251_v5  ;;  %v343_v5 = vld [vmem:[#allocation4 + $0x8a0] sm:$0xff]  ;;  %v6442_v6 = vpack.c.bf16 %v353_v63, %v344_v62 }
  0x90   :  { %v799_v63 = vld [vmem:[#allocation4 + $0x60] sm:$0xff] }
  0x91   :  { %6341 = vmatpush1.bf16.msra.mxu0 %v6340_v17  ;;  %6405 = vmatpush1.bf16.msra.mxu1 %v6404_v18  ;;  %v6362_v17 = vpack.c.bf16 %v279_v11, %v270_v10  ;;  %v269_v18 = vld [vmem:[#allocation4 + $0x650] sm:$0xff]  ;;  %v6444_v11 = vpack.c.bf16 %v352_v7, %v343_v5  ;;  %v798_v5 = vld [vmem:[#allocation4 + $0x58] sm:$0xff] }
  0x92   :  { %6343 = vmatprep.subr.bf16.mxu0 %v6342_v19  ;;  %6407 = vmatprep.subr.bf16.mxu1 %v6406_v23  ;;  %v278_v19 = vld [vmem:[#allocation4 + $0x698] sm:$0xff]  ;;  %v288_v23 = vld [vmem:[#allocation4 + $0x6e8] sm:$0xff] }
  0x93   :  { %v6364_v27 = vpack.c.bf16 %v278_v19, %v269_v18  ;;  %v806_v7 = vld [vmem:[#allocation4 + $0x98] sm:$0xff] }
  0x95   :  { %6345 = vmatpush1.bf16.msra.mxu0 %v6344_v29  ;;  %6409 = vmatpush1.bf16.msra.mxu1 %v6408_v30  ;;  %v6366_v29 = vpack.c.bf16 %v297_v24, %v288_v23  ;;  %v287_v30 = vld [vmem:[#allocation4 + $0x6e0] sm:$0xff]  ;;  %v264_v23 = vld [vmem:[#allocation4 + $0x628] sm:$0xff] }
  0x96   :  { %6347 = vmatprep.subr.bf16.mxu0 %v6346_v31  ;;  %6411 = vmatprep.subr.bf16.mxu1 %v6410_v35  ;;  %v296_v31 = vld [vmem:[#allocation4 + $0x728] sm:$0xff]  ;;  %v306_v35 = vld [vmem:[#allocation4 + $0x778] sm:$0xff]  ;;  %v6454_v25 = vpack.c.bf16 %v264_v23, %v255_v22  ;;  %v835_v23 = vld [vmem:[#allocation4 + $0x180] sm:$0xff] }
  0x97   :  { %v6368_v39 = vpack.c.bf16 %v296_v31, %v287_v30 }
  0x99   :  { %6349 = vmatpush1.bf16.msra.mxu0 %v6348_v41  ;;  %6413 = vmatpush1.bf16.msra.mxu1 %v6412_v42  ;;  %v6370_v41 = vpack.c.bf16 %v315_v36, %v306_v35  ;;  %v305_v42 = vld [vmem:[#allocation4 + $0x770] sm:$0xff]  ;;  %v300_v35 = vld [vmem:[#allocation4 + $0x748] sm:$0xff] }
  0x9a   :  { %6351 = vmatprep.subr.bf16.mxu0 %v6350_v43  ;;  %6415 = vmatprep.subr.bf16.mxu1 %v6414_v47  ;;  %v314_v43 = vld [vmem:[#allocation4 + $0x7b8] sm:$0xff]  ;;  %v324_v47 = vld [vmem:[#allocation4 + $0x808] sm:$0xff]  ;;  %v6462_v37 = vpack.c.bf16 %v300_v35, %v291_v34  ;;  %v853_v35 = vld [vmem:[#allocation4 + $0x210] sm:$0xff] }
  0x9b   :  { %v6372_v51 = vpack.c.bf16 %v314_v43, %v305_v42  ;;  %v165_v43 = vld [vmem:[#allocation4 + $0x310] sm:$0xff] }
  0x9d   :  { %6353 = vmatpush1.bf16.msra.mxu0 %v6352_v53  ;;  %6417 = vmatpush1.bf16.msra.mxu1 %v6416_v54  ;;  %v6374_v53 = vpack.c.bf16 %v333_v48, %v324_v47  ;;  %v323_v54 = vld [vmem:[#allocation4 + $0x800] sm:$0xff]  ;;  %v6468_v47 = vpack.c.bf16 %v174_v44, %v165_v43  ;;  %v869_v43 = vld [vmem:[#allocation4 + $0x290] sm:$0xff]  ;;  %v862_v44 = vld [vmem:[#allocation4 + $0x258] sm:$0xff] }
  0x9e   :  { %6355 = vmatprep.subr.bf16.mxu0 %v6354_v55  ;;  %6419 = vmatprep.subr.bf16.mxu1 %v6418_v60  ;;  %v332_v55 = vld [vmem:[#allocation4 + $0x848] sm:$0xff]  ;;  %v342_v60 = vld [vmem:[#allocation4 + $0x898] sm:$0xff] }
  0x9f   :  { %v6376_v0 = vpack.c.bf16 %v332_v55, %v323_v54  ;;  %v201_v55 = vld [vmem:[#allocation4 + $0x430] sm:$0xff] }
  0xa1   :  { %6357 = vmatpush1.bf16.msra.mxu0 %v6356_v2  ;;  %6421 = vmatpush1.bf16.msra.mxu1 %v6420_v3  ;;  %v6378_v2 = vpack.c.bf16 %v351_v61, %v342_v60  ;;  %v341_v3 = vld [vmem:[#allocation4 + $0x890] sm:$0xff]  ;;  %v790_v61 = vld [vmem:[#allocation4 + $0x18] sm:$0xff] }
  0xa2   :  { %6359 = vmatprep.subr.bf16.mxu0 %v6358_v4  ;;  %6423 = vmatprep.subr.bf16.mxu1 %v6422_v8  ;;  %v350_v4 = vld [vmem:[#allocation4 + $0x8d8] sm:$0xff]  ;;  %v219_v8 = vld [vmem:[#allocation4 + $0x4c0] sm:$0xff]  ;;  %v797_v60 = vld [vmem:[#allocation4 + $0x50] sm:$0xff] }
  0xa3   :  { %v6380_v10 = vpack.c.bf16 %v350_v4, %v341_v3  ;;  %v6446_v12 = vpack.c.bf16 %v228_v9, %v219_v8  ;;  %v6478_v62 = vpack.c.bf16 %v797_v60, %v788_v59  ;;  %v789_v4 = vld [vmem:[#allocation4 + $0x10] sm:$0xff]  ;;  %v815_v8 = vld [vmem:[#allocation4 + $0xe0] sm:$0xff]  ;;  %v808_v9 = vld [vmem:[#allocation4 + $0xa8] sm:$0xff] }
  0xa4   :  { %v889_v59 = vld [vmem:[#allocation4 + $0x330] sm:$0xff] }
  0xa5   :  { %6361 = vmatpush1.bf16.msra.mxu0 %v6360_v14  ;;  %6425 = vmatpush1.bf16.msra.mxu1 %v6424_v15  ;;  %v84_v14 = vld [vmem:[#allocation4 + $0x88] sm:$0xff]  ;;  %v237_v15 = vld [vmem:[#allocation4 + $0x550] sm:$0xff] }
  0xa6   :  { %6363 = vmatprep.subr.bf16.mxu0 %v6362_v17  ;;  %6427 = vmatprep.subr.bf16.mxu1 %v6426_v21  ;;  %v246_v17 = vld [vmem:[#allocation4 + $0x598] sm:$0xff]  ;;  %v6448_v18 = vpack.c.bf16 %v84_v14, %v75_v13  ;;  %v877_v60 = vld [vmem:[#allocation4 + $0x2d0] sm:$0xff] }
  0xa7   :  { %v6450_v19 = vpack.c.bf16 %v246_v17, %v237_v15  ;;  %v102_v21 = vld [vmem:[#allocation4 + $0x118] sm:$0xff]  ;;  %v807_v15 = vld [vmem:[#allocation4 + $0xa0] sm:$0xff]  ;;  %v816_v17 = vld [vmem:[#allocation4 + $0xe8] sm:$0xff] }
  0xa8   :  { %v6452_v24 = vpack.c.bf16 %v102_v21, %v93_v20  ;;  %v833_v20 = vld [vmem:[#allocation4 + $0x170] sm:$0xff]  ;;  %v826_v21 = vld [vmem:[#allocation4 + $0x138] sm:$0xff] }
  0xa9   :  { %6365 = vmatpush1.bf16.msra.mxu0 %v6364_v27  ;;  %6429 = vmatpush1.bf16.msra.mxu1 %v6428_v28  ;;  %v120_v27 = vld [vmem:[#allocation4 + $0x1a8] sm:$0xff]  ;;  %v273_v28 = vld [vmem:[#allocation4 + $0x670] sm:$0xff] }
  0xaa   :  { %6367 = vmatprep.subr.bf16.mxu0 %v6366_v29  ;;  %6431 = vmatprep.subr.bf16.mxu1 %v6430_v33  ;;  %v282_v29 = vld [vmem:[#allocation4 + $0x6b8] sm:$0xff]  ;;  %v6456_v30 = vpack.c.bf16 %v120_v27, %v111_v26  ;;  %v6550_v26 = vpack.c.bf16 %v835_v23, %v826_v21 }
  0xab   :  { %v6458_v31 = vpack.c.bf16 %v282_v29, %v273_v28  ;;  %v138_v33 = vld [vmem:[#allocation4 + $0x238] sm:$0xff]  ;;  %v825_v28 = vld [vmem:[#allocation4 + $0x130] sm:$0xff] }
  0xac   :  { %v6460_v36 = vpack.c.bf16 %v138_v33, %v129_v32  ;;  %v834_v29 = vld [vmem:[#allocation4 + $0x178] sm:$0xff]  ;;  %v851_v32 = vld [vmem:[#allocation4 + $0x200] sm:$0xff]  ;;  %v844_v33 = vld [vmem:[#allocation4 + $0x1c8] sm:$0xff] }
  0xad   :  { %6369 = vmatpush1.bf16.msra.mxu0 %v6368_v39  ;;  %6433 = vmatpush1.bf16.msra.mxu1 %v6432_v40  ;;  %v156_v39 = vld [vmem:[#allocation4 + $0x2c8] sm:$0xff]  ;;  %v309_v40 = vld [vmem:[#allocation4 + $0x790] sm:$0xff]  ;;  %v922_v21 = vld [vmem:[#allocation4 + $0x438] sm:$0xff] }
  0xae   :  { %6371 = vmatprep.subr.bf16.mxu0 %v6370_v41  ;;  %6435 = vmatprep.subr.bf16.mxu1 %v6434_v45  ;;  %v318_v41 = vld [vmem:[#allocation4 + $0x7d8] sm:$0xff]  ;;  %v327_v45 = vld [vmem:[#allocation4 + $0x820] sm:$0xff] }
  0xaf   :  { %v6466_v42 = vpack.c.bf16 %v318_v41, %v309_v40  ;;  %v6470_v48 = vpack.c.bf16 %v336_v46, %v327_v45  ;;  %v843_v40 = vld [vmem:[#allocation4 + $0x1c0] sm:$0xff]  ;;  %v852_v41 = vld [vmem:[#allocation4 + $0x208] sm:$0xff] }
  0xb0   :  { %v871_v46 = vld [vmem:[#allocation4 + $0x2a0] sm:$0xff] }
  0xb1   :  { %6373 = vmatpush1.bf16.msra.mxu0 %v6372_v51  ;;  %6437 = vmatpush1.bf16.msra.mxu1 %v6436_v52  ;;  %v345_v51 = vld [vmem:[#allocation4 + $0x8b0] sm:$0xff]  ;;  %v354_v52 = vld [vmem:[#allocation4 + $0x8f8] sm:$0xff] }
  0xb2   :  { %6375 = vmatprep.subr.bf16.mxu0 %v6374_v53  ;;  %6439 = vmatprep.subr.bf16.mxu1 %v6438_v57  ;;  %v6472_v53 = vpack.c.bf16 %v192_v50, %v183_v49  ;;  %v6474_v54 = vpack.c.bf16 %v354_v52, %v345_v51  ;;  %v6476_v57 = vpack.c.bf16 %v210_v56, %v201_v55  ;;  %v861_v51 = vld [vmem:[#allocation4 + $0x250] sm:$0xff]  ;;  %v870_v52 = vld [vmem:[#allocation4 + $0x298] sm:$0xff]  ;;  %v887_v55 = vld [vmem:[#allocation4 + $0x320] sm:$0xff] }
  0xb3   :  { %v6558_v49 = vpack.c.bf16 %v871_v46, %v862_v44  ;;  %v880_v56 = vld [vmem:[#allocation4 + $0x2e8] sm:$0xff]  ;;  %v958_v44 = vld [vmem:[#allocation4 + $0x558] sm:$0xff] }
  0xb5   :  { %6377 = vmatpush1.bf16.msra.mxu0 %v6376_v0  ;;  %6441 = vmatpush1.bf16.msra.mxu1 %v6440_v1  ;;  %v787_v0 = vld [vmem:[#allocation4] sm:$0xff]  ;;  %v796_v1 = vld [vmem:[#allocation4 + $0x48] sm:$0xff] }
  0xb6   :  { %6379 = vmatprep.subr.bf16.mxu0 %v6378_v2  ;;  %6443 = vmatprep.subr.bf16.mxu1 %v6442_v6  ;;  %v6542_v2 = vpack.c.bf16 %v799_v63, %v790_v61  ;;  %v6480_v3 = vpack.c.bf16 %v796_v1, %v787_v0  ;;  %v6544_v6 = vpack.c.bf16 %v798_v5, %v789_v4  ;;  %v886_v61 = vld [vmem:[#allocation4 + $0x318] sm:$0xff]  ;;  %v879_v0 = vld [vmem:[#allocation4 + $0x2e0] sm:$0xff]  ;;  %v888_v1 = vld [vmem:[#allocation4 + $0x328] sm:$0xff] }
  0xb7   :  { %v6500_v63 = vpack.c.bf16 %v886_v61, %v877_v60  ;;  %v905_v4 = vld [vmem:[#allocation4 + $0x3b0] sm:$0xff]  ;;  %v898_v5 = vld [vmem:[#allocation4 + $0x378] sm:$0xff]  ;;  %v976_v60 = vld [vmem:[#allocation4 + $0x5e8] sm:$0xff] }
  0xb9   :  { %6381 = vmatpush1.bf16.msra.mxu0 %v6380_v10  ;;  %6445 = vmatpush1.bf16.msra.mxu1 %v6444_v11  ;;  %v817_v10 = vld [vmem:[#allocation4 + $0xf0] sm:$0xff] }
  0xba   :  { %6447 = vmatprep.subr.bf16.mxu0 %v6446_v12  ;;  %6479 = vmatprep.subr.bf16.mxu1 %v6478_v62  ;;  %v805_v11 = vld [vmem:[#allocation4 + $0x90] sm:$0xff]  ;;  %v814_v12 = vld [vmem:[#allocation4 + $0xd8] sm:$0xff]  ;;  %v6546_v13 = vpack.c.bf16 %v817_v10, %v808_v9  ;;  %v6562_v62 = vpack.c.bf16 %v889_v59, %v880_v56  ;;  %v904_v9 = vld [vmem:[#allocation4 + $0x3a8] sm:$0xff] }
  0xbb   :  { %v6484_v14 = vpack.c.bf16 %v814_v12, %v805_v11  ;;  %v897_v11 = vld [vmem:[#allocation4 + $0x370] sm:$0xff]  ;;  %v906_v12 = vld [vmem:[#allocation4 + $0x3b8] sm:$0xff]  ;;  %v967_v59 = vld [vmem:[#allocation4 + $0x5a0] sm:$0xff] }
  0xbc   :  { %571 = vmatmul.mubr.f32.vlgmr.msra.gmra.mrb[2].mxu0 %v8979_v16  ;;  %642 = vmatmul.mubr.f32.vlgmr.msra.gmra.mrb[2].mxu1 %v8979_v16 }
  0xbd   :  { %6449 = vmatpush3.bf16.msra.mxu0 %v6448_v18  ;;  %712 = vmatprep.mubr.f32.mxu0 %v8982_v58  ;;  %v6464_v58 = vpack.c.bf16 %v156_v39, %v147_v38  ;;  %v6548_v18 = vpack.c.bf16 %v816_v17, %v807_v15  ;;  %v6554_v38 = vpack.c.bf16 %v853_v35, %v844_v33  ;;  %v923_v15 = vld [vmem:[#allocation4 + $0x440] sm:$0xff]  ;;  %v916_v17 = vld [vmem:[#allocation4 + $0x408] sm:$0xff] }
  0xbe   :  { %6451 = vmatprep.subr.bf16.mxu0 %v6450_v19  ;;  %6481 = vmatpush1.bf16.msra.mxu1 %v6480_v3  ;;  %v824_v19 = vld [vmem:[#allocation4 + $0x128] sm:$0xff] }
  0xbf   :  { %v6486_v22 = vpack.c.bf16 %v833_v20, %v824_v19  ;;  %v896_v3 = vld [vmem:[#allocation4 + $0x368] sm:$0xff]  ;;  %v925_v19 = vld [vmem:[#allocation4 + $0x450] sm:$0xff] }
  0xc0   :  { %v913_v20 = vld [vmem:[#allocation4 + $0x3f0] sm:$0xff]  ;;  %v940_v33 = vld [vmem:[#allocation4 + $0x4c8] sm:$0xff] }
  0xc1   :  { %6453 = vmatpush3.bf16.msra.mxu0 %v6452_v24  ;;  %v823_v24 = vld [vmem:[#allocation4 + $0x120] sm:$0xff]  ;;  %v6508_v23 = vpack.c.bf16 %v922_v21, %v913_v20  ;;  %v1012_v21 = vld [vmem:[#allocation4 + $0x708] sm:$0xff] }
  0xc2   :  { %6455 = vmatprep.subr.bf16.mxu0 %v6454_v25  ;;  %v832_v25 = vld [vmem:[#allocation4 + $0x168] sm:$0xff]  ;;  %v1003_v20 = vld [vmem:[#allocation4 + $0x6c0] sm:$0xff] }
  0xc3   :  { %v6488_v27 = vpack.c.bf16 %v832_v25, %v823_v24  ;;  %v915_v24 = vld [vmem:[#allocation4 + $0x400] sm:$0xff]  ;;  %v924_v25 = vld [vmem:[#allocation4 + $0x448] sm:$0xff] }
  0xc5   :  { %6457 = vmatpush3.bf16.msra.mxu0 %v6456_v30  ;;  %v6552_v30 = vpack.c.bf16 %v834_v29, %v825_v28  ;;  %v941_v28 = vld [vmem:[#allocation4 + $0x4d0] sm:$0xff]  ;;  %v934_v29 = vld [vmem:[#allocation4 + $0x498] sm:$0xff] }
  0xc6   :  { %6459 = vmatprep.subr.bf16.mxu0 %v6458_v31  ;;  %v842_v31 = vld [vmem:[#allocation4 + $0x1b8] sm:$0xff] }
  0xc7   :  { %v6490_v34 = vpack.c.bf16 %v851_v32, %v842_v31  ;;  %v943_v31 = vld [vmem:[#allocation4 + $0x4e0] sm:$0xff] }
  0xc8   :  { %v931_v32 = vld [vmem:[#allocation4 + $0x480] sm:$0xff] }
  0xc9   :  { %6461 = vmatpush3.bf16.msra.mxu0 %v6460_v36  ;;  %v841_v36 = vld [vmem:[#allocation4 + $0x1b0] sm:$0xff]  ;;  %v6512_v35 = vpack.c.bf16 %v940_v33, %v931_v32 }
  0xca   :  { %6463 = vmatprep.subr.bf16.mxu0 %v6462_v37  ;;  %v850_v37 = vld [vmem:[#allocation4 + $0x1f8] sm:$0xff]  ;;  %v1021_v33 = vld [vmem:[#allocation4 + $0x750] sm:$0xff] }
  0xcb   :  { %v6492_v39 = vpack.c.bf16 %v850_v37, %v841_v36  ;;  %v933_v36 = vld [vmem:[#allocation4 + $0x490] sm:$0xff]  ;;  %v942_v37 = vld [vmem:[#allocation4 + $0x4d8] sm:$0xff] }
  0xcd   :  { %6465 = vmatpush3.bf16.msra.mxu0 %v6464_v58  ;;  %v6556_v58 = vpack.c.bf16 %v852_v41, %v843_v40  ;;  %v959_v40 = vld [vmem:[#allocation4 + $0x560] sm:$0xff]  ;;  %v952_v41 = vld [vmem:[#allocation4 + $0x528] sm:$0xff] }
  0xce   :  { %6467 = vmatprep.subr.bf16.mxu0 %v6466_v42  ;;  %v860_v42 = vld [vmem:[#allocation4 + $0x248] sm:$0xff] }
  0xcf   :  { %v6494_v45 = vpack.c.bf16 %v869_v43, %v860_v42  ;;  %v961_v42 = vld [vmem:[#allocation4 + $0x570] sm:$0xff] }
  0xd0   :  { %v949_v43 = vld [vmem:[#allocation4 + $0x510] sm:$0xff] }
  0xd1   :  { %6469 = vmatpush3.bf16.msra.mxu0 %v6468_v47  ;;  %v859_v47 = vld [vmem:[#allocation4 + $0x240] sm:$0xff]  ;;  %v6516_v46 = vpack.c.bf16 %v958_v44, %v949_v43 }
  0xd2   :  { %6471 = vmatprep.subr.bf16.mxu0 %v6470_v48  ;;  %v868_v48 = vld [vmem:[#allocation4 + $0x288] sm:$0xff]  ;;  %v1039_v43 = vld [vmem:[#allocation4 + $0x7e0] sm:$0xff] }
  0xd3   :  { %v6496_v50 = vpack.c.bf16 %v868_v48, %v859_v47  ;;  %v951_v47 = vld [vmem:[#allocation4 + $0x520] sm:$0xff]  ;;  %v960_v48 = vld [vmem:[#allocation4 + $0x568] sm:$0xff] }
  0xd5   :  { %6473 = vmatpush3.bf16.msra.mxu0 %v6472_v53  ;;  %v6560_v53 = vpack.c.bf16 %v870_v52, %v861_v51  ;;  %v968_v51 = vld [vmem:[#allocation4 + $0x5a8] sm:$0xff]  ;;  %v977_v52 = vld [vmem:[#allocation4 + $0x5f0] sm:$0xff] }
  0xd6   :  { %6475 = vmatprep.subr.bf16.mxu0 %v6474_v54  ;;  %v878_v54 = vld [vmem:[#allocation4 + $0x2d8] sm:$0xff]  ;;  %v6518_v56 = vpack.c.bf16 %v977_v52, %v968_v51  ;;  %v1060_v51 = vld [vmem:[#allocation4 + $0x888] sm:$0xff] }
  0xd9   :  { %6477 = vmatpush3.bf16.msra.mxu0 %v6476_v57  ;;  %v6498_v57 = vpack.c.bf16 %v887_v55, %v878_v54 }
  0xda   :  { %6543 = vmatprep.subr.bf16.mxu0 %v6542_v2  ;;  %v6564_v2 = vpack.c.bf16 %v888_v1, %v879_v0  ;;  %v969_v0 = vld [vmem:[#allocation4 + $0x5b0] sm:$0xff]  ;;  %v978_v1 = vld [vmem:[#allocation4 + $0x5f8] sm:$0xff] }
  0xdc   :  { %713 = vmatmul.mubr.f32.vlgmr.msra.gmra.mrb[4].mxu0 %v8979_v16  ;;  %v6482_v16 = vpack.c.bf16 %v815_v8, %v806_v7  ;;  %v907_v7 = vld [vmem:[#allocation4 + $0x3c0] sm:$0xff] }
  0xdd   :  { %6545 = vmatpush1.bf16.msra.mxu0 %v6544_v6  ;;  %v6502_v6 = vpack.c.bf16 %v905_v4, %v896_v3  ;;  %v895_v8 = vld [vmem:[#allocation4 + $0x360] sm:$0xff]  ;;  %v986_v3 = vld [vmem:[#allocation4 + $0x638] sm:$0xff] }
  0xde   :  { %6483 = vmatprep.subr.bf16.mxu1 %v6482_v16  ;;  %6547 = vmatprep.subr.bf16.mxu0 %v6546_v13  ;;  %v6566_v16 = vpack.c.bf16 %v907_v7, %v898_v5  ;;  %v6504_v10 = vpack.c.bf16 %v904_v9, %v895_v8  ;;  %v6568_v13 = vpack.c.bf16 %v906_v12, %v897_v11  ;;  %v995_v4 = vld [vmem:[#allocation4 + $0x680] sm:$0xff]  ;;  %v997_v7 = vld [vmem:[#allocation4 + $0x690] sm:$0xff]  ;;  %v996_v11 = vld [vmem:[#allocation4 + $0x688] sm:$0xff] }
  0xdf   :  { %6485 = vmatpush1.bf16.msra.mxu1 %v6484_v14  ;;  %v914_v14 = vld [vmem:[#allocation4 + $0x3f8] sm:$0xff]  ;;  %v6522_v5 = vpack.c.bf16 %v995_v4, %v986_v3  ;;  %v985_v8 = vld [vmem:[#allocation4 + $0x630] sm:$0xff]  ;;  %v792_v3 = vld [vmem:[#allocation4 + $0x28] sm:$0xff] }
  0xe0   :  { %6487 = vmatprep.subr.bf16.mxu1 %v6486_v22  ;;  %v6570_v22 = vpack.c.bf16 %v925_v19, %v916_v17  ;;  %v1006_v17 = vld [vmem:[#allocation4 + $0x6d8] sm:$0xff]  ;;  %v1015_v19 = vld [vmem:[#allocation4 + $0x720] sm:$0xff]  ;;  %v801_v4 = vld [vmem:[#allocation4 + $0x70] sm:$0xff] }
  0xe1   :  { %6549 = vmatpush1.bf16.msra.mxu0 %v6548_v18  ;;  %v6506_v18 = vpack.c.bf16 %v923_v15, %v914_v14  ;;  %v1004_v14 = vld [vmem:[#allocation4 + $0x6c8] sm:$0xff]  ;;  %v1013_v15 = vld [vmem:[#allocation4 + $0x710] sm:$0xff] }
  0xe2   :  { %6551 = vmatprep.subr.bf16.mxu0 %v6550_v26  ;;  %v6572_v26 = vpack.c.bf16 %v924_v25, %v915_v24  ;;  %v1005_v24 = vld [vmem:[#allocation4 + $0x6d0] sm:$0xff]  ;;  %v1014_v25 = vld [vmem:[#allocation4 + $0x718] sm:$0xff] }
  0xe3   :  { %6489 = vmatpush1.bf16.msra.mxu1 %v6488_v27  ;;  %v932_v27 = vld [vmem:[#allocation4 + $0x488] sm:$0xff] }
  0xe4   :  { %6491 = vmatprep.subr.bf16.mxu1 %v6490_v34  ;;  %v6574_v34 = vpack.c.bf16 %v943_v31, %v934_v29  ;;  %v1024_v29 = vld [vmem:[#allocation4 + $0x768] sm:$0xff] }
  0xe5   :  { %6553 = vmatpush1.bf16.msra.mxu0 %v6552_v30  ;;  %v6510_v30 = vpack.c.bf16 %v941_v28, %v932_v27  ;;  %v6592_v27 = vpack.c.bf16 %v1014_v25, %v1005_v24  ;;  %v1031_v28 = vld [vmem:[#allocation4 + $0x7a0] sm:$0xff] }
  0xe6   :  { %6555 = vmatprep.subr.bf16.mxu0 %v6554_v38  ;;  %v6576_v38 = vpack.c.bf16 %v942_v37, %v933_v36  ;;  %v1032_v37 = vld [vmem:[#allocation4 + $0x7a8] sm:$0xff] }
  0xe7   :  { %6493 = vmatpush1.bf16.msra.mxu1 %v6492_v39  ;;  %v950_v39 = vld [vmem:[#allocation4 + $0x518] sm:$0xff] }
  0xe8   :  { %6495 = vmatprep.subr.bf16.mxu1 %v6494_v45  ;;  %v6578_v45 = vpack.c.bf16 %v961_v42, %v952_v41  ;;  %v1051_v42 = vld [vmem:[#allocation4 + $0x840] sm:$0xff] }
  0xe9   :  { %6557 = vmatpush1.bf16.msra.mxu0 %v6556_v58  ;;  %v6514_v58 = vpack.c.bf16 %v959_v40, %v950_v39  ;;  %v1049_v39 = vld [vmem:[#allocation4 + $0x830] sm:$0xff] }
  0xea   :  { %6559 = vmatprep.subr.bf16.mxu0 %v6558_v49  ;;  %v6580_v49 = vpack.c.bf16 %v960_v48, %v951_v47  ;;  %v1050_v47 = vld [vmem:[#allocation4 + $0x838] sm:$0xff] }
  0xeb   :  { %6497 = vmatpush1.bf16.msra.mxu1 %v6496_v50  ;;  %v1058_v48 = vld [vmem:[#allocation4 + $0x878] sm:$0xff] }
  0xec   :  { %6499 = vmatprep.subr.bf16.mxu1 %v6498_v57  ;;  %v979_v57 = vld [vmem:[#allocation4 + $0x600] sm:$0xff] }
  0xed   :  { %6561 = vmatpush1.bf16.msra.mxu0 %v6560_v53  ;;  %v970_v53 = vld [vmem:[#allocation4 + $0x5b8] sm:$0xff] }
  0xee   :  { %6563 = vmatprep.subr.bf16.mxu0 %v6562_v62  ;;  %v6582_v62 = vpack.c.bf16 %v979_v57, %v970_v53  ;;  %v1057_v57 = vld [vmem:[#allocation4 + $0x870] sm:$0xff] }
  0xef   :  { %6501 = vmatpush1.bf16.msra.mxu1 %v6500_v63  ;;  %v6520_v63 = vpack.c.bf16 %v976_v60, %v967_v59 }
  0xf0   :  { %6503 = vmatprep.subr.bf16.mxu1 %v6502_v6  ;;  %v988_v6 = vld [vmem:[#allocation4 + $0x648] sm:$0xff] }
  0xf1   :  { %6565 = vmatpush1.bf16.msra.mxu0 %v6564_v2  ;;  %v6584_v2 = vpack.c.bf16 %v978_v1, %v969_v0  ;;  %v6586_v9 = vpack.c.bf16 %v997_v7, %v988_v6  ;;  %v1068_v0 = vld [vmem:[#allocation4 + $0x8c8] sm:$0xff]  ;;  %v6606_v6 = vpack.c.bf16 %v801_v4, %v792_v3  ;;  %v803_v7 = vld [vmem:[#allocation4 + $0x80] sm:$0xff] }
  0xf2   :  { %6567 = vmatprep.subr.bf16.mxu0 %v6566_v16  ;;  %v994_v16 = vld [vmem:[#allocation4 + $0x678] sm:$0xff] }
  0xf3   :  { %6505 = vmatpush1.bf16.msra.mxu1 %v6504_v10  ;;  %v987_v10 = vld [vmem:[#allocation4 + $0x640] sm:$0xff]  ;;  %v6524_v12 = vpack.c.bf16 %v994_v16, %v985_v8  ;;  %v355_v16 = vld [vmem:[#allocation8] sm:$0xff] }
  0xf4   :  { %6507 = vmatprep.subr.bf16.mxu1 %v6506_v18  ;;  %v6526_v18 = vpack.c.bf16 %v1013_v15, %v1004_v14  ;;  %v357_v14 = vld [vmem:[#allocation8 + $0x10] sm:$0xff] }
  0xf5   :  { %6569 = vmatpush1.bf16.msra.mxu0 %v6568_v13  ;;  %v6588_v13 = vpack.c.bf16 %v996_v11, %v987_v10 }
  0xf6   :  { %6571 = vmatprep.subr.bf16.mxu0 %v6570_v22  ;;  %v6590_v22 = vpack.c.bf16 %v1015_v19, %v1006_v17 }
  0xf7   :  { %6509 = vmatpush1.bf16.msra.mxu1 %v6508_v23  ;;  %v6528_v23 = vpack.c.bf16 %v1012_v21, %v1003_v20 }
  0xf8   :  { %6511 = vmatprep.subr.bf16.mxu1 %v6510_v30  ;;  %v1033_v30 = vld [vmem:[#allocation4 + $0x7b0] sm:$0xff] }
  0xf9   :  { %6573 = vmatpush1.bf16.msra.mxu0 %v6572_v26  ;;  %v1022_v26 = vld [vmem:[#allocation4 + $0x758] sm:$0xff]  ;;  %v6594_v32 = vpack.c.bf16 %v1033_v30, %v1024_v29 }
  0xfa   :  { %6575 = vmatprep.subr.bf16.mxu0 %v6574_v34  ;;  %v6530_v31 = vpack.c.bf16 %v1031_v28, %v1022_v26  ;;  %v1030_v34 = vld [vmem:[#allocation4 + $0x798] sm:$0xff] }
  0xfb   :  { %6513 = vmatpush1.bf16.msra.mxu1 %v6512_v35  ;;  %v1023_v35 = vld [vmem:[#allocation4 + $0x760] sm:$0xff]  ;;  %v6532_v36 = vpack.c.bf16 %v1030_v34, %v1021_v33  ;;  %v358_v33 = vld [vmem:[#allocation8 + $0x18] sm:$0xff] }
  0xfc   :  { %6515 = vmatprep.subr.bf16.mxu1 %v6514_v58  ;;  %v6596_v40 = vpack.c.bf16 %v1032_v37, %v1023_v35  ;;  %v1042_v58 = vld [vmem:[#allocation4 + $0x7f8] sm:$0xff] }
  0xfd   :  { %6577 = vmatpush1.bf16.msra.mxu0 %v6576_v38  ;;  %v1040_v38 = vld [vmem:[#allocation4 + $0x7e8] sm:$0xff]  ;;  %v6598_v44 = vpack.c.bf16 %v1051_v42, %v1042_v58  ;;  %v361_v42 = vld [vmem:[#allocation8 + $0x30] sm:$0xff] }
  0xfe   :  { %6579 = vmatprep.subr.bf16.mxu0 %v6578_v45  ;;  %v6534_v41 = vpack.c.bf16 %v1049_v39, %v1040_v38  ;;  %v1048_v45 = vld [vmem:[#allocation4 + $0x828] sm:$0xff] }
  0xff   :  { %6517 = vmatpush1.bf16.msra.mxu1 %v6516_v46  ;;  %v1041_v46 = vld [vmem:[#allocation4 + $0x7f0] sm:$0xff]  ;;  %v6536_v52 = vpack.c.bf16 %v1048_v45, %v1039_v43 }
 0x100   :  { %6519 = vmatprep.subr.bf16.mxu1 %v6518_v56  ;;  %v6600_v53 = vpack.c.bf16 %v1050_v47, %v1041_v46  ;;  %v1069_v56 = vld [vmem:[#allocation4 + $0x8d0] sm:$0xff] }
 0x101   :  { %6581 = vmatpush1.bf16.msra.mxu0 %v6580_v49  ;;  %v1067_v49 = vld [vmem:[#allocation4 + $0x8c0] sm:$0xff]  ;;  %v6602_v60 = vpack.c.bf16 %v1069_v56, %v1060_v51 }
 0x102   :  { %6583 = vmatprep.subr.bf16.mxu0 %v6582_v62  ;;  %v6538_v59 = vpack.c.bf16 %v1067_v49, %v1058_v48  ;;  %v1066_v62 = vld [vmem:[#allocation4 + $0x8b8] sm:$0xff] }
 0x103   :  { %6521 = vmatpush1.bf16.msra.mxu1 %v6520_v63  ;;  %v1059_v63 = vld [vmem:[#allocation4 + $0x880] sm:$0xff]  ;;  %v6540_v1 = vpack.c.bf16 %v1066_v62, %v1057_v57 }
 0x104   :  { %6523 = vmatprep.subr.bf16.mxu1 %v6522_v5  ;;  %v794_v5 = vld [vmem:[#allocation4 + $0x38] sm:$0xff] }
 0x105   :  { %6585 = vmatpush1.bf16.msra.mxu0 %v6584_v2  ;;  %v6604_v2 = vpack.c.bf16 %v1068_v0, %v1059_v63  ;;  %v6670_v8 = vpack.c.bf16 %v803_v7, %v794_v5 }
 0x106   :  { %6587 = vmatprep.subr.bf16.mxu0 %v6586_v9  ;;  %v356_v9 = vld [vmem:[#allocation8 + $0x8] sm:$0xff] }
 0x107   :  { %6525 = vmatpush1.bf16.msra.mxu1 %v6524_v12 }
 0x108   :  { %6527 = vmatprep.subr.bf16.mxu1 %v6526_v18 }
 0x109   :  { %6589 = vmatpush1.bf16.msra.mxu0 %v6588_v13 }
 0x10a   :  { %6591 = vmatprep.subr.bf16.mxu0 %v6590_v22 }
 0x10b   :  { %6529 = vmatpush1.bf16.msra.mxu1 %v6528_v23  ;;  %v362_v23 = vld [vmem:[#allocation8 + $0x38] sm:$0xff] }
 0x10c   :  { %6531 = vmatprep.subr.bf16.mxu1 %v6530_v31 }
 0x10d   :  { %6593 = vmatpush1.bf16.msra.mxu0 %v6592_v27  ;;  %v359_v27 = vld [vmem:[#allocation8 + $0x20] sm:$0xff] }
 0x10e   :  { %6595 = vmatprep.subr.bf16.mxu0 %v6594_v32  ;;  %v59_v32 = vld [vmem:[#allocation5 + $0x8] sm:$0xff] }
 0x10f   :  { %6533 = vmatpush1.bf16.msra.mxu1 %v6532_v36 }
 0x110   :  { %6535 = vmatprep.subr.bf16.mxu1 %v6534_v41 }
 0x111   :  { %6597 = vmatpush1.bf16.msra.mxu0 %v6596_v40 }
 0x112   :  { %6599 = vmatprep.subr.bf16.mxu0 %v6598_v44 }
 0x113   :  { %6537 = vmatpush1.bf16.msra.mxu1 %v6536_v52 }
 0x114   :  { %6539 = vmatprep.subr.bf16.mxu1 %v6538_v59 }
 0x115   :  { %6601 = vmatpush1.bf16.msra.mxu0 %v6600_v53  ;;  %v363_v53 = vld [vmem:[#allocation8 + $0x40] sm:$0xff] }
 0x116   :  { %6603 = vmatprep.subr.bf16.mxu0 %v6602_v60 }
 0x117   :  { %6541 = vmatpush1.bf16.msra.mxu1 %v6540_v1 }
 0x118   :  { %6607 = vmatprep.subr.bf16.mxu1 %v6606_v6 }
 0x119   :  { %6605 = vmatpush1.bf16.msra.mxu0 %v6604_v2 }
 0x11a   :  { %6671 = vmatprep.subr.bf16.mxu0 %v6670_v8 }
 0x14f   :  { %v8994_v50 = vpop.f32.mrb[0].mxu0  ;;  %v8998_v55 = vpop.f32.mrb[0].mxu1 }
 0x150   :  { %v8996_v54 = vpop.f32.mrb[1].mxu0  ;;  %v9000_v61 = vpop.f32.mrb[1].mxu1  ;;  %v431_v11 = vadd.f32 %v8994_v50, %v355_v16  ;;  %v502_v15 = vadd.f32 %v8998_v55, %v357_v14  ;;  %v360_v50 = vld [vmem:[#allocation8 + $0x28] sm:$0xff] }
 0x151   :  { %v433_v10 = vadd.f32 %v8996_v54, %v356_v9  ;;  %v504_v39 = vadd.f32 %v9000_v61, %v358_v33 }
 0x152   :  { %v5854_v13 = vmul.f32 -1.442695, %v431_v11  ;;  %v5856_v20 = vmul.f32 -1.442695, %v502_v15 }
 0x153   :  { %v5855_v12 = vmul.f32 -1.442695, %v433_v10  ;;  %v5857_v58 = vmul.f32 -1.442695, %v504_v39  ;;  %v827_v39 = vld [vmem:[#allocation4 + $0x140] sm:$0xff] }
 0x155   :  { %8504 = vpow2.f32 %v5855_v12 }
 0x156   :  { %8506 = vpow2.f32 %v5854_v13 }
 0x157   :  { %8508 = vpow2.f32 %v5856_v20  ;;  %v793_v20 = vld [vmem:[#allocation4 + $0x30] sm:$0xff] }
 0x15f   :  { %v8505_v17 = vpop.eup %8504 }
 0x160   :  { %v8507_v18 = vpop.eup %8506  ;;  %v740_v24 = vadd.f32 1.0, %v8505_v17 }
 0x161   :  { %v739_v26 = vadd.f32 1.0, %v8507_v18  ;;  %v8509_v55 = vpop.eup %8508  ;;  %v791_v18 = vld [vmem:[#allocation4 + $0x20] sm:$0xff] }
 0x162   :  { %8510 = vrcp.f32 %v740_v24  ;;  %v741_v37 = vadd.f32 1.0, %v8509_v55  ;;  %v819_v24 = vld [vmem:[#allocation4 + $0x100] sm:$0xff] }
 0x163   :  { %8512 = vrcp.f32 %v739_v26  ;;  %v821_v26 = vld [vmem:[#allocation4 + $0x110] sm:$0xff]  ;;  %v811_v55 = vld [vmem:[#allocation4 + $0xc0] sm:$0xff] }
 0x16c   :  { %v8511_v31 = vpop.eup %8510 }
 0x16d   :  { %v8513_v35 = vpop.eup %8512  ;;  %v762_v38 = vmul.f32 %v8511_v31, %v59_v32  ;;  %v828_v31 = vld [vmem:[#allocation4 + $0x148] sm:$0xff] }
 0x18f   :  { %v572_v19 = vpop.f32.mrb[2].mxu0  ;;  %v643_v21 = vpop.f32.mrb[2].mxu1 }
 0x190   :  { %v574_v22 = vpop.f32.mrb[3].mxu0  ;;  %v645_v25 = vpop.f32.mrb[3].mxu1  ;;  %v573_v29 = vadd.f32 %v572_v19, %v359_v27  ;;  %v644_v43 = vadd.f32 %v643_v21, %v361_v42  ;;  %v800_v19 = vld [vmem:[#allocation4 + $0x68] sm:$0xff]  ;;  %v802_v21 = vld [vmem:[#allocation4 + $0x78] sm:$0xff]  ;;  %v829_v42 = vld [vmem:[#allocation4 + $0x150] sm:$0xff] }
 0x191   :  { %v646_v54 = vadd.f32 %v645_v25, %v362_v23  ;;  %v575_v28 = vadd.f32 %v574_v22, %v360_v50  ;;  %v810_v22 = vld [vmem:[#allocation4 + $0xb8] sm:$0xff]  ;;  %v812_v25 = vld [vmem:[#allocation4 + $0xc8] sm:$0xff]  ;;  %v6608_v50 = vpack.c.bf16 %v800_v19, %v791_v18  ;;  %v6672_v27 = vpack.c.bf16 %v802_v21, %v793_v20  ;;  %v883_v19 = vld [vmem:[#allocation4 + $0x300] sm:$0xff] }
 0x192   :  { %v5858_v34 = vmul.f32 -1.442695, %v573_v29  ;;  %v5860_v46 = vmul.f32 -1.442695, %v644_v43  ;;  %v818_v29 = vld [vmem:[#allocation4 + $0xf8] sm:$0xff]  ;;  %v6674_v33 = vpack.c.bf16 %v821_v26, %v812_v25  ;;  %v892_v20 = vld [vmem:[#allocation4 + $0x348] sm:$0xff] }
 0x193   :  { %8514 = vtanh.f32 %v646_v54  ;;  %v5859_v30 = vmul.f32 -1.442695, %v575_v28  ;;  %v809_v28 = vld [vmem:[#allocation4 + $0xb0] sm:$0xff]  ;;  %v838_v43 = vld [vmem:[#allocation4 + $0x198] sm:$0xff]  ;;  %v900_v21 = vld [vmem:[#allocation4 + $0x388] sm:$0xff]  ;;  %v6692_v26 = vpack.c.bf16 %v892_v20, %v883_v19 }
 0x194   :  { %v990_v19 = vld [vmem:[#allocation4 + $0x658] sm:$0xff]  ;;  %v999_v20 = vld [vmem:[#allocation4 + $0x6a0] sm:$0xff] }
 0x195   :  { %8516 = vpow2.f32 %v5859_v30  ;;  %v820_v30 = vld [vmem:[#allocation4 + $0x108] sm:$0xff] }
 0x196   :  { %8518 = vpow2.f32 %v5858_v34  ;;  %v837_v34 = vld [vmem:[#allocation4 + $0x190] sm:$0xff] }
 0x197   :  { %8520 = vrcp.f32 %v741_v37  ;;  %v6612_v37 = vpack.c.bf16 %v818_v29, %v809_v28 }
 0x19d   :  { %v8515_v36 = vpop.eup %8514 }
 0x19e   :  { %v763_v40 = vmul.f32 %v8515_v36, %v8513_v35  ;;  %v830_v35 = vld [vmem:[#allocation4 + $0x158] sm:$0xff]  ;;  %v839_v36 = vld [vmem:[#allocation4 + $0x1a0] sm:$0xff] }
 0x19f   :  { %v8517_v44 = vpop.eup %8516 }
 0x1a0   :  { %v764_v41 = vadd.f32 %v763_v40, %v762_v38  ;;  %v8519_v45 = vpop.eup %8518  ;;  %v744_v48 = vadd.f32 1.0, %v8517_v44  ;;  %v6676_v38 = vpack.c.bf16 %v820_v30, %v811_v55  ;;  %v836_v40 = vld [vmem:[#allocation4 + $0x188] sm:$0xff]  ;;  %v846_v44 = vld [vmem:[#allocation4 + $0x1d8] sm:$0xff]  ;;  %v901_v55 = vld [vmem:[#allocation4 + $0x390] sm:$0xff] }
 0x1a1   :  { %v8521_v47 = vpop.eup %8520  ;;  %v743_v52 = vadd.f32 1.0, %v8519_v45  ;;  %v855_v45 = vld [vmem:[#allocation4 + $0x220] sm:$0xff]  ;;  %v910_v30 = vld [vmem:[#allocation4 + $0x3d8] sm:$0xff] }
 0x1a2   :  { %8522 = vtanh.f32 %v764_v41 }
 0x1a3   :  { %8524 = vpow2.f32 %v5857_v58  ;;  %v6678_v58 = vpack.c.bf16 %v839_v36, %v830_v35  ;;  %v6696_v36 = vpack.c.bf16 %v910_v30, %v901_v55  ;;  %v1008_v55 = vld [vmem:[#allocation4 + $0x6e8] sm:$0xff]  ;;  %v1017_v30 = vld [vmem:[#allocation4 + $0x730] sm:$0xff] }
 0x1a4   :  { %8526 = vpow2.f32 %v5860_v46  ;;  %v848_v46 = vld [vmem:[#allocation4 + $0x1e8] sm:$0xff] }
 0x1a5   :  { %8528 = vrcp.f32 %v744_v48  ;;  %v6616_v48 = vpack.c.bf16 %v836_v40, %v827_v39 }
 0x1a6   :  { %8530 = vrcp.f32 %v743_v52  ;;  %v854_v52 = vld [vmem:[#allocation4 + $0x218] sm:$0xff] }
 0x1ac   :  { %v8523_v51 = vpop.eup %8522 }
 0x1ad   :  { %v769_v56 = vmul.f32 %v8523_v51, %v8521_v47  ;;  %v8525_v60 = vpop.eup %8524  ;;  %v857_v47 = vld [vmem:[#allocation4 + $0x230] sm:$0xff] }
 0x1ae   :  { %v742_v62 = vadd.f32 1.0, %v8525_v60  ;;  %v8527_v63 = vpop.eup %8526  ;;  %v845_v51 = vld [vmem:[#allocation4 + $0x1d0] sm:$0xff] }
 0x1af   :  { %v5942_v49 = vpop.f32.mrb[4].mxu0  ;;  %v8529_v0 = vpop.eup %8528  ;;  %v745_v2 = vadd.f32 1.0, %v8527_v63  ;;  %v873_v60 = vld [vmem:[#allocation4 + $0x2b0] sm:$0xff]  ;;  %v875_v63 = vld [vmem:[#allocation4 + $0x2c0] sm:$0xff] }
 0x1b0   :  { %v5943_v61 = vpop.f32.mrb[5].mxu0  ;;  %v8531_v1 = vpop.eup %8530  ;;  %v765_v4 = vmul.f32 %v8529_v0, %v59_v32  ;;  %v6610_v32 = vpack.c.bf16 %v819_v24, %v810_v22  ;;  %v6620_v0 = vpack.c.bf16 %v854_v52, %v845_v51  ;;  %v909_v22 = vld [vmem:[#allocation4 + $0x3d0] sm:$0xff]  ;;  %v911_v24 = vld [vmem:[#allocation4 + $0x3e0] sm:$0xff] }
 0x1b1   :  { %v5944_v57 = vadd.f32 %v5943_v61, %v5942_v49  ;;  %v6680_v49 = vpack.c.bf16 %v838_v43, %v829_v42  ;;  %v6682_v61 = vpack.c.bf16 %v857_v47, %v848_v46  ;;  %v6630_v28 = vpack.c.bf16 %v909_v22, %v900_v21  ;;  %v936_v42 = vld [vmem:[#allocation4 + $0x4a8] sm:$0xff]  ;;  %v945_v43 = vld [vmem:[#allocation4 + $0x4f0] sm:$0xff] }
 0x1b2   :  { %v6638_v51 = vpack.c.bf16 %v945_v43, %v936_v42  ;;  %v992_v21 = vld [vmem:[#allocation4 + $0x668] sm:$0xff]  ;;  %v1001_v22 = vld [vmem:[#allocation4 + $0x6b0] sm:$0xff] }
 0x1b3   :  { %v715_v59 = vadd.f32 %v5944_v57, %v363_v53  ;;  %v6618_v53 = vpack.c.bf16 %v855_v45, %v846_v44  ;;  %v856_v57 = vld [vmem:[#allocation4 + $0x228] sm:$0xff]  ;;  %v938_v44 = vld [vmem:[#allocation4 + $0x4b8] sm:$0xff]  ;;  %v947_v45 = vld [vmem:[#allocation4 + $0x500] sm:$0xff] }
 0x1b4   :  { %v6702_v52 = vpack.c.bf16 %v947_v45, %v938_v44  ;;  %v1028_v42 = vld [vmem:[#allocation4 + $0x788] sm:$0xff]  ;;  %v1037_v43 = vld [vmem:[#allocation4 + $0x7d0] sm:$0xff] }
 0x1b5   :  { %8532 = vtanh.f32 %v715_v59  ;;  %v864_v59 = vld [vmem:[#allocation4 + $0x268] sm:$0xff] }
 0x1b6   :  { %8534 = vrcp.f32 %v742_v62  ;;  %v866_v62 = vld [vmem:[#allocation4 + $0x278] sm:$0xff] }
 0x1b7   :  { %8536 = vrcp.f32 %v745_v2  ;;  %v863_v2 = vld [vmem:[#allocation4 + $0x260] sm:$0xff] }
 0x1bf   :  { %v8533_v3 = vpop.eup %8532 }
 0x1c0   :  { %v766_v5 = vmul.f32 %v8533_v3, %v8531_v1  ;;  %v8535_v8 = vpop.eup %8534  ;;  %v872_v3 = vld [vmem:[#allocation4 + $0x2a8] sm:$0xff] }
 0x1c1   :  { %v8537_v10 = vpop.eup %8536 }
 0x1c2   :  { %v767_v6 = vadd.f32 %v766_v5, %v765_v4  ;;  %v6622_v4 = vpack.c.bf16 %v873_v60, %v864_v59  ;;  %v6686_v5 = vpack.c.bf16 %v875_v63, %v866_v62  ;;  %v956_v59 = vld [vmem:[#allocation4 + $0x548] sm:$0xff]  ;;  %v965_v60 = vld [vmem:[#allocation4 + $0x590] sm:$0xff] }
 0x1c4   :  { %8538 = vtanh.f32 %v767_v6  ;;  %v772_v7 = vsub.f32 %v764_v41, %v767_v6  ;;  %v6614_v41 = vpack.c.bf16 %v837_v34, %v828_v31  ;;  %v918_v31 = vld [vmem:[#allocation4 + $0x418] sm:$0xff]  ;;  %v929_v34 = vld [vmem:[#allocation4 + $0x470] sm:$0xff] }
 0x1c6   :  { %v773_v9 = vmul.f32 %v8535_v8, %v772_v7  ;;  %v874_v7 = vld [vmem:[#allocation4 + $0x2b8] sm:$0xff] }
 0x1c8   :  { %v774_v16 = vadd.f32 %v773_v9, %v767_v6  ;;  %v865_v6 = vld [vmem:[#allocation4 + $0x270] sm:$0xff]  ;;  %v891_v9 = vld [vmem:[#allocation4 + $0x340] sm:$0xff] }
 0x1ca   :  { %781 = vst [vmem:[#allocation10 + $0x8] sm:$0xff] %v774_v16  ;;  %v884_v16 = vld [vmem:[#allocation4 + $0x308] sm:$0xff] }
 0x1ce   :  { %v8539_v11 = vpop.eup %8538 }
 0x1cf   :  { %v771_v12 = vmul.f32 %v8539_v11, %v8537_v10  ;;  %v893_v10 = vld [vmem:[#allocation4 + $0x350] sm:$0xff]  ;;  %v6624_v11 = vpack.c.bf16 %v872_v3, %v863_v2  ;;  %v6706_v3 = vpack.c.bf16 %v965_v60, %v956_v59 }
 0x1d0   :  { %v6690_v18 = vpack.c.bf16 %v893_v10, %v884_v16 }
 0x1d1   :  { %v775_v13 = vsub.f32 %v769_v56, %v771_v12  ;;  %v847_v56 = vld [vmem:[#allocation4 + $0x1e0] sm:$0xff] }
 0x1d2   :  { %v6684_v1 = vpack.c.bf16 %v856_v57, %v847_v56  ;;  %v954_v56 = vld [vmem:[#allocation4 + $0x538] sm:$0xff]  ;;  %v963_v57 = vld [vmem:[#allocation4 + $0x580] sm:$0xff] }
 0x1d3   :  { %v776_v14 = vmul.f32 %v8535_v8, %v775_v13  ;;  %v882_v8 = vld [vmem:[#allocation4 + $0x2f8] sm:$0xff]  ;;  %v881_v13 = vld [vmem:[#allocation4 + $0x2f0] sm:$0xff]  ;;  %v6642_v2 = vpack.c.bf16 %v963_v57, %v954_v56  ;;  %v1055_v57 = vld [vmem:[#allocation4 + $0x860] sm:$0xff] }
 0x1d4   :  { %v1046_v56 = vld [vmem:[#allocation4 + $0x818] sm:$0xff] }
 0x1d5   :  { %v9006_v15 = vadd.f32 %v776_v14, %v771_v12  ;;  %v6688_v12 = vpack.c.bf16 %v874_v7, %v865_v6  ;;  %v890_v14 = vld [vmem:[#allocation4 + $0x338] sm:$0xff]  ;;  %v972_v6 = vld [vmem:[#allocation4 + $0x5c8] sm:$0xff]  ;;  %v981_v7 = vld [vmem:[#allocation4 + $0x610] sm:$0xff] }
 0x1d6   :  { %v6628_v25 = vpack.c.bf16 %v890_v14, %v881_v13  ;;  %v6646_v13 = vpack.c.bf16 %v981_v7, %v972_v6  ;;  %v1064_v6 = vld [vmem:[#allocation4 + $0x8a8] sm:$0xff]  ;;  %v1073_v7 = vld [vmem:[#allocation4 + $0x8f0] sm:$0xff] }
 0x1d7   :  { %780 = vst [vmem:[#allocation10] sm:$0xff] %v9006_v15  ;;  %v784_v17 = vadd.f32 1e-06, %v9006_v15 }
 0x1d9   :  { %8540 = vlog2.f32 %v784_v17  ;;  %v6626_v17 = vpack.c.bf16 %v891_v9, %v882_v8  ;;  %v974_v8 = vld [vmem:[#allocation4 + $0x5d8] sm:$0xff]  ;;  %v983_v9 = vld [vmem:[#allocation4 + $0x620] sm:$0xff] }
 0x1da   :  { %v6710_v14 = vpack.c.bf16 %v983_v9, %v974_v8 }
 0x1e3   :  { %v8541_v23 = vpop.eup %8540 }
 0x1e4   :  { %v9010_v54 = vmul.f32 0.6931472, %v8541_v23  ;;  %v902_v23 = vld [vmem:[#allocation4 + $0x398] sm:$0xff] }
 0x1e5   :  { %v6694_v29 = vpack.c.bf16 %v911_v24, %v902_v23 }
 0x1e6   :  { %1149 = vmatprep.mubr.f32.mxu1 %v9010_v54  ;;  %1220 = vmatprep.mubr.f32.mxu0 %v9010_v54 }
 0x1e7   :  { %1150 = vmatmul.mubr.f32.vlgmr.msra.gmra.mrb[4].mxu1 %v9006_v15  ;;  %1221 = vmatmul.mubr.f32.vlgmr.msra.gmra.mrb[6].mxu0 %v9006_v15 }
 0x1e8   :  { %6609 = vmatpush1.bf16.msra.mxu1 %v6608_v50  ;;  %6673 = vmatpush1.bf16.msra.mxu0 %v6672_v27  ;;  %v899_v50 = vld [vmem:[#allocation4 + $0x380] sm:$0xff]  ;;  %v908_v27 = vld [vmem:[#allocation4 + $0x3c8] sm:$0xff] }
 0x1e9   :  { %1291 = vmatprep.mubr.f32.mxu1 %v9010_v54  ;;  %1362 = vmatprep.mubr.f32.mxu0 %v9010_v54  ;;  %v6632_v35 = vpack.c.bf16 %v908_v27, %v899_v50  ;;  %v6650_v50 = vpack.c.bf16 %v999_v20, %v990_v19  ;;  %v6714_v27 = vpack.c.bf16 %v1001_v22, %v992_v21  ;;  %v795_v22 = vld [vmem:[#allocation4 + $0x40] sm:$0xff] }
 0x1ea   :  { %6611 = vmatprep.subr.bf16.mxu1 %v6610_v32  ;;  %6675 = vmatprep.subr.bf16.mxu0 %v6674_v33  ;;  %v927_v32 = vld [vmem:[#allocation4 + $0x460] sm:$0xff]  ;;  %v920_v33 = vld [vmem:[#allocation4 + $0x428] sm:$0xff] }
 0x1eb   :  { %v6634_v39 = vpack.c.bf16 %v927_v32, %v918_v31  ;;  %v6698_v40 = vpack.c.bf16 %v929_v34, %v920_v33  ;;  %v1010_v31 = vld [vmem:[#allocation4 + $0x6f8] sm:$0xff]  ;;  %v1019_v32 = vld [vmem:[#allocation4 + $0x740] sm:$0xff] }
 0x1ec   :  { %6613 = vmatpush1.bf16.msra.mxu1 %v6612_v37  ;;  %6677 = vmatpush1.bf16.msra.mxu0 %v6676_v38  ;;  %v917_v37 = vld [vmem:[#allocation4 + $0x410] sm:$0xff]  ;;  %v926_v38 = vld [vmem:[#allocation4 + $0x458] sm:$0xff] }
 0x1ed   :  { %6615 = vmatprep.subr.bf16.mxu1 %v6614_v41  ;;  %6679 = vmatprep.subr.bf16.mxu0 %v6678_v58  ;;  %v919_v41 = vld [vmem:[#allocation4 + $0x420] sm:$0xff]  ;;  %v928_v58 = vld [vmem:[#allocation4 + $0x468] sm:$0xff]  ;;  %v6636_v46 = vpack.c.bf16 %v926_v38, %v917_v37  ;;  %v6654_v37 = vpack.c.bf16 %v1017_v30, %v1008_v55  ;;  %v6718_v38 = vpack.c.bf16 %v1019_v32, %v1010_v31 }
 0x1ee   :  { %v6700_v47 = vpack.c.bf16 %v928_v58, %v919_v41  ;;  %v1026_v41 = vld [vmem:[#allocation4 + $0x778] sm:$0xff]  ;;  %v1035_v58 = vld [vmem:[#allocation4 + $0x7c0] sm:$0xff]  ;;  %v984_v55 = vld [vmem:[#allocation4 + $0x628] sm:$0xff] }
 0x1ef   :  { %v831_v32 = vld [vmem:[#allocation4 + $0x160] sm:$0xff] }
 0x1f0   :  { %6617 = vmatpush1.bf16.msra.mxu1 %v6616_v48  ;;  %6681 = vmatpush1.bf16.msra.mxu0 %v6680_v49  ;;  %v935_v48 = vld [vmem:[#allocation4 + $0x4a0] sm:$0xff]  ;;  %v944_v49 = vld [vmem:[#allocation4 + $0x4e8] sm:$0xff] }
 0x1f1   :  { %6619 = vmatprep.subr.bf16.mxu1 %v6618_v53  ;;  %6683 = vmatprep.subr.bf16.mxu0 %v6682_v61  ;;  %v937_v53 = vld [vmem:[#allocation4 + $0x4b0] sm:$0xff]  ;;  %v946_v61 = vld [vmem:[#allocation4 + $0x4f8] sm:$0xff]  ;;  %v6640_v62 = vpack.c.bf16 %v944_v49, %v935_v48  ;;  %v6658_v48 = vpack.c.bf16 %v1035_v58, %v1026_v41  ;;  %v6722_v49 = vpack.c.bf16 %v1037_v43, %v1028_v42  ;;  %v1020_v41 = vld [vmem:[#allocation4 + $0x748] sm:$0xff] }
 0x1f2   :  { %v6704_v63 = vpack.c.bf16 %v946_v61, %v937_v53  ;;  %v1044_v53 = vld [vmem:[#allocation4 + $0x808] sm:$0xff]  ;;  %v1053_v61 = vld [vmem:[#allocation4 + $0x850] sm:$0xff] }
 0x1f3   :  { %v876_v43 = vld [vmem:[#allocation4 + $0x2c8] sm:$0xff] }
 0x1f4   :  { %6621 = vmatpush1.bf16.msra.mxu1 %v6620_v0  ;;  %6685 = vmatpush1.bf16.msra.mxu0 %v6684_v1  ;;  %v953_v0 = vld [vmem:[#allocation4 + $0x530] sm:$0xff]  ;;  %v962_v1 = vld [vmem:[#allocation4 + $0x578] sm:$0xff] }
 0x1f5   :  { %6623 = vmatprep.subr.bf16.mxu1 %v6622_v4  ;;  %6687 = vmatprep.subr.bf16.mxu0 %v6686_v5  ;;  %v955_v4 = vld [vmem:[#allocation4 + $0x540] sm:$0xff]  ;;  %v964_v5 = vld [vmem:[#allocation4 + $0x588] sm:$0xff]  ;;  %v6644_v16 = vpack.c.bf16 %v962_v1, %v953_v0  ;;  %v6662_v0 = vpack.c.bf16 %v1053_v61, %v1044_v53  ;;  %v6726_v1 = vpack.c.bf16 %v1055_v57, %v1046_v56 }
 0x1f6   :  { %v6708_v10 = vpack.c.bf16 %v964_v5, %v955_v4  ;;  %v1062_v4 = vld [vmem:[#allocation4 + $0x898] sm:$0xff]  ;;  %v1071_v5 = vld [vmem:[#allocation4 + $0x8e0] sm:$0xff]  ;;  %v912_v57 = vld [vmem:[#allocation4 + $0x3e8] sm:$0xff] }
 0x1f7   :  { %v903_v56 = vld [vmem:[#allocation4 + $0x3a0] sm:$0xff] }
 0x1f8   :  { %6625 = vmatpush1.bf16.msra.mxu1 %v6624_v11  ;;  %6689 = vmatpush1.bf16.msra.mxu0 %v6688_v12  ;;  %v971_v11 = vld [vmem:[#allocation4 + $0x5c0] sm:$0xff]  ;;  %v980_v12 = vld [vmem:[#allocation4 + $0x608] sm:$0xff] }
 0x1f9   :  { %6627 = vmatprep.subr.bf16.mxu1 %v6626_v17  ;;  %6691 = vmatprep.subr.bf16.mxu0 %v6690_v18  ;;  %v973_v17 = vld [vmem:[#allocation4 + $0x5d0] sm:$0xff]  ;;  %v982_v18 = vld [vmem:[#allocation4 + $0x618] sm:$0xff]  ;;  %v6648_v23 = vpack.c.bf16 %v980_v12, %v971_v11  ;;  %v6730_v11 = vpack.c.bf16 %v1073_v7, %v1064_v6  ;;  %v1521_v7 = vld [vmem:[#allocation4 + $0x60] sm:$0xff] }
 0x1fa   :  { %v6712_v24 = vpack.c.bf16 %v982_v18, %v973_v17  ;;  %v1070_v12 = vld [vmem:[#allocation4 + $0x8d8] sm:$0xff]  ;;  %v939_v17 = vld [vmem:[#allocation4 + $0x4c0] sm:$0xff]  ;;  %v948_v18 = vld [vmem:[#allocation4 + $0x508] sm:$0xff] }
 0x1fb   :  { %v6734_v21 = vpack.c.bf16 %v948_v18, %v939_v17  ;;  %v1537_v17 = vld [vmem:[#allocation4 + $0xe0] sm:$0xff]  ;;  %v1530_v18 = vld [vmem:[#allocation4 + $0xa8] sm:$0xff] }
 0x1fc   :  { %6629 = vmatpush1.bf16.msra.mxu1 %v6628_v25  ;;  %6693 = vmatpush1.bf16.msra.mxu0 %v6692_v26  ;;  %v989_v25 = vld [vmem:[#allocation4 + $0x650] sm:$0xff]  ;;  %v998_v26 = vld [vmem:[#allocation4 + $0x698] sm:$0xff] }
 0x1fd   :  { %6631 = vmatprep.subr.bf16.mxu1 %v6630_v28  ;;  %6695 = vmatprep.subr.bf16.mxu0 %v6694_v29  ;;  %v991_v28 = vld [vmem:[#allocation4 + $0x660] sm:$0xff]  ;;  %v1000_v29 = vld [vmem:[#allocation4 + $0x6a8] sm:$0xff]  ;;  %v6652_v33 = vpack.c.bf16 %v998_v26, %v989_v25  ;;  %v966_v25 = vld [vmem:[#allocation4 + $0x598] sm:$0xff] }
 0x1fe   :  { %v6716_v34 = vpack.c.bf16 %v1000_v29, %v991_v28  ;;  %v822_v28 = vld [vmem:[#allocation4 + $0x118] sm:$0xff]  ;;  %v975_v29 = vld [vmem:[#allocation4 + $0x5e0] sm:$0xff] }
 0x1ff   :  { %v6742_v31 = vpack.c.bf16 %v984_v55, %v975_v29  ;;  %v1557_v55 = vld [vmem:[#allocation4 + $0x180] sm:$0xff] }
 0x200   :  { %6633 = vmatpush1.bf16.msra.mxu1 %v6632_v35  ;;  %6697 = vmatpush1.bf16.msra.mxu0 %v6696_v36  ;;  %v1007_v35 = vld [vmem:[#allocation4 + $0x6e0] sm:$0xff]  ;;  %v1016_v36 = vld [vmem:[#allocation4 + $0x728] sm:$0xff] }
 0x201   :  { %6635 = vmatprep.subr.bf16.mxu1 %v6634_v39  ;;  %6699 = vmatprep.subr.bf16.mxu0 %v6698_v40  ;;  %v1009_v39 = vld [vmem:[#allocation4 + $0x6f0] sm:$0xff]  ;;  %v1018_v40 = vld [vmem:[#allocation4 + $0x738] sm:$0xff]  ;;  %v6656_v44 = vpack.c.bf16 %v1016_v36, %v1007_v35 }
 0x202   :  { %v6720_v45 = vpack.c.bf16 %v1018_v40, %v1009_v39  ;;  %v1002_v35 = vld [vmem:[#allocation4 + $0x6b8] sm:$0xff]  ;;  %v1011_v40 = vld [vmem:[#allocation4 + $0x700] sm:$0xff] }
 0x203   :  { %v858_v39 = vld [vmem:[#allocation4 + $0x238] sm:$0xff]  ;;  %v6750_v42 = vpack.c.bf16 %v1020_v41, %v1011_v40  ;;  %v1575_v41 = vld [vmem:[#allocation4 + $0x210] sm:$0xff] }
 0x204   :  { %6637 = vmatpush1.bf16.msra.mxu1 %v6636_v46  ;;  %6701 = vmatpush1.bf16.msra.mxu0 %v6700_v47  ;;  %v1025_v46 = vld [vmem:[#allocation4 + $0x770] sm:$0xff]  ;;  %v1034_v47 = vld [vmem:[#allocation4 + $0x7b8] sm:$0xff] }
 0x205   :  { %6639 = vmatprep.subr.bf16.mxu1 %v6638_v51  ;;  %6703 = vmatprep.subr.bf16.mxu0 %v6702_v52  ;;  %v1027_v51 = vld [vmem:[#allocation4 + $0x780] sm:$0xff]  ;;  %v1036_v52 = vld [vmem:[#allocation4 + $0x7c8] sm:$0xff]  ;;  %v6660_v59 = vpack.c.bf16 %v1034_v47, %v1025_v46 }
 0x206   :  { %v6724_v60 = vpack.c.bf16 %v1036_v52, %v1027_v51  ;;  %v1047_v51 = vld [vmem:[#allocation4 + $0x820] sm:$0xff]  ;;  %v1056_v52 = vld [vmem:[#allocation4 + $0x868] sm:$0xff] }
 0x207   :  { %v6758_v61 = vpack.c.bf16 %v1056_v52, %v1047_v51  ;;  %v1593_v52 = vld [vmem:[#allocation4 + $0x2a0] sm:$0xff] }
 0x208   :  { %6641 = vmatpush1.bf16.msra.mxu1 %v6640_v62  ;;  %6705 = vmatpush1.bf16.msra.mxu0 %v6704_v63  ;;  %v1043_v62 = vld [vmem:[#allocation4 + $0x800] sm:$0xff]  ;;  %v1052_v63 = vld [vmem:[#allocation4 + $0x848] sm:$0xff] }
 0x209   :  { %6643 = vmatprep.subr.bf16.mxu1 %v6642_v2  ;;  %6707 = vmatprep.subr.bf16.mxu0 %v6706_v3  ;;  %v1045_v2 = vld [vmem:[#allocation4 + $0x810] sm:$0xff]  ;;  %v1054_v3 = vld [vmem:[#allocation4 + $0x858] sm:$0xff]  ;;  %v6664_v8 = vpack.c.bf16 %v1052_v63, %v1043_v62  ;;  %v6760_v62 = vpack.c.bf16 %v912_v57, %v903_v56 }
 0x20a   :  { %v6728_v9 = vpack.c.bf16 %v1054_v3, %v1045_v2  ;;  %v1510_v3 = vld [vmem:[#allocation4 + $0x8] sm:$0xff] }
 0x20c   :  { %6645 = vmatpush1.bf16.msra.mxu1 %v6644_v16  ;;  %6709 = vmatpush1.bf16.msra.mxu0 %v6708_v10  ;;  %v1061_v16 = vld [vmem:[#allocation4 + $0x890] sm:$0xff]  ;;  %v6666_v10 = vpack.c.bf16 %v1071_v5, %v1062_v4  ;;  %v1512_v5 = vld [vmem:[#allocation4 + $0x18] sm:$0xff] }
 0x20d   :  { %6647 = vmatprep.subr.bf16.mxu1 %v6646_v13  ;;  %6711 = vmatprep.subr.bf16.mxu0 %v6710_v14  ;;  %v1063_v13 = vld [vmem:[#allocation4 + $0x8a0] sm:$0xff]  ;;  %v1072_v14 = vld [vmem:[#allocation4 + $0x8e8] sm:$0xff]  ;;  %v6668_v19 = vpack.c.bf16 %v1070_v12, %v1061_v16  ;;  %v1519_v4 = vld [vmem:[#allocation4 + $0x50] sm:$0xff]  ;;  %v6830_v16 = vpack.c.bf16 %v1521_v7, %v1512_v5 }
 0x20e   :  { %v6732_v20 = vpack.c.bf16 %v1072_v14, %v1063_v13  ;;  %v6766_v6 = vpack.c.bf16 %v1519_v4, %v1510_v3  ;;  %v1520_v12 = vld [vmem:[#allocation4 + $0x58] sm:$0xff]  ;;  %v1611_v3 = vld [vmem:[#allocation4 + $0x330] sm:$0xff] }
 0x20f   :  { %v1528_v14 = vld [vmem:[#allocation4 + $0x98] sm:$0xff]  ;;  %v1599_v4 = vld [vmem:[#allocation4 + $0x2d0] sm:$0xff] }
 0x210   :  { %6649 = vmatpush1.bf16.msra.mxu1 %v6648_v23  ;;  %6713 = vmatpush1.bf16.msra.mxu0 %v6712_v24  ;;  %v804_v23 = vld [vmem:[#allocation4 + $0x88] sm:$0xff]  ;;  %v957_v24 = vld [vmem:[#allocation4 + $0x550] sm:$0xff]  ;;  %v1608_v5 = vld [vmem:[#allocation4 + $0x318] sm:$0xff] }
 0x211   :  { %6651 = vmatprep.subr.bf16.mxu1 %v6650_v50  ;;  %6715 = vmatprep.subr.bf16.mxu0 %v6714_v27  ;;  %v6736_v26 = vpack.c.bf16 %v804_v23, %v795_v22  ;;  %v6738_v50 = vpack.c.bf16 %v966_v25, %v957_v24  ;;  %v813_v27 = vld [vmem:[#allocation4 + $0xd0] sm:$0xff]  ;;  %v1529_v24 = vld [vmem:[#allocation4 + $0xa0] sm:$0xff]  ;;  %v1538_v25 = vld [vmem:[#allocation4 + $0xe8] sm:$0xff]  ;;  %v6788_v7 = vpack.c.bf16 %v1608_v5, %v1599_v4 }
 0x212   :  { %v6740_v30 = vpack.c.bf16 %v822_v28, %v813_v27  ;;  %v1555_v27 = vld [vmem:[#allocation4 + $0x170] sm:$0xff]  ;;  %v1548_v28 = vld [vmem:[#allocation4 + $0x138] sm:$0xff] }
 0x214   :  { %6653 = vmatpush1.bf16.msra.mxu1 %v6652_v33  ;;  %6717 = vmatpush1.bf16.msra.mxu0 %v6716_v34  ;;  %v840_v33 = vld [vmem:[#allocation4 + $0x1a8] sm:$0xff]  ;;  %v993_v34 = vld [vmem:[#allocation4 + $0x670] sm:$0xff] }
 0x215   :  { %6655 = vmatprep.subr.bf16.mxu1 %v6654_v37  ;;  %6719 = vmatprep.subr.bf16.mxu0 %v6718_v38  ;;  %v6744_v36 = vpack.c.bf16 %v840_v33, %v831_v32  ;;  %v6746_v37 = vpack.c.bf16 %v1002_v35, %v993_v34  ;;  %v849_v38 = vld [vmem:[#allocation4 + $0x1f0] sm:$0xff]  ;;  %v6838_v32 = vpack.c.bf16 %v1557_v55, %v1548_v28  ;;  %v1556_v35 = vld [vmem:[#allocation4 + $0x178] sm:$0xff] }
 0x216   :  { %v6748_v58 = vpack.c.bf16 %v858_v39, %v849_v38  ;;  %v1547_v34 = vld [vmem:[#allocation4 + $0x130] sm:$0xff]  ;;  %v1573_v38 = vld [vmem:[#allocation4 + $0x200] sm:$0xff]  ;;  %v1566_v39 = vld [vmem:[#allocation4 + $0x1c8] sm:$0xff] }
 0x217   :  { %v1644_v28 = vld [vmem:[#allocation4 + $0x438] sm:$0xff] }
 0x218   :  { %6657 = vmatpush1.bf16.msra.mxu1 %v6656_v44  ;;  %6721 = vmatpush1.bf16.msra.mxu0 %v6720_v45  ;;  %v1029_v44 = vld [vmem:[#allocation4 + $0x790] sm:$0xff]  ;;  %v1038_v45 = vld [vmem:[#allocation4 + $0x7d8] sm:$0xff] }
 0x219   :  { %6659 = vmatprep.subr.bf16.mxu1 %v6658_v48  ;;  %6723 = vmatprep.subr.bf16.mxu0 %v6722_v49  ;;  %v6754_v47 = vpack.c.bf16 %v1038_v45, %v1029_v44  ;;  %v885_v48 = vld [vmem:[#allocation4 + $0x310] sm:$0xff]  ;;  %v894_v49 = vld [vmem:[#allocation4 + $0x358] sm:$0xff]  ;;  %v1565_v44 = vld [vmem:[#allocation4 + $0x1c0] sm:$0xff] }
 0x21a   :  { %v6756_v53 = vpack.c.bf16 %v894_v49, %v885_v48  ;;  %v1574_v45 = vld [vmem:[#allocation4 + $0x208] sm:$0xff]  ;;  %v1591_v48 = vld [vmem:[#allocation4 + $0x290] sm:$0xff]  ;;  %v1584_v49 = vld [vmem:[#allocation4 + $0x258] sm:$0xff] }
 0x21b   :  { %v6846_v56 = vpack.c.bf16 %v1593_v52, %v1584_v49  ;;  %v1680_v49 = vld [vmem:[#allocation4 + $0x558] sm:$0xff] }
 0x21c   :  { %6661 = vmatpush1.bf16.msra.mxu1 %v6660_v59  ;;  %6725 = vmatpush1.bf16.msra.mxu0 %v6724_v60  ;;  %v1065_v59 = vld [vmem:[#allocation4 + $0x8b0] sm:$0xff]  ;;  %v1074_v60 = vld [vmem:[#allocation4 + $0x8f8] sm:$0xff] }
 0x21d   :  { %6663 = vmatprep.subr.bf16.mxu1 %v6662_v0  ;;  %6727 = vmatprep.subr.bf16.mxu0 %v6726_v1  ;;  %v6762_v63 = vpack.c.bf16 %v1074_v60, %v1065_v59  ;;  %v921_v0 = vld [vmem:[#allocation4 + $0x430] sm:$0xff]  ;;  %v930_v1 = vld [vmem:[#allocation4 + $0x478] sm:$0xff] }
 0x21e   :  { %v6764_v2 = vpack.c.bf16 %v930_v1, %v921_v0  ;;  %v1583_v59 = vld [vmem:[#allocation4 + $0x250] sm:$0xff]  ;;  %v1592_v60 = vld [vmem:[#allocation4 + $0x298] sm:$0xff]  ;;  %v1609_v0 = vld [vmem:[#allocation4 + $0x320] sm:$0xff] }
 0x21f   :  { %v1602_v1 = vld [vmem:[#allocation4 + $0x2e8] sm:$0xff] }
 0x220   :  { %6665 = vmatpush1.bf16.msra.mxu1 %v6664_v8  ;;  %6729 = vmatpush1.bf16.msra.mxu0 %v6728_v9  ;;  %v1509_v8 = vld [vmem:[#allocation4] sm:$0xff]  ;;  %v1518_v9 = vld [vmem:[#allocation4 + $0x48] sm:$0xff] }
 0x221   :  { %6667 = vmatprep.subr.bf16.mxu1 %v6666_v10  ;;  %6731 = vmatprep.subr.bf16.mxu0 %v6730_v11  ;;  %v6768_v10 = vpack.c.bf16 %v1518_v9, %v1509_v8  ;;  %v1511_v11 = vld [vmem:[#allocation4 + $0x10] sm:$0xff]  ;;  %v1601_v8 = vld [vmem:[#allocation4 + $0x2e0] sm:$0xff]  ;;  %v1610_v9 = vld [vmem:[#allocation4 + $0x328] sm:$0xff] }
 0x222   :  { %v6832_v13 = vpack.c.bf16 %v1520_v12, %v1511_v11  ;;  %v1627_v11 = vld [vmem:[#allocation4 + $0x3b0] sm:$0xff]  ;;  %v1620_v12 = vld [vmem:[#allocation4 + $0x378] sm:$0xff] }
 0x224   :  { %6669 = vmatpush1.bf16.msra.mxu1 %v6668_v19  ;;  %6733 = vmatpush1.bf16.msra.mxu0 %v6732_v20  ;;  %v1539_v19 = vld [vmem:[#allocation4 + $0xf0] sm:$0xff] }
 0x225   :  { %6735 = vmatprep.subr.bf16.mxu1 %v6734_v21  ;;  %6767 = vmatprep.subr.bf16.mxu0 %v6766_v6  ;;  %v1527_v20 = vld [vmem:[#allocation4 + $0x90] sm:$0xff]  ;;  %v1536_v21 = vld [vmem:[#allocation4 + $0xd8] sm:$0xff]  ;;  %v6834_v22 = vpack.c.bf16 %v1539_v19, %v1530_v18  ;;  %v6850_v6 = vpack.c.bf16 %v1611_v3, %v1602_v1  ;;  %v1626_v18 = vld [vmem:[#allocation4 + $0x3a8] sm:$0xff] }
 0x226   :  { %v6772_v23 = vpack.c.bf16 %v1536_v21, %v1527_v20  ;;  %v1619_v20 = vld [vmem:[#allocation4 + $0x370] sm:$0xff]  ;;  %v1628_v21 = vld [vmem:[#allocation4 + $0x3b8] sm:$0xff]  ;;  %v1701_v1 = vld [vmem:[#allocation4 + $0x600] sm:$0xff] }
 0x227   :  { %1292 = vmatmul.mubr.f32.vlgmr.msra.gmra.mrb[6].mxu1 %v9006_v15  ;;  %1363 = vmatmul.mubr.f32.vlgmr.msra.gmra.mrb[8].mxu0 %v9006_v15  ;;  %v1698_v3 = vld [vmem:[#allocation4 + $0x5e8] sm:$0xff] }
 0x228   :  { %6737 = vmatpush3.bf16.msra.mxu1 %v6736_v26  ;;  %1433 = vmatprep.mubr.f32.mxu1 %v9010_v54  ;;  %v867_v54 = vld [vmem:[#allocation4 + $0x280] sm:$0xff]  ;;  %v6836_v26 = vpack.c.bf16 %v1538_v25, %v1529_v24  ;;  %v1638_v25 = vld [vmem:[#allocation4 + $0x408] sm:$0xff] }
 0x229   :  { %6739 = vmatprep.subr.bf16.mxu1 %v6738_v50  ;;  %v6752_v46 = vpack.c.bf16 %v876_v43, %v867_v54  ;;  %6769 = vmatpush1.bf16.msra.mxu0 %v6768_v10  ;;  %v1546_v50 = vld [vmem:[#allocation4 + $0x128] sm:$0xff]  ;;  %v6842_v54 = vpack.c.bf16 %v1575_v41, %v1566_v39  ;;  %v1645_v24 = vld [vmem:[#allocation4 + $0x440] sm:$0xff] }
 0x22a   :  { %v6774_v29 = vpack.c.bf16 %v1555_v27, %v1546_v50  ;;  %v1618_v10 = vld [vmem:[#allocation4 + $0x368] sm:$0xff]  ;;  %v1647_v50 = vld [vmem:[#allocation4 + $0x450] sm:$0xff] }
 0x22b   :  { %v1635_v27 = vld [vmem:[#allocation4 + $0x3f0] sm:$0xff]  ;;  %v1662_v39 = vld [vmem:[#allocation4 + $0x4c8] sm:$0xff] }
 0x22c   :  { %6741 = vmatpush3.bf16.msra.mxu1 %v6740_v30  ;;  %v1545_v30 = vld [vmem:[#allocation4 + $0x120] sm:$0xff]  ;;  %v6796_v55 = vpack.c.bf16 %v1644_v28, %v1635_v27  ;;  %v1734_v28 = vld [vmem:[#allocation4 + $0x708] sm:$0xff] }
 0x22d   :  { %6743 = vmatprep.subr.bf16.mxu1 %v6742_v31  ;;  %v1554_v31 = vld [vmem:[#allocation4 + $0x168] sm:$0xff]  ;;  %v1725_v27 = vld [vmem:[#allocation4 + $0x6c0] sm:$0xff] }
 0x22e   :  { %v6776_v33 = vpack.c.bf16 %v1554_v31, %v1545_v30  ;;  %v1637_v30 = vld [vmem:[#allocation4 + $0x400] sm:$0xff]  ;;  %v1646_v31 = vld [vmem:[#allocation4 + $0x448] sm:$0xff] }
 0x230   :  { %6745 = vmatpush3.bf16.msra.mxu1 %v6744_v36  ;;  %v6840_v36 = vpack.c.bf16 %v1556_v35, %v1547_v34  ;;  %v1663_v34 = vld [vmem:[#allocation4 + $0x4d0] sm:$0xff]  ;;  %v1656_v35 = vld [vmem:[#allocation4 + $0x498] sm:$0xff] }
 0x231   :  { %6747 = vmatprep.subr.bf16.mxu1 %v6746_v37  ;;  %v1564_v37 = vld [vmem:[#allocation4 + $0x1b8] sm:$0xff] }
 0x232   :  { %v6778_v40 = vpack.c.bf16 %v1573_v38, %v1564_v37  ;;  %v1665_v37 = vld [vmem:[#allocation4 + $0x4e0] sm:$0xff] }
 0x233   :  { %v1653_v38 = vld [vmem:[#allocation4 + $0x480] sm:$0xff] }
 0x234   :  { %6749 = vmatpush3.bf16.msra.mxu1 %v6748_v58  ;;  %v1563_v58 = vld [vmem:[#allocation4 + $0x1b0] sm:$0xff]  ;;  %v6800_v41 = vpack.c.bf16 %v1662_v39, %v1653_v38 }
 0x235   :  { %6751 = vmatprep.subr.bf16.mxu1 %v6750_v42  ;;  %v1572_v42 = vld [vmem:[#allocation4 + $0x1f8] sm:$0xff]  ;;  %v1743_v39 = vld [vmem:[#allocation4 + $0x750] sm:$0xff] }
 0x236   :  { %v6780_v43 = vpack.c.bf16 %v1572_v42, %v1563_v58  ;;  %v1655_v58 = vld [vmem:[#allocation4 + $0x490] sm:$0xff]  ;;  %v1664_v42 = vld [vmem:[#allocation4 + $0x4d8] sm:$0xff] }
 0x238   :  { %6753 = vmatpush3.bf16.msra.mxu1 %v6752_v46  ;;  %v6844_v46 = vpack.c.bf16 %v1574_v45, %v1565_v44  ;;  %v1681_v44 = vld [vmem:[#allocation4 + $0x560] sm:$0xff]  ;;  %v1674_v45 = vld [vmem:[#allocation4 + $0x528] sm:$0xff] }
 0x239   :  { %6755 = vmatprep.subr.bf16.mxu1 %v6754_v47  ;;  %v1582_v47 = vld [vmem:[#allocation4 + $0x248] sm:$0xff] }
 0x23a   :  { %v6782_v51 = vpack.c.bf16 %v1591_v48, %v1582_v47  ;;  %v1683_v47 = vld [vmem:[#allocation4 + $0x570] sm:$0xff] }
 0x23b   :  { %v1671_v48 = vld [vmem:[#allocation4 + $0x510] sm:$0xff] }
 0x23c   :  { %6757 = vmatpush3.bf16.msra.mxu1 %v6756_v53  ;;  %v1581_v53 = vld [vmem:[#allocation4 + $0x240] sm:$0xff]  ;;  %v6804_v52 = vpack.c.bf16 %v1680_v49, %v1671_v48 }
 0x23d   :  { %6759 = vmatprep.subr.bf16.mxu1 %v6758_v61  ;;  %v1590_v61 = vld [vmem:[#allocation4 + $0x288] sm:$0xff]  ;;  %v1761_v48 = vld [vmem:[#allocation4 + $0x7e0] sm:$0xff] }
 0x23e   :  { %v6784_v57 = vpack.c.bf16 %v1590_v61, %v1581_v53  ;;  %v1673_v53 = vld [vmem:[#allocation4 + $0x520] sm:$0xff]  ;;  %v1682_v61 = vld [vmem:[#allocation4 + $0x568] sm:$0xff] }
 0x240   :  { %6761 = vmatpush3.bf16.msra.mxu1 %v6760_v62  ;;  %v6848_v62 = vpack.c.bf16 %v1592_v60, %v1583_v59  ;;  %v1699_v59 = vld [vmem:[#allocation4 + $0x5f0] sm:$0xff]  ;;  %v1692_v60 = vld [vmem:[#allocation4 + $0x5b8] sm:$0xff] }
 0x241   :  { %6763 = vmatprep.subr.bf16.mxu1 %v6762_v63  ;;  %v1600_v63 = vld [vmem:[#allocation4 + $0x2d8] sm:$0xff] }
 0x244   :  { %6765 = vmatpush3.bf16.msra.mxu1 %v6764_v2  ;;  %v6786_v2 = vpack.c.bf16 %v1609_v0, %v1600_v63 }
 0x245   :  { %6831 = vmatprep.subr.bf16.mxu1 %v6830_v16  ;;  %v6852_v16 = vpack.c.bf16 %v1610_v9, %v1601_v8  ;;  %v1691_v8 = vld [vmem:[#allocation4 + $0x5b0] sm:$0xff]  ;;  %v1700_v9 = vld [vmem:[#allocation4 + $0x5f8] sm:$0xff] }
 0x247   :  { %1434 = vmatmul.mubr.f32.vlgmr.msra.gmra.mrb[8].mxu1 %v9006_v15  ;;  %v6770_v15 = vpack.c.bf16 %v1537_v17, %v1528_v14  ;;  %v1629_v14 = vld [vmem:[#allocation4 + $0x3c0] sm:$0xff] }
 0x248   :  { %6833 = vmatpush1.bf16.msra.mxu1 %v6832_v13  ;;  %v6790_v13 = vpack.c.bf16 %v1627_v11, %v1618_v10  ;;  %v1617_v17 = vld [vmem:[#allocation4 + $0x360] sm:$0xff]  ;;  %v1708_v10 = vld [vmem:[#allocation4 + $0x638] sm:$0xff] }
 0x249   :  { %6771 = vmatprep.subr.bf16.mxu0 %v6770_v15  ;;  %6835 = vmatprep.subr.bf16.mxu1 %v6834_v22  ;;  %v6854_v15 = vpack.c.bf16 %v1629_v14, %v1620_v12  ;;  %v6792_v19 = vpack.c.bf16 %v1626_v18, %v1617_v17  ;;  %v6856_v22 = vpack.c.bf16 %v1628_v21, %v1619_v20  ;;  %v1717_v11 = vld [vmem:[#allocation4 + $0x680] sm:$0xff]  ;;  %v1719_v14 = vld [vmem:[#allocation4 + $0x690] sm:$0xff]  ;;  %v1718_v21 = vld [vmem:[#allocation4 + $0x688] sm:$0xff] }
 0x24a   :  { %6773 = vmatpush1.bf16.msra.mxu0 %v6772_v23  ;;  %v1636_v23 = vld [vmem:[#allocation4 + $0x3f8] sm:$0xff]  ;;  %v6810_v12 = vpack.c.bf16 %v1717_v11, %v1708_v10  ;;  %v1707_v18 = vld [vmem:[#allocation4 + $0x630] sm:$0xff]  ;;  %v1514_v10 = vld [vmem:[#allocation4 + $0x28] sm:$0xff] }
 0x24b   :  { %6775 = vmatprep.subr.bf16.mxu0 %v6774_v29  ;;  %v6858_v29 = vpack.c.bf16 %v1647_v50, %v1638_v25  ;;  %v1728_v25 = vld [vmem:[#allocation4 + $0x6d8] sm:$0xff]  ;;  %v1737_v50 = vld [vmem:[#allocation4 + $0x720] sm:$0xff]  ;;  %v1523_v11 = vld [vmem:[#allocation4 + $0x70] sm:$0xff] }
 0x24c   :  { %6837 = vmatpush1.bf16.msra.mxu1 %v6836_v26  ;;  %v6794_v26 = vpack.c.bf16 %v1645_v24, %v1636_v23  ;;  %v1726_v23 = vld [vmem:[#allocation4 + $0x6c8] sm:$0xff]  ;;  %v1735_v24 = vld [vmem:[#allocation4 + $0x710] sm:$0xff] }
 0x24d   :  { %6839 = vmatprep.subr.bf16.mxu1 %v6838_v32  ;;  %v6860_v32 = vpack.c.bf16 %v1646_v31, %v1637_v30  ;;  %v1727_v30 = vld [vmem:[#allocation4 + $0x6d0] sm:$0xff]  ;;  %v1736_v31 = vld [vmem:[#allocation4 + $0x718] sm:$0xff] }
 0x24e   :  { %6777 = vmatpush1.bf16.msra.mxu0 %v6776_v33  ;;  %v1654_v33 = vld [vmem:[#allocation4 + $0x488] sm:$0xff] }
 0x24f   :  { %6779 = vmatprep.subr.bf16.mxu0 %v6778_v40  ;;  %v6862_v40 = vpack.c.bf16 %v1665_v37, %v1656_v35  ;;  %v1746_v35 = vld [vmem:[#allocation4 + $0x768] sm:$0xff] }
 0x250   :  { %6841 = vmatpush1.bf16.msra.mxu1 %v6840_v36  ;;  %v6798_v36 = vpack.c.bf16 %v1663_v34, %v1654_v33  ;;  %v6880_v33 = vpack.c.bf16 %v1736_v31, %v1727_v30  ;;  %v1753_v34 = vld [vmem:[#allocation4 + $0x7a0] sm:$0xff] }
 0x251   :  { %6843 = vmatprep.subr.bf16.mxu1 %v6842_v54  ;;  %v6864_v54 = vpack.c.bf16 %v1664_v42, %v1655_v58  ;;  %v1754_v42 = vld [vmem:[#allocation4 + $0x7a8] sm:$0xff] }
 0x252   :  { %6781 = vmatpush1.bf16.msra.mxu0 %v6780_v43  ;;  %v1672_v43 = vld [vmem:[#allocation4 + $0x518] sm:$0xff] }
 0x253   :  { %6783 = vmatprep.subr.bf16.mxu0 %v6782_v51  ;;  %v6866_v51 = vpack.c.bf16 %v1683_v47, %v1674_v45  ;;  %v1773_v47 = vld [vmem:[#allocation4 + $0x840] sm:$0xff] }
 0x254   :  { %6845 = vmatpush1.bf16.msra.mxu1 %v6844_v46  ;;  %v6802_v46 = vpack.c.bf16 %v1681_v44, %v1672_v43  ;;  %v1771_v43 = vld [vmem:[#allocation4 + $0x830] sm:$0xff] }
 0x255   :  { %6847 = vmatprep.subr.bf16.mxu1 %v6846_v56  ;;  %v6868_v56 = vpack.c.bf16 %v1682_v61, %v1673_v53  ;;  %v1772_v53 = vld [vmem:[#allocation4 + $0x838] sm:$0xff] }
 0x256   :  { %6785 = vmatpush1.bf16.msra.mxu0 %v6784_v57  ;;  %v1690_v57 = vld [vmem:[#allocation4 + $0x5a8] sm:$0xff]  ;;  %v1780_v61 = vld [vmem:[#allocation4 + $0x878] sm:$0xff] }
 0x257   :  { %6787 = vmatprep.subr.bf16.mxu0 %v6786_v2  ;;  %v6806_v0 = vpack.c.bf16 %v1699_v59, %v1690_v57  ;;  %v1689_v2 = vld [vmem:[#allocation4 + $0x5a0] sm:$0xff]  ;;  %v1782_v57 = vld [vmem:[#allocation4 + $0x888] sm:$0xff] }
 0x258   :  { %6849 = vmatpush1.bf16.msra.mxu1 %v6848_v62 }
 0x259   :  { %6851 = vmatprep.subr.bf16.mxu1 %v6850_v6  ;;  %v6870_v6 = vpack.c.bf16 %v1701_v1, %v1692_v60  ;;  %v1791_v60 = vld [vmem:[#allocation4 + $0x8d0] sm:$0xff] }
 0x25a   :  { %6789 = vmatpush1.bf16.msra.mxu0 %v6788_v7  ;;  %v6808_v7 = vpack.c.bf16 %v1698_v3, %v1689_v2  ;;  %v1779_v2 = vld [vmem:[#allocation4 + $0x870] sm:$0xff]  ;;  %v1788_v3 = vld [vmem:[#allocation4 + $0x8b8] sm:$0xff] }
 0x25b   :  { %6791 = vmatprep.subr.bf16.mxu0 %v6790_v13  ;;  %v1710_v13 = vld [vmem:[#allocation4 + $0x648] sm:$0xff] }
 0x25c   :  { %6853 = vmatpush1.bf16.msra.mxu1 %v6852_v16  ;;  %v6872_v16 = vpack.c.bf16 %v1700_v9, %v1691_v8  ;;  %v6874_v17 = vpack.c.bf16 %v1719_v14, %v1710_v13  ;;  %v1790_v8 = vld [vmem:[#allocation4 + $0x8c8] sm:$0xff]  ;;  %v6828_v9 = vpack.c.bf16 %v1788_v3, %v1779_v2  ;;  %v6894_v13 = vpack.c.bf16 %v1523_v11, %v1514_v10  ;;  %v1525_v14 = vld [vmem:[#allocation4 + $0x80] sm:$0xff] }
 0x25d   :  { %6855 = vmatprep.subr.bf16.mxu1 %v6854_v15  ;;  %v1716_v15 = vld [vmem:[#allocation4 + $0x678] sm:$0xff] }
 0x25e   :  { %6793 = vmatpush1.bf16.msra.mxu0 %v6792_v19  ;;  %v1709_v19 = vld [vmem:[#allocation4 + $0x640] sm:$0xff]  ;;  %v6812_v20 = vpack.c.bf16 %v1716_v15, %v1707_v18  ;;  %v1076_v15 = vld [vmem:[#allocation8 + $0x48] sm:$0xff] }
 0x25f   :  { %6795 = vmatprep.subr.bf16.mxu0 %v6794_v26  ;;  %v6814_v26 = vpack.c.bf16 %v1735_v24, %v1726_v23  ;;  %v1077_v18 = vld [vmem:[#allocation8 + $0x50] sm:$0xff]  ;;  %v1078_v23 = vld [vmem:[#allocation8 + $0x58] sm:$0xff] }
 0x260   :  { %6857 = vmatpush1.bf16.msra.mxu1 %v6856_v22  ;;  %v6876_v22 = vpack.c.bf16 %v1718_v21, %v1709_v19 }
 0x261   :  { %6859 = vmatprep.subr.bf16.mxu1 %v6858_v29  ;;  %v6878_v29 = vpack.c.bf16 %v1737_v50, %v1728_v25 }
 0x262   :  { %6797 = vmatpush1.bf16.msra.mxu0 %v6796_v55  ;;  %v6816_v55 = vpack.c.bf16 %v1734_v28, %v1725_v27 }
 0x263   :  { %6799 = vmatprep.subr.bf16.mxu0 %v6798_v36  ;;  %v1755_v36 = vld [vmem:[#allocation4 + $0x7b0] sm:$0xff] }
 0x264   :  { %6861 = vmatpush1.bf16.msra.mxu1 %v6860_v32  ;;  %v1744_v32 = vld [vmem:[#allocation4 + $0x758] sm:$0xff]  ;;  %v6882_v38 = vpack.c.bf16 %v1755_v36, %v1746_v35 }
 0x265   :  { %6863 = vmatprep.subr.bf16.mxu1 %v6862_v40  ;;  %v6818_v37 = vpack.c.bf16 %v1753_v34, %v1744_v32  ;;  %v1752_v40 = vld [vmem:[#allocation4 + $0x798] sm:$0xff]  ;;  %v1081_v32 = vld [vmem:[#allocation8 + $0x70] sm:$0xff] }
 0x266   :  { %6801 = vmatpush1.bf16.msra.mxu0 %v6800_v41  ;;  %v1745_v41 = vld [vmem:[#allocation4 + $0x760] sm:$0xff]  ;;  %v6820_v58 = vpack.c.bf16 %v1752_v40, %v1743_v39  ;;  %v8806_v40 = vld [vmem:[#allocation10 + $0x8] sm:$0xff] }
 0x267   :  { %6803 = vmatprep.subr.bf16.mxu0 %v6802_v46  ;;  %v6884_v44 = vpack.c.bf16 %v1754_v42, %v1745_v41  ;;  %v1764_v46 = vld [vmem:[#allocation4 + $0x7f8] sm:$0xff] }
 0x268   :  { %6865 = vmatpush1.bf16.msra.mxu1 %v6864_v54  ;;  %v1762_v54 = vld [vmem:[#allocation4 + $0x7e8] sm:$0xff]  ;;  %v6886_v49 = vpack.c.bf16 %v1773_v47, %v1764_v46 }
 0x269   :  { %6867 = vmatprep.subr.bf16.mxu1 %v6866_v51  ;;  %v6822_v45 = vpack.c.bf16 %v1771_v43, %v1762_v54  ;;  %v1770_v51 = vld [vmem:[#allocation4 + $0x828] sm:$0xff]  ;;  %v1079_v54 = vld [vmem:[#allocation8 + $0x60] sm:$0xff] }
 0x26a   :  { %6805 = vmatpush1.bf16.msra.mxu0 %v6804_v52  ;;  %v1763_v52 = vld [vmem:[#allocation4 + $0x7f0] sm:$0xff]  ;;  %v6824_v59 = vpack.c.bf16 %v1770_v51, %v1761_v48  ;;  %v1082_v47 = vld [vmem:[#allocation8 + $0x78] sm:$0xff] }
 0x26b   :  { %6807 = vmatprep.subr.bf16.mxu0 %v6806_v0  ;;  %v6888_v0 = vpack.c.bf16 %v1772_v53, %v1763_v52 }
 0x26c   :  { %6869 = vmatpush1.bf16.msra.mxu1 %v6868_v56  ;;  %v1789_v56 = vld [vmem:[#allocation4 + $0x8c0] sm:$0xff] }
 0x26d   :  { %6871 = vmatprep.subr.bf16.mxu1 %v6870_v6  ;;  %v6826_v1 = vpack.c.bf16 %v1789_v56, %v1780_v61  ;;  %v6890_v6 = vpack.c.bf16 %v1791_v60, %v1782_v57 }
 0x26e   :  { %6809 = vmatpush1.bf16.msra.mxu0 %v6808_v7  ;;  %v1781_v7 = vld [vmem:[#allocation4 + $0x880] sm:$0xff] }
 0x26f   :  { %6811 = vmatprep.subr.bf16.mxu0 %v6810_v12  ;;  %v1516_v12 = vld [vmem:[#allocation4 + $0x38] sm:$0xff] }
 0x270   :  { %6873 = vmatpush1.bf16.msra.mxu1 %v6872_v16  ;;  %v6892_v16 = vpack.c.bf16 %v1790_v8, %v1781_v7 }
 0x271   :  { %6875 = vmatprep.subr.bf16.mxu1 %v6874_v17  ;;  %v6958_v17 = vpack.c.bf16 %v1525_v14, %v1516_v12 }
 0x272   :  { %6813 = vmatpush1.bf16.msra.mxu0 %v6812_v20 }
 0x273   :  { %6815 = vmatprep.subr.bf16.mxu0 %v6814_v26 }
 0x274   :  { %6877 = vmatpush1.bf16.msra.mxu1 %v6876_v22 }
 0x275   :  { %6879 = vmatprep.subr.bf16.mxu1 %v6878_v29  ;;  %v1083_v29 = vld [vmem:[#allocation8 + $0x80] sm:$0xff] }
 0x276   :  { %6817 = vmatpush1.bf16.msra.mxu0 %v6816_v55 }
 0x277   :  { %6819 = vmatprep.subr.bf16.mxu0 %v6818_v37 }
 0x278   :  { %6881 = vmatpush1.bf16.msra.mxu1 %v6880_v33  ;;  %v1080_v33 = vld [vmem:[#allocation8 + $0x68] sm:$0xff] }
 0x279   :  { %6883 = vmatprep.subr.bf16.mxu1 %v6882_v38 }
 0x27a   :  { %6821 = vmatpush1.bf16.msra.mxu0 %v6820_v58 }
 0x27b   :  { %6823 = vmatprep.subr.bf16.mxu0 %v6822_v45 }
 0x27c   :  { %6885 = vmatpush1.bf16.msra.mxu1 %v6884_v44 }
 0x27d   :  { %6887 = vmatprep.subr.bf16.mxu1 %v6886_v49 }
 0x27e   :  { %6825 = vmatpush1.bf16.msra.mxu0 %v6824_v59 }
 0x27f   :  { %6827 = vmatprep.subr.bf16.mxu0 %v6826_v1 }
 0x280   :  { %6889 = vmatpush1.bf16.msra.mxu1 %v6888_v0  ;;  %v1084_v0 = vld [vmem:[#allocation8 + $0x88] sm:$0xff] }
 0x281   :  { %6891 = vmatprep.subr.bf16.mxu1 %v6890_v6 }
 0x282   :  { %6829 = vmatpush1.bf16.msra.mxu0 %v6828_v9 }
 0x283   :  { %6895 = vmatprep.subr.bf16.mxu0 %v6894_v13 }
 0x284   :  { %6893 = vmatpush1.bf16.msra.mxu1 %v6892_v16 }
 0x285   :  { %6959 = vmatprep.subr.bf16.mxu1 %v6958_v17 }
 0x2ba   :  { %v9022_v62 = vpop.f32.mrb[4].mxu1  ;;  %v9024_v63 = vpop.f32.mrb[6].mxu0 }
 0x2bb   :  { %v9026_v4 = vpop.f32.mrb[5].mxu1  ;;  %v9028_v5 = vpop.f32.mrb[7].mxu0  ;;  %v1152_v20 = vadd.f32 %v9022_v62, %v1076_v15  ;;  %v1223_v24 = vadd.f32 %v9024_v63, %v1078_v23 }
 0x2bc   :  { %v1154_v19 = vadd.f32 %v9026_v4, %v1077_v18  ;;  %v1225_v45 = vadd.f32 %v9028_v5, %v1079_v54 }
 0x2bd   :  { %v5861_v22 = vmul.f32 -1.442695, %v1152_v20  ;;  %v5863_v50 = vmul.f32 -1.442695, %v1223_v24 }
 0x2be   :  { %v5862_v21 = vmul.f32 -1.442695, %v1154_v19  ;;  %v5864_v46 = vmul.f32 -1.442695, %v1225_v45 }
 0x2c0   :  { %8542 = vpow2.f32 %v5862_v21 }
 0x2c1   :  { %8544 = vpow2.f32 %v5861_v22 }
 0x2c2   :  { %8546 = vpow2.f32 %v5863_v50  ;;  %v1522_v50 = vld [vmem:[#allocation4 + $0x68] sm:$0xff] }
 0x2ca   :  { %v8543_v25 = vpop.eup %8542 }
 0x2cb   :  { %v8545_v26 = vpop.eup %8544  ;;  %v1461_v27 = vadd.f32 1.0, %v8543_v25 }
 0x2cc   :  { %v1460_v28 = vadd.f32 1.0, %v8545_v26  ;;  %v8547_v34 = vpop.eup %8546  ;;  %v1513_v26 = vld [vmem:[#allocation4 + $0x20] sm:$0xff] }
 0x2cd   :  { %8548 = vrcp.f32 %v1461_v27  ;;  %v1462_v39 = vadd.f32 1.0, %v8547_v34  ;;  %v1515_v27 = vld [vmem:[#allocation4 + $0x30] sm:$0xff] }
 0x2ce   :  { %8550 = vrcp.f32 %v1460_v28  ;;  %v1524_v28 = vld [vmem:[#allocation4 + $0x78] sm:$0xff]  ;;  %v1531_v34 = vld [vmem:[#allocation4 + $0xb0] sm:$0xff] }
 0x2d7   :  { %v8549_v63 = vpop.eup %8548 }
 0x2d8   :  { %v8551_v37 = vpop.eup %8550  ;;  %v1483_v41 = vmul.f32 %v8806_v40, %v8549_v63  ;;  %v1533_v63 = vld [vmem:[#allocation4 + $0xc0] sm:$0xff] }
 0x2fa   :  { %v1293_v55 = vpop.f32.mrb[6].mxu1  ;;  %v1364_v30 = vpop.f32.mrb[8].mxu0 }
 0x2fb   :  { %v1295_v31 = vpop.f32.mrb[7].mxu1  ;;  %v1366_v4 = vpop.f32.mrb[9].mxu0  ;;  %v1294_v36 = vadd.f32 %v1293_v55, %v1080_v33  ;;  %v1365_v48 = vadd.f32 %v1364_v30, %v1082_v47  ;;  %v1541_v30 = vld [vmem:[#allocation4 + $0x100] sm:$0xff]  ;;  %v6960_v33 = vpack.c.bf16 %v1524_v28, %v1515_v27  ;;  %v1551_v47 = vld [vmem:[#allocation4 + $0x150] sm:$0xff]  ;;  %v1614_v27 = vld [vmem:[#allocation4 + $0x348] sm:$0xff] }
 0x2fc   :  { %v1367_v62 = vadd.f32 %v1366_v4, %v1083_v29  ;;  %v1296_v35 = vadd.f32 %v1295_v31, %v1081_v32  ;;  %v1532_v29 = vld [vmem:[#allocation4 + $0xb8] sm:$0xff]  ;;  %v1534_v31 = vld [vmem:[#allocation4 + $0xc8] sm:$0xff]  ;;  %v1543_v4 = vld [vmem:[#allocation4 + $0x110] sm:$0xff]  ;;  %v6896_v32 = vpack.c.bf16 %v1522_v50, %v1513_v26 }
 0x2fd   :  { %v5865_v43 = vmul.f32 -1.442695, %v1294_v36  ;;  %v5867_v61 = vmul.f32 -1.442695, %v1365_v48  ;;  %v1542_v36 = vld [vmem:[#allocation4 + $0x108] sm:$0xff]  ;;  %v1560_v48 = vld [vmem:[#allocation4 + $0x198] sm:$0xff] }
 0x2fe   :  { %8552 = vtanh.f32 %v1367_v62  ;;  %v5866_v58 = vmul.f32 -1.442695, %v1296_v35  ;;  %v1540_v35 = vld [vmem:[#allocation4 + $0xf8] sm:$0xff]  ;;  %v6964_v54 = vpack.c.bf16 %v1542_v36, %v1533_v63  ;;  %v1605_v50 = vld [vmem:[#allocation4 + $0x300] sm:$0xff]  ;;  %v1622_v28 = vld [vmem:[#allocation4 + $0x388] sm:$0xff] }
 0x2ff   :  { %8554 = vrcp.f32 %v1462_v39  ;;  %v6962_v39 = vpack.c.bf16 %v1543_v4, %v1534_v31  ;;  %v6980_v4 = vpack.c.bf16 %v1614_v27, %v1605_v50  ;;  %v1623_v63 = vld [vmem:[#allocation4 + $0x390] sm:$0xff]  ;;  %v1632_v36 = vld [vmem:[#allocation4 + $0x3d8] sm:$0xff]  ;;  %v1721_v27 = vld [vmem:[#allocation4 + $0x6a0] sm:$0xff] }
 0x300   :  { %8556 = vpow2.f32 %v5866_v58  ;;  %v1561_v58 = vld [vmem:[#allocation4 + $0x1a0] sm:$0xff]  ;;  %v1712_v50 = vld [vmem:[#allocation4 + $0x658] sm:$0xff] }
 0x301   :  { %8558 = vpow2.f32 %v5865_v43  ;;  %v1549_v43 = vld [vmem:[#allocation4 + $0x140] sm:$0xff] }
 0x308   :  { %v8553_v38 = vpop.eup %8552 }
 0x309   :  { %v1484_v42 = vmul.f32 %v8553_v38, %v8551_v37  ;;  %v8555_v49 = vpop.eup %8554  ;;  %v1550_v37 = vld [vmem:[#allocation4 + $0x148] sm:$0xff]  ;;  %v6898_v38 = vpack.c.bf16 %v1541_v30, %v1532_v29  ;;  %v1631_v29 = vld [vmem:[#allocation4 + $0x3d0] sm:$0xff]  ;;  %v1633_v30 = vld [vmem:[#allocation4 + $0x3e0] sm:$0xff] }
 0x30a   :  { %v8557_v51 = vpop.eup %8556 }
 0x30b   :  { %v1485_v44 = vadd.f32 %v1484_v42, %v1483_v41  ;;  %v8559_v52 = vpop.eup %8558  ;;  %v1465_v56 = vadd.f32 1.0, %v8557_v51  ;;  %v1552_v41 = vld [vmem:[#allocation4 + $0x158] sm:$0xff]  ;;  %v6900_v42 = vpack.c.bf16 %v1540_v35, %v1531_v34  ;;  %v1577_v51 = vld [vmem:[#allocation4 + $0x220] sm:$0xff]  ;;  %v6918_v34 = vpack.c.bf16 %v1631_v29, %v1622_v28  ;;  %v1714_v28 = vld [vmem:[#allocation4 + $0x668] sm:$0xff] }
 0x30c   :  { %v1464_v60 = vadd.f32 1.0, %v8559_v52  ;;  %v1570_v52 = vld [vmem:[#allocation4 + $0x1e8] sm:$0xff]  ;;  %v1723_v29 = vld [vmem:[#allocation4 + $0x6b0] sm:$0xff] }
 0x30d   :  { %8560 = vtanh.f32 %v1485_v44 }
 0x30e   :  { %8562 = vpow2.f32 %v5864_v46  ;;  %v6966_v46 = vpack.c.bf16 %v1561_v58, %v1552_v41  ;;  %v6984_v58 = vpack.c.bf16 %v1632_v36, %v1623_v63  ;;  %v1730_v63 = vld [vmem:[#allocation4 + $0x6e8] sm:$0xff]  ;;  %v1739_v36 = vld [vmem:[#allocation4 + $0x730] sm:$0xff] }
 0x30f   :  { %8564 = vpow2.f32 %v5867_v61 }
 0x310   :  { %8566 = vrcp.f32 %v1465_v56  ;;  %v6968_v56 = vpack.c.bf16 %v1560_v48, %v1551_v47  ;;  %v1658_v47 = vld [vmem:[#allocation4 + $0x4a8] sm:$0xff]  ;;  %v1667_v48 = vld [vmem:[#allocation4 + $0x4f0] sm:$0xff] }
 0x311   :  { %8568 = vrcp.f32 %v1464_v60 }
 0x317   :  { %v8561_v53 = vpop.eup %8560 }
 0x318   :  { %v1490_v57 = vmul.f32 %v8561_v53, %v8555_v49  ;;  %v8563_v3 = vpop.eup %8562  ;;  %v1568_v49 = vld [vmem:[#allocation4 + $0x1d8] sm:$0xff]  ;;  %v1579_v53 = vld [vmem:[#allocation4 + $0x230] sm:$0xff] }
 0x319   :  { %v1463_v6 = vadd.f32 1.0, %v8563_v3  ;;  %v8565_v7 = vpop.eup %8564  ;;  %v6906_v60 = vpack.c.bf16 %v1577_v51, %v1568_v49  ;;  %v1595_v3 = vld [vmem:[#allocation4 + $0x2b0] sm:$0xff]  ;;  %v1660_v49 = vld [vmem:[#allocation4 + $0x4b8] sm:$0xff]  ;;  %v1669_v51 = vld [vmem:[#allocation4 + $0x500] sm:$0xff] }
 0x31a   :  { %v5977_v59 = vpop.f32.mrb[8].mxu1  ;;  %v8567_v8 = vpop.eup %8566  ;;  %v1466_v10 = vadd.f32 1.0, %v8565_v7  ;;  %v1597_v7 = vld [vmem:[#allocation4 + $0x2c0] sm:$0xff] }
 0x31b   :  { %v5978_v1 = vpop.f32.mrb[9].mxu1  ;;  %v8569_v9 = vpop.eup %8568  ;;  %v1486_v11 = vmul.f32 %v8806_v40, %v8567_v8  ;;  %v1559_v40 = vld [vmem:[#allocation4 + $0x190] sm:$0xff] }
 0x31c   :  { %v5979_v2 = vadd.f32 %v5978_v1, %v5977_v59  ;;  %v6902_v45 = vpack.c.bf16 %v1559_v40, %v1550_v37  ;;  %v1576_v59 = vld [vmem:[#allocation4 + $0x218] sm:$0xff]  ;;  %v1569_v1 = vld [vmem:[#allocation4 + $0x1e0] sm:$0xff]  ;;  %v1651_v40 = vld [vmem:[#allocation4 + $0x470] sm:$0xff] }
 0x31d   :  { %v1640_v37 = vld [vmem:[#allocation4 + $0x418] sm:$0xff] }
 0x31e   :  { %v1436_v5 = vadd.f32 %v5979_v2, %v1084_v0  ;;  %v6970_v0 = vpack.c.bf16 %v1579_v53, %v1570_v52  ;;  %v1578_v2 = vld [vmem:[#allocation4 + $0x228] sm:$0xff] }
 0x320   :  { %8570 = vtanh.f32 %v1436_v5  ;;  %v1586_v5 = vld [vmem:[#allocation4 + $0x268] sm:$0xff] }
 0x321   :  { %8572 = vrcp.f32 %v1463_v6  ;;  %v1588_v6 = vld [vmem:[#allocation4 + $0x278] sm:$0xff] }
 0x322   :  { %8574 = vrcp.f32 %v1466_v10  ;;  %v1594_v10 = vld [vmem:[#allocation4 + $0x2a8] sm:$0xff] }
 0x32a   :  { %v8571_v16 = vpop.eup %8570 }
 0x32b   :  { %v1487_v12 = vmul.f32 %v8571_v16, %v8569_v9  ;;  %v8573_v17 = vpop.eup %8572  ;;  %v6972_v9 = vpack.c.bf16 %v1578_v2, %v1569_v1  ;;  %v1585_v16 = vld [vmem:[#allocation4 + $0x260] sm:$0xff]  ;;  %v1676_v1 = vld [vmem:[#allocation4 + $0x538] sm:$0xff] }
 0x32c   :  { %v8575_v19 = vpop.eup %8574  ;;  %v1685_v2 = vld [vmem:[#allocation4 + $0x580] sm:$0xff] }
 0x32d   :  { %v1488_v13 = vadd.f32 %v1487_v12, %v1486_v11  ;;  %v6910_v11 = vpack.c.bf16 %v1595_v3, %v1586_v5  ;;  %v6974_v12 = vpack.c.bf16 %v1597_v7, %v1588_v6  ;;  %v1678_v5 = vld [vmem:[#allocation4 + $0x548] sm:$0xff]  ;;  %v1687_v3 = vld [vmem:[#allocation4 + $0x590] sm:$0xff] }
 0x32f   :  { %8576 = vtanh.f32 %v1488_v13  ;;  %v1493_v14 = vsub.f32 %v1485_v44, %v1488_v13  ;;  %v1558_v44 = vld [vmem:[#allocation4 + $0x188] sm:$0xff] }
 0x330   :  { %v6904_v61 = vpack.c.bf16 %v1558_v44, %v1549_v43 }
 0x331   :  { %v1494_v18 = vmul.f32 %v8573_v17, %v1493_v14  ;;  %v1596_v14 = vld [vmem:[#allocation4 + $0x2b8] sm:$0xff] }
 0x333   :  { %v1495_v15 = vadd.f32 %v1494_v18, %v1488_v13  ;;  %v1587_v13 = vld [vmem:[#allocation4 + $0x270] sm:$0xff]  ;;  %v1613_v18 = vld [vmem:[#allocation4 + $0x340] sm:$0xff] }
 0x335   :  { %1503 = vst [vmem:[#allocation10 + $0x18] sm:$0xff] %v1495_v15  ;;  %v1606_v15 = vld [vmem:[#allocation4 + $0x308] sm:$0xff] }
 0x339   :  { %v8577_v20 = vpop.eup %8576 }
 0x33a   :  { %v1492_v21 = vmul.f32 %v8577_v20, %v8575_v19  ;;  %v1615_v19 = vld [vmem:[#allocation4 + $0x350] sm:$0xff]  ;;  %v6912_v20 = vpack.c.bf16 %v1594_v10, %v1585_v16  ;;  %v6930_v16 = vpack.c.bf16 %v1685_v2, %v1676_v1  ;;  %v6994_v10 = vpack.c.bf16 %v1687_v3, %v1678_v5  ;;  %v1768_v1 = vld [vmem:[#allocation4 + $0x818] sm:$0xff]  ;;  %v1777_v2 = vld [vmem:[#allocation4 + $0x860] sm:$0xff] }
 0x33b   :  { %v6978_v26 = vpack.c.bf16 %v1615_v19, %v1606_v15 }
 0x33c   :  { %v1496_v22 = vsub.f32 %v1490_v57, %v1492_v21  ;;  %v1567_v57 = vld [vmem:[#allocation4 + $0x1d0] sm:$0xff] }
 0x33d   :  { %v6908_v8 = vpack.c.bf16 %v1576_v59, %v1567_v57  ;;  %v6926_v57 = vpack.c.bf16 %v1667_v48, %v1658_v47  ;;  %v6990_v59 = vpack.c.bf16 %v1669_v51, %v1660_v49  ;;  %v1750_v47 = vld [vmem:[#allocation4 + $0x788] sm:$0xff]  ;;  %v1759_v48 = vld [vmem:[#allocation4 + $0x7d0] sm:$0xff] }
 0x33e   :  { %v1497_v23 = vmul.f32 %v8573_v17, %v1496_v22  ;;  %v1604_v17 = vld [vmem:[#allocation4 + $0x2f8] sm:$0xff]  ;;  %v1603_v22 = vld [vmem:[#allocation4 + $0x2f0] sm:$0xff] }
 0x340   :  { %v9034_v24 = vadd.f32 %v1497_v23, %v1492_v21  ;;  %v6976_v21 = vpack.c.bf16 %v1596_v14, %v1587_v13  ;;  %v1612_v23 = vld [vmem:[#allocation4 + $0x338] sm:$0xff]  ;;  %v1694_v13 = vld [vmem:[#allocation4 + $0x5c8] sm:$0xff]  ;;  %v1703_v14 = vld [vmem:[#allocation4 + $0x610] sm:$0xff] }
 0x341   :  { %v6916_v31 = vpack.c.bf16 %v1612_v23, %v1603_v22  ;;  %v6934_v22 = vpack.c.bf16 %v1703_v14, %v1694_v13  ;;  %v1786_v13 = vld [vmem:[#allocation4 + $0x8a8] sm:$0xff]  ;;  %v1795_v14 = vld [vmem:[#allocation4 + $0x8f0] sm:$0xff] }
 0x342   :  { %1502 = vst [vmem:[#allocation10 + $0x10] sm:$0xff] %v9034_v24  ;;  %v1506_v25 = vadd.f32 1e-06, %v9034_v24 }
 0x344   :  { %8578 = vlog2.f32 %v1506_v25  ;;  %v6914_v25 = vpack.c.bf16 %v1613_v18, %v1604_v17  ;;  %v1696_v17 = vld [vmem:[#allocation4 + $0x5d8] sm:$0xff]  ;;  %v1705_v18 = vld [vmem:[#allocation4 + $0x620] sm:$0xff] }
 0x345   :  { %v6998_v23 = vpack.c.bf16 %v1705_v18, %v1696_v17 }
 0x34e   :  { %v8579_v55 = vpop.eup %8578 }
 0x34f   :  { %v9038_v62 = vmul.f32 0.6931472, %v8579_v55  ;;  %v1624_v55 = vld [vmem:[#allocation4 + $0x398] sm:$0xff] }
 0x350   :  { %v6982_v35 = vpack.c.bf16 %v1633_v30, %v1624_v55 }
 0x351   :  { %1871 = vmatprep.mubr.f32.mxu0 %v9038_v62  ;;  %1942 = vmatprep.mubr.f32.mxu1 %v9038_v62 }
 0x352   :  { %1872 = vmatmul.mubr.f32.vlgmr.msra.gmra.mrb[10].mxu0 %v9034_v24  ;;  %1943 = vmatmul.mubr.f32.vlgmr.msra.gmra.mrb[10].mxu1 %v9034_v24 }
 0x353   :  { %6897 = vmatpush1.bf16.msra.mxu0 %v6896_v32  ;;  %6961 = vmatpush1.bf16.msra.mxu1 %v6960_v33  ;;  %v1621_v32 = vld [vmem:[#allocation4 + $0x380] sm:$0xff]  ;;  %v1630_v33 = vld [vmem:[#allocation4 + $0x3c8] sm:$0xff] }
 0x354   :  { %2013 = vmatprep.mubr.f32.mxu0 %v9038_v62  ;;  %2084 = vmatprep.mubr.f32.mxu1 %v9038_v62  ;;  %v6920_v41 = vpack.c.bf16 %v1630_v33, %v1621_v32  ;;  %v6938_v32 = vpack.c.bf16 %v1721_v27, %v1712_v50  ;;  %v7002_v33 = vpack.c.bf16 %v1723_v29, %v1714_v28  ;;  %v1517_v29 = vld [vmem:[#allocation4 + $0x40] sm:$0xff] }
 0x355   :  { %6899 = vmatprep.subr.bf16.mxu0 %v6898_v38  ;;  %6963 = vmatprep.subr.bf16.mxu1 %v6962_v39  ;;  %v1649_v38 = vld [vmem:[#allocation4 + $0x460] sm:$0xff]  ;;  %v1642_v39 = vld [vmem:[#allocation4 + $0x428] sm:$0xff] }
 0x356   :  { %v6922_v43 = vpack.c.bf16 %v1649_v38, %v1640_v37  ;;  %v6986_v44 = vpack.c.bf16 %v1651_v40, %v1642_v39  ;;  %v1732_v37 = vld [vmem:[#allocation4 + $0x6f8] sm:$0xff]  ;;  %v1741_v38 = vld [vmem:[#allocation4 + $0x740] sm:$0xff] }
 0x357   :  { %6901 = vmatpush1.bf16.msra.mxu0 %v6900_v42  ;;  %6965 = vmatpush1.bf16.msra.mxu1 %v6964_v54  ;;  %v1639_v42 = vld [vmem:[#allocation4 + $0x410] sm:$0xff]  ;;  %v1648_v54 = vld [vmem:[#allocation4 + $0x458] sm:$0xff] }
 0x358   :  { %6903 = vmatprep.subr.bf16.mxu0 %v6902_v45  ;;  %6967 = vmatprep.subr.bf16.mxu1 %v6966_v46  ;;  %v1641_v45 = vld [vmem:[#allocation4 + $0x420] sm:$0xff]  ;;  %v1650_v46 = vld [vmem:[#allocation4 + $0x468] sm:$0xff]  ;;  %v6924_v52 = vpack.c.bf16 %v1648_v54, %v1639_v42  ;;  %v6942_v42 = vpack.c.bf16 %v1739_v36, %v1730_v63  ;;  %v7006_v54 = vpack.c.bf16 %v1741_v38, %v1732_v37 }
 0x359   :  { %v6988_v53 = vpack.c.bf16 %v1650_v46, %v1641_v45  ;;  %v1748_v45 = vld [vmem:[#allocation4 + $0x778] sm:$0xff]  ;;  %v1757_v46 = vld [vmem:[#allocation4 + $0x7c0] sm:$0xff]  ;;  %v1706_v63 = vld [vmem:[#allocation4 + $0x628] sm:$0xff] }
 0x35a   :  { %v1553_v38 = vld [vmem:[#allocation4 + $0x160] sm:$0xff] }
 0x35b   :  { %6905 = vmatpush1.bf16.msra.mxu0 %v6904_v61  ;;  %6969 = vmatpush1.bf16.msra.mxu1 %v6968_v56  ;;  %v1657_v61 = vld [vmem:[#allocation4 + $0x4a0] sm:$0xff]  ;;  %v1666_v56 = vld [vmem:[#allocation4 + $0x4e8] sm:$0xff] }
 0x35c   :  { %6907 = vmatprep.subr.bf16.mxu0 %v6906_v60  ;;  %6971 = vmatprep.subr.bf16.mxu1 %v6970_v0  ;;  %v1659_v60 = vld [vmem:[#allocation4 + $0x4b0] sm:$0xff]  ;;  %v1668_v0 = vld [vmem:[#allocation4 + $0x4f8] sm:$0xff]  ;;  %v6928_v6 = vpack.c.bf16 %v1666_v56, %v1657_v61  ;;  %v6946_v61 = vpack.c.bf16 %v1757_v46, %v1748_v45  ;;  %v7010_v56 = vpack.c.bf16 %v1759_v48, %v1750_v47  ;;  %v1742_v45 = vld [vmem:[#allocation4 + $0x748] sm:$0xff] }
 0x35d   :  { %v6992_v7 = vpack.c.bf16 %v1668_v0, %v1659_v60  ;;  %v1766_v60 = vld [vmem:[#allocation4 + $0x808] sm:$0xff]  ;;  %v1775_v0 = vld [vmem:[#allocation4 + $0x850] sm:$0xff] }
 0x35e   :  { %v1598_v48 = vld [vmem:[#allocation4 + $0x2c8] sm:$0xff] }
 0x35f   :  { %6909 = vmatpush1.bf16.msra.mxu0 %v6908_v8  ;;  %6973 = vmatpush1.bf16.msra.mxu1 %v6972_v9  ;;  %v1675_v8 = vld [vmem:[#allocation4 + $0x530] sm:$0xff]  ;;  %v1684_v9 = vld [vmem:[#allocation4 + $0x578] sm:$0xff] }
 0x360   :  { %6911 = vmatprep.subr.bf16.mxu0 %v6910_v11  ;;  %6975 = vmatprep.subr.bf16.mxu1 %v6974_v12  ;;  %v1677_v11 = vld [vmem:[#allocation4 + $0x540] sm:$0xff]  ;;  %v1686_v12 = vld [vmem:[#allocation4 + $0x588] sm:$0xff]  ;;  %v6932_v15 = vpack.c.bf16 %v1684_v9, %v1675_v8  ;;  %v6950_v8 = vpack.c.bf16 %v1775_v0, %v1766_v60  ;;  %v7014_v9 = vpack.c.bf16 %v1777_v2, %v1768_v1 }
 0x361   :  { %v6996_v19 = vpack.c.bf16 %v1686_v12, %v1677_v11  ;;  %v1784_v11 = vld [vmem:[#allocation4 + $0x898] sm:$0xff]  ;;  %v1793_v12 = vld [vmem:[#allocation4 + $0x8e0] sm:$0xff]  ;;  %v1634_v2 = vld [vmem:[#allocation4 + $0x3e8] sm:$0xff] }
 0x362   :  { %v1625_v1 = vld [vmem:[#allocation4 + $0x3a0] sm:$0xff] }
 0x363   :  { %6913 = vmatpush1.bf16.msra.mxu0 %v6912_v20  ;;  %6977 = vmatpush1.bf16.msra.mxu1 %v6976_v21  ;;  %v1693_v20 = vld [vmem:[#allocation4 + $0x5c0] sm:$0xff]  ;;  %v1702_v21 = vld [vmem:[#allocation4 + $0x608] sm:$0xff] }
 0x364   :  { %6915 = vmatprep.subr.bf16.mxu0 %v6914_v25  ;;  %6979 = vmatprep.subr.bf16.mxu1 %v6978_v26  ;;  %v1695_v25 = vld [vmem:[#allocation4 + $0x5d0] sm:$0xff]  ;;  %v1704_v26 = vld [vmem:[#allocation4 + $0x618] sm:$0xff]  ;;  %v6936_v55 = vpack.c.bf16 %v1702_v21, %v1693_v20  ;;  %v7018_v20 = vpack.c.bf16 %v1795_v14, %v1786_v13  ;;  %v2243_v14 = vld [vmem:[#allocation4 + $0x60] sm:$0xff] }
 0x365   :  { %v7000_v30 = vpack.c.bf16 %v1704_v26, %v1695_v25  ;;  %v1792_v21 = vld [vmem:[#allocation4 + $0x8d8] sm:$0xff]  ;;  %v1661_v25 = vld [vmem:[#allocation4 + $0x4c0] sm:$0xff]  ;;  %v1670_v26 = vld [vmem:[#allocation4 + $0x508] sm:$0xff] }
 0x366   :  { %v7022_v28 = vpack.c.bf16 %v1670_v26, %v1661_v25  ;;  %v2259_v25 = vld [vmem:[#allocation4 + $0xe0] sm:$0xff]  ;;  %v2252_v26 = vld [vmem:[#allocation4 + $0xa8] sm:$0xff] }
 0x367   :  { %6917 = vmatpush1.bf16.msra.mxu0 %v6916_v31  ;;  %6981 = vmatpush1.bf16.msra.mxu1 %v6980_v4  ;;  %v1711_v31 = vld [vmem:[#allocation4 + $0x650] sm:$0xff]  ;;  %v1720_v4 = vld [vmem:[#allocation4 + $0x698] sm:$0xff] }
 0x368   :  { %6919 = vmatprep.subr.bf16.mxu0 %v6918_v34  ;;  %6983 = vmatprep.subr.bf16.mxu1 %v6982_v35  ;;  %v1713_v34 = vld [vmem:[#allocation4 + $0x660] sm:$0xff]  ;;  %v1722_v35 = vld [vmem:[#allocation4 + $0x6a8] sm:$0xff]  ;;  %v6940_v39 = vpack.c.bf16 %v1720_v4, %v1711_v31  ;;  %v1688_v31 = vld [vmem:[#allocation4 + $0x598] sm:$0xff] }
 0x369   :  { %v7004_v40 = vpack.c.bf16 %v1722_v35, %v1713_v34  ;;  %v1544_v34 = vld [vmem:[#allocation4 + $0x118] sm:$0xff]  ;;  %v1697_v35 = vld [vmem:[#allocation4 + $0x5e0] sm:$0xff] }
 0x36a   :  { %v7030_v37 = vpack.c.bf16 %v1706_v63, %v1697_v35  ;;  %v2279_v63 = vld [vmem:[#allocation4 + $0x180] sm:$0xff] }
 0x36b   :  { %6921 = vmatpush1.bf16.msra.mxu0 %v6920_v41  ;;  %6985 = vmatpush1.bf16.msra.mxu1 %v6984_v58  ;;  %v1729_v41 = vld [vmem:[#allocation4 + $0x6e0] sm:$0xff]  ;;  %v1738_v58 = vld [vmem:[#allocation4 + $0x728] sm:$0xff] }
 0x36c   :  { %6923 = vmatprep.subr.bf16.mxu0 %v6922_v43  ;;  %6987 = vmatprep.subr.bf16.mxu1 %v6986_v44  ;;  %v1731_v43 = vld [vmem:[#allocation4 + $0x6f0] sm:$0xff]  ;;  %v1740_v44 = vld [vmem:[#allocation4 + $0x738] sm:$0xff]  ;;  %v6944_v49 = vpack.c.bf16 %v1738_v58, %v1729_v41 }
 0x36d   :  { %v7008_v51 = vpack.c.bf16 %v1740_v44, %v1731_v43  ;;  %v1724_v41 = vld [vmem:[#allocation4 + $0x6b8] sm:$0xff]  ;;  %v1733_v44 = vld [vmem:[#allocation4 + $0x700] sm:$0xff] }
 0x36e   :  { %v1580_v43 = vld [vmem:[#allocation4 + $0x238] sm:$0xff]  ;;  %v7038_v47 = vpack.c.bf16 %v1742_v45, %v1733_v44  ;;  %v2297_v45 = vld [vmem:[#allocation4 + $0x210] sm:$0xff] }
 0x36f   :  { %6925 = vmatpush1.bf16.msra.mxu0 %v6924_v52  ;;  %6989 = vmatpush1.bf16.msra.mxu1 %v6988_v53  ;;  %v1747_v52 = vld [vmem:[#allocation4 + $0x770] sm:$0xff]  ;;  %v1756_v53 = vld [vmem:[#allocation4 + $0x7b8] sm:$0xff] }
 0x370   :  { %6927 = vmatprep.subr.bf16.mxu0 %v6926_v57  ;;  %6991 = vmatprep.subr.bf16.mxu1 %v6990_v59  ;;  %v1749_v57 = vld [vmem:[#allocation4 + $0x780] sm:$0xff]  ;;  %v1758_v59 = vld [vmem:[#allocation4 + $0x7c8] sm:$0xff]  ;;  %v6948_v5 = vpack.c.bf16 %v1756_v53, %v1747_v52 }
 0x371   :  { %v7012_v3 = vpack.c.bf16 %v1758_v59, %v1749_v57  ;;  %v1769_v57 = vld [vmem:[#allocation4 + $0x820] sm:$0xff]  ;;  %v1778_v59 = vld [vmem:[#allocation4 + $0x868] sm:$0xff] }
 0x372   :  { %v7046_v0 = vpack.c.bf16 %v1778_v59, %v1769_v57  ;;  %v2315_v59 = vld [vmem:[#allocation4 + $0x2a0] sm:$0xff] }
 0x373   :  { %6929 = vmatpush1.bf16.msra.mxu0 %v6928_v6  ;;  %6993 = vmatpush1.bf16.msra.mxu1 %v6992_v7  ;;  %v1765_v6 = vld [vmem:[#allocation4 + $0x800] sm:$0xff]  ;;  %v1774_v7 = vld [vmem:[#allocation4 + $0x848] sm:$0xff] }
 0x374   :  { %6931 = vmatprep.subr.bf16.mxu0 %v6930_v16  ;;  %6995 = vmatprep.subr.bf16.mxu1 %v6994_v10  ;;  %v1767_v16 = vld [vmem:[#allocation4 + $0x810] sm:$0xff]  ;;  %v1776_v10 = vld [vmem:[#allocation4 + $0x858] sm:$0xff]  ;;  %v6952_v17 = vpack.c.bf16 %v1774_v7, %v1765_v6  ;;  %v7048_v6 = vpack.c.bf16 %v1634_v2, %v1625_v1 }
 0x375   :  { %v7016_v18 = vpack.c.bf16 %v1776_v10, %v1767_v16  ;;  %v2232_v10 = vld [vmem:[#allocation4 + $0x8] sm:$0xff] }
 0x377   :  { %6933 = vmatpush1.bf16.msra.mxu0 %v6932_v15  ;;  %6997 = vmatpush1.bf16.msra.mxu1 %v6996_v19  ;;  %v1783_v15 = vld [vmem:[#allocation4 + $0x890] sm:$0xff]  ;;  %v6954_v19 = vpack.c.bf16 %v1793_v12, %v1784_v11  ;;  %v2234_v12 = vld [vmem:[#allocation4 + $0x18] sm:$0xff] }
 0x378   :  { %6935 = vmatprep.subr.bf16.mxu0 %v6934_v22  ;;  %6999 = vmatprep.subr.bf16.mxu1 %v6998_v23  ;;  %v1785_v22 = vld [vmem:[#allocation4 + $0x8a0] sm:$0xff]  ;;  %v1794_v23 = vld [vmem:[#allocation4 + $0x8e8] sm:$0xff]  ;;  %v6956_v50 = vpack.c.bf16 %v1792_v21, %v1783_v15  ;;  %v2241_v11 = vld [vmem:[#allocation4 + $0x50] sm:$0xff]  ;;  %v7118_v15 = vpack.c.bf16 %v2243_v14, %v2234_v12 }
 0x379   :  { %v7020_v27 = vpack.c.bf16 %v1794_v23, %v1785_v22  ;;  %v7054_v13 = vpack.c.bf16 %v2241_v11, %v2232_v10  ;;  %v2242_v21 = vld [vmem:[#allocation4 + $0x58] sm:$0xff]  ;;  %v2333_v10 = vld [vmem:[#allocation4 + $0x330] sm:$0xff] }
 0x37a   :  { %v2250_v23 = vld [vmem:[#allocation4 + $0x98] sm:$0xff]  ;;  %v2321_v11 = vld [vmem:[#allocation4 + $0x2d0] sm:$0xff] }
 0x37b   :  { %6937 = vmatpush1.bf16.msra.mxu0 %v6936_v55  ;;  %7001 = vmatpush1.bf16.msra.mxu1 %v7000_v30  ;;  %v1526_v55 = vld [vmem:[#allocation4 + $0x88] sm:$0xff]  ;;  %v1679_v30 = vld [vmem:[#allocation4 + $0x550] sm:$0xff]  ;;  %v2330_v12 = vld [vmem:[#allocation4 + $0x318] sm:$0xff] }
 0x37c   :  { %6939 = vmatprep.subr.bf16.mxu0 %v6938_v32  ;;  %7003 = vmatprep.subr.bf16.mxu1 %v7002_v33  ;;  %v7024_v4 = vpack.c.bf16 %v1526_v55, %v1517_v29  ;;  %v7026_v32 = vpack.c.bf16 %v1688_v31, %v1679_v30  ;;  %v1535_v33 = vld [vmem:[#allocation4 + $0xd0] sm:$0xff]  ;;  %v2251_v30 = vld [vmem:[#allocation4 + $0xa0] sm:$0xff]  ;;  %v2260_v31 = vld [vmem:[#allocation4 + $0xe8] sm:$0xff]  ;;  %v7076_v14 = vpack.c.bf16 %v2330_v12, %v2321_v11 }
 0x37d   :  { %v7028_v36 = vpack.c.bf16 %v1544_v34, %v1535_v33  ;;  %v2277_v33 = vld [vmem:[#allocation4 + $0x170] sm:$0xff]  ;;  %v2270_v34 = vld [vmem:[#allocation4 + $0x138] sm:$0xff] }
 0x37f   :  { %6941 = vmatpush1.bf16.msra.mxu0 %v6940_v39  ;;  %7005 = vmatpush1.bf16.msra.mxu1 %v7004_v40  ;;  %v1562_v39 = vld [vmem:[#allocation4 + $0x1a8] sm:$0xff]  ;;  %v1715_v40 = vld [vmem:[#allocation4 + $0x670] sm:$0xff] }
 0x380   :  { %6943 = vmatprep.subr.bf16.mxu0 %v6942_v42  ;;  %7007 = vmatprep.subr.bf16.mxu1 %v7006_v54  ;;  %v7032_v58 = vpack.c.bf16 %v1562_v39, %v1553_v38  ;;  %v7034_v42 = vpack.c.bf16 %v1724_v41, %v1715_v40  ;;  %v1571_v54 = vld [vmem:[#allocation4 + $0x1f0] sm:$0xff]  ;;  %v7126_v38 = vpack.c.bf16 %v2279_v63, %v2270_v34  ;;  %v2278_v41 = vld [vmem:[#allocation4 + $0x178] sm:$0xff] }
 0x381   :  { %v7036_v46 = vpack.c.bf16 %v1580_v43, %v1571_v54  ;;  %v2269_v40 = vld [vmem:[#allocation4 + $0x130] sm:$0xff]  ;;  %v2295_v54 = vld [vmem:[#allocation4 + $0x200] sm:$0xff]  ;;  %v2288_v43 = vld [vmem:[#allocation4 + $0x1c8] sm:$0xff] }
 0x382   :  { %v2366_v34 = vld [vmem:[#allocation4 + $0x438] sm:$0xff] }
 0x383   :  { %6945 = vmatpush1.bf16.msra.mxu0 %v6944_v49  ;;  %7009 = vmatpush1.bf16.msra.mxu1 %v7008_v51  ;;  %v1751_v49 = vld [vmem:[#allocation4 + $0x790] sm:$0xff]  ;;  %v1760_v51 = vld [vmem:[#allocation4 + $0x7d8] sm:$0xff] }
 0x384   :  { %6947 = vmatprep.subr.bf16.mxu0 %v6946_v61  ;;  %7011 = vmatprep.subr.bf16.mxu1 %v7010_v56  ;;  %v7042_v53 = vpack.c.bf16 %v1760_v51, %v1751_v49  ;;  %v1607_v61 = vld [vmem:[#allocation4 + $0x310] sm:$0xff]  ;;  %v1616_v56 = vld [vmem:[#allocation4 + $0x358] sm:$0xff]  ;;  %v2287_v49 = vld [vmem:[#allocation4 + $0x1c0] sm:$0xff] }
 0x385   :  { %v7044_v60 = vpack.c.bf16 %v1616_v56, %v1607_v61  ;;  %v2296_v51 = vld [vmem:[#allocation4 + $0x208] sm:$0xff]  ;;  %v2313_v61 = vld [vmem:[#allocation4 + $0x290] sm:$0xff]  ;;  %v2306_v56 = vld [vmem:[#allocation4 + $0x258] sm:$0xff] }
 0x386   :  { %v7134_v1 = vpack.c.bf16 %v2315_v59, %v2306_v56  ;;  %v2402_v56 = vld [vmem:[#allocation4 + $0x558] sm:$0xff] }
 0x387   :  { %6949 = vmatpush1.bf16.msra.mxu0 %v6948_v5  ;;  %7013 = vmatpush1.bf16.msra.mxu1 %v7012_v3  ;;  %v1787_v5 = vld [vmem:[#allocation4 + $0x8b0] sm:$0xff]  ;;  %v1796_v3 = vld [vmem:[#allocation4 + $0x8f8] sm:$0xff] }
 0x388   :  { %6951 = vmatprep.subr.bf16.mxu0 %v6950_v8  ;;  %7015 = vmatprep.subr.bf16.mxu1 %v7014_v9  ;;  %v7050_v7 = vpack.c.bf16 %v1796_v3, %v1787_v5  ;;  %v1643_v8 = vld [vmem:[#allocation4 + $0x430] sm:$0xff]  ;;  %v1652_v9 = vld [vmem:[#allocation4 + $0x478] sm:$0xff] }
 0x389   :  { %v7052_v16 = vpack.c.bf16 %v1652_v9, %v1643_v8  ;;  %v2305_v5 = vld [vmem:[#allocation4 + $0x250] sm:$0xff]  ;;  %v2314_v3 = vld [vmem:[#allocation4 + $0x298] sm:$0xff]  ;;  %v2331_v8 = vld [vmem:[#allocation4 + $0x320] sm:$0xff] }
 0x38a   :  { %v2324_v9 = vld [vmem:[#allocation4 + $0x2e8] sm:$0xff] }
 0x38b   :  { %6953 = vmatpush1.bf16.msra.mxu0 %v6952_v17  ;;  %7017 = vmatpush1.bf16.msra.mxu1 %v7016_v18  ;;  %v2231_v17 = vld [vmem:[#allocation4] sm:$0xff]  ;;  %v2240_v18 = vld [vmem:[#allocation4 + $0x48] sm:$0xff] }
 0x38c   :  { %6955 = vmatprep.subr.bf16.mxu0 %v6954_v19  ;;  %7019 = vmatprep.subr.bf16.mxu1 %v7018_v20  ;;  %v7056_v19 = vpack.c.bf16 %v2240_v18, %v2231_v17  ;;  %v2233_v20 = vld [vmem:[#allocation4 + $0x10] sm:$0xff]  ;;  %v2323_v17 = vld [vmem:[#allocation4 + $0x2e0] sm:$0xff]  ;;  %v2332_v18 = vld [vmem:[#allocation4 + $0x328] sm:$0xff] }
 0x38d   :  { %v7120_v22 = vpack.c.bf16 %v2242_v21, %v2233_v20  ;;  %v2349_v20 = vld [vmem:[#allocation4 + $0x3b0] sm:$0xff]  ;;  %v2342_v21 = vld [vmem:[#allocation4 + $0x378] sm:$0xff] }
 0x38f   :  { %6957 = vmatpush1.bf16.msra.mxu0 %v6956_v50  ;;  %7021 = vmatpush1.bf16.msra.mxu1 %v7020_v27  ;;  %v2261_v50 = vld [vmem:[#allocation4 + $0xf0] sm:$0xff] }
 0x390   :  { %7023 = vmatprep.subr.bf16.mxu0 %v7022_v28  ;;  %7055 = vmatprep.subr.bf16.mxu1 %v7054_v13  ;;  %v2249_v27 = vld [vmem:[#allocation4 + $0x90] sm:$0xff]  ;;  %v2258_v28 = vld [vmem:[#allocation4 + $0xd8] sm:$0xff]  ;;  %v7122_v29 = vpack.c.bf16 %v2261_v50, %v2252_v26  ;;  %v7138_v13 = vpack.c.bf16 %v2333_v10, %v2324_v9  ;;  %v2348_v26 = vld [vmem:[#allocation4 + $0x3a8] sm:$0xff] }
 0x391   :  { %v7060_v55 = vpack.c.bf16 %v2258_v28, %v2249_v27  ;;  %v2341_v27 = vld [vmem:[#allocation4 + $0x370] sm:$0xff]  ;;  %v2350_v28 = vld [vmem:[#allocation4 + $0x3b8] sm:$0xff]  ;;  %v2420_v9 = vld [vmem:[#allocation4 + $0x5e8] sm:$0xff] }
 0x392   :  { %2014 = vmatmul.mubr.f32.vlgmr.msra.gmra.mrb[12].mxu0 %v9034_v24  ;;  %2085 = vmatmul.mubr.f32.vlgmr.msra.gmra.mrb[12].mxu1 %v9034_v24 }
 0x393   :  { %7025 = vmatpush3.bf16.msra.mxu0 %v7024_v4  ;;  %2155 = vmatprep.mubr.f32.mxu0 %v9038_v62  ;;  %v1589_v62 = vld [vmem:[#allocation4 + $0x280] sm:$0xff]  ;;  %v7124_v4 = vpack.c.bf16 %v2260_v31, %v2251_v30  ;;  %v2360_v31 = vld [vmem:[#allocation4 + $0x408] sm:$0xff] }
 0x394   :  { %7027 = vmatprep.subr.bf16.mxu0 %v7026_v32  ;;  %v7040_v52 = vpack.c.bf16 %v1598_v48, %v1589_v62  ;;  %7057 = vmatpush1.bf16.msra.mxu1 %v7056_v19  ;;  %v2268_v32 = vld [vmem:[#allocation4 + $0x128] sm:$0xff]  ;;  %v7130_v62 = vpack.c.bf16 %v2297_v45, %v2288_v43  ;;  %v2367_v30 = vld [vmem:[#allocation4 + $0x440] sm:$0xff] }
 0x395   :  { %v7062_v35 = vpack.c.bf16 %v2277_v33, %v2268_v32  ;;  %v2340_v19 = vld [vmem:[#allocation4 + $0x368] sm:$0xff]  ;;  %v2369_v32 = vld [vmem:[#allocation4 + $0x450] sm:$0xff] }
 0x396   :  { %v2357_v33 = vld [vmem:[#allocation4 + $0x3f0] sm:$0xff]  ;;  %v2384_v43 = vld [vmem:[#allocation4 + $0x4c8] sm:$0xff] }
 0x397   :  { %7029 = vmatpush3.bf16.msra.mxu0 %v7028_v36  ;;  %v2267_v36 = vld [vmem:[#allocation4 + $0x120] sm:$0xff]  ;;  %v7084_v63 = vpack.c.bf16 %v2366_v34, %v2357_v33  ;;  %v2456_v34 = vld [vmem:[#allocation4 + $0x708] sm:$0xff] }
 0x398   :  { %7031 = vmatprep.subr.bf16.mxu0 %v7030_v37  ;;  %v2276_v37 = vld [vmem:[#allocation4 + $0x168] sm:$0xff]  ;;  %v2447_v33 = vld [vmem:[#allocation4 + $0x6c0] sm:$0xff] }
 0x399   :  { %v7064_v39 = vpack.c.bf16 %v2276_v37, %v2267_v36  ;;  %v2359_v36 = vld [vmem:[#allocation4 + $0x400] sm:$0xff]  ;;  %v2368_v37 = vld [vmem:[#allocation4 + $0x448] sm:$0xff] }
 0x39b   :  { %7033 = vmatpush3.bf16.msra.mxu0 %v7032_v58  ;;  %v7128_v58 = vpack.c.bf16 %v2278_v41, %v2269_v40  ;;  %v2385_v40 = vld [vmem:[#allocation4 + $0x4d0] sm:$0xff]  ;;  %v2378_v41 = vld [vmem:[#allocation4 + $0x498] sm:$0xff] }
 0x39c   :  { %7035 = vmatprep.subr.bf16.mxu0 %v7034_v42  ;;  %v2286_v42 = vld [vmem:[#allocation4 + $0x1b8] sm:$0xff] }
 0x39d   :  { %v7066_v44 = vpack.c.bf16 %v2295_v54, %v2286_v42  ;;  %v2387_v42 = vld [vmem:[#allocation4 + $0x4e0] sm:$0xff] }
 0x39e   :  { %v2375_v54 = vld [vmem:[#allocation4 + $0x480] sm:$0xff] }
 0x39f   :  { %7037 = vmatpush3.bf16.msra.mxu0 %v7036_v46  ;;  %v2285_v46 = vld [vmem:[#allocation4 + $0x1b0] sm:$0xff]  ;;  %v7088_v45 = vpack.c.bf16 %v2384_v43, %v2375_v54 }
 0x3a0   :  { %7039 = vmatprep.subr.bf16.mxu0 %v7038_v47  ;;  %v2294_v47 = vld [vmem:[#allocation4 + $0x1f8] sm:$0xff]  ;;  %v2465_v43 = vld [vmem:[#allocation4 + $0x750] sm:$0xff] }
 0x3a1   :  { %v7068_v48 = vpack.c.bf16 %v2294_v47, %v2285_v46  ;;  %v2377_v46 = vld [vmem:[#allocation4 + $0x490] sm:$0xff]  ;;  %v2386_v47 = vld [vmem:[#allocation4 + $0x4d8] sm:$0xff] }
 0x3a3   :  { %7041 = vmatpush3.bf16.msra.mxu0 %v7040_v52  ;;  %v7132_v52 = vpack.c.bf16 %v2296_v51, %v2287_v49  ;;  %v2403_v49 = vld [vmem:[#allocation4 + $0x560] sm:$0xff]  ;;  %v2396_v51 = vld [vmem:[#allocation4 + $0x528] sm:$0xff] }
 0x3a4   :  { %7043 = vmatprep.subr.bf16.mxu0 %v7042_v53  ;;  %v2304_v53 = vld [vmem:[#allocation4 + $0x248] sm:$0xff] }
 0x3a5   :  { %v7070_v57 = vpack.c.bf16 %v2313_v61, %v2304_v53  ;;  %v2405_v53 = vld [vmem:[#allocation4 + $0x570] sm:$0xff] }
 0x3a6   :  { %v2393_v61 = vld [vmem:[#allocation4 + $0x510] sm:$0xff] }
 0x3a7   :  { %7045 = vmatpush3.bf16.msra.mxu0 %v7044_v60  ;;  %v2303_v60 = vld [vmem:[#allocation4 + $0x240] sm:$0xff]  ;;  %v7092_v59 = vpack.c.bf16 %v2402_v56, %v2393_v61 }
 0x3a8   :  { %7047 = vmatprep.subr.bf16.mxu0 %v7046_v0  ;;  %v2312_v0 = vld [vmem:[#allocation4 + $0x288] sm:$0xff]  ;;  %v2483_v61 = vld [vmem:[#allocation4 + $0x7e0] sm:$0xff] }
 0x3a9   :  { %v7072_v2 = vpack.c.bf16 %v2312_v0, %v2303_v60  ;;  %v2395_v60 = vld [vmem:[#allocation4 + $0x520] sm:$0xff]  ;;  %v2404_v0 = vld [vmem:[#allocation4 + $0x568] sm:$0xff] }
 0x3ab   :  { %7049 = vmatpush3.bf16.msra.mxu0 %v7048_v6  ;;  %v7136_v6 = vpack.c.bf16 %v2314_v3, %v2305_v5  ;;  %v2421_v5 = vld [vmem:[#allocation4 + $0x5f0] sm:$0xff]  ;;  %v2414_v3 = vld [vmem:[#allocation4 + $0x5b8] sm:$0xff] }
 0x3ac   :  { %7051 = vmatprep.subr.bf16.mxu0 %v7050_v7  ;;  %v2322_v7 = vld [vmem:[#allocation4 + $0x2d8] sm:$0xff] }
 0x3af   :  { %7053 = vmatpush3.bf16.msra.mxu0 %v7052_v16  ;;  %v7074_v16 = vpack.c.bf16 %v2331_v8, %v2322_v7  ;;  %v2423_v7 = vld [vmem:[#allocation4 + $0x600] sm:$0xff] }
 0x3b0   :  { %7119 = vmatprep.subr.bf16.mxu0 %v7118_v15  ;;  %v7140_v15 = vpack.c.bf16 %v2332_v18, %v2323_v17  ;;  %v2411_v8 = vld [vmem:[#allocation4 + $0x5a0] sm:$0xff]  ;;  %v7158_v11 = vpack.c.bf16 %v2423_v7, %v2414_v3  ;;  %v2513_v3 = vld [vmem:[#allocation4 + $0x8d0] sm:$0xff] }
 0x3b1   :  { %v7096_v12 = vpack.c.bf16 %v2420_v9, %v2411_v8  ;;  %v2501_v8 = vld [vmem:[#allocation4 + $0x870] sm:$0xff]  ;;  %v2510_v9 = vld [vmem:[#allocation4 + $0x8b8] sm:$0xff] }
 0x3b2   :  { %2156 = vmatmul.mubr.f32.vlgmr.msra.gmra.mrb[14].mxu0 %v9034_v24  ;;  %v7058_v24 = vpack.c.bf16 %v2259_v25, %v2250_v23  ;;  %v2351_v23 = vld [vmem:[#allocation4 + $0x3c0] sm:$0xff] }
 0x3b3   :  { %7121 = vmatpush1.bf16.msra.mxu0 %v7120_v22  ;;  %v7078_v22 = vpack.c.bf16 %v2349_v20, %v2340_v19  ;;  %v2339_v25 = vld [vmem:[#allocation4 + $0x360] sm:$0xff]  ;;  %v2430_v19 = vld [vmem:[#allocation4 + $0x638] sm:$0xff] }
 0x3b4   :  { %7059 = vmatprep.subr.bf16.mxu1 %v7058_v24  ;;  %7123 = vmatprep.subr.bf16.mxu0 %v7122_v29  ;;  %v7142_v24 = vpack.c.bf16 %v2351_v23, %v2342_v21  ;;  %v7080_v50 = vpack.c.bf16 %v2348_v26, %v2339_v25  ;;  %v7144_v29 = vpack.c.bf16 %v2350_v28, %v2341_v27  ;;  %v2439_v20 = vld [vmem:[#allocation4 + $0x680] sm:$0xff]  ;;  %v2432_v21 = vld [vmem:[#allocation4 + $0x648] sm:$0xff]  ;;  %v2441_v23 = vld [vmem:[#allocation4 + $0x690] sm:$0xff] }
 0x3b5   :  { %7061 = vmatpush1.bf16.msra.mxu1 %v7060_v55  ;;  %v2358_v55 = vld [vmem:[#allocation4 + $0x3f8] sm:$0xff]  ;;  %v2429_v25 = vld [vmem:[#allocation4 + $0x630] sm:$0xff]  ;;  %v7162_v26 = vpack.c.bf16 %v2441_v23, %v2432_v21  ;;  %v2440_v28 = vld [vmem:[#allocation4 + $0x688] sm:$0xff] }
 0x3b6   :  { %7063 = vmatprep.subr.bf16.mxu1 %v7062_v35  ;;  %v7146_v35 = vpack.c.bf16 %v2369_v32, %v2360_v31  ;;  %v2450_v31 = vld [vmem:[#allocation4 + $0x6d8] sm:$0xff]  ;;  %v2459_v32 = vld [vmem:[#allocation4 + $0x720] sm:$0xff] }
 0x3b7   :  { %7125 = vmatpush1.bf16.msra.mxu0 %v7124_v4  ;;  %v7082_v4 = vpack.c.bf16 %v2367_v30, %v2358_v55  ;;  %v2448_v55 = vld [vmem:[#allocation4 + $0x6c8] sm:$0xff]  ;;  %v2457_v30 = vld [vmem:[#allocation4 + $0x710] sm:$0xff]  ;;  %v2238_v21 = vld [vmem:[#allocation4 + $0x38] sm:$0xff] }
 0x3b8   :  { %7127 = vmatprep.subr.bf16.mxu0 %v7126_v38  ;;  %v7148_v38 = vpack.c.bf16 %v2368_v37, %v2359_v36  ;;  %v2449_v36 = vld [vmem:[#allocation4 + $0x6d0] sm:$0xff]  ;;  %v2458_v37 = vld [vmem:[#allocation4 + $0x718] sm:$0xff]  ;;  %v2247_v23 = vld [vmem:[#allocation4 + $0x80] sm:$0xff] }
 0x3b9   :  { %7065 = vmatpush1.bf16.msra.mxu1 %v7064_v39  ;;  %v2376_v39 = vld [vmem:[#allocation4 + $0x488] sm:$0xff] }
 0x3ba   :  { %7067 = vmatprep.subr.bf16.mxu1 %v7066_v44  ;;  %v7150_v44 = vpack.c.bf16 %v2387_v42, %v2378_v41  ;;  %v2468_v41 = vld [vmem:[#allocation4 + $0x768] sm:$0xff] }
 0x3bb   :  { %7129 = vmatpush1.bf16.msra.mxu0 %v7128_v58  ;;  %v7086_v58 = vpack.c.bf16 %v2385_v40, %v2376_v39  ;;  %v7168_v39 = vpack.c.bf16 %v2458_v37, %v2449_v36  ;;  %v2475_v40 = vld [vmem:[#allocation4 + $0x7a0] sm:$0xff] }
 0x3bc   :  { %7131 = vmatprep.subr.bf16.mxu0 %v7130_v62  ;;  %v7152_v62 = vpack.c.bf16 %v2386_v47, %v2377_v46  ;;  %v2476_v47 = vld [vmem:[#allocation4 + $0x7a8] sm:$0xff] }
 0x3bd   :  { %7069 = vmatpush1.bf16.msra.mxu1 %v7068_v48  ;;  %v2394_v48 = vld [vmem:[#allocation4 + $0x518] sm:$0xff] }
 0x3be   :  { %7071 = vmatprep.subr.bf16.mxu1 %v7070_v57  ;;  %v7154_v57 = vpack.c.bf16 %v2405_v53, %v2396_v51  ;;  %v2495_v53 = vld [vmem:[#allocation4 + $0x840] sm:$0xff] }
 0x3bf   :  { %7133 = vmatpush1.bf16.msra.mxu0 %v7132_v52  ;;  %v7090_v52 = vpack.c.bf16 %v2403_v49, %v2394_v48  ;;  %v2493_v48 = vld [vmem:[#allocation4 + $0x830] sm:$0xff] }
 0x3c0   :  { %7135 = vmatprep.subr.bf16.mxu0 %v7134_v1  ;;  %v7156_v1 = vpack.c.bf16 %v2404_v0, %v2395_v60  ;;  %v2494_v60 = vld [vmem:[#allocation4 + $0x838] sm:$0xff] }
 0x3c1   :  { %7073 = vmatpush1.bf16.msra.mxu1 %v7072_v2  ;;  %v2412_v2 = vld [vmem:[#allocation4 + $0x5a8] sm:$0xff]  ;;  %v2502_v0 = vld [vmem:[#allocation4 + $0x878] sm:$0xff] }
 0x3c2   :  { %7075 = vmatprep.subr.bf16.mxu1 %v7074_v16 }
 0x3c3   :  { %7137 = vmatpush1.bf16.msra.mxu0 %v7136_v6  ;;  %v7094_v6 = vpack.c.bf16 %v2421_v5, %v2412_v2  ;;  %v2504_v2 = vld [vmem:[#allocation4 + $0x888] sm:$0xff] }
 0x3c4   :  { %7139 = vmatprep.subr.bf16.mxu0 %v7138_v13  ;;  %v2413_v13 = vld [vmem:[#allocation4 + $0x5b0] sm:$0xff] }
 0x3c5   :  { %7077 = vmatpush1.bf16.msra.mxu1 %v7076_v14  ;;  %v2422_v14 = vld [vmem:[#allocation4 + $0x5f8] sm:$0xff] }
 0x3c6   :  { %7079 = vmatprep.subr.bf16.mxu1 %v7078_v22  ;;  %v7098_v22 = vpack.c.bf16 %v2439_v20, %v2430_v19  ;;  %v2236_v19 = vld [vmem:[#allocation4 + $0x28] sm:$0xff]  ;;  %v2245_v20 = vld [vmem:[#allocation4 + $0x70] sm:$0xff] }
 0x3c7   :  { %7141 = vmatpush1.bf16.msra.mxu0 %v7140_v15  ;;  %v7160_v15 = vpack.c.bf16 %v2422_v14, %v2413_v13  ;;  %v2512_v13 = vld [vmem:[#allocation4 + $0x8c8] sm:$0xff]  ;;  %v7116_v14 = vpack.c.bf16 %v2510_v9, %v2501_v8 }
 0x3c8   :  { %7143 = vmatprep.subr.bf16.mxu0 %v7142_v24  ;;  %v2438_v24 = vld [vmem:[#allocation4 + $0x678] sm:$0xff] }
 0x3c9   :  { %7081 = vmatpush1.bf16.msra.mxu1 %v7080_v50  ;;  %v2431_v50 = vld [vmem:[#allocation4 + $0x640] sm:$0xff]  ;;  %v7100_v27 = vpack.c.bf16 %v2438_v24, %v2429_v25  ;;  %v7246_v25 = vpack.c.bf16 %v2247_v23, %v2238_v21 }
 0x3ca   :  { %7083 = vmatprep.subr.bf16.mxu1 %v7082_v4  ;;  %v7102_v4 = vpack.c.bf16 %v2457_v30, %v2448_v55  ;;  %v1798_v24 = vld [vmem:[#allocation8 + $0x90] sm:$0xff]  ;;  %v1800_v55 = vld [vmem:[#allocation8 + $0xa0] sm:$0xff] }
 0x3cb   :  { %7145 = vmatpush1.bf16.msra.mxu0 %v7144_v29  ;;  %v7164_v29 = vpack.c.bf16 %v2440_v28, %v2431_v50 }
 0x3cc   :  { %7147 = vmatprep.subr.bf16.mxu0 %v7146_v35  ;;  %v7166_v35 = vpack.c.bf16 %v2459_v32, %v2450_v31 }
 0x3cd   :  { %7085 = vmatpush1.bf16.msra.mxu1 %v7084_v63  ;;  %v7104_v63 = vpack.c.bf16 %v2456_v34, %v2447_v33 }
 0x3ce   :  { %7087 = vmatprep.subr.bf16.mxu1 %v7086_v58  ;;  %v2477_v58 = vld [vmem:[#allocation4 + $0x7b0] sm:$0xff] }
 0x3cf   :  { %7149 = vmatpush1.bf16.msra.mxu0 %v7148_v38  ;;  %v2466_v38 = vld [vmem:[#allocation4 + $0x758] sm:$0xff]  ;;  %v7170_v54 = vpack.c.bf16 %v2477_v58, %v2468_v41 }
 0x3d0   :  { %7151 = vmatprep.subr.bf16.mxu0 %v7150_v44  ;;  %v7106_v42 = vpack.c.bf16 %v2475_v40, %v2466_v38  ;;  %v2474_v44 = vld [vmem:[#allocation4 + $0x798] sm:$0xff]  ;;  %v1803_v38 = vld [vmem:[#allocation8 + $0xb8] sm:$0xff] }
 0x3d1   :  { %7089 = vmatpush1.bf16.msra.mxu1 %v7088_v45  ;;  %v2467_v45 = vld [vmem:[#allocation4 + $0x760] sm:$0xff]  ;;  %v7108_v46 = vpack.c.bf16 %v2474_v44, %v2465_v43  ;;  %v8807_v44 = vld [vmem:[#allocation10 + $0x18] sm:$0xff] }
 0x3d2   :  { %7091 = vmatprep.subr.bf16.mxu1 %v7090_v52  ;;  %v7172_v49 = vpack.c.bf16 %v2476_v47, %v2467_v45  ;;  %v2486_v52 = vld [vmem:[#allocation4 + $0x7f8] sm:$0xff] }
 0x3d3   :  { %7153 = vmatpush1.bf16.msra.mxu0 %v7152_v62  ;;  %v2484_v62 = vld [vmem:[#allocation4 + $0x7e8] sm:$0xff]  ;;  %v7174_v56 = vpack.c.bf16 %v2495_v53, %v2486_v52  ;;  %v1804_v53 = vld [vmem:[#allocation8 + $0xc0] sm:$0xff] }
 0x3d4   :  { %7155 = vmatprep.subr.bf16.mxu0 %v7154_v57  ;;  %v7110_v51 = vpack.c.bf16 %v2493_v48, %v2484_v62  ;;  %v2492_v57 = vld [vmem:[#allocation4 + $0x828] sm:$0xff]  ;;  %v1801_v62 = vld [vmem:[#allocation8 + $0xa8] sm:$0xff] }
 0x3d5   :  { %7093 = vmatpush1.bf16.msra.mxu1 %v7092_v59  ;;  %v2485_v59 = vld [vmem:[#allocation4 + $0x7f0] sm:$0xff]  ;;  %v7112_v5 = vpack.c.bf16 %v2492_v57, %v2483_v61 }
 0x3d6   :  { %7095 = vmatprep.subr.bf16.mxu1 %v7094_v6  ;;  %v7176_v6 = vpack.c.bf16 %v2494_v60, %v2485_v59 }
 0x3d7   :  { %7157 = vmatpush1.bf16.msra.mxu0 %v7156_v1  ;;  %v2511_v1 = vld [vmem:[#allocation4 + $0x8c0] sm:$0xff] }
 0x3d8   :  { %7159 = vmatprep.subr.bf16.mxu0 %v7158_v11  ;;  %v7114_v7 = vpack.c.bf16 %v2511_v1, %v2502_v0  ;;  %v7178_v11 = vpack.c.bf16 %v2513_v3, %v2504_v2 }
 0x3d9   :  { %7097 = vmatpush1.bf16.msra.mxu1 %v7096_v12  ;;  %v2503_v12 = vld [vmem:[#allocation4 + $0x880] sm:$0xff] }
 0x3da   :  { %7099 = vmatprep.subr.bf16.mxu1 %v7098_v22  ;;  %v7182_v22 = vpack.c.bf16 %v2245_v20, %v2236_v19 }
 0x3db   :  { %7161 = vmatpush1.bf16.msra.mxu0 %v7160_v15  ;;  %v7180_v15 = vpack.c.bf16 %v2512_v13, %v2503_v12 }
 0x3dc   :  { %7163 = vmatprep.subr.bf16.mxu0 %v7162_v26  ;;  %v1799_v26 = vld [vmem:[#allocation8 + $0x98] sm:$0xff] }
 0x3dd   :  { %7101 = vmatpush1.bf16.msra.mxu1 %v7100_v27 }
 0x3de   :  { %7103 = vmatprep.subr.bf16.mxu1 %v7102_v4 }
 0x3df   :  { %7165 = vmatpush1.bf16.msra.mxu0 %v7164_v29 }
 0x3e0   :  { %7167 = vmatprep.subr.bf16.mxu0 %v7166_v35  ;;  %v1805_v35 = vld [vmem:[#allocation8 + $0xc8] sm:$0xff] }
 0x3e1   :  { %7105 = vmatpush1.bf16.msra.mxu1 %v7104_v63 }
 0x3e2   :  { %7107 = vmatprep.subr.bf16.mxu1 %v7106_v42 }
 0x3e3   :  { %7169 = vmatpush1.bf16.msra.mxu0 %v7168_v39  ;;  %v1802_v39 = vld [vmem:[#allocation8 + $0xb0] sm:$0xff] }
 0x3e4   :  { %7171 = vmatprep.subr.bf16.mxu0 %v7170_v54 }
 0x3e5   :  { %7109 = vmatpush1.bf16.msra.mxu1 %v7108_v46 }
 0x3e6   :  { %7111 = vmatprep.subr.bf16.mxu1 %v7110_v51 }
 0x3e7   :  { %7173 = vmatpush1.bf16.msra.mxu0 %v7172_v49 }
 0x3e8   :  { %7175 = vmatprep.subr.bf16.mxu0 %v7174_v56 }
 0x3e9   :  { %7113 = vmatpush1.bf16.msra.mxu1 %v7112_v5 }
 0x3ea   :  { %7115 = vmatprep.subr.bf16.mxu1 %v7114_v7 }
 0x3eb   :  { %7177 = vmatpush1.bf16.msra.mxu0 %v7176_v6  ;;  %v1806_v6 = vld [vmem:[#allocation8 + $0xd0] sm:$0xff] }
 0x3ec   :  { %7179 = vmatprep.subr.bf16.mxu0 %v7178_v11 }
 0x3ed   :  { %7117 = vmatpush1.bf16.msra.mxu1 %v7116_v14 }
 0x3ee   :  { %7183 = vmatprep.subr.bf16.mxu1 %v7182_v22 }
 0x3ef   :  { %7181 = vmatpush1.bf16.msra.mxu0 %v7180_v15 }
 0x3f0   :  { %7247 = vmatprep.subr.bf16.mxu0 %v7246_v25 }
 0x425   :  { %v9050_v16 = vpop.f32.mrb[10].mxu0  ;;  %v9052_v10 = vpop.f32.mrb[10].mxu1 }
 0x426   :  { %v9054_v17 = vpop.f32.mrb[11].mxu0  ;;  %v9056_v18 = vpop.f32.mrb[11].mxu1  ;;  %v1874_v27 = vadd.f32 %v9050_v16, %v1798_v24  ;;  %v1945_v30 = vadd.f32 %v9052_v10, %v1800_v55 }
 0x427   :  { %v1876_v50 = vadd.f32 %v9054_v17, %v1799_v26  ;;  %v1947_v51 = vadd.f32 %v9056_v18, %v1801_v62 }
 0x428   :  { %v5868_v29 = vmul.f32 -1.442695, %v1874_v27  ;;  %v5870_v32 = vmul.f32 -1.442695, %v1945_v30 }
 0x429   :  { %v5869_v28 = vmul.f32 -1.442695, %v1876_v50  ;;  %v5871_v52 = vmul.f32 -1.442695, %v1947_v51 }
 0x42b   :  { %8580 = vpow2.f32 %v5869_v28 }
 0x42c   :  { %8582 = vpow2.f32 %v5868_v29 }
 0x42d   :  { %8584 = vpow2.f32 %v5870_v32  ;;  %v2244_v32 = vld [vmem:[#allocation4 + $0x68] sm:$0xff] }
 0x435   :  { %v8581_v31 = vpop.eup %8580 }
 0x436   :  { %v8583_v4 = vpop.eup %8582  ;;  %v2183_v33 = vadd.f32 1.0, %v8581_v31 }
 0x437   :  { %v2182_v34 = vadd.f32 1.0, %v8583_v4  ;;  %v8585_v40 = vpop.eup %8584  ;;  %v2235_v4 = vld [vmem:[#allocation4 + $0x20] sm:$0xff] }
 0x438   :  { %8586 = vrcp.f32 %v2183_v33  ;;  %v2184_v43 = vadd.f32 1.0, %v8585_v40  ;;  %v2237_v33 = vld [vmem:[#allocation4 + $0x30] sm:$0xff] }
 0x439   :  { %8588 = vrcp.f32 %v2182_v34  ;;  %v2246_v34 = vld [vmem:[#allocation4 + $0x78] sm:$0xff]  ;;  %v2253_v40 = vld [vmem:[#allocation4 + $0xb0] sm:$0xff] }
 0x442   :  { %v8587_v10 = vpop.eup %8586 }
 0x443   :  { %v8589_v42 = vpop.eup %8588  ;;  %v2205_v45 = vmul.f32 %v8807_v44, %v8587_v10  ;;  %v2255_v10 = vld [vmem:[#allocation4 + $0xc0] sm:$0xff] }
 0x465   :  { %v2015_v63 = vpop.f32.mrb[12].mxu0  ;;  %v2086_v36 = vpop.f32.mrb[12].mxu1 }
 0x466   :  { %v2017_v37 = vpop.f32.mrb[13].mxu0  ;;  %v2088_v17 = vpop.f32.mrb[13].mxu1  ;;  %v2016_v58 = vadd.f32 %v2015_v63, %v1802_v39  ;;  %v2087_v61 = vadd.f32 %v2086_v36, %v1804_v53  ;;  %v2263_v36 = vld [vmem:[#allocation4 + $0x100] sm:$0xff]  ;;  %v7248_v39 = vpack.c.bf16 %v2246_v34, %v2237_v33  ;;  %v2273_v53 = vld [vmem:[#allocation4 + $0x150] sm:$0xff]  ;;  %v2336_v33 = vld [vmem:[#allocation4 + $0x348] sm:$0xff] }
 0x467   :  { %v2089_v16 = vadd.f32 %v2088_v17, %v1805_v35  ;;  %v2018_v41 = vadd.f32 %v2017_v37, %v1803_v38  ;;  %v2254_v35 = vld [vmem:[#allocation4 + $0xb8] sm:$0xff]  ;;  %v2256_v37 = vld [vmem:[#allocation4 + $0xc8] sm:$0xff]  ;;  %v2265_v17 = vld [vmem:[#allocation4 + $0x110] sm:$0xff]  ;;  %v7184_v38 = vpack.c.bf16 %v2244_v32, %v2235_v4 }
 0x468   :  { %v5872_v48 = vmul.f32 -1.442695, %v2016_v58  ;;  %v5874_v0 = vmul.f32 -1.442695, %v2087_v61  ;;  %v2264_v58 = vld [vmem:[#allocation4 + $0x108] sm:$0xff]  ;;  %v2282_v61 = vld [vmem:[#allocation4 + $0x198] sm:$0xff] }
 0x469   :  { %8590 = vtanh.f32 %v2089_v16  ;;  %v5873_v46 = vmul.f32 -1.442695, %v2018_v41  ;;  %v2262_v41 = vld [vmem:[#allocation4 + $0xf8] sm:$0xff]  ;;  %v7252_v62 = vpack.c.bf16 %v2264_v58, %v2255_v10  ;;  %v2327_v32 = vld [vmem:[#allocation4 + $0x300] sm:$0xff]  ;;  %v2344_v34 = vld [vmem:[#allocation4 + $0x388] sm:$0xff] }
 0x46a   :  { %8592 = vrcp.f32 %v2184_v43  ;;  %v7250_v43 = vpack.c.bf16 %v2265_v17, %v2256_v37  ;;  %v7268_v17 = vpack.c.bf16 %v2336_v33, %v2327_v32  ;;  %v2345_v10 = vld [vmem:[#allocation4 + $0x390] sm:$0xff]  ;;  %v2354_v58 = vld [vmem:[#allocation4 + $0x3d8] sm:$0xff]  ;;  %v2443_v33 = vld [vmem:[#allocation4 + $0x6a0] sm:$0xff] }
 0x46b   :  { %8594 = vpow2.f32 %v5873_v46  ;;  %v2283_v46 = vld [vmem:[#allocation4 + $0x1a0] sm:$0xff]  ;;  %v2434_v32 = vld [vmem:[#allocation4 + $0x658] sm:$0xff] }
 0x46c   :  { %8596 = vpow2.f32 %v5872_v48  ;;  %v2271_v48 = vld [vmem:[#allocation4 + $0x140] sm:$0xff] }
 0x473   :  { %v8591_v54 = vpop.eup %8590 }
 0x474   :  { %v2206_v47 = vmul.f32 %v8591_v54, %v8589_v42  ;;  %v8593_v56 = vpop.eup %8592  ;;  %v2272_v42 = vld [vmem:[#allocation4 + $0x148] sm:$0xff]  ;;  %v7186_v54 = vpack.c.bf16 %v2263_v36, %v2254_v35  ;;  %v2353_v35 = vld [vmem:[#allocation4 + $0x3d0] sm:$0xff]  ;;  %v2355_v36 = vld [vmem:[#allocation4 + $0x3e0] sm:$0xff] }
 0x475   :  { %v8595_v57 = vpop.eup %8594 }
 0x476   :  { %v2207_v49 = vadd.f32 %v2206_v47, %v2205_v45  ;;  %v8597_v59 = vpop.eup %8596  ;;  %v2187_v1 = vadd.f32 1.0, %v8595_v57  ;;  %v2274_v45 = vld [vmem:[#allocation4 + $0x158] sm:$0xff]  ;;  %v7188_v47 = vpack.c.bf16 %v2262_v41, %v2253_v40  ;;  %v2299_v57 = vld [vmem:[#allocation4 + $0x220] sm:$0xff]  ;;  %v7206_v40 = vpack.c.bf16 %v2353_v35, %v2344_v34  ;;  %v2436_v34 = vld [vmem:[#allocation4 + $0x668] sm:$0xff] }
 0x477   :  { %v2186_v3 = vadd.f32 1.0, %v8597_v59  ;;  %v2292_v59 = vld [vmem:[#allocation4 + $0x1e8] sm:$0xff]  ;;  %v2445_v35 = vld [vmem:[#allocation4 + $0x6b0] sm:$0xff] }
 0x478   :  { %8598 = vtanh.f32 %v2207_v49 }
 0x479   :  { %8600 = vpow2.f32 %v5871_v52  ;;  %v7254_v52 = vpack.c.bf16 %v2283_v46, %v2274_v45  ;;  %v7272_v46 = vpack.c.bf16 %v2354_v58, %v2345_v10  ;;  %v2452_v10 = vld [vmem:[#allocation4 + $0x6e8] sm:$0xff]  ;;  %v2461_v58 = vld [vmem:[#allocation4 + $0x730] sm:$0xff] }
 0x47a   :  { %8602 = vpow2.f32 %v5874_v0 }
 0x47b   :  { %8604 = vrcp.f32 %v2187_v1  ;;  %v7256_v1 = vpack.c.bf16 %v2282_v61, %v2273_v53  ;;  %v2380_v53 = vld [vmem:[#allocation4 + $0x4a8] sm:$0xff]  ;;  %v2389_v61 = vld [vmem:[#allocation4 + $0x4f0] sm:$0xff] }
 0x47c   :  { %8606 = vrcp.f32 %v2186_v3 }
 0x482   :  { %v8599_v60 = vpop.eup %8598 }
 0x483   :  { %v2212_v2 = vmul.f32 %v8599_v60, %v8593_v56  ;;  %v8601_v9 = vpop.eup %8600  ;;  %v2290_v56 = vld [vmem:[#allocation4 + $0x1d8] sm:$0xff]  ;;  %v2301_v60 = vld [vmem:[#allocation4 + $0x230] sm:$0xff] }
 0x484   :  { %v2185_v11 = vadd.f32 1.0, %v8601_v9  ;;  %v8603_v12 = vpop.eup %8602  ;;  %v7194_v3 = vpack.c.bf16 %v2299_v57, %v2290_v56  ;;  %v2317_v9 = vld [vmem:[#allocation4 + $0x2b0] sm:$0xff]  ;;  %v2382_v56 = vld [vmem:[#allocation4 + $0x4b8] sm:$0xff]  ;;  %v2391_v57 = vld [vmem:[#allocation4 + $0x500] sm:$0xff] }
 0x485   :  { %v6012_v5 = vpop.f32.mrb[14].mxu0  ;;  %v8605_v13 = vpop.eup %8604  ;;  %v2188_v19 = vadd.f32 1.0, %v8603_v12  ;;  %v2319_v12 = vld [vmem:[#allocation4 + $0x2c0] sm:$0xff] }
 0x486   :  { %v6013_v7 = vpop.f32.mrb[15].mxu0  ;;  %v8607_v14 = vpop.eup %8606  ;;  %v2208_v20 = vmul.f32 %v8807_v44, %v8605_v13  ;;  %v2281_v44 = vld [vmem:[#allocation4 + $0x190] sm:$0xff] }
 0x487   :  { %v6014_v8 = vadd.f32 %v6013_v7, %v6012_v5  ;;  %v7190_v51 = vpack.c.bf16 %v2281_v44, %v2272_v42  ;;  %v2298_v5 = vld [vmem:[#allocation4 + $0x218] sm:$0xff]  ;;  %v2291_v7 = vld [vmem:[#allocation4 + $0x1e0] sm:$0xff]  ;;  %v2373_v44 = vld [vmem:[#allocation4 + $0x470] sm:$0xff] }
 0x488   :  { %v2362_v42 = vld [vmem:[#allocation4 + $0x418] sm:$0xff] }
 0x489   :  { %v2158_v18 = vadd.f32 %v6014_v8, %v1806_v6  ;;  %v7258_v6 = vpack.c.bf16 %v2301_v60, %v2292_v59  ;;  %v2300_v8 = vld [vmem:[#allocation4 + $0x228] sm:$0xff] }
 0x48b   :  { %8608 = vtanh.f32 %v2158_v18  ;;  %v2308_v18 = vld [vmem:[#allocation4 + $0x268] sm:$0xff] }
 0x48c   :  { %8610 = vrcp.f32 %v2185_v11  ;;  %v2310_v11 = vld [vmem:[#allocation4 + $0x278] sm:$0xff] }
 0x48d   :  { %8612 = vrcp.f32 %v2188_v19  ;;  %v2316_v19 = vld [vmem:[#allocation4 + $0x2a8] sm:$0xff] }
 0x495   :  { %v8609_v15 = vpop.eup %8608 }
 0x496   :  { %v2209_v21 = vmul.f32 %v8609_v15, %v8607_v14  ;;  %v8611_v25 = vpop.eup %8610  ;;  %v7260_v14 = vpack.c.bf16 %v2300_v8, %v2291_v7  ;;  %v2307_v15 = vld [vmem:[#allocation4 + $0x260] sm:$0xff]  ;;  %v2398_v7 = vld [vmem:[#allocation4 + $0x538] sm:$0xff] }
 0x497   :  { %v8613_v50 = vpop.eup %8612  ;;  %v2407_v8 = vld [vmem:[#allocation4 + $0x580] sm:$0xff] }
 0x498   :  { %v2210_v22 = vadd.f32 %v2209_v21, %v2208_v20  ;;  %v7198_v20 = vpack.c.bf16 %v2317_v9, %v2308_v18  ;;  %v7262_v21 = vpack.c.bf16 %v2319_v12, %v2310_v11  ;;  %v2400_v18 = vld [vmem:[#allocation4 + $0x548] sm:$0xff]  ;;  %v2409_v9 = vld [vmem:[#allocation4 + $0x590] sm:$0xff] }
 0x49a   :  { %8614 = vtanh.f32 %v2210_v22  ;;  %v2215_v23 = vsub.f32 %v2207_v49, %v2210_v22  ;;  %v2280_v49 = vld [vmem:[#allocation4 + $0x188] sm:$0xff] }
 0x49b   :  { %v7192_v0 = vpack.c.bf16 %v2280_v49, %v2271_v48 }
 0x49c   :  { %v2216_v26 = vmul.f32 %v8611_v25, %v2215_v23  ;;  %v2318_v23 = vld [vmem:[#allocation4 + $0x2b8] sm:$0xff] }
 0x49e   :  { %v2217_v24 = vadd.f32 %v2216_v26, %v2210_v22  ;;  %v2309_v22 = vld [vmem:[#allocation4 + $0x270] sm:$0xff]  ;;  %v2335_v26 = vld [vmem:[#allocation4 + $0x340] sm:$0xff] }
 0x4a0   :  { %2225 = vst [vmem:[#allocation10 + $0x28] sm:$0xff] %v2217_v24  ;;  %v2328_v24 = vld [vmem:[#allocation4 + $0x308] sm:$0xff] }
 0x4a4   :  { %v8615_v27 = vpop.eup %8614 }
 0x4a5   :  { %v2214_v28 = vmul.f32 %v8615_v27, %v8613_v50  ;;  %v2337_v50 = vld [vmem:[#allocation4 + $0x350] sm:$0xff]  ;;  %v7200_v27 = vpack.c.bf16 %v2316_v19, %v2307_v15  ;;  %v7218_v15 = vpack.c.bf16 %v2407_v8, %v2398_v7  ;;  %v7282_v19 = vpack.c.bf16 %v2409_v9, %v2400_v18  ;;  %v2490_v7 = vld [vmem:[#allocation4 + $0x818] sm:$0xff]  ;;  %v2499_v8 = vld [vmem:[#allocation4 + $0x860] sm:$0xff] }
 0x4a6   :  { %v7266_v4 = vpack.c.bf16 %v2337_v50, %v2328_v24 }
 0x4a7   :  { %v2218_v29 = vsub.f32 %v2212_v2, %v2214_v28  ;;  %v2289_v2 = vld [vmem:[#allocation4 + $0x1d0] sm:$0xff] }
 0x4a8   :  { %v7196_v13 = vpack.c.bf16 %v2298_v5, %v2289_v2  ;;  %v7214_v2 = vpack.c.bf16 %v2389_v61, %v2380_v53  ;;  %v7278_v5 = vpack.c.bf16 %v2391_v57, %v2382_v56  ;;  %v2472_v53 = vld [vmem:[#allocation4 + $0x788] sm:$0xff]  ;;  %v2481_v61 = vld [vmem:[#allocation4 + $0x7d0] sm:$0xff] }
 0x4a9   :  { %v2219_v55 = vmul.f32 %v8611_v25, %v2218_v29  ;;  %v2326_v25 = vld [vmem:[#allocation4 + $0x2f8] sm:$0xff]  ;;  %v2325_v29 = vld [vmem:[#allocation4 + $0x2f0] sm:$0xff] }
 0x4ab   :  { %v9062_v30 = vadd.f32 %v2219_v55, %v2214_v28  ;;  %v7264_v28 = vpack.c.bf16 %v2318_v23, %v2309_v22  ;;  %v2334_v55 = vld [vmem:[#allocation4 + $0x338] sm:$0xff]  ;;  %v2416_v22 = vld [vmem:[#allocation4 + $0x5c8] sm:$0xff]  ;;  %v2425_v23 = vld [vmem:[#allocation4 + $0x610] sm:$0xff] }
 0x4ac   :  { %v7204_v37 = vpack.c.bf16 %v2334_v55, %v2325_v29  ;;  %v7222_v29 = vpack.c.bf16 %v2425_v23, %v2416_v22  ;;  %v2508_v22 = vld [vmem:[#allocation4 + $0x8a8] sm:$0xff]  ;;  %v2517_v23 = vld [vmem:[#allocation4 + $0x8f0] sm:$0xff] }
 0x4ad   :  { %2224 = vst [vmem:[#allocation10 + $0x20] sm:$0xff] %v9062_v30  ;;  %v2228_v31 = vadd.f32 1e-06, %v9062_v30 }
 0x4af   :  { %8616 = vlog2.f32 %v2228_v31  ;;  %v7202_v31 = vpack.c.bf16 %v2335_v26, %v2326_v25  ;;  %v2418_v25 = vld [vmem:[#allocation4 + $0x5d8] sm:$0xff]  ;;  %v2427_v26 = vld [vmem:[#allocation4 + $0x620] sm:$0xff] }
 0x4b0   :  { %v7286_v55 = vpack.c.bf16 %v2427_v26, %v2418_v25 }
 0x4b9   :  { %v8617_v63 = vpop.eup %8616 }
 0x4ba   :  { %v9066_v16 = vmul.f32 0.6931472, %v8617_v63  ;;  %v2346_v63 = vld [vmem:[#allocation4 + $0x398] sm:$0xff] }
 0x4bb   :  { %v7270_v41 = vpack.c.bf16 %v2355_v36, %v2346_v63 }
 0x4bc   :  { %2593 = vmatprep.mubr.f32.mxu1 %v9066_v16  ;;  %2664 = vmatprep.mubr.f32.mxu0 %v9066_v16 }
 0x4bd   :  { %2594 = vmatmul.mubr.f32.vlgmr.msra.gmra.mrb[14].mxu1 %v9062_v30  ;;  %2665 = vmatmul.mubr.f32.vlgmr.msra.gmra.mrb[16].mxu0 %v9062_v30 }
 0x4be   :  { %7185 = vmatpush1.bf16.msra.mxu1 %v7184_v38  ;;  %7249 = vmatpush1.bf16.msra.mxu0 %v7248_v39  ;;  %v2343_v38 = vld [vmem:[#allocation4 + $0x380] sm:$0xff]  ;;  %v2352_v39 = vld [vmem:[#allocation4 + $0x3c8] sm:$0xff] }
 0x4bf   :  { %2735 = vmatprep.mubr.f32.mxu1 %v9066_v16  ;;  %2806 = vmatprep.mubr.f32.mxu0 %v9066_v16  ;;  %v7208_v45 = vpack.c.bf16 %v2352_v39, %v2343_v38  ;;  %v7226_v38 = vpack.c.bf16 %v2443_v33, %v2434_v32  ;;  %v7290_v39 = vpack.c.bf16 %v2445_v35, %v2436_v34  ;;  %v2239_v35 = vld [vmem:[#allocation4 + $0x40] sm:$0xff] }
 0x4c0   :  { %7187 = vmatprep.subr.bf16.mxu1 %v7186_v54  ;;  %7251 = vmatprep.subr.bf16.mxu0 %v7250_v43  ;;  %v2371_v54 = vld [vmem:[#allocation4 + $0x460] sm:$0xff]  ;;  %v2364_v43 = vld [vmem:[#allocation4 + $0x428] sm:$0xff] }
 0x4c1   :  { %v7210_v48 = vpack.c.bf16 %v2371_v54, %v2362_v42  ;;  %v7274_v49 = vpack.c.bf16 %v2373_v44, %v2364_v43  ;;  %v2454_v42 = vld [vmem:[#allocation4 + $0x6f8] sm:$0xff]  ;;  %v2463_v54 = vld [vmem:[#allocation4 + $0x740] sm:$0xff] }
 0x4c2   :  { %7189 = vmatpush1.bf16.msra.mxu1 %v7188_v47  ;;  %7253 = vmatpush1.bf16.msra.mxu0 %v7252_v62  ;;  %v2361_v47 = vld [vmem:[#allocation4 + $0x410] sm:$0xff]  ;;  %v2370_v62 = vld [vmem:[#allocation4 + $0x458] sm:$0xff] }
 0x4c3   :  { %7191 = vmatprep.subr.bf16.mxu1 %v7190_v51  ;;  %7255 = vmatprep.subr.bf16.mxu0 %v7254_v52  ;;  %v2363_v51 = vld [vmem:[#allocation4 + $0x420] sm:$0xff]  ;;  %v2372_v52 = vld [vmem:[#allocation4 + $0x468] sm:$0xff]  ;;  %v7212_v59 = vpack.c.bf16 %v2370_v62, %v2361_v47  ;;  %v7230_v47 = vpack.c.bf16 %v2461_v58, %v2452_v10  ;;  %v7294_v62 = vpack.c.bf16 %v2463_v54, %v2454_v42 }
 0x4c4   :  { %v7276_v60 = vpack.c.bf16 %v2372_v52, %v2363_v51  ;;  %v2470_v51 = vld [vmem:[#allocation4 + $0x778] sm:$0xff]  ;;  %v2479_v52 = vld [vmem:[#allocation4 + $0x7c0] sm:$0xff]  ;;  %v2428_v10 = vld [vmem:[#allocation4 + $0x628] sm:$0xff] }
 0x4c5   :  { %v2275_v54 = vld [vmem:[#allocation4 + $0x160] sm:$0xff] }
 0x4c6   :  { %7193 = vmatpush1.bf16.msra.mxu1 %v7192_v0  ;;  %7257 = vmatpush1.bf16.msra.mxu0 %v7256_v1  ;;  %v2379_v0 = vld [vmem:[#allocation4 + $0x4a0] sm:$0xff]  ;;  %v2388_v1 = vld [vmem:[#allocation4 + $0x4e8] sm:$0xff] }
 0x4c7   :  { %7195 = vmatprep.subr.bf16.mxu1 %v7194_v3  ;;  %7259 = vmatprep.subr.bf16.mxu0 %v7258_v6  ;;  %v2381_v3 = vld [vmem:[#allocation4 + $0x4b0] sm:$0xff]  ;;  %v2390_v6 = vld [vmem:[#allocation4 + $0x4f8] sm:$0xff]  ;;  %v7216_v11 = vpack.c.bf16 %v2388_v1, %v2379_v0  ;;  %v7234_v0 = vpack.c.bf16 %v2479_v52, %v2470_v51  ;;  %v7298_v1 = vpack.c.bf16 %v2481_v61, %v2472_v53  ;;  %v2464_v51 = vld [vmem:[#allocation4 + $0x748] sm:$0xff] }
 0x4c8   :  { %v7280_v12 = vpack.c.bf16 %v2390_v6, %v2381_v3  ;;  %v2488_v3 = vld [vmem:[#allocation4 + $0x808] sm:$0xff]  ;;  %v2497_v6 = vld [vmem:[#allocation4 + $0x850] sm:$0xff] }
 0x4c9   :  { %v2320_v61 = vld [vmem:[#allocation4 + $0x2c8] sm:$0xff] }
 0x4ca   :  { %7197 = vmatpush1.bf16.msra.mxu1 %v7196_v13  ;;  %7261 = vmatpush1.bf16.msra.mxu0 %v7260_v14  ;;  %v2397_v13 = vld [vmem:[#allocation4 + $0x530] sm:$0xff]  ;;  %v2406_v14 = vld [vmem:[#allocation4 + $0x578] sm:$0xff] }
 0x4cb   :  { %7199 = vmatprep.subr.bf16.mxu1 %v7198_v20  ;;  %7263 = vmatprep.subr.bf16.mxu0 %v7262_v21  ;;  %v2399_v20 = vld [vmem:[#allocation4 + $0x540] sm:$0xff]  ;;  %v2408_v21 = vld [vmem:[#allocation4 + $0x588] sm:$0xff]  ;;  %v7220_v24 = vpack.c.bf16 %v2406_v14, %v2397_v13  ;;  %v7238_v13 = vpack.c.bf16 %v2497_v6, %v2488_v3  ;;  %v7302_v14 = vpack.c.bf16 %v2499_v8, %v2490_v7 }
 0x4cc   :  { %v7284_v50 = vpack.c.bf16 %v2408_v21, %v2399_v20  ;;  %v2506_v20 = vld [vmem:[#allocation4 + $0x898] sm:$0xff]  ;;  %v2515_v21 = vld [vmem:[#allocation4 + $0x8e0] sm:$0xff]  ;;  %v2356_v8 = vld [vmem:[#allocation4 + $0x3e8] sm:$0xff] }
 0x4cd   :  { %v2347_v7 = vld [vmem:[#allocation4 + $0x3a0] sm:$0xff] }
 0x4ce   :  { %7201 = vmatpush1.bf16.msra.mxu1 %v7200_v27  ;;  %7265 = vmatpush1.bf16.msra.mxu0 %v7264_v28  ;;  %v2415_v27 = vld [vmem:[#allocation4 + $0x5c0] sm:$0xff]  ;;  %v2424_v28 = vld [vmem:[#allocation4 + $0x608] sm:$0xff] }
 0x4cf   :  { %7203 = vmatprep.subr.bf16.mxu1 %v7202_v31  ;;  %7267 = vmatprep.subr.bf16.mxu0 %v7266_v4  ;;  %v2417_v31 = vld [vmem:[#allocation4 + $0x5d0] sm:$0xff]  ;;  %v2426_v4 = vld [vmem:[#allocation4 + $0x618] sm:$0xff]  ;;  %v7224_v63 = vpack.c.bf16 %v2424_v28, %v2415_v27  ;;  %v7306_v27 = vpack.c.bf16 %v2517_v23, %v2508_v22  ;;  %v2965_v23 = vld [vmem:[#allocation4 + $0x60] sm:$0xff] }
 0x4d0   :  { %v7288_v36 = vpack.c.bf16 %v2426_v4, %v2417_v31  ;;  %v2514_v28 = vld [vmem:[#allocation4 + $0x8d8] sm:$0xff]  ;;  %v2383_v31 = vld [vmem:[#allocation4 + $0x4c0] sm:$0xff]  ;;  %v2392_v4 = vld [vmem:[#allocation4 + $0x508] sm:$0xff] }
 0x4d1   :  { %v7310_v34 = vpack.c.bf16 %v2392_v4, %v2383_v31  ;;  %v2981_v31 = vld [vmem:[#allocation4 + $0xe0] sm:$0xff]  ;;  %v2974_v4 = vld [vmem:[#allocation4 + $0xa8] sm:$0xff] }
 0x4d2   :  { %7205 = vmatpush1.bf16.msra.mxu1 %v7204_v37  ;;  %7269 = vmatpush1.bf16.msra.mxu0 %v7268_v17  ;;  %v2433_v37 = vld [vmem:[#allocation4 + $0x650] sm:$0xff]  ;;  %v2442_v17 = vld [vmem:[#allocation4 + $0x698] sm:$0xff] }
 0x4d3   :  { %7207 = vmatprep.subr.bf16.mxu1 %v7206_v40  ;;  %7271 = vmatprep.subr.bf16.mxu0 %v7270_v41  ;;  %v2435_v40 = vld [vmem:[#allocation4 + $0x660] sm:$0xff]  ;;  %v2444_v41 = vld [vmem:[#allocation4 + $0x6a8] sm:$0xff]  ;;  %v7228_v43 = vpack.c.bf16 %v2442_v17, %v2433_v37  ;;  %v2410_v37 = vld [vmem:[#allocation4 + $0x598] sm:$0xff] }
 0x4d4   :  { %v7292_v44 = vpack.c.bf16 %v2444_v41, %v2435_v40  ;;  %v2266_v40 = vld [vmem:[#allocation4 + $0x118] sm:$0xff]  ;;  %v2419_v41 = vld [vmem:[#allocation4 + $0x5e0] sm:$0xff] }
 0x4d5   :  { %v7318_v42 = vpack.c.bf16 %v2428_v10, %v2419_v41  ;;  %v3001_v10 = vld [vmem:[#allocation4 + $0x180] sm:$0xff] }
 0x4d6   :  { %7209 = vmatpush1.bf16.msra.mxu1 %v7208_v45  ;;  %7273 = vmatpush1.bf16.msra.mxu0 %v7272_v46  ;;  %v2451_v45 = vld [vmem:[#allocation4 + $0x6e0] sm:$0xff]  ;;  %v2460_v46 = vld [vmem:[#allocation4 + $0x728] sm:$0xff] }
 0x4d7   :  { %7211 = vmatprep.subr.bf16.mxu1 %v7210_v48  ;;  %7275 = vmatprep.subr.bf16.mxu0 %v7274_v49  ;;  %v2453_v48 = vld [vmem:[#allocation4 + $0x6f0] sm:$0xff]  ;;  %v2462_v49 = vld [vmem:[#allocation4 + $0x738] sm:$0xff]  ;;  %v7232_v56 = vpack.c.bf16 %v2460_v46, %v2451_v45 }
 0x4d8   :  { %v7296_v57 = vpack.c.bf16 %v2462_v49, %v2453_v48  ;;  %v2446_v45 = vld [vmem:[#allocation4 + $0x6b8] sm:$0xff]  ;;  %v2455_v49 = vld [vmem:[#allocation4 + $0x700] sm:$0xff] }
 0x4d9   :  { %v2302_v48 = vld [vmem:[#allocation4 + $0x238] sm:$0xff]  ;;  %v7326_v53 = vpack.c.bf16 %v2464_v51, %v2455_v49  ;;  %v3019_v51 = vld [vmem:[#allocation4 + $0x210] sm:$0xff] }
 0x4da   :  { %7213 = vmatpush1.bf16.msra.mxu1 %v7212_v59  ;;  %7277 = vmatpush1.bf16.msra.mxu0 %v7276_v60  ;;  %v2469_v59 = vld [vmem:[#allocation4 + $0x770] sm:$0xff]  ;;  %v2478_v60 = vld [vmem:[#allocation4 + $0x7b8] sm:$0xff] }
 0x4db   :  { %7215 = vmatprep.subr.bf16.mxu1 %v7214_v2  ;;  %7279 = vmatprep.subr.bf16.mxu0 %v7278_v5  ;;  %v2471_v2 = vld [vmem:[#allocation4 + $0x780] sm:$0xff]  ;;  %v2480_v5 = vld [vmem:[#allocation4 + $0x7c8] sm:$0xff]  ;;  %v7236_v18 = vpack.c.bf16 %v2478_v60, %v2469_v59 }
 0x4dc   :  { %v7300_v9 = vpack.c.bf16 %v2480_v5, %v2471_v2  ;;  %v2491_v2 = vld [vmem:[#allocation4 + $0x820] sm:$0xff]  ;;  %v2500_v5 = vld [vmem:[#allocation4 + $0x868] sm:$0xff] }
 0x4dd   :  { %v7334_v6 = vpack.c.bf16 %v2500_v5, %v2491_v2  ;;  %v3037_v5 = vld [vmem:[#allocation4 + $0x2a0] sm:$0xff] }
 0x4de   :  { %7217 = vmatpush1.bf16.msra.mxu1 %v7216_v11  ;;  %7281 = vmatpush1.bf16.msra.mxu0 %v7280_v12  ;;  %v2487_v11 = vld [vmem:[#allocation4 + $0x800] sm:$0xff]  ;;  %v2496_v12 = vld [vmem:[#allocation4 + $0x848] sm:$0xff] }
 0x4df   :  { %7219 = vmatprep.subr.bf16.mxu1 %v7218_v15  ;;  %7283 = vmatprep.subr.bf16.mxu0 %v7282_v19  ;;  %v2489_v15 = vld [vmem:[#allocation4 + $0x810] sm:$0xff]  ;;  %v2498_v19 = vld [vmem:[#allocation4 + $0x858] sm:$0xff]  ;;  %v7240_v25 = vpack.c.bf16 %v2496_v12, %v2487_v11  ;;  %v7336_v11 = vpack.c.bf16 %v2356_v8, %v2347_v7 }
 0x4e0   :  { %v7304_v26 = vpack.c.bf16 %v2498_v19, %v2489_v15  ;;  %v2954_v19 = vld [vmem:[#allocation4 + $0x8] sm:$0xff] }
 0x4e2   :  { %7221 = vmatpush1.bf16.msra.mxu1 %v7220_v24  ;;  %7285 = vmatpush1.bf16.msra.mxu0 %v7284_v50  ;;  %v2505_v24 = vld [vmem:[#allocation4 + $0x890] sm:$0xff]  ;;  %v7242_v50 = vpack.c.bf16 %v2515_v21, %v2506_v20  ;;  %v2956_v21 = vld [vmem:[#allocation4 + $0x18] sm:$0xff] }
 0x4e3   :  { %7223 = vmatprep.subr.bf16.mxu1 %v7222_v29  ;;  %7287 = vmatprep.subr.bf16.mxu0 %v7286_v55  ;;  %v2507_v29 = vld [vmem:[#allocation4 + $0x8a0] sm:$0xff]  ;;  %v2516_v55 = vld [vmem:[#allocation4 + $0x8e8] sm:$0xff]  ;;  %v7244_v32 = vpack.c.bf16 %v2514_v28, %v2505_v24  ;;  %v2963_v20 = vld [vmem:[#allocation4 + $0x50] sm:$0xff]  ;;  %v7406_v24 = vpack.c.bf16 %v2965_v23, %v2956_v21 }
 0x4e4   :  { %v7308_v33 = vpack.c.bf16 %v2516_v55, %v2507_v29  ;;  %v7342_v22 = vpack.c.bf16 %v2963_v20, %v2954_v19  ;;  %v2964_v28 = vld [vmem:[#allocation4 + $0x58] sm:$0xff]  ;;  %v3055_v19 = vld [vmem:[#allocation4 + $0x330] sm:$0xff] }
 0x4e5   :  { %v2972_v55 = vld [vmem:[#allocation4 + $0x98] sm:$0xff]  ;;  %v3043_v20 = vld [vmem:[#allocation4 + $0x2d0] sm:$0xff] }
 0x4e6   :  { %7225 = vmatpush1.bf16.msra.mxu1 %v7224_v63  ;;  %7289 = vmatpush1.bf16.msra.mxu0 %v7288_v36  ;;  %v2248_v63 = vld [vmem:[#allocation4 + $0x88] sm:$0xff]  ;;  %v2401_v36 = vld [vmem:[#allocation4 + $0x550] sm:$0xff]  ;;  %v3052_v21 = vld [vmem:[#allocation4 + $0x318] sm:$0xff] }
 0x4e7   :  { %7227 = vmatprep.subr.bf16.mxu1 %v7226_v38  ;;  %7291 = vmatprep.subr.bf16.mxu0 %v7290_v39  ;;  %v7312_v17 = vpack.c.bf16 %v2248_v63, %v2239_v35  ;;  %v7314_v38 = vpack.c.bf16 %v2410_v37, %v2401_v36  ;;  %v2257_v39 = vld [vmem:[#allocation4 + $0xd0] sm:$0xff]  ;;  %v2973_v36 = vld [vmem:[#allocation4 + $0xa0] sm:$0xff]  ;;  %v2982_v37 = vld [vmem:[#allocation4 + $0xe8] sm:$0xff]  ;;  %v7364_v23 = vpack.c.bf16 %v3052_v21, %v3043_v20 }
 0x4e8   :  { %v7316_v58 = vpack.c.bf16 %v2266_v40, %v2257_v39  ;;  %v2999_v39 = vld [vmem:[#allocation4 + $0x170] sm:$0xff]  ;;  %v2992_v40 = vld [vmem:[#allocation4 + $0x138] sm:$0xff] }
 0x4ea   :  { %7229 = vmatpush1.bf16.msra.mxu1 %v7228_v43  ;;  %7293 = vmatpush1.bf16.msra.mxu0 %v7292_v44  ;;  %v2284_v43 = vld [vmem:[#allocation4 + $0x1a8] sm:$0xff]  ;;  %v2437_v44 = vld [vmem:[#allocation4 + $0x670] sm:$0xff] }
 0x4eb   :  { %7231 = vmatprep.subr.bf16.mxu1 %v7230_v47  ;;  %7295 = vmatprep.subr.bf16.mxu0 %v7294_v62  ;;  %v7320_v46 = vpack.c.bf16 %v2284_v43, %v2275_v54  ;;  %v7322_v47 = vpack.c.bf16 %v2446_v45, %v2437_v44  ;;  %v2293_v62 = vld [vmem:[#allocation4 + $0x1f0] sm:$0xff]  ;;  %v7414_v54 = vpack.c.bf16 %v3001_v10, %v2992_v40  ;;  %v3000_v45 = vld [vmem:[#allocation4 + $0x178] sm:$0xff] }
 0x4ec   :  { %v7324_v52 = vpack.c.bf16 %v2302_v48, %v2293_v62  ;;  %v2991_v44 = vld [vmem:[#allocation4 + $0x130] sm:$0xff]  ;;  %v3017_v62 = vld [vmem:[#allocation4 + $0x200] sm:$0xff]  ;;  %v3010_v48 = vld [vmem:[#allocation4 + $0x1c8] sm:$0xff] }
 0x4ed   :  { %v3088_v40 = vld [vmem:[#allocation4 + $0x438] sm:$0xff] }
 0x4ee   :  { %7233 = vmatpush1.bf16.msra.mxu1 %v7232_v56  ;;  %7297 = vmatpush1.bf16.msra.mxu0 %v7296_v57  ;;  %v2473_v56 = vld [vmem:[#allocation4 + $0x790] sm:$0xff]  ;;  %v2482_v57 = vld [vmem:[#allocation4 + $0x7d8] sm:$0xff] }
 0x4ef   :  { %7235 = vmatprep.subr.bf16.mxu1 %v7234_v0  ;;  %7299 = vmatprep.subr.bf16.mxu0 %v7298_v1  ;;  %v7330_v60 = vpack.c.bf16 %v2482_v57, %v2473_v56  ;;  %v2329_v0 = vld [vmem:[#allocation4 + $0x310] sm:$0xff]  ;;  %v2338_v1 = vld [vmem:[#allocation4 + $0x358] sm:$0xff]  ;;  %v3009_v56 = vld [vmem:[#allocation4 + $0x1c0] sm:$0xff] }
 0x4f0   :  { %v7332_v3 = vpack.c.bf16 %v2338_v1, %v2329_v0  ;;  %v3018_v57 = vld [vmem:[#allocation4 + $0x208] sm:$0xff]  ;;  %v3035_v0 = vld [vmem:[#allocation4 + $0x290] sm:$0xff]  ;;  %v3028_v1 = vld [vmem:[#allocation4 + $0x258] sm:$0xff] }
 0x4f1   :  { %v7422_v7 = vpack.c.bf16 %v3037_v5, %v3028_v1  ;;  %v3124_v1 = vld [vmem:[#allocation4 + $0x558] sm:$0xff] }
 0x4f2   :  { %7237 = vmatpush1.bf16.msra.mxu1 %v7236_v18  ;;  %7301 = vmatpush1.bf16.msra.mxu0 %v7300_v9  ;;  %v2509_v18 = vld [vmem:[#allocation4 + $0x8b0] sm:$0xff]  ;;  %v2518_v9 = vld [vmem:[#allocation4 + $0x8f8] sm:$0xff] }
 0x4f3   :  { %7239 = vmatprep.subr.bf16.mxu1 %v7238_v13  ;;  %7303 = vmatprep.subr.bf16.mxu0 %v7302_v14  ;;  %v7338_v12 = vpack.c.bf16 %v2518_v9, %v2509_v18  ;;  %v2365_v13 = vld [vmem:[#allocation4 + $0x430] sm:$0xff]  ;;  %v2374_v14 = vld [vmem:[#allocation4 + $0x478] sm:$0xff] }
 0x4f4   :  { %v7340_v15 = vpack.c.bf16 %v2374_v14, %v2365_v13  ;;  %v3027_v18 = vld [vmem:[#allocation4 + $0x250] sm:$0xff]  ;;  %v3036_v9 = vld [vmem:[#allocation4 + $0x298] sm:$0xff]  ;;  %v3053_v13 = vld [vmem:[#allocation4 + $0x320] sm:$0xff] }
 0x4f5   :  { %v3046_v14 = vld [vmem:[#allocation4 + $0x2e8] sm:$0xff] }
 0x4f6   :  { %7241 = vmatpush1.bf16.msra.mxu1 %v7240_v25  ;;  %7305 = vmatpush1.bf16.msra.mxu0 %v7304_v26  ;;  %v2953_v25 = vld [vmem:[#allocation4] sm:$0xff]  ;;  %v2962_v26 = vld [vmem:[#allocation4 + $0x48] sm:$0xff] }
 0x4f7   :  { %7243 = vmatprep.subr.bf16.mxu1 %v7242_v50  ;;  %7307 = vmatprep.subr.bf16.mxu0 %v7306_v27  ;;  %v7344_v50 = vpack.c.bf16 %v2962_v26, %v2953_v25  ;;  %v2955_v27 = vld [vmem:[#allocation4 + $0x10] sm:$0xff]  ;;  %v3045_v25 = vld [vmem:[#allocation4 + $0x2e0] sm:$0xff]  ;;  %v3054_v26 = vld [vmem:[#allocation4 + $0x328] sm:$0xff] }
 0x4f8   :  { %v7408_v29 = vpack.c.bf16 %v2964_v28, %v2955_v27  ;;  %v3071_v27 = vld [vmem:[#allocation4 + $0x3b0] sm:$0xff]  ;;  %v3064_v28 = vld [vmem:[#allocation4 + $0x378] sm:$0xff] }
 0x4fa   :  { %7245 = vmatpush1.bf16.msra.mxu1 %v7244_v32  ;;  %7309 = vmatpush1.bf16.msra.mxu0 %v7308_v33  ;;  %v2983_v32 = vld [vmem:[#allocation4 + $0xf0] sm:$0xff] }
 0x4fb   :  { %7311 = vmatprep.subr.bf16.mxu1 %v7310_v34  ;;  %7343 = vmatprep.subr.bf16.mxu0 %v7342_v22  ;;  %v2971_v33 = vld [vmem:[#allocation4 + $0x90] sm:$0xff]  ;;  %v2980_v34 = vld [vmem:[#allocation4 + $0xd8] sm:$0xff]  ;;  %v7410_v35 = vpack.c.bf16 %v2983_v32, %v2974_v4  ;;  %v7426_v22 = vpack.c.bf16 %v3055_v19, %v3046_v14  ;;  %v3070_v4 = vld [vmem:[#allocation4 + $0x3a8] sm:$0xff] }
 0x4fc   :  { %v7348_v63 = vpack.c.bf16 %v2980_v34, %v2971_v33  ;;  %v3063_v33 = vld [vmem:[#allocation4 + $0x370] sm:$0xff]  ;;  %v3072_v34 = vld [vmem:[#allocation4 + $0x3b8] sm:$0xff]  ;;  %v3142_v14 = vld [vmem:[#allocation4 + $0x5e8] sm:$0xff] }
 0x4fd   :  { %2736 = vmatmul.mubr.f32.vlgmr.msra.gmra.mrb[16].mxu1 %v9062_v30  ;;  %2807 = vmatmul.mubr.f32.vlgmr.msra.gmra.mrb[18].mxu0 %v9062_v30 }
 0x4fe   :  { %7313 = vmatpush3.bf16.msra.mxu1 %v7312_v17  ;;  %2877 = vmatprep.mubr.f32.mxu1 %v9066_v16  ;;  %v2311_v16 = vld [vmem:[#allocation4 + $0x280] sm:$0xff]  ;;  %v7412_v17 = vpack.c.bf16 %v2982_v37, %v2973_v36  ;;  %v3082_v37 = vld [vmem:[#allocation4 + $0x408] sm:$0xff] }
 0x4ff   :  { %7315 = vmatprep.subr.bf16.mxu1 %v7314_v38  ;;  %v7328_v59 = vpack.c.bf16 %v2320_v61, %v2311_v16  ;;  %7345 = vmatpush1.bf16.msra.mxu0 %v7344_v50  ;;  %v2990_v38 = vld [vmem:[#allocation4 + $0x128] sm:$0xff]  ;;  %v7418_v16 = vpack.c.bf16 %v3019_v51, %v3010_v48  ;;  %v3089_v36 = vld [vmem:[#allocation4 + $0x440] sm:$0xff] }
 0x500   :  { %v7350_v41 = vpack.c.bf16 %v2999_v39, %v2990_v38  ;;  %v3062_v50 = vld [vmem:[#allocation4 + $0x368] sm:$0xff]  ;;  %v3091_v38 = vld [vmem:[#allocation4 + $0x450] sm:$0xff] }
 0x501   :  { %v3079_v39 = vld [vmem:[#allocation4 + $0x3f0] sm:$0xff]  ;;  %v3106_v48 = vld [vmem:[#allocation4 + $0x4c8] sm:$0xff] }
 0x502   :  { %7317 = vmatpush3.bf16.msra.mxu1 %v7316_v58  ;;  %v2989_v58 = vld [vmem:[#allocation4 + $0x120] sm:$0xff]  ;;  %v7372_v10 = vpack.c.bf16 %v3088_v40, %v3079_v39  ;;  %v3178_v40 = vld [vmem:[#allocation4 + $0x708] sm:$0xff] }
 0x503   :  { %7319 = vmatprep.subr.bf16.mxu1 %v7318_v42  ;;  %v2998_v42 = vld [vmem:[#allocation4 + $0x168] sm:$0xff]  ;;  %v3169_v39 = vld [vmem:[#allocation4 + $0x6c0] sm:$0xff] }
 0x504   :  { %v7352_v43 = vpack.c.bf16 %v2998_v42, %v2989_v58  ;;  %v3081_v58 = vld [vmem:[#allocation4 + $0x400] sm:$0xff]  ;;  %v3090_v42 = vld [vmem:[#allocation4 + $0x448] sm:$0xff] }
 0x506   :  { %7321 = vmatpush3.bf16.msra.mxu1 %v7320_v46  ;;  %v7416_v46 = vpack.c.bf16 %v3000_v45, %v2991_v44  ;;  %v3107_v44 = vld [vmem:[#allocation4 + $0x4d0] sm:$0xff]  ;;  %v3100_v45 = vld [vmem:[#allocation4 + $0x498] sm:$0xff] }
 0x507   :  { %7323 = vmatprep.subr.bf16.mxu1 %v7322_v47  ;;  %v3008_v47 = vld [vmem:[#allocation4 + $0x1b8] sm:$0xff] }
 0x508   :  { %v7354_v49 = vpack.c.bf16 %v3017_v62, %v3008_v47  ;;  %v3109_v47 = vld [vmem:[#allocation4 + $0x4e0] sm:$0xff] }
 0x509   :  { %v3097_v62 = vld [vmem:[#allocation4 + $0x480] sm:$0xff] }
 0x50a   :  { %7325 = vmatpush3.bf16.msra.mxu1 %v7324_v52  ;;  %v3007_v52 = vld [vmem:[#allocation4 + $0x1b0] sm:$0xff]  ;;  %v7376_v51 = vpack.c.bf16 %v3106_v48, %v3097_v62 }
 0x50b   :  { %7327 = vmatprep.subr.bf16.mxu1 %v7326_v53  ;;  %v3016_v53 = vld [vmem:[#allocation4 + $0x1f8] sm:$0xff]  ;;  %v3187_v48 = vld [vmem:[#allocation4 + $0x750] sm:$0xff] }
 0x50c   :  { %v7356_v61 = vpack.c.bf16 %v3016_v53, %v3007_v52  ;;  %v3099_v52 = vld [vmem:[#allocation4 + $0x490] sm:$0xff]  ;;  %v3108_v53 = vld [vmem:[#allocation4 + $0x4d8] sm:$0xff] }
 0x50e   :  { %7329 = vmatpush3.bf16.msra.mxu1 %v7328_v59  ;;  %v7420_v59 = vpack.c.bf16 %v3018_v57, %v3009_v56  ;;  %v3125_v56 = vld [vmem:[#allocation4 + $0x560] sm:$0xff]  ;;  %v3118_v57 = vld [vmem:[#allocation4 + $0x528] sm:$0xff] }
 0x50f   :  { %7331 = vmatprep.subr.bf16.mxu1 %v7330_v60  ;;  %v3026_v60 = vld [vmem:[#allocation4 + $0x248] sm:$0xff] }
 0x510   :  { %v7358_v2 = vpack.c.bf16 %v3035_v0, %v3026_v60  ;;  %v3127_v60 = vld [vmem:[#allocation4 + $0x570] sm:$0xff] }
 0x511   :  { %v3115_v0 = vld [vmem:[#allocation4 + $0x510] sm:$0xff] }
 0x512   :  { %7333 = vmatpush3.bf16.msra.mxu1 %v7332_v3  ;;  %v3025_v3 = vld [vmem:[#allocation4 + $0x240] sm:$0xff]  ;;  %v7380_v5 = vpack.c.bf16 %v3124_v1, %v3115_v0 }
 0x513   :  { %7335 = vmatprep.subr.bf16.mxu1 %v7334_v6  ;;  %v3034_v6 = vld [vmem:[#allocation4 + $0x288] sm:$0xff]  ;;  %v3205_v0 = vld [vmem:[#allocation4 + $0x7e0] sm:$0xff] }
 0x514   :  { %v7360_v8 = vpack.c.bf16 %v3034_v6, %v3025_v3  ;;  %v3117_v3 = vld [vmem:[#allocation4 + $0x520] sm:$0xff]  ;;  %v3126_v6 = vld [vmem:[#allocation4 + $0x568] sm:$0xff] }
 0x516   :  { %7337 = vmatpush3.bf16.msra.mxu1 %v7336_v11  ;;  %v7424_v11 = vpack.c.bf16 %v3036_v9, %v3027_v18  ;;  %v3143_v18 = vld [vmem:[#allocation4 + $0x5f0] sm:$0xff]  ;;  %v3136_v9 = vld [vmem:[#allocation4 + $0x5b8] sm:$0xff] }
 0x517   :  { %7339 = vmatprep.subr.bf16.mxu1 %v7338_v12  ;;  %v3044_v12 = vld [vmem:[#allocation4 + $0x2d8] sm:$0xff] }
 0x51a   :  { %7341 = vmatpush3.bf16.msra.mxu1 %v7340_v15  ;;  %v7362_v15 = vpack.c.bf16 %v3053_v13, %v3044_v12  ;;  %v3145_v12 = vld [vmem:[#allocation4 + $0x600] sm:$0xff] }
 0x51b   :  { %7407 = vmatprep.subr.bf16.mxu1 %v7406_v24  ;;  %v7428_v24 = vpack.c.bf16 %v3054_v26, %v3045_v25  ;;  %v3133_v13 = vld [vmem:[#allocation4 + $0x5a0] sm:$0xff]  ;;  %v7446_v20 = vpack.c.bf16 %v3145_v12, %v3136_v9  ;;  %v3235_v9 = vld [vmem:[#allocation4 + $0x8d0] sm:$0xff] }
 0x51c   :  { %v7384_v21 = vpack.c.bf16 %v3142_v14, %v3133_v13  ;;  %v3223_v13 = vld [vmem:[#allocation4 + $0x870] sm:$0xff]  ;;  %v3232_v14 = vld [vmem:[#allocation4 + $0x8b8] sm:$0xff] }
 0x51d   :  { %2878 = vmatmul.mubr.f32.vlgmr.msra.gmra.mrb[18].mxu1 %v9062_v30  ;;  %v7346_v30 = vpack.c.bf16 %v2981_v31, %v2972_v55  ;;  %v3073_v55 = vld [vmem:[#allocation4 + $0x3c0] sm:$0xff] }
 0x51e   :  { %7409 = vmatpush1.bf16.msra.mxu1 %v7408_v29  ;;  %v7366_v29 = vpack.c.bf16 %v3071_v27, %v3062_v50  ;;  %v3061_v31 = vld [vmem:[#allocation4 + $0x360] sm:$0xff]  ;;  %v3152_v50 = vld [vmem:[#allocation4 + $0x638] sm:$0xff] }
 0x51f   :  { %7347 = vmatprep.subr.bf16.mxu0 %v7346_v30  ;;  %7411 = vmatprep.subr.bf16.mxu1 %v7410_v35  ;;  %v7430_v30 = vpack.c.bf16 %v3073_v55, %v3064_v28  ;;  %v7368_v32 = vpack.c.bf16 %v3070_v4, %v3061_v31  ;;  %v7432_v35 = vpack.c.bf16 %v3072_v34, %v3063_v33  ;;  %v3161_v27 = vld [vmem:[#allocation4 + $0x680] sm:$0xff]  ;;  %v3154_v28 = vld [vmem:[#allocation4 + $0x648] sm:$0xff]  ;;  %v3163_v55 = vld [vmem:[#allocation4 + $0x690] sm:$0xff] }
 0x520   :  { %7349 = vmatpush1.bf16.msra.mxu0 %v7348_v63  ;;  %v3080_v63 = vld [vmem:[#allocation4 + $0x3f8] sm:$0xff]  ;;  %v3151_v31 = vld [vmem:[#allocation4 + $0x630] sm:$0xff]  ;;  %v7450_v4 = vpack.c.bf16 %v3163_v55, %v3154_v28  ;;  %v3162_v34 = vld [vmem:[#allocation4 + $0x688] sm:$0xff] }
 0x521   :  { %7351 = vmatprep.subr.bf16.mxu0 %v7350_v41  ;;  %v7434_v41 = vpack.c.bf16 %v3091_v38, %v3082_v37  ;;  %v3172_v37 = vld [vmem:[#allocation4 + $0x6d8] sm:$0xff]  ;;  %v3181_v38 = vld [vmem:[#allocation4 + $0x720] sm:$0xff] }
 0x522   :  { %7413 = vmatpush1.bf16.msra.mxu1 %v7412_v17  ;;  %v7370_v17 = vpack.c.bf16 %v3089_v36, %v3080_v63  ;;  %v3170_v63 = vld [vmem:[#allocation4 + $0x6c8] sm:$0xff]  ;;  %v3179_v36 = vld [vmem:[#allocation4 + $0x710] sm:$0xff]  ;;  %v2960_v28 = vld [vmem:[#allocation4 + $0x38] sm:$0xff] }
 0x523   :  { %7415 = vmatprep.subr.bf16.mxu1 %v7414_v54  ;;  %v7436_v54 = vpack.c.bf16 %v3090_v42, %v3081_v58  ;;  %v3171_v58 = vld [vmem:[#allocation4 + $0x6d0] sm:$0xff]  ;;  %v3180_v42 = vld [vmem:[#allocation4 + $0x718] sm:$0xff]  ;;  %v2969_v55 = vld [vmem:[#allocation4 + $0x80] sm:$0xff] }
 0x524   :  { %7353 = vmatpush1.bf16.msra.mxu0 %v7352_v43  ;;  %v3098_v43 = vld [vmem:[#allocation4 + $0x488] sm:$0xff] }
 0x525   :  { %7355 = vmatprep.subr.bf16.mxu0 %v7354_v49  ;;  %v7438_v49 = vpack.c.bf16 %v3109_v47, %v3100_v45  ;;  %v3190_v45 = vld [vmem:[#allocation4 + $0x768] sm:$0xff] }
 0x526   :  { %7417 = vmatpush1.bf16.msra.mxu1 %v7416_v46  ;;  %v7374_v46 = vpack.c.bf16 %v3107_v44, %v3098_v43  ;;  %v7456_v43 = vpack.c.bf16 %v3180_v42, %v3171_v58  ;;  %v3197_v44 = vld [vmem:[#allocation4 + $0x7a0] sm:$0xff] }
 0x527   :  { %7419 = vmatprep.subr.bf16.mxu1 %v7418_v16  ;;  %v7440_v16 = vpack.c.bf16 %v3108_v53, %v3099_v52  ;;  %v3198_v53 = vld [vmem:[#allocation4 + $0x7a8] sm:$0xff] }
 0x528   :  { %7357 = vmatpush1.bf16.msra.mxu0 %v7356_v61  ;;  %v3116_v61 = vld [vmem:[#allocation4 + $0x518] sm:$0xff] }
 0x529   :  { %7359 = vmatprep.subr.bf16.mxu0 %v7358_v2  ;;  %v7442_v2 = vpack.c.bf16 %v3127_v60, %v3118_v57  ;;  %v3217_v60 = vld [vmem:[#allocation4 + $0x840] sm:$0xff] }
 0x52a   :  { %7421 = vmatpush1.bf16.msra.mxu1 %v7420_v59  ;;  %v7378_v59 = vpack.c.bf16 %v3125_v56, %v3116_v61  ;;  %v3215_v61 = vld [vmem:[#allocation4 + $0x830] sm:$0xff] }
 0x52b   :  { %7423 = vmatprep.subr.bf16.mxu1 %v7422_v7  ;;  %v7444_v7 = vpack.c.bf16 %v3126_v6, %v3117_v3  ;;  %v3216_v3 = vld [vmem:[#allocation4 + $0x838] sm:$0xff] }
 0x52c   :  { %7361 = vmatpush1.bf16.msra.mxu0 %v7360_v8  ;;  %v3134_v8 = vld [vmem:[#allocation4 + $0x5a8] sm:$0xff]  ;;  %v3224_v6 = vld [vmem:[#allocation4 + $0x878] sm:$0xff] }
 0x52d   :  { %7363 = vmatprep.subr.bf16.mxu0 %v7362_v15 }
 0x52e   :  { %7425 = vmatpush1.bf16.msra.mxu1 %v7424_v11  ;;  %v7382_v11 = vpack.c.bf16 %v3143_v18, %v3134_v8  ;;  %v3226_v8 = vld [vmem:[#allocation4 + $0x888] sm:$0xff] }
 0x52f   :  { %7427 = vmatprep.subr.bf16.mxu1 %v7426_v22  ;;  %v3135_v22 = vld [vmem:[#allocation4 + $0x5b0] sm:$0xff] }
 0x530   :  { %7365 = vmatpush1.bf16.msra.mxu0 %v7364_v23  ;;  %v3144_v23 = vld [vmem:[#allocation4 + $0x5f8] sm:$0xff] }
 0x531   :  { %7367 = vmatprep.subr.bf16.mxu0 %v7366_v29  ;;  %v7386_v29 = vpack.c.bf16 %v3161_v27, %v3152_v50  ;;  %v2958_v50 = vld [vmem:[#allocation4 + $0x28] sm:$0xff]  ;;  %v2967_v27 = vld [vmem:[#allocation4 + $0x70] sm:$0xff] }
 0x532   :  { %7429 = vmatpush1.bf16.msra.mxu1 %v7428_v24  ;;  %v7448_v24 = vpack.c.bf16 %v3144_v23, %v3135_v22  ;;  %v3234_v22 = vld [vmem:[#allocation4 + $0x8c8] sm:$0xff]  ;;  %v7404_v23 = vpack.c.bf16 %v3232_v14, %v3223_v13 }
 0x533   :  { %7431 = vmatprep.subr.bf16.mxu1 %v7430_v30  ;;  %v3160_v30 = vld [vmem:[#allocation4 + $0x678] sm:$0xff] }
 0x534   :  { %7369 = vmatpush1.bf16.msra.mxu0 %v7368_v32  ;;  %v3153_v32 = vld [vmem:[#allocation4 + $0x640] sm:$0xff]  ;;  %v7388_v33 = vpack.c.bf16 %v3160_v30, %v3151_v31  ;;  %v7534_v31 = vpack.c.bf16 %v2969_v55, %v2960_v28  ;;  %v2520_v30 = vld [vmem:[#allocation8 + $0xd8] sm:$0xff] }
 0x535   :  { %7371 = vmatprep.subr.bf16.mxu0 %v7370_v17  ;;  %v7390_v17 = vpack.c.bf16 %v3179_v36, %v3170_v63  ;;  %v2522_v63 = vld [vmem:[#allocation8 + $0xe8] sm:$0xff] }
 0x536   :  { %7433 = vmatpush1.bf16.msra.mxu1 %v7432_v35  ;;  %v7452_v35 = vpack.c.bf16 %v3162_v34, %v3153_v32 }
 0x537   :  { %7435 = vmatprep.subr.bf16.mxu1 %v7434_v41  ;;  %v7454_v41 = vpack.c.bf16 %v3181_v38, %v3172_v37 }
 0x538   :  { %7373 = vmatpush1.bf16.msra.mxu0 %v7372_v10  ;;  %v7392_v10 = vpack.c.bf16 %v3178_v40, %v3169_v39 }
 0x539   :  { %7375 = vmatprep.subr.bf16.mxu0 %v7374_v46  ;;  %v3199_v46 = vld [vmem:[#allocation4 + $0x7b0] sm:$0xff] }
 0x53a   :  { %7437 = vmatpush1.bf16.msra.mxu1 %v7436_v54  ;;  %v3188_v54 = vld [vmem:[#allocation4 + $0x758] sm:$0xff]  ;;  %v7458_v62 = vpack.c.bf16 %v3199_v46, %v3190_v45 }
 0x53b   :  { %7439 = vmatprep.subr.bf16.mxu1 %v7438_v49  ;;  %v7394_v47 = vpack.c.bf16 %v3197_v44, %v3188_v54  ;;  %v3196_v49 = vld [vmem:[#allocation4 + $0x798] sm:$0xff]  ;;  %v2525_v54 = vld [vmem:[#allocation8 + $0x100] sm:$0xff] }
 0x53c   :  { %7377 = vmatpush1.bf16.msra.mxu0 %v7376_v51  ;;  %v3189_v51 = vld [vmem:[#allocation4 + $0x760] sm:$0xff]  ;;  %v7396_v52 = vpack.c.bf16 %v3196_v49, %v3187_v48  ;;  %v8808_v49 = vld [vmem:[#allocation10 + $0x28] sm:$0xff] }
 0x53d   :  { %7379 = vmatprep.subr.bf16.mxu0 %v7378_v59  ;;  %v7460_v56 = vpack.c.bf16 %v3198_v53, %v3189_v51  ;;  %v3208_v59 = vld [vmem:[#allocation4 + $0x7f8] sm:$0xff] }
 0x53e   :  { %7441 = vmatpush1.bf16.msra.mxu1 %v7440_v16  ;;  %v3206_v16 = vld [vmem:[#allocation4 + $0x7e8] sm:$0xff]  ;;  %v7462_v1 = vpack.c.bf16 %v3217_v60, %v3208_v59  ;;  %v2526_v60 = vld [vmem:[#allocation8 + $0x108] sm:$0xff] }
 0x53f   :  { %7443 = vmatprep.subr.bf16.mxu1 %v7442_v2  ;;  %v7398_v57 = vpack.c.bf16 %v3215_v61, %v3206_v16  ;;  %v3214_v2 = vld [vmem:[#allocation4 + $0x828] sm:$0xff]  ;;  %v2523_v16 = vld [vmem:[#allocation8 + $0xf0] sm:$0xff] }
 0x540   :  { %7381 = vmatpush1.bf16.msra.mxu0 %v7380_v5  ;;  %v3207_v5 = vld [vmem:[#allocation4 + $0x7f0] sm:$0xff]  ;;  %v7400_v18 = vpack.c.bf16 %v3214_v2, %v3205_v0 }
 0x541   :  { %7383 = vmatprep.subr.bf16.mxu0 %v7382_v11  ;;  %v7464_v11 = vpack.c.bf16 %v3216_v3, %v3207_v5 }
 0x542   :  { %7445 = vmatpush1.bf16.msra.mxu1 %v7444_v7  ;;  %v3233_v7 = vld [vmem:[#allocation4 + $0x8c0] sm:$0xff] }
 0x543   :  { %7447 = vmatprep.subr.bf16.mxu1 %v7446_v20  ;;  %v7402_v12 = vpack.c.bf16 %v3233_v7, %v3224_v6  ;;  %v7466_v20 = vpack.c.bf16 %v3235_v9, %v3226_v8 }
 0x544   :  { %7385 = vmatpush1.bf16.msra.mxu0 %v7384_v21  ;;  %v3225_v21 = vld [vmem:[#allocation4 + $0x880] sm:$0xff] }
 0x545   :  { %7387 = vmatprep.subr.bf16.mxu0 %v7386_v29  ;;  %v7470_v29 = vpack.c.bf16 %v2967_v27, %v2958_v50 }
 0x546   :  { %7449 = vmatpush1.bf16.msra.mxu1 %v7448_v24  ;;  %v7468_v24 = vpack.c.bf16 %v3234_v22, %v3225_v21 }
 0x547   :  { %7451 = vmatprep.subr.bf16.mxu1 %v7450_v4  ;;  %v2521_v4 = vld [vmem:[#allocation8 + $0xe0] sm:$0xff] }
 0x548   :  { %7389 = vmatpush1.bf16.msra.mxu0 %v7388_v33 }
 0x549   :  { %7391 = vmatprep.subr.bf16.mxu0 %v7390_v17 }
 0x54a   :  { %7453 = vmatpush1.bf16.msra.mxu1 %v7452_v35 }
 0x54b   :  { %7455 = vmatprep.subr.bf16.mxu1 %v7454_v41  ;;  %v2527_v41 = vld [vmem:[#allocation8 + $0x110] sm:$0xff] }
 0x54c   :  { %7393 = vmatpush1.bf16.msra.mxu0 %v7392_v10 }
 0x54d   :  { %7395 = vmatprep.subr.bf16.mxu0 %v7394_v47 }
 0x54e   :  { %7457 = vmatpush1.bf16.msra.mxu1 %v7456_v43  ;;  %v2524_v43 = vld [vmem:[#allocation8 + $0xf8] sm:$0xff] }
 0x54f   :  { %7459 = vmatprep.subr.bf16.mxu1 %v7458_v62 }
 0x550   :  { %7397 = vmatpush1.bf16.msra.mxu0 %v7396_v52 }
 0x551   :  { %7399 = vmatprep.subr.bf16.mxu0 %v7398_v57 }
 0x552   :  { %7461 = vmatpush1.bf16.msra.mxu1 %v7460_v56 }
 0x553   :  { %7463 = vmatprep.subr.bf16.mxu1 %v7462_v1 }
 0x554   :  { %7401 = vmatpush1.bf16.msra.mxu0 %v7400_v18 }
 0x555   :  { %7403 = vmatprep.subr.bf16.mxu0 %v7402_v12 }
 0x556   :  { %7465 = vmatpush1.bf16.msra.mxu1 %v7464_v11  ;;  %v2528_v11 = vld [vmem:[#allocation8 + $0x118] sm:$0xff] }
 0x557   :  { %7467 = vmatprep.subr.bf16.mxu1 %v7466_v20 }
 0x558   :  { %7405 = vmatpush1.bf16.msra.mxu0 %v7404_v23 }
 0x559   :  { %7471 = vmatprep.subr.bf16.mxu0 %v7470_v29 }
 0x55a   :  { %7469 = vmatpush1.bf16.msra.mxu1 %v7468_v24 }
 0x55b   :  { %7535 = vmatprep.subr.bf16.mxu1 %v7534_v31 }
 0x590   :  { %v9078_v15 = vpop.f32.mrb[14].mxu1  ;;  %v9080_v19 = vpop.f32.mrb[16].mxu0 }
 0x591   :  { %v9082_v25 = vpop.f32.mrb[15].mxu1  ;;  %v9084_v26 = vpop.f32.mrb[17].mxu0  ;;  %v2596_v33 = vadd.f32 %v9078_v15, %v2520_v30  ;;  %v2667_v36 = vadd.f32 %v9080_v19, %v2522_v63 }
 0x592   :  { %v2598_v32 = vadd.f32 %v9082_v25, %v2521_v4  ;;  %v2669_v57 = vadd.f32 %v9084_v26, %v2523_v16 }
 0x593   :  { %v5875_v35 = vmul.f32 -1.442695, %v2596_v33  ;;  %v5877_v38 = vmul.f32 -1.442695, %v2667_v36 }
 0x594   :  { %v5876_v34 = vmul.f32 -1.442695, %v2598_v32  ;;  %v5878_v59 = vmul.f32 -1.442695, %v2669_v57 }
 0x596   :  { %8618 = vpow2.f32 %v5876_v34 }
 0x597   :  { %8620 = vpow2.f32 %v5875_v35 }
 0x598   :  { %8622 = vpow2.f32 %v5877_v38  ;;  %v2966_v38 = vld [vmem:[#allocation4 + $0x68] sm:$0xff] }
 0x5a0   :  { %v8619_v37 = vpop.eup %8618 }
 0x5a1   :  { %v8621_v17 = vpop.eup %8620  ;;  %v2905_v39 = vadd.f32 1.0, %v8619_v37 }
 0x5a2   :  { %v2904_v40 = vadd.f32 1.0, %v8621_v17  ;;  %v8623_v44 = vpop.eup %8622  ;;  %v2957_v17 = vld [vmem:[#allocation4 + $0x20] sm:$0xff] }
 0x5a3   :  { %8624 = vrcp.f32 %v2905_v39  ;;  %v2906_v48 = vadd.f32 1.0, %v8623_v44  ;;  %v2959_v39 = vld [vmem:[#allocation4 + $0x30] sm:$0xff] }
 0x5a4   :  { %8626 = vrcp.f32 %v2904_v40  ;;  %v2968_v40 = vld [vmem:[#allocation4 + $0x78] sm:$0xff]  ;;  %v2975_v44 = vld [vmem:[#allocation4 + $0xb0] sm:$0xff] }
 0x5ad   :  { %v8625_v19 = vpop.eup %8624 }
 0x5ae   :  { %v8627_v47 = vpop.eup %8626  ;;  %v2927_v51 = vmul.f32 %v8808_v49, %v8625_v19  ;;  %v2977_v19 = vld [vmem:[#allocation4 + $0xc0] sm:$0xff] }
 0x5d0   :  { %v2737_v10 = vpop.f32.mrb[16].mxu1  ;;  %v2808_v58 = vpop.f32.mrb[18].mxu0 }
 0x5d1   :  { %v2739_v42 = vpop.f32.mrb[17].mxu1  ;;  %v2810_v25 = vpop.f32.mrb[19].mxu0  ;;  %v2738_v46 = vadd.f32 %v2737_v10, %v2524_v43  ;;  %v2809_v0 = vadd.f32 %v2808_v58, %v2526_v60  ;;  %v2985_v58 = vld [vmem:[#allocation4 + $0x100] sm:$0xff]  ;;  %v7536_v43 = vpack.c.bf16 %v2968_v40, %v2959_v39  ;;  %v2995_v60 = vld [vmem:[#allocation4 + $0x150] sm:$0xff]  ;;  %v3058_v39 = vld [vmem:[#allocation4 + $0x348] sm:$0xff] }
 0x5d2   :  { %v2811_v15 = vadd.f32 %v2810_v25, %v2527_v41  ;;  %v2740_v45 = vadd.f32 %v2739_v42, %v2525_v54  ;;  %v2976_v41 = vld [vmem:[#allocation4 + $0xb8] sm:$0xff]  ;;  %v2978_v42 = vld [vmem:[#allocation4 + $0xc8] sm:$0xff]  ;;  %v2987_v25 = vld [vmem:[#allocation4 + $0x110] sm:$0xff]  ;;  %v7472_v54 = vpack.c.bf16 %v2966_v38, %v2957_v17 }
 0x5d3   :  { %v5879_v61 = vmul.f32 -1.442695, %v2738_v46  ;;  %v5881_v6 = vmul.f32 -1.442695, %v2809_v0  ;;  %v2986_v46 = vld [vmem:[#allocation4 + $0x108] sm:$0xff]  ;;  %v3004_v0 = vld [vmem:[#allocation4 + $0x198] sm:$0xff] }
 0x5d4   :  { %8628 = vtanh.f32 %v2811_v15  ;;  %v5880_v52 = vmul.f32 -1.442695, %v2740_v45  ;;  %v2984_v45 = vld [vmem:[#allocation4 + $0xf8] sm:$0xff]  ;;  %v7540_v16 = vpack.c.bf16 %v2986_v46, %v2977_v19  ;;  %v3049_v38 = vld [vmem:[#allocation4 + $0x300] sm:$0xff]  ;;  %v3066_v40 = vld [vmem:[#allocation4 + $0x388] sm:$0xff] }
 0x5d5   :  { %8630 = vrcp.f32 %v2906_v48  ;;  %v7538_v48 = vpack.c.bf16 %v2987_v25, %v2978_v42  ;;  %v7556_v25 = vpack.c.bf16 %v3058_v39, %v3049_v38  ;;  %v3067_v19 = vld [vmem:[#allocation4 + $0x390] sm:$0xff]  ;;  %v3076_v46 = vld [vmem:[#allocation4 + $0x3d8] sm:$0xff]  ;;  %v3165_v39 = vld [vmem:[#allocation4 + $0x6a0] sm:$0xff] }
 0x5d6   :  { %8632 = vpow2.f32 %v5880_v52  ;;  %v3005_v52 = vld [vmem:[#allocation4 + $0x1a0] sm:$0xff]  ;;  %v3156_v38 = vld [vmem:[#allocation4 + $0x658] sm:$0xff] }
 0x5d7   :  { %8634 = vpow2.f32 %v5879_v61  ;;  %v2993_v61 = vld [vmem:[#allocation4 + $0x140] sm:$0xff] }
 0x5de   :  { %v8629_v62 = vpop.eup %8628 }
 0x5df   :  { %v2928_v53 = vmul.f32 %v8629_v62, %v8627_v47  ;;  %v8631_v1 = vpop.eup %8630  ;;  %v2994_v47 = vld [vmem:[#allocation4 + $0x148] sm:$0xff]  ;;  %v7474_v62 = vpack.c.bf16 %v2985_v58, %v2976_v41  ;;  %v3075_v41 = vld [vmem:[#allocation4 + $0x3d0] sm:$0xff]  ;;  %v3077_v58 = vld [vmem:[#allocation4 + $0x3e0] sm:$0xff] }
 0x5e0   :  { %v8633_v2 = vpop.eup %8632 }
 0x5e1   :  { %v2929_v56 = vadd.f32 %v2928_v53, %v2927_v51  ;;  %v8635_v5 = vpop.eup %8634  ;;  %v2909_v7 = vadd.f32 1.0, %v8633_v2  ;;  %v2996_v51 = vld [vmem:[#allocation4 + $0x158] sm:$0xff]  ;;  %v7476_v53 = vpack.c.bf16 %v2984_v45, %v2975_v44  ;;  %v3021_v2 = vld [vmem:[#allocation4 + $0x220] sm:$0xff]  ;;  %v7494_v44 = vpack.c.bf16 %v3075_v41, %v3066_v40  ;;  %v3158_v40 = vld [vmem:[#allocation4 + $0x668] sm:$0xff] }
 0x5e2   :  { %v2908_v9 = vadd.f32 1.0, %v8635_v5  ;;  %v3014_v5 = vld [vmem:[#allocation4 + $0x1e8] sm:$0xff]  ;;  %v3167_v41 = vld [vmem:[#allocation4 + $0x6b0] sm:$0xff] }
 0x5e3   :  { %8636 = vtanh.f32 %v2929_v56 }
 0x5e4   :  { %8638 = vpow2.f32 %v5878_v59  ;;  %v7542_v59 = vpack.c.bf16 %v3005_v52, %v2996_v51  ;;  %v7560_v52 = vpack.c.bf16 %v3076_v46, %v3067_v19  ;;  %v3174_v19 = vld [vmem:[#allocation4 + $0x6e8] sm:$0xff]  ;;  %v3183_v46 = vld [vmem:[#allocation4 + $0x730] sm:$0xff] }
 0x5e5   :  { %8640 = vpow2.f32 %v5881_v6 }
 0x5e6   :  { %8642 = vrcp.f32 %v2909_v7  ;;  %v7544_v7 = vpack.c.bf16 %v3004_v0, %v2995_v60  ;;  %v3102_v60 = vld [vmem:[#allocation4 + $0x4a8] sm:$0xff]  ;;  %v3111_v0 = vld [vmem:[#allocation4 + $0x4f0] sm:$0xff] }
 0x5e7   :  { %8644 = vrcp.f32 %v2908_v9 }
 0x5ed   :  { %v8637_v3 = vpop.eup %8636 }
 0x5ee   :  { %v2934_v8 = vmul.f32 %v8637_v3, %v8631_v1  ;;  %v8639_v14 = vpop.eup %8638  ;;  %v3012_v1 = vld [vmem:[#allocation4 + $0x1d8] sm:$0xff]  ;;  %v3023_v3 = vld [vmem:[#allocation4 + $0x230] sm:$0xff] }
 0x5ef   :  { %v2907_v20 = vadd.f32 1.0, %v8639_v14  ;;  %v8641_v21 = vpop.eup %8640  ;;  %v7482_v9 = vpack.c.bf16 %v3021_v2, %v3012_v1  ;;  %v3039_v14 = vld [vmem:[#allocation4 + $0x2b0] sm:$0xff]  ;;  %v3104_v1 = vld [vmem:[#allocation4 + $0x4b8] sm:$0xff]  ;;  %v3113_v2 = vld [vmem:[#allocation4 + $0x500] sm:$0xff] }
 0x5f0   :  { %v6047_v18 = vpop.f32.mrb[18].mxu1  ;;  %v8643_v22 = vpop.eup %8642  ;;  %v2910_v50 = vadd.f32 1.0, %v8641_v21  ;;  %v3041_v21 = vld [vmem:[#allocation4 + $0x2c0] sm:$0xff] }
 0x5f1   :  { %v6048_v12 = vpop.f32.mrb[19].mxu1  ;;  %v8645_v23 = vpop.eup %8644  ;;  %v2930_v27 = vmul.f32 %v8808_v49, %v8643_v22  ;;  %v3003_v49 = vld [vmem:[#allocation4 + $0x190] sm:$0xff] }
 0x5f2   :  { %v6049_v13 = vadd.f32 %v6048_v12, %v6047_v18  ;;  %v7478_v57 = vpack.c.bf16 %v3003_v49, %v2994_v47  ;;  %v3020_v18 = vld [vmem:[#allocation4 + $0x218] sm:$0xff]  ;;  %v3013_v12 = vld [vmem:[#allocation4 + $0x1e0] sm:$0xff]  ;;  %v3095_v49 = vld [vmem:[#allocation4 + $0x470] sm:$0xff] }
 0x5f3   :  { %v3084_v47 = vld [vmem:[#allocation4 + $0x418] sm:$0xff] }
 0x5f4   :  { %v2880_v26 = vadd.f32 %v6049_v13, %v2528_v11  ;;  %v7546_v11 = vpack.c.bf16 %v3023_v3, %v3014_v5  ;;  %v3022_v13 = vld [vmem:[#allocation4 + $0x228] sm:$0xff] }
 0x5f6   :  { %8646 = vtanh.f32 %v2880_v26  ;;  %v3030_v26 = vld [vmem:[#allocation4 + $0x268] sm:$0xff] }
 0x5f7   :  { %8648 = vrcp.f32 %v2907_v20  ;;  %v3032_v20 = vld [vmem:[#allocation4 + $0x278] sm:$0xff] }
 0x5f8   :  { %8650 = vrcp.f32 %v2910_v50  ;;  %v3038_v50 = vld [vmem:[#allocation4 + $0x2a8] sm:$0xff] }
 0x600   :  { %v8647_v24 = vpop.eup %8646 }
 0x601   :  { %v2931_v28 = vmul.f32 %v8647_v24, %v8645_v23  ;;  %v8649_v31 = vpop.eup %8648  ;;  %v7548_v23 = vpack.c.bf16 %v3022_v13, %v3013_v12  ;;  %v3029_v24 = vld [vmem:[#allocation4 + $0x260] sm:$0xff]  ;;  %v3120_v12 = vld [vmem:[#allocation4 + $0x538] sm:$0xff] }
 0x602   :  { %v8651_v32 = vpop.eup %8650  ;;  %v3129_v13 = vld [vmem:[#allocation4 + $0x580] sm:$0xff] }
 0x603   :  { %v2932_v29 = vadd.f32 %v2931_v28, %v2930_v27  ;;  %v7486_v27 = vpack.c.bf16 %v3039_v14, %v3030_v26  ;;  %v7550_v28 = vpack.c.bf16 %v3041_v21, %v3032_v20  ;;  %v3122_v26 = vld [vmem:[#allocation4 + $0x548] sm:$0xff]  ;;  %v3131_v14 = vld [vmem:[#allocation4 + $0x590] sm:$0xff] }
 0x605   :  { %8652 = vtanh.f32 %v2932_v29  ;;  %v2937_v55 = vsub.f32 %v2929_v56, %v2932_v29  ;;  %v3002_v56 = vld [vmem:[#allocation4 + $0x188] sm:$0xff] }
 0x606   :  { %v7480_v6 = vpack.c.bf16 %v3002_v56, %v2993_v61 }
 0x607   :  { %v2938_v4 = vmul.f32 %v8649_v31, %v2937_v55  ;;  %v3040_v55 = vld [vmem:[#allocation4 + $0x2b8] sm:$0xff] }
 0x609   :  { %v2939_v30 = vadd.f32 %v2938_v4, %v2932_v29  ;;  %v3031_v29 = vld [vmem:[#allocation4 + $0x270] sm:$0xff]  ;;  %v3057_v4 = vld [vmem:[#allocation4 + $0x340] sm:$0xff] }
 0x60b   :  { %2947 = vst [vmem:[#allocation10 + $0x38] sm:$0xff] %v2939_v30  ;;  %v3050_v30 = vld [vmem:[#allocation4 + $0x308] sm:$0xff] }
 0x60f   :  { %v8653_v33 = vpop.eup %8652 }
 0x610   :  { %v2936_v34 = vmul.f32 %v8653_v33, %v8651_v32  ;;  %v3059_v32 = vld [vmem:[#allocation4 + $0x350] sm:$0xff]  ;;  %v7488_v33 = vpack.c.bf16 %v3038_v50, %v3029_v24  ;;  %v7506_v24 = vpack.c.bf16 %v3129_v13, %v3120_v12  ;;  %v7570_v50 = vpack.c.bf16 %v3131_v14, %v3122_v26  ;;  %v3212_v12 = vld [vmem:[#allocation4 + $0x818] sm:$0xff]  ;;  %v3221_v13 = vld [vmem:[#allocation4 + $0x860] sm:$0xff] }
 0x611   :  { %v7554_v17 = vpack.c.bf16 %v3059_v32, %v3050_v30 }
 0x612   :  { %v2940_v35 = vsub.f32 %v2934_v8, %v2936_v34  ;;  %v3011_v8 = vld [vmem:[#allocation4 + $0x1d0] sm:$0xff] }
 0x613   :  { %v7484_v22 = vpack.c.bf16 %v3020_v18, %v3011_v8  ;;  %v7502_v8 = vpack.c.bf16 %v3111_v0, %v3102_v60  ;;  %v7566_v18 = vpack.c.bf16 %v3113_v2, %v3104_v1  ;;  %v3194_v60 = vld [vmem:[#allocation4 + $0x788] sm:$0xff]  ;;  %v3203_v0 = vld [vmem:[#allocation4 + $0x7d0] sm:$0xff] }
 0x614   :  { %v2941_v63 = vmul.f32 %v8649_v31, %v2940_v35  ;;  %v3048_v31 = vld [vmem:[#allocation4 + $0x2f8] sm:$0xff]  ;;  %v3047_v35 = vld [vmem:[#allocation4 + $0x2f0] sm:$0xff] }
 0x616   :  { %v9090_v36 = vadd.f32 %v2941_v63, %v2936_v34  ;;  %v7552_v34 = vpack.c.bf16 %v3040_v55, %v3031_v29  ;;  %v3056_v63 = vld [vmem:[#allocation4 + $0x338] sm:$0xff]  ;;  %v3138_v29 = vld [vmem:[#allocation4 + $0x5c8] sm:$0xff]  ;;  %v3147_v55 = vld [vmem:[#allocation4 + $0x610] sm:$0xff] }
 0x617   :  { %v7492_v42 = vpack.c.bf16 %v3056_v63, %v3047_v35  ;;  %v7510_v35 = vpack.c.bf16 %v3147_v55, %v3138_v29  ;;  %v3230_v29 = vld [vmem:[#allocation4 + $0x8a8] sm:$0xff]  ;;  %v3239_v55 = vld [vmem:[#allocation4 + $0x8f0] sm:$0xff] }
 0x618   :  { %2946 = vst [vmem:[#allocation10 + $0x30] sm:$0xff] %v9090_v36  ;;  %v2950_v37 = vadd.f32 1e-06, %v9090_v36 }
 0x61a   :  { %8654 = vlog2.f32 %v2950_v37  ;;  %v7490_v37 = vpack.c.bf16 %v3057_v4, %v3048_v31  ;;  %v3140_v31 = vld [vmem:[#allocation4 + $0x5d8] sm:$0xff]  ;;  %v3149_v4 = vld [vmem:[#allocation4 + $0x620] sm:$0xff] }
 0x61b   :  { %v7574_v63 = vpack.c.bf16 %v3149_v4, %v3140_v31 }
 0x624   :  { %v8655_v10 = vpop.eup %8654 }
 0x625   :  { %v9094_v15 = vmul.f32 0.6931472, %v8655_v10  ;;  %v3068_v10 = vld [vmem:[#allocation4 + $0x398] sm:$0xff] }
 0x626   :  { %v7558_v45 = vpack.c.bf16 %v3077_v58, %v3068_v10 }
 0x627   :  { %3315 = vmatprep.mubr.f32.mxu0 %v9094_v15  ;;  %3386 = vmatprep.mubr.f32.mxu1 %v9094_v15 }
 0x628   :  { %3316 = vmatmul.mubr.f32.vlgmr.msra.gmra.mrb[20].mxu0 %v9090_v36  ;;  %3387 = vmatmul.mubr.f32.vlgmr.msra.gmra.mrb[20].mxu1 %v9090_v36 }
 0x629   :  { %7473 = vmatpush1.bf16.msra.mxu0 %v7472_v54  ;;  %7537 = vmatpush1.bf16.msra.mxu1 %v7536_v43  ;;  %v3065_v54 = vld [vmem:[#allocation4 + $0x380] sm:$0xff]  ;;  %v3074_v43 = vld [vmem:[#allocation4 + $0x3c8] sm:$0xff] }
 0x62a   :  { %3457 = vmatprep.mubr.f32.mxu0 %v9094_v15  ;;  %3528 = vmatprep.mubr.f32.mxu1 %v9094_v15  ;;  %v7496_v51 = vpack.c.bf16 %v3074_v43, %v3065_v54  ;;  %v7514_v54 = vpack.c.bf16 %v3165_v39, %v3156_v38  ;;  %v7578_v43 = vpack.c.bf16 %v3167_v41, %v3158_v40  ;;  %v2961_v41 = vld [vmem:[#allocation4 + $0x40] sm:$0xff] }
 0x62b   :  { %7475 = vmatprep.subr.bf16.mxu0 %v7474_v62  ;;  %7539 = vmatprep.subr.bf16.mxu1 %v7538_v48  ;;  %v3093_v62 = vld [vmem:[#allocation4 + $0x460] sm:$0xff]  ;;  %v3086_v48 = vld [vmem:[#allocation4 + $0x428] sm:$0xff] }
 0x62c   :  { %v7498_v61 = vpack.c.bf16 %v3093_v62, %v3084_v47  ;;  %v7562_v56 = vpack.c.bf16 %v3095_v49, %v3086_v48  ;;  %v3176_v47 = vld [vmem:[#allocation4 + $0x6f8] sm:$0xff]  ;;  %v3185_v62 = vld [vmem:[#allocation4 + $0x740] sm:$0xff] }
 0x62d   :  { %7477 = vmatpush1.bf16.msra.mxu0 %v7476_v53  ;;  %7541 = vmatpush1.bf16.msra.mxu1 %v7540_v16  ;;  %v3083_v53 = vld [vmem:[#allocation4 + $0x410] sm:$0xff]  ;;  %v3092_v16 = vld [vmem:[#allocation4 + $0x458] sm:$0xff] }
 0x62e   :  { %7479 = vmatprep.subr.bf16.mxu0 %v7478_v57  ;;  %7543 = vmatprep.subr.bf16.mxu1 %v7542_v59  ;;  %v3085_v57 = vld [vmem:[#allocation4 + $0x420] sm:$0xff]  ;;  %v3094_v59 = vld [vmem:[#allocation4 + $0x468] sm:$0xff]  ;;  %v7500_v5 = vpack.c.bf16 %v3092_v16, %v3083_v53  ;;  %v7518_v53 = vpack.c.bf16 %v3183_v46, %v3174_v19  ;;  %v7582_v16 = vpack.c.bf16 %v3185_v62, %v3176_v47 }
 0x62f   :  { %v7564_v3 = vpack.c.bf16 %v3094_v59, %v3085_v57  ;;  %v3192_v57 = vld [vmem:[#allocation4 + $0x778] sm:$0xff]  ;;  %v3201_v59 = vld [vmem:[#allocation4 + $0x7c0] sm:$0xff]  ;;  %v3150_v19 = vld [vmem:[#allocation4 + $0x628] sm:$0xff] }
 0x630   :  { %v2997_v62 = vld [vmem:[#allocation4 + $0x160] sm:$0xff] }
 0x631   :  { %7481 = vmatpush1.bf16.msra.mxu0 %v7480_v6  ;;  %7545 = vmatpush1.bf16.msra.mxu1 %v7544_v7  ;;  %v3101_v6 = vld [vmem:[#allocation4 + $0x4a0] sm:$0xff]  ;;  %v3110_v7 = vld [vmem:[#allocation4 + $0x4e8] sm:$0xff] }
 0x632   :  { %7483 = vmatprep.subr.bf16.mxu0 %v7482_v9  ;;  %7547 = vmatprep.subr.bf16.mxu1 %v7546_v11  ;;  %v3103_v9 = vld [vmem:[#allocation4 + $0x4b0] sm:$0xff]  ;;  %v3112_v11 = vld [vmem:[#allocation4 + $0x4f8] sm:$0xff]  ;;  %v7504_v20 = vpack.c.bf16 %v3110_v7, %v3101_v6  ;;  %v7522_v6 = vpack.c.bf16 %v3201_v59, %v3192_v57  ;;  %v7586_v7 = vpack.c.bf16 %v3203_v0, %v3194_v60  ;;  %v3186_v57 = vld [vmem:[#allocation4 + $0x748] sm:$0xff] }
 0x633   :  { %v7568_v21 = vpack.c.bf16 %v3112_v11, %v3103_v9  ;;  %v3210_v9 = vld [vmem:[#allocation4 + $0x808] sm:$0xff]  ;;  %v3219_v11 = vld [vmem:[#allocation4 + $0x850] sm:$0xff] }
 0x634   :  { %v3042_v0 = vld [vmem:[#allocation4 + $0x2c8] sm:$0xff] }
 0x635   :  { %7485 = vmatpush1.bf16.msra.mxu0 %v7484_v22  ;;  %7549 = vmatpush1.bf16.msra.mxu1 %v7548_v23  ;;  %v3119_v22 = vld [vmem:[#allocation4 + $0x530] sm:$0xff]  ;;  %v3128_v23 = vld [vmem:[#allocation4 + $0x578] sm:$0xff] }
 0x636   :  { %7487 = vmatprep.subr.bf16.mxu0 %v7486_v27  ;;  %7551 = vmatprep.subr.bf16.mxu1 %v7550_v28  ;;  %v3121_v27 = vld [vmem:[#allocation4 + $0x540] sm:$0xff]  ;;  %v3130_v28 = vld [vmem:[#allocation4 + $0x588] sm:$0xff]  ;;  %v7508_v30 = vpack.c.bf16 %v3128_v23, %v3119_v22  ;;  %v7526_v22 = vpack.c.bf16 %v3219_v11, %v3210_v9  ;;  %v7590_v23 = vpack.c.bf16 %v3221_v13, %v3212_v12 }
 0x637   :  { %v7572_v32 = vpack.c.bf16 %v3130_v28, %v3121_v27  ;;  %v3228_v27 = vld [vmem:[#allocation4 + $0x898] sm:$0xff]  ;;  %v3237_v28 = vld [vmem:[#allocation4 + $0x8e0] sm:$0xff]  ;;  %v3078_v13 = vld [vmem:[#allocation4 + $0x3e8] sm:$0xff] }
 0x638   :  { %v3069_v12 = vld [vmem:[#allocation4 + $0x3a0] sm:$0xff] }
 0x639   :  { %7489 = vmatpush1.bf16.msra.mxu0 %v7488_v33  ;;  %7553 = vmatpush1.bf16.msra.mxu1 %v7552_v34  ;;  %v3137_v33 = vld [vmem:[#allocation4 + $0x5c0] sm:$0xff]  ;;  %v3146_v34 = vld [vmem:[#allocation4 + $0x608] sm:$0xff] }
 0x63a   :  { %7491 = vmatprep.subr.bf16.mxu0 %v7490_v37  ;;  %7555 = vmatprep.subr.bf16.mxu1 %v7554_v17  ;;  %v3139_v37 = vld [vmem:[#allocation4 + $0x5d0] sm:$0xff]  ;;  %v3148_v17 = vld [vmem:[#allocation4 + $0x618] sm:$0xff]  ;;  %v7512_v10 = vpack.c.bf16 %v3146_v34, %v3137_v33  ;;  %v7594_v33 = vpack.c.bf16 %v3239_v55, %v3230_v29  ;;  %v3687_v55 = vld [vmem:[#allocation4 + $0x60] sm:$0xff] }
 0x63b   :  { %v7576_v58 = vpack.c.bf16 %v3148_v17, %v3139_v37  ;;  %v3236_v34 = vld [vmem:[#allocation4 + $0x8d8] sm:$0xff]  ;;  %v3105_v37 = vld [vmem:[#allocation4 + $0x4c0] sm:$0xff]  ;;  %v3114_v17 = vld [vmem:[#allocation4 + $0x508] sm:$0xff] }
 0x63c   :  { %v7598_v40 = vpack.c.bf16 %v3114_v17, %v3105_v37  ;;  %v3703_v37 = vld [vmem:[#allocation4 + $0xe0] sm:$0xff]  ;;  %v3696_v17 = vld [vmem:[#allocation4 + $0xa8] sm:$0xff] }
 0x63d   :  { %7493 = vmatpush1.bf16.msra.mxu0 %v7492_v42  ;;  %7557 = vmatpush1.bf16.msra.mxu1 %v7556_v25  ;;  %v3155_v42 = vld [vmem:[#allocation4 + $0x650] sm:$0xff]  ;;  %v3164_v25 = vld [vmem:[#allocation4 + $0x698] sm:$0xff] }
 0x63e   :  { %7495 = vmatprep.subr.bf16.mxu0 %v7494_v44  ;;  %7559 = vmatprep.subr.bf16.mxu1 %v7558_v45  ;;  %v3157_v44 = vld [vmem:[#allocation4 + $0x660] sm:$0xff]  ;;  %v3166_v45 = vld [vmem:[#allocation4 + $0x6a8] sm:$0xff]  ;;  %v7516_v48 = vpack.c.bf16 %v3164_v25, %v3155_v42  ;;  %v3132_v42 = vld [vmem:[#allocation4 + $0x598] sm:$0xff] }
 0x63f   :  { %v7580_v49 = vpack.c.bf16 %v3166_v45, %v3157_v44  ;;  %v2988_v44 = vld [vmem:[#allocation4 + $0x118] sm:$0xff]  ;;  %v3141_v45 = vld [vmem:[#allocation4 + $0x5e0] sm:$0xff] }
 0x640   :  { %v7606_v47 = vpack.c.bf16 %v3150_v19, %v3141_v45  ;;  %v3723_v19 = vld [vmem:[#allocation4 + $0x180] sm:$0xff] }
 0x641   :  { %7497 = vmatpush1.bf16.msra.mxu0 %v7496_v51  ;;  %7561 = vmatpush1.bf16.msra.mxu1 %v7560_v52  ;;  %v3173_v51 = vld [vmem:[#allocation4 + $0x6e0] sm:$0xff]  ;;  %v3182_v52 = vld [vmem:[#allocation4 + $0x728] sm:$0xff] }
 0x642   :  { %7499 = vmatprep.subr.bf16.mxu0 %v7498_v61  ;;  %7563 = vmatprep.subr.bf16.mxu1 %v7562_v56  ;;  %v3175_v61 = vld [vmem:[#allocation4 + $0x6f0] sm:$0xff]  ;;  %v3184_v56 = vld [vmem:[#allocation4 + $0x738] sm:$0xff]  ;;  %v7520_v1 = vpack.c.bf16 %v3182_v52, %v3173_v51 }
 0x643   :  { %v7584_v2 = vpack.c.bf16 %v3184_v56, %v3175_v61  ;;  %v3168_v51 = vld [vmem:[#allocation4 + $0x6b8] sm:$0xff]  ;;  %v3177_v56 = vld [vmem:[#allocation4 + $0x700] sm:$0xff] }
 0x644   :  { %v3024_v61 = vld [vmem:[#allocation4 + $0x238] sm:$0xff]  ;;  %v7614_v60 = vpack.c.bf16 %v3186_v57, %v3177_v56  ;;  %v3741_v57 = vld [vmem:[#allocation4 + $0x210] sm:$0xff] }
 0x645   :  { %7501 = vmatpush1.bf16.msra.mxu0 %v7500_v5  ;;  %7565 = vmatpush1.bf16.msra.mxu1 %v7564_v3  ;;  %v3191_v5 = vld [vmem:[#allocation4 + $0x770] sm:$0xff]  ;;  %v3200_v3 = vld [vmem:[#allocation4 + $0x7b8] sm:$0xff] }
 0x646   :  { %7503 = vmatprep.subr.bf16.mxu0 %v7502_v8  ;;  %7567 = vmatprep.subr.bf16.mxu1 %v7566_v18  ;;  %v3193_v8 = vld [vmem:[#allocation4 + $0x780] sm:$0xff]  ;;  %v3202_v18 = vld [vmem:[#allocation4 + $0x7c8] sm:$0xff]  ;;  %v7524_v26 = vpack.c.bf16 %v3200_v3, %v3191_v5 }
 0x647   :  { %v7588_v14 = vpack.c.bf16 %v3202_v18, %v3193_v8  ;;  %v3213_v8 = vld [vmem:[#allocation4 + $0x820] sm:$0xff]  ;;  %v3222_v18 = vld [vmem:[#allocation4 + $0x868] sm:$0xff] }
 0x648   :  { %v7622_v11 = vpack.c.bf16 %v3222_v18, %v3213_v8  ;;  %v3759_v18 = vld [vmem:[#allocation4 + $0x2a0] sm:$0xff] }
 0x649   :  { %7505 = vmatpush1.bf16.msra.mxu0 %v7504_v20  ;;  %7569 = vmatpush1.bf16.msra.mxu1 %v7568_v21  ;;  %v3209_v20 = vld [vmem:[#allocation4 + $0x800] sm:$0xff]  ;;  %v3218_v21 = vld [vmem:[#allocation4 + $0x848] sm:$0xff] }
 0x64a   :  { %7507 = vmatprep.subr.bf16.mxu0 %v7506_v24  ;;  %7571 = vmatprep.subr.bf16.mxu1 %v7570_v50  ;;  %v3211_v24 = vld [vmem:[#allocation4 + $0x810] sm:$0xff]  ;;  %v3220_v50 = vld [vmem:[#allocation4 + $0x858] sm:$0xff]  ;;  %v7528_v31 = vpack.c.bf16 %v3218_v21, %v3209_v20  ;;  %v7624_v20 = vpack.c.bf16 %v3078_v13, %v3069_v12 }
 0x64b   :  { %v7592_v4 = vpack.c.bf16 %v3220_v50, %v3211_v24  ;;  %v3676_v50 = vld [vmem:[#allocation4 + $0x8] sm:$0xff] }
 0x64d   :  { %7509 = vmatpush1.bf16.msra.mxu0 %v7508_v30  ;;  %7573 = vmatpush1.bf16.msra.mxu1 %v7572_v32  ;;  %v3227_v30 = vld [vmem:[#allocation4 + $0x890] sm:$0xff]  ;;  %v7530_v32 = vpack.c.bf16 %v3237_v28, %v3228_v27  ;;  %v3678_v28 = vld [vmem:[#allocation4 + $0x18] sm:$0xff] }
 0x64e   :  { %7511 = vmatprep.subr.bf16.mxu0 %v7510_v35  ;;  %7575 = vmatprep.subr.bf16.mxu1 %v7574_v63  ;;  %v3229_v35 = vld [vmem:[#allocation4 + $0x8a0] sm:$0xff]  ;;  %v3238_v63 = vld [vmem:[#allocation4 + $0x8e8] sm:$0xff]  ;;  %v7532_v38 = vpack.c.bf16 %v3236_v34, %v3227_v30  ;;  %v3685_v27 = vld [vmem:[#allocation4 + $0x50] sm:$0xff]  ;;  %v7694_v30 = vpack.c.bf16 %v3687_v55, %v3678_v28 }
 0x64f   :  { %v7596_v39 = vpack.c.bf16 %v3238_v63, %v3229_v35  ;;  %v7630_v29 = vpack.c.bf16 %v3685_v27, %v3676_v50  ;;  %v3686_v34 = vld [vmem:[#allocation4 + $0x58] sm:$0xff]  ;;  %v3777_v50 = vld [vmem:[#allocation4 + $0x330] sm:$0xff] }
 0x650   :  { %v3694_v63 = vld [vmem:[#allocation4 + $0x98] sm:$0xff]  ;;  %v3765_v27 = vld [vmem:[#allocation4 + $0x2d0] sm:$0xff] }
 0x651   :  { %7513 = vmatpush1.bf16.msra.mxu0 %v7512_v10  ;;  %7577 = vmatpush1.bf16.msra.mxu1 %v7576_v58  ;;  %v2970_v10 = vld [vmem:[#allocation4 + $0x88] sm:$0xff]  ;;  %v3123_v58 = vld [vmem:[#allocation4 + $0x550] sm:$0xff]  ;;  %v3774_v28 = vld [vmem:[#allocation4 + $0x318] sm:$0xff] }
 0x652   :  { %7515 = vmatprep.subr.bf16.mxu0 %v7514_v54  ;;  %7579 = vmatprep.subr.bf16.mxu1 %v7578_v43  ;;  %v7600_v25 = vpack.c.bf16 %v2970_v10, %v2961_v41  ;;  %v7602_v54 = vpack.c.bf16 %v3132_v42, %v3123_v58  ;;  %v2979_v43 = vld [vmem:[#allocation4 + $0xd0] sm:$0xff]  ;;  %v3695_v58 = vld [vmem:[#allocation4 + $0xa0] sm:$0xff]  ;;  %v3704_v42 = vld [vmem:[#allocation4 + $0xe8] sm:$0xff]  ;;  %v7652_v55 = vpack.c.bf16 %v3774_v28, %v3765_v27 }
 0x653   :  { %v7604_v46 = vpack.c.bf16 %v2988_v44, %v2979_v43  ;;  %v3721_v43 = vld [vmem:[#allocation4 + $0x170] sm:$0xff]  ;;  %v3714_v44 = vld [vmem:[#allocation4 + $0x138] sm:$0xff] }
 0x655   :  { %7517 = vmatpush1.bf16.msra.mxu0 %v7516_v48  ;;  %7581 = vmatpush1.bf16.msra.mxu1 %v7580_v49  ;;  %v3006_v48 = vld [vmem:[#allocation4 + $0x1a8] sm:$0xff]  ;;  %v3159_v49 = vld [vmem:[#allocation4 + $0x670] sm:$0xff] }
 0x656   :  { %7519 = vmatprep.subr.bf16.mxu0 %v7518_v53  ;;  %7583 = vmatprep.subr.bf16.mxu1 %v7582_v16  ;;  %v7608_v52 = vpack.c.bf16 %v3006_v48, %v2997_v62  ;;  %v7610_v53 = vpack.c.bf16 %v3168_v51, %v3159_v49  ;;  %v3015_v16 = vld [vmem:[#allocation4 + $0x1f0] sm:$0xff]  ;;  %v7702_v62 = vpack.c.bf16 %v3723_v19, %v3714_v44  ;;  %v3722_v51 = vld [vmem:[#allocation4 + $0x178] sm:$0xff] }
 0x657   :  { %v7612_v59 = vpack.c.bf16 %v3024_v61, %v3015_v16  ;;  %v3713_v49 = vld [vmem:[#allocation4 + $0x130] sm:$0xff]  ;;  %v3739_v16 = vld [vmem:[#allocation4 + $0x200] sm:$0xff]  ;;  %v3732_v61 = vld [vmem:[#allocation4 + $0x1c8] sm:$0xff] }
 0x658   :  { %v3810_v44 = vld [vmem:[#allocation4 + $0x438] sm:$0xff] }
 0x659   :  { %7521 = vmatpush1.bf16.msra.mxu0 %v7520_v1  ;;  %7585 = vmatpush1.bf16.msra.mxu1 %v7584_v2  ;;  %v3195_v1 = vld [vmem:[#allocation4 + $0x790] sm:$0xff]  ;;  %v3204_v2 = vld [vmem:[#allocation4 + $0x7d8] sm:$0xff] }
 0x65a   :  { %7523 = vmatprep.subr.bf16.mxu0 %v7522_v6  ;;  %7587 = vmatprep.subr.bf16.mxu1 %v7586_v7  ;;  %v7618_v3 = vpack.c.bf16 %v3204_v2, %v3195_v1  ;;  %v3051_v6 = vld [vmem:[#allocation4 + $0x310] sm:$0xff]  ;;  %v3060_v7 = vld [vmem:[#allocation4 + $0x358] sm:$0xff]  ;;  %v3731_v1 = vld [vmem:[#allocation4 + $0x1c0] sm:$0xff] }
 0x65b   :  { %v7620_v9 = vpack.c.bf16 %v3060_v7, %v3051_v6  ;;  %v3740_v2 = vld [vmem:[#allocation4 + $0x208] sm:$0xff]  ;;  %v3757_v6 = vld [vmem:[#allocation4 + $0x290] sm:$0xff]  ;;  %v3750_v7 = vld [vmem:[#allocation4 + $0x258] sm:$0xff] }
 0x65c   :  { %v7710_v12 = vpack.c.bf16 %v3759_v18, %v3750_v7  ;;  %v3846_v7 = vld [vmem:[#allocation4 + $0x558] sm:$0xff] }
 0x65d   :  { %7525 = vmatpush1.bf16.msra.mxu0 %v7524_v26  ;;  %7589 = vmatpush1.bf16.msra.mxu1 %v7588_v14  ;;  %v3231_v26 = vld [vmem:[#allocation4 + $0x8b0] sm:$0xff]  ;;  %v3240_v14 = vld [vmem:[#allocation4 + $0x8f8] sm:$0xff] }
 0x65e   :  { %7527 = vmatprep.subr.bf16.mxu0 %v7526_v22  ;;  %7591 = vmatprep.subr.bf16.mxu1 %v7590_v23  ;;  %v7626_v21 = vpack.c.bf16 %v3240_v14, %v3231_v26  ;;  %v3087_v22 = vld [vmem:[#allocation4 + $0x430] sm:$0xff]  ;;  %v3096_v23 = vld [vmem:[#allocation4 + $0x478] sm:$0xff] }
 0x65f   :  { %v7628_v24 = vpack.c.bf16 %v3096_v23, %v3087_v22  ;;  %v3749_v26 = vld [vmem:[#allocation4 + $0x250] sm:$0xff]  ;;  %v3758_v14 = vld [vmem:[#allocation4 + $0x298] sm:$0xff]  ;;  %v3775_v22 = vld [vmem:[#allocation4 + $0x320] sm:$0xff] }
 0x660   :  { %v3768_v23 = vld [vmem:[#allocation4 + $0x2e8] sm:$0xff] }
 0x661   :  { %7529 = vmatpush1.bf16.msra.mxu0 %v7528_v31  ;;  %7593 = vmatpush1.bf16.msra.mxu1 %v7592_v4  ;;  %v3675_v31 = vld [vmem:[#allocation4] sm:$0xff]  ;;  %v3684_v4 = vld [vmem:[#allocation4 + $0x48] sm:$0xff] }
 0x662   :  { %7531 = vmatprep.subr.bf16.mxu0 %v7530_v32  ;;  %7595 = vmatprep.subr.bf16.mxu1 %v7594_v33  ;;  %v7632_v32 = vpack.c.bf16 %v3684_v4, %v3675_v31  ;;  %v3677_v33 = vld [vmem:[#allocation4 + $0x10] sm:$0xff]  ;;  %v3767_v31 = vld [vmem:[#allocation4 + $0x2e0] sm:$0xff]  ;;  %v3776_v4 = vld [vmem:[#allocation4 + $0x328] sm:$0xff] }
 0x663   :  { %v7696_v35 = vpack.c.bf16 %v3686_v34, %v3677_v33  ;;  %v3793_v33 = vld [vmem:[#allocation4 + $0x3b0] sm:$0xff]  ;;  %v3786_v34 = vld [vmem:[#allocation4 + $0x378] sm:$0xff] }
 0x665   :  { %7533 = vmatpush1.bf16.msra.mxu0 %v7532_v38  ;;  %7597 = vmatpush1.bf16.msra.mxu1 %v7596_v39  ;;  %v3705_v38 = vld [vmem:[#allocation4 + $0xf0] sm:$0xff] }
 0x666   :  { %7599 = vmatprep.subr.bf16.mxu0 %v7598_v40  ;;  %7631 = vmatprep.subr.bf16.mxu1 %v7630_v29  ;;  %v3693_v39 = vld [vmem:[#allocation4 + $0x90] sm:$0xff]  ;;  %v3702_v40 = vld [vmem:[#allocation4 + $0xd8] sm:$0xff]  ;;  %v7698_v41 = vpack.c.bf16 %v3705_v38, %v3696_v17  ;;  %v7714_v29 = vpack.c.bf16 %v3777_v50, %v3768_v23  ;;  %v3792_v17 = vld [vmem:[#allocation4 + $0x3a8] sm:$0xff] }
 0x667   :  { %v7636_v10 = vpack.c.bf16 %v3702_v40, %v3693_v39  ;;  %v3785_v39 = vld [vmem:[#allocation4 + $0x370] sm:$0xff]  ;;  %v3794_v40 = vld [vmem:[#allocation4 + $0x3b8] sm:$0xff]  ;;  %v3864_v23 = vld [vmem:[#allocation4 + $0x5e8] sm:$0xff] }
 0x668   :  { %3458 = vmatmul.mubr.f32.vlgmr.msra.gmra.mrb[22].mxu0 %v9090_v36  ;;  %3529 = vmatmul.mubr.f32.vlgmr.msra.gmra.mrb[22].mxu1 %v9090_v36 }
 0x669   :  { %7601 = vmatpush3.bf16.msra.mxu0 %v7600_v25  ;;  %3599 = vmatprep.mubr.f32.mxu0 %v9094_v15  ;;  %v3033_v15 = vld [vmem:[#allocation4 + $0x280] sm:$0xff]  ;;  %v7700_v25 = vpack.c.bf16 %v3704_v42, %v3695_v58  ;;  %v3804_v42 = vld [vmem:[#allocation4 + $0x408] sm:$0xff] }
 0x66a   :  { %7603 = vmatprep.subr.bf16.mxu0 %v7602_v54  ;;  %v7616_v5 = vpack.c.bf16 %v3042_v0, %v3033_v15  ;;  %7633 = vmatpush1.bf16.msra.mxu1 %v7632_v32  ;;  %v3712_v54 = vld [vmem:[#allocation4 + $0x128] sm:$0xff]  ;;  %v7706_v15 = vpack.c.bf16 %v3741_v57, %v3732_v61  ;;  %v3811_v58 = vld [vmem:[#allocation4 + $0x440] sm:$0xff] }
 0x66b   :  { %v7638_v45 = vpack.c.bf16 %v3721_v43, %v3712_v54  ;;  %v3784_v32 = vld [vmem:[#allocation4 + $0x368] sm:$0xff]  ;;  %v3813_v54 = vld [vmem:[#allocation4 + $0x450] sm:$0xff] }
 0x66c   :  { %v3801_v43 = vld [vmem:[#allocation4 + $0x3f0] sm:$0xff]  ;;  %v3828_v61 = vld [vmem:[#allocation4 + $0x4c8] sm:$0xff] }
 0x66d   :  { %7605 = vmatpush3.bf16.msra.mxu0 %v7604_v46  ;;  %v3711_v46 = vld [vmem:[#allocation4 + $0x120] sm:$0xff]  ;;  %v7660_v19 = vpack.c.bf16 %v3810_v44, %v3801_v43  ;;  %v3900_v44 = vld [vmem:[#allocation4 + $0x708] sm:$0xff] }
 0x66e   :  { %7607 = vmatprep.subr.bf16.mxu0 %v7606_v47  ;;  %v3720_v47 = vld [vmem:[#allocation4 + $0x168] sm:$0xff]  ;;  %v3891_v43 = vld [vmem:[#allocation4 + $0x6c0] sm:$0xff] }
 0x66f   :  { %v7640_v48 = vpack.c.bf16 %v3720_v47, %v3711_v46  ;;  %v3803_v46 = vld [vmem:[#allocation4 + $0x400] sm:$0xff]  ;;  %v3812_v47 = vld [vmem:[#allocation4 + $0x448] sm:$0xff] }
 0x671   :  { %7609 = vmatpush3.bf16.msra.mxu0 %v7608_v52  ;;  %v7704_v52 = vpack.c.bf16 %v3722_v51, %v3713_v49  ;;  %v3829_v49 = vld [vmem:[#allocation4 + $0x4d0] sm:$0xff]  ;;  %v3822_v51 = vld [vmem:[#allocation4 + $0x498] sm:$0xff] }
 0x672   :  { %7611 = vmatprep.subr.bf16.mxu0 %v7610_v53  ;;  %v3730_v53 = vld [vmem:[#allocation4 + $0x1b8] sm:$0xff] }
 0x673   :  { %v7642_v56 = vpack.c.bf16 %v3739_v16, %v3730_v53  ;;  %v3831_v53 = vld [vmem:[#allocation4 + $0x4e0] sm:$0xff] }
 0x674   :  { %v3819_v16 = vld [vmem:[#allocation4 + $0x480] sm:$0xff] }
 0x675   :  { %7613 = vmatpush3.bf16.msra.mxu0 %v7612_v59  ;;  %v3729_v59 = vld [vmem:[#allocation4 + $0x1b0] sm:$0xff]  ;;  %v7664_v57 = vpack.c.bf16 %v3828_v61, %v3819_v16 }
 0x676   :  { %7615 = vmatprep.subr.bf16.mxu0 %v7614_v60  ;;  %v3738_v60 = vld [vmem:[#allocation4 + $0x1f8] sm:$0xff]  ;;  %v3909_v61 = vld [vmem:[#allocation4 + $0x750] sm:$0xff] }
 0x677   :  { %v7644_v0 = vpack.c.bf16 %v3738_v60, %v3729_v59  ;;  %v3821_v59 = vld [vmem:[#allocation4 + $0x490] sm:$0xff]  ;;  %v3830_v60 = vld [vmem:[#allocation4 + $0x4d8] sm:$0xff] }
 0x679   :  { %7617 = vmatpush3.bf16.msra.mxu0 %v7616_v5  ;;  %v7708_v5 = vpack.c.bf16 %v3740_v2, %v3731_v1  ;;  %v3847_v1 = vld [vmem:[#allocation4 + $0x560] sm:$0xff]  ;;  %v3840_v2 = vld [vmem:[#allocation4 + $0x528] sm:$0xff] }
 0x67a   :  { %7619 = vmatprep.subr.bf16.mxu0 %v7618_v3  ;;  %v3748_v3 = vld [vmem:[#allocation4 + $0x248] sm:$0xff] }
 0x67b   :  { %v7646_v8 = vpack.c.bf16 %v3757_v6, %v3748_v3  ;;  %v3849_v3 = vld [vmem:[#allocation4 + $0x570] sm:$0xff] }
 0x67c   :  { %v3837_v6 = vld [vmem:[#allocation4 + $0x510] sm:$0xff] }
 0x67d   :  { %7621 = vmatpush3.bf16.msra.mxu0 %v7620_v9  ;;  %v3747_v9 = vld [vmem:[#allocation4 + $0x240] sm:$0xff]  ;;  %v7668_v18 = vpack.c.bf16 %v3846_v7, %v3837_v6 }
 0x67e   :  { %7623 = vmatprep.subr.bf16.mxu0 %v7622_v11  ;;  %v3756_v11 = vld [vmem:[#allocation4 + $0x288] sm:$0xff]  ;;  %v3927_v6 = vld [vmem:[#allocation4 + $0x7e0] sm:$0xff] }
 0x67f   :  { %v7648_v13 = vpack.c.bf16 %v3756_v11, %v3747_v9  ;;  %v3839_v9 = vld [vmem:[#allocation4 + $0x520] sm:$0xff]  ;;  %v3848_v11 = vld [vmem:[#allocation4 + $0x568] sm:$0xff] }
 0x681   :  { %7625 = vmatpush3.bf16.msra.mxu0 %v7624_v20  ;;  %v7712_v20 = vpack.c.bf16 %v3758_v14, %v3749_v26  ;;  %v3865_v26 = vld [vmem:[#allocation4 + $0x5f0] sm:$0xff]  ;;  %v3858_v14 = vld [vmem:[#allocation4 + $0x5b8] sm:$0xff] }
 0x682   :  { %7627 = vmatprep.subr.bf16.mxu0 %v7626_v21  ;;  %v3766_v21 = vld [vmem:[#allocation4 + $0x2d8] sm:$0xff] }
 0x685   :  { %7629 = vmatpush3.bf16.msra.mxu0 %v7628_v24  ;;  %v7650_v24 = vpack.c.bf16 %v3775_v22, %v3766_v21  ;;  %v3867_v21 = vld [vmem:[#allocation4 + $0x600] sm:$0xff] }
 0x686   :  { %7695 = vmatprep.subr.bf16.mxu0 %v7694_v30  ;;  %v7716_v30 = vpack.c.bf16 %v3776_v4, %v3767_v31  ;;  %v3855_v22 = vld [vmem:[#allocation4 + $0x5a0] sm:$0xff]  ;;  %v7734_v27 = vpack.c.bf16 %v3867_v21, %v3858_v14  ;;  %v3957_v14 = vld [vmem:[#allocation4 + $0x8d0] sm:$0xff] }
 0x687   :  { %v7672_v28 = vpack.c.bf16 %v3864_v23, %v3855_v22  ;;  %v3945_v22 = vld [vmem:[#allocation4 + $0x870] sm:$0xff]  ;;  %v3954_v23 = vld [vmem:[#allocation4 + $0x8b8] sm:$0xff] }
 0x688   :  { %3600 = vmatmul.mubr.f32.vlgmr.msra.gmra.mrb[24].mxu0 %v9090_v36  ;;  %v7634_v36 = vpack.c.bf16 %v3703_v37, %v3694_v63  ;;  %v3795_v63 = vld [vmem:[#allocation4 + $0x3c0] sm:$0xff] }
 0x689   :  { %7697 = vmatpush1.bf16.msra.mxu0 %v7696_v35  ;;  %v7654_v35 = vpack.c.bf16 %v3793_v33, %v3784_v32  ;;  %v3783_v37 = vld [vmem:[#allocation4 + $0x360] sm:$0xff]  ;;  %v3874_v32 = vld [vmem:[#allocation4 + $0x638] sm:$0xff] }
 0x68a   :  { %7635 = vmatprep.subr.bf16.mxu1 %v7634_v36  ;;  %7699 = vmatprep.subr.bf16.mxu0 %v7698_v41  ;;  %v7718_v36 = vpack.c.bf16 %v3795_v63, %v3786_v34  ;;  %v7656_v38 = vpack.c.bf16 %v3792_v17, %v3783_v37  ;;  %v7720_v41 = vpack.c.bf16 %v3794_v40, %v3785_v39  ;;  %v3883_v33 = vld [vmem:[#allocation4 + $0x680] sm:$0xff]  ;;  %v3876_v34 = vld [vmem:[#allocation4 + $0x648] sm:$0xff]  ;;  %v3885_v63 = vld [vmem:[#allocation4 + $0x690] sm:$0xff] }
 0x68b   :  { %7637 = vmatpush1.bf16.msra.mxu1 %v7636_v10  ;;  %v3802_v10 = vld [vmem:[#allocation4 + $0x3f8] sm:$0xff]  ;;  %v3873_v37 = vld [vmem:[#allocation4 + $0x630] sm:$0xff]  ;;  %v7738_v17 = vpack.c.bf16 %v3885_v63, %v3876_v34  ;;  %v3884_v40 = vld [vmem:[#allocation4 + $0x688] sm:$0xff] }
 0x68c   :  { %7639 = vmatprep.subr.bf16.mxu1 %v7638_v45  ;;  %v7722_v45 = vpack.c.bf16 %v3813_v54, %v3804_v42  ;;  %v3894_v42 = vld [vmem:[#allocation4 + $0x6d8] sm:$0xff]  ;;  %v3903_v54 = vld [vmem:[#allocation4 + $0x720] sm:$0xff] }
 0x68d   :  { %7701 = vmatpush1.bf16.msra.mxu0 %v7700_v25  ;;  %v7658_v25 = vpack.c.bf16 %v3811_v58, %v3802_v10  ;;  %v3892_v10 = vld [vmem:[#allocation4 + $0x6c8] sm:$0xff]  ;;  %v3901_v58 = vld [vmem:[#allocation4 + $0x710] sm:$0xff]  ;;  %v3682_v34 = vld [vmem:[#allocation4 + $0x38] sm:$0xff] }
 0x68e   :  { %7703 = vmatprep.subr.bf16.mxu0 %v7702_v62  ;;  %v7724_v62 = vpack.c.bf16 %v3812_v47, %v3803_v46  ;;  %v3893_v46 = vld [vmem:[#allocation4 + $0x6d0] sm:$0xff]  ;;  %v3902_v47 = vld [vmem:[#allocation4 + $0x718] sm:$0xff]  ;;  %v3691_v63 = vld [vmem:[#allocation4 + $0x80] sm:$0xff] }
 0x68f   :  { %7641 = vmatpush1.bf16.msra.mxu1 %v7640_v48  ;;  %v3820_v48 = vld [vmem:[#allocation4 + $0x488] sm:$0xff] }
 0x690   :  { %7643 = vmatprep.subr.bf16.mxu1 %v7642_v56  ;;  %v7726_v56 = vpack.c.bf16 %v3831_v53, %v3822_v51  ;;  %v3912_v51 = vld [vmem:[#allocation4 + $0x768] sm:$0xff] }
 0x691   :  { %7705 = vmatpush1.bf16.msra.mxu0 %v7704_v52  ;;  %v7662_v52 = vpack.c.bf16 %v3829_v49, %v3820_v48  ;;  %v7744_v48 = vpack.c.bf16 %v3902_v47, %v3893_v46  ;;  %v3919_v49 = vld [vmem:[#allocation4 + $0x7a0] sm:$0xff] }
 0x692   :  { %7707 = vmatprep.subr.bf16.mxu0 %v7706_v15  ;;  %v7728_v15 = vpack.c.bf16 %v3830_v60, %v3821_v59  ;;  %v3920_v60 = vld [vmem:[#allocation4 + $0x7a8] sm:$0xff] }
 0x693   :  { %7645 = vmatpush1.bf16.msra.mxu1 %v7644_v0  ;;  %v3838_v0 = vld [vmem:[#allocation4 + $0x518] sm:$0xff] }
 0x694   :  { %7647 = vmatprep.subr.bf16.mxu1 %v7646_v8  ;;  %v7730_v8 = vpack.c.bf16 %v3849_v3, %v3840_v2  ;;  %v3939_v3 = vld [vmem:[#allocation4 + $0x840] sm:$0xff] }
 0x695   :  { %7709 = vmatpush1.bf16.msra.mxu0 %v7708_v5  ;;  %v7666_v5 = vpack.c.bf16 %v3847_v1, %v3838_v0  ;;  %v3937_v0 = vld [vmem:[#allocation4 + $0x830] sm:$0xff] }
 0x696   :  { %7711 = vmatprep.subr.bf16.mxu0 %v7710_v12  ;;  %v7732_v12 = vpack.c.bf16 %v3848_v11, %v3839_v9  ;;  %v3938_v9 = vld [vmem:[#allocation4 + $0x838] sm:$0xff] }
 0x697   :  { %7649 = vmatpush1.bf16.msra.mxu1 %v7648_v13  ;;  %v3856_v13 = vld [vmem:[#allocation4 + $0x5a8] sm:$0xff]  ;;  %v3946_v11 = vld [vmem:[#allocation4 + $0x878] sm:$0xff] }
 0x698   :  { %7651 = vmatprep.subr.bf16.mxu1 %v7650_v24 }
 0x699   :  { %7713 = vmatpush1.bf16.msra.mxu0 %v7712_v20  ;;  %v7670_v20 = vpack.c.bf16 %v3865_v26, %v3856_v13  ;;  %v3948_v13 = vld [vmem:[#allocation4 + $0x888] sm:$0xff] }
 0x69a   :  { %7715 = vmatprep.subr.bf16.mxu0 %v7714_v29  ;;  %v3857_v29 = vld [vmem:[#allocation4 + $0x5b0] sm:$0xff] }
 0x69b   :  { %7653 = vmatpush1.bf16.msra.mxu1 %v7652_v55  ;;  %v3866_v55 = vld [vmem:[#allocation4 + $0x5f8] sm:$0xff] }
 0x69c   :  { %7655 = vmatprep.subr.bf16.mxu1 %v7654_v35  ;;  %v7674_v35 = vpack.c.bf16 %v3883_v33, %v3874_v32  ;;  %v3680_v32 = vld [vmem:[#allocation4 + $0x28] sm:$0xff]  ;;  %v3689_v33 = vld [vmem:[#allocation4 + $0x70] sm:$0xff] }
 0x69d   :  { %7717 = vmatpush1.bf16.msra.mxu0 %v7716_v30  ;;  %v7736_v30 = vpack.c.bf16 %v3866_v55, %v3857_v29  ;;  %v3956_v29 = vld [vmem:[#allocation4 + $0x8c8] sm:$0xff]  ;;  %v7692_v55 = vpack.c.bf16 %v3954_v23, %v3945_v22 }
 0x69e   :  { %7719 = vmatprep.subr.bf16.mxu0 %v7718_v36  ;;  %v3882_v36 = vld [vmem:[#allocation4 + $0x678] sm:$0xff] }
 0x69f   :  { %7657 = vmatpush1.bf16.msra.mxu1 %v7656_v38  ;;  %v3875_v38 = vld [vmem:[#allocation4 + $0x640] sm:$0xff]  ;;  %v7676_v39 = vpack.c.bf16 %v3882_v36, %v3873_v37  ;;  %v7822_v37 = vpack.c.bf16 %v3691_v63, %v3682_v34  ;;  %v3242_v36 = vld [vmem:[#allocation8 + $0x120] sm:$0xff] }
 0x6a0   :  { %7659 = vmatprep.subr.bf16.mxu1 %v7658_v25  ;;  %v7678_v25 = vpack.c.bf16 %v3901_v58, %v3892_v10  ;;  %v3244_v10 = vld [vmem:[#allocation8 + $0x130] sm:$0xff] }
 0x6a1   :  { %7721 = vmatpush1.bf16.msra.mxu0 %v7720_v41  ;;  %v7740_v41 = vpack.c.bf16 %v3884_v40, %v3875_v38 }
 0x6a2   :  { %7723 = vmatprep.subr.bf16.mxu0 %v7722_v45  ;;  %v7742_v45 = vpack.c.bf16 %v3903_v54, %v3894_v42 }
 0x6a3   :  { %7661 = vmatpush1.bf16.msra.mxu1 %v7660_v19  ;;  %v7680_v19 = vpack.c.bf16 %v3900_v44, %v3891_v43 }
 0x6a4   :  { %7663 = vmatprep.subr.bf16.mxu1 %v7662_v52  ;;  %v3921_v52 = vld [vmem:[#allocation4 + $0x7b0] sm:$0xff] }
 0x6a5   :  { %7725 = vmatpush1.bf16.msra.mxu0 %v7724_v62  ;;  %v3910_v62 = vld [vmem:[#allocation4 + $0x758] sm:$0xff]  ;;  %v7746_v16 = vpack.c.bf16 %v3921_v52, %v3912_v51 }
 0x6a6   :  { %7727 = vmatprep.subr.bf16.mxu0 %v7726_v56  ;;  %v7682_v53 = vpack.c.bf16 %v3919_v49, %v3910_v62  ;;  %v3918_v56 = vld [vmem:[#allocation4 + $0x798] sm:$0xff] }
 0x6a7   :  { %7665 = vmatpush1.bf16.msra.mxu1 %v7664_v57  ;;  %v3911_v57 = vld [vmem:[#allocation4 + $0x760] sm:$0xff]  ;;  %v7684_v59 = vpack.c.bf16 %v3918_v56, %v3909_v61  ;;  %v3247_v62 = vld [vmem:[#allocation8 + $0x148] sm:$0xff]  ;;  %v8809_v56 = vld [vmem:[#allocation10 + $0x38] sm:$0xff] }
 0x6a8   :  { %7667 = vmatprep.subr.bf16.mxu1 %v7666_v5  ;;  %v7748_v1 = vpack.c.bf16 %v3920_v60, %v3911_v57  ;;  %v3930_v5 = vld [vmem:[#allocation4 + $0x7f8] sm:$0xff] }
 0x6a9   :  { %7729 = vmatpush1.bf16.msra.mxu0 %v7728_v15  ;;  %v3928_v15 = vld [vmem:[#allocation4 + $0x7e8] sm:$0xff]  ;;  %v7750_v7 = vpack.c.bf16 %v3939_v3, %v3930_v5  ;;  %v3248_v3 = vld [vmem:[#allocation8 + $0x150] sm:$0xff] }
 0x6aa   :  { %7731 = vmatprep.subr.bf16.mxu0 %v7730_v8  ;;  %v7686_v2 = vpack.c.bf16 %v3937_v0, %v3928_v15  ;;  %v3936_v8 = vld [vmem:[#allocation4 + $0x828] sm:$0xff] }
 0x6ab   :  { %7669 = vmatpush1.bf16.msra.mxu1 %v7668_v18  ;;  %v3929_v18 = vld [vmem:[#allocation4 + $0x7f0] sm:$0xff]  ;;  %v7688_v26 = vpack.c.bf16 %v3936_v8, %v3927_v6  ;;  %v3245_v15 = vld [vmem:[#allocation8 + $0x138] sm:$0xff] }
 0x6ac   :  { %7671 = vmatprep.subr.bf16.mxu1 %v7670_v20  ;;  %v7752_v20 = vpack.c.bf16 %v3938_v9, %v3929_v18 }
 0x6ad   :  { %7733 = vmatpush1.bf16.msra.mxu0 %v7732_v12  ;;  %v3955_v12 = vld [vmem:[#allocation4 + $0x8c0] sm:$0xff] }
 0x6ae   :  { %7735 = vmatprep.subr.bf16.mxu0 %v7734_v27  ;;  %v7690_v21 = vpack.c.bf16 %v3955_v12, %v3946_v11  ;;  %v7754_v27 = vpack.c.bf16 %v3957_v14, %v3948_v13 }
 0x6af   :  { %7673 = vmatpush1.bf16.msra.mxu1 %v7672_v28  ;;  %v3947_v28 = vld [vmem:[#allocation4 + $0x880] sm:$0xff] }
 0x6b0   :  { %7675 = vmatprep.subr.bf16.mxu1 %v7674_v35  ;;  %v7758_v35 = vpack.c.bf16 %v3689_v33, %v3680_v32 }
 0x6b1   :  { %7737 = vmatpush1.bf16.msra.mxu0 %v7736_v30  ;;  %v7756_v30 = vpack.c.bf16 %v3956_v29, %v3947_v28 }
 0x6b2   :  { %7739 = vmatprep.subr.bf16.mxu0 %v7738_v17  ;;  %v3243_v17 = vld [vmem:[#allocation8 + $0x128] sm:$0xff] }
 0x6b3   :  { %7677 = vmatpush1.bf16.msra.mxu1 %v7676_v39 }
 0x6b4   :  { %7679 = vmatprep.subr.bf16.mxu1 %v7678_v25 }
 0x6b5   :  { %7741 = vmatpush1.bf16.msra.mxu0 %v7740_v41 }
 0x6b6   :  { %7743 = vmatprep.subr.bf16.mxu0 %v7742_v45  ;;  %v3249_v45 = vld [vmem:[#allocation8 + $0x158] sm:$0xff] }
 0x6b7   :  { %7681 = vmatpush1.bf16.msra.mxu1 %v7680_v19 }
 0x6b8   :  { %7683 = vmatprep.subr.bf16.mxu1 %v7682_v53 }
 0x6b9   :  { %7745 = vmatpush1.bf16.msra.mxu0 %v7744_v48  ;;  %v3246_v48 = vld [vmem:[#allocation8 + $0x140] sm:$0xff] }
 0x6ba   :  { %7747 = vmatprep.subr.bf16.mxu0 %v7746_v16 }
 0x6bb   :  { %7685 = vmatpush1.bf16.msra.mxu1 %v7684_v59 }
 0x6bc   :  { %7687 = vmatprep.subr.bf16.mxu1 %v7686_v2 }
 0x6bd   :  { %7749 = vmatpush1.bf16.msra.mxu0 %v7748_v1 }
 0x6be   :  { %7751 = vmatprep.subr.bf16.mxu0 %v7750_v7 }
 0x6bf   :  { %7689 = vmatpush1.bf16.msra.mxu1 %v7688_v26 }
 0x6c0   :  { %7691 = vmatprep.subr.bf16.mxu1 %v7690_v21 }
 0x6c1   :  { %7753 = vmatpush1.bf16.msra.mxu0 %v7752_v20  ;;  %v3250_v20 = vld [vmem:[#allocation8 + $0x160] sm:$0xff] }
 0x6c2   :  { %7755 = vmatprep.subr.bf16.mxu0 %v7754_v27 }
 0x6c3   :  { %7693 = vmatpush1.bf16.msra.mxu1 %v7692_v55 }
 0x6c4   :  { %7759 = vmatprep.subr.bf16.mxu1 %v7758_v35 }
 0x6c5   :  { %7757 = vmatpush1.bf16.msra.mxu0 %v7756_v30 }
 0x6c6   :  { %7823 = vmatprep.subr.bf16.mxu0 %v7822_v37 }
 0x6fb   :  { %v9106_v24 = vpop.f32.mrb[20].mxu0  ;;  %v9108_v50 = vpop.f32.mrb[20].mxu1 }
 0x6fc   :  { %v9110_v31 = vpop.f32.mrb[21].mxu0  ;;  %v9112_v4 = vpop.f32.mrb[21].mxu1  ;;  %v3318_v39 = vadd.f32 %v9106_v24, %v3242_v36  ;;  %v3389_v58 = vadd.f32 %v9108_v50, %v3244_v10 }
 0x6fd   :  { %v3320_v38 = vadd.f32 %v9110_v31, %v3243_v17  ;;  %v3391_v2 = vadd.f32 %v9112_v4, %v3245_v15 }
 0x6fe   :  { %v5882_v41 = vmul.f32 -1.442695, %v3318_v39  ;;  %v5884_v54 = vmul.f32 -1.442695, %v3389_v58 }
 0x6ff   :  { %v5883_v40 = vmul.f32 -1.442695, %v3320_v38  ;;  %v5885_v5 = vmul.f32 -1.442695, %v3391_v2 }
 0x701   :  { %8656 = vpow2.f32 %v5883_v40 }
 0x702   :  { %8658 = vpow2.f32 %v5882_v41 }
 0x703   :  { %8660 = vpow2.f32 %v5884_v54  ;;  %v3688_v54 = vld [vmem:[#allocation4 + $0x68] sm:$0xff] }
 0x70b   :  { %v8657_v42 = vpop.eup %8656 }
 0x70c   :  { %v8659_v25 = vpop.eup %8658  ;;  %v3627_v43 = vadd.f32 1.0, %v8657_v42 }
 0x70d   :  { %v3626_v44 = vadd.f32 1.0, %v8659_v25  ;;  %v8661_v49 = vpop.eup %8660  ;;  %v3679_v25 = vld [vmem:[#allocation4 + $0x20] sm:$0xff] }
 0x70e   :  { %8662 = vrcp.f32 %v3627_v43  ;;  %v3628_v61 = vadd.f32 1.0, %v8661_v49  ;;  %v3681_v43 = vld [vmem:[#allocation4 + $0x30] sm:$0xff] }
 0x70f   :  { %8664 = vrcp.f32 %v3626_v44  ;;  %v3690_v44 = vld [vmem:[#allocation4 + $0x78] sm:$0xff]  ;;  %v3697_v49 = vld [vmem:[#allocation4 + $0xb0] sm:$0xff] }
 0x718   :  { %v8663_v50 = vpop.eup %8662 }
 0x719   :  { %v8665_v53 = vpop.eup %8664  ;;  %v3649_v57 = vmul.f32 %v8809_v56, %v8663_v50  ;;  %v3699_v50 = vld [vmem:[#allocation4 + $0xc0] sm:$0xff] }
 0x73b   :  { %v3459_v19 = vpop.f32.mrb[22].mxu0  ;;  %v3530_v46 = vpop.f32.mrb[22].mxu1 }
 0x73c   :  { %v3461_v47 = vpop.f32.mrb[23].mxu0  ;;  %v3532_v31 = vpop.f32.mrb[23].mxu1  ;;  %v3460_v52 = vadd.f32 %v3459_v19, %v3246_v48  ;;  %v3531_v6 = vadd.f32 %v3530_v46, %v3248_v3  ;;  %v3707_v46 = vld [vmem:[#allocation4 + $0x100] sm:$0xff]  ;;  %v7824_v48 = vpack.c.bf16 %v3690_v44, %v3681_v43  ;;  %v3717_v3 = vld [vmem:[#allocation4 + $0x150] sm:$0xff]  ;;  %v3780_v43 = vld [vmem:[#allocation4 + $0x348] sm:$0xff] }
 0x73d   :  { %v3533_v24 = vadd.f32 %v3532_v31, %v3249_v45  ;;  %v3462_v51 = vadd.f32 %v3461_v47, %v3247_v62  ;;  %v3698_v45 = vld [vmem:[#allocation4 + $0xb8] sm:$0xff]  ;;  %v3700_v47 = vld [vmem:[#allocation4 + $0xc8] sm:$0xff]  ;;  %v3709_v31 = vld [vmem:[#allocation4 + $0x110] sm:$0xff]  ;;  %v7760_v62 = vpack.c.bf16 %v3688_v54, %v3679_v25 }
 0x73e   :  { %v5886_v0 = vmul.f32 -1.442695, %v3460_v52  ;;  %v5888_v11 = vmul.f32 -1.442695, %v3531_v6  ;;  %v3708_v52 = vld [vmem:[#allocation4 + $0x108] sm:$0xff]  ;;  %v3726_v6 = vld [vmem:[#allocation4 + $0x198] sm:$0xff] }
 0x73f   :  { %8666 = vtanh.f32 %v3533_v24  ;;  %v5887_v59 = vmul.f32 -1.442695, %v3462_v51  ;;  %v3706_v51 = vld [vmem:[#allocation4 + $0xf8] sm:$0xff]  ;;  %v7828_v15 = vpack.c.bf16 %v3708_v52, %v3699_v50  ;;  %v3771_v54 = vld [vmem:[#allocation4 + $0x300] sm:$0xff]  ;;  %v3788_v44 = vld [vmem:[#allocation4 + $0x388] sm:$0xff] }
 0x740   :  { %8668 = vrcp.f32 %v3628_v61  ;;  %v7826_v61 = vpack.c.bf16 %v3709_v31, %v3700_v47  ;;  %v7844_v31 = vpack.c.bf16 %v3780_v43, %v3771_v54  ;;  %v3789_v50 = vld [vmem:[#allocation4 + $0x390] sm:$0xff]  ;;  %v3798_v52 = vld [vmem:[#allocation4 + $0x3d8] sm:$0xff]  ;;  %v3887_v43 = vld [vmem:[#allocation4 + $0x6a0] sm:$0xff] }
 0x741   :  { %8670 = vpow2.f32 %v5887_v59  ;;  %v3727_v59 = vld [vmem:[#allocation4 + $0x1a0] sm:$0xff]  ;;  %v3878_v54 = vld [vmem:[#allocation4 + $0x658] sm:$0xff] }
 0x742   :  { %8672 = vpow2.f32 %v5886_v0  ;;  %v3715_v0 = vld [vmem:[#allocation4 + $0x140] sm:$0xff] }
 0x749   :  { %v8667_v16 = vpop.eup %8666 }
 0x74a   :  { %v3650_v60 = vmul.f32 %v8667_v16, %v8665_v53  ;;  %v8669_v7 = vpop.eup %8668  ;;  %v3716_v53 = vld [vmem:[#allocation4 + $0x148] sm:$0xff]  ;;  %v7762_v16 = vpack.c.bf16 %v3707_v46, %v3698_v45  ;;  %v3797_v45 = vld [vmem:[#allocation4 + $0x3d0] sm:$0xff]  ;;  %v3799_v46 = vld [vmem:[#allocation4 + $0x3e0] sm:$0xff] }
 0x74b   :  { %v8671_v8 = vpop.eup %8670 }
 0x74c   :  { %v3651_v1 = vadd.f32 %v3650_v60, %v3649_v57  ;;  %v8673_v18 = vpop.eup %8672  ;;  %v3631_v12 = vadd.f32 1.0, %v8671_v8  ;;  %v3718_v57 = vld [vmem:[#allocation4 + $0x158] sm:$0xff]  ;;  %v7764_v60 = vpack.c.bf16 %v3706_v51, %v3697_v49  ;;  %v3743_v8 = vld [vmem:[#allocation4 + $0x220] sm:$0xff]  ;;  %v7782_v49 = vpack.c.bf16 %v3797_v45, %v3788_v44  ;;  %v3880_v44 = vld [vmem:[#allocation4 + $0x668] sm:$0xff] }
 0x74d   :  { %v3630_v14 = vadd.f32 1.0, %v8673_v18  ;;  %v3736_v18 = vld [vmem:[#allocation4 + $0x1e8] sm:$0xff]  ;;  %v3889_v45 = vld [vmem:[#allocation4 + $0x6b0] sm:$0xff] }
 0x74e   :  { %8674 = vtanh.f32 %v3651_v1 }
 0x74f   :  { %8676 = vpow2.f32 %v5885_v5  ;;  %v7830_v5 = vpack.c.bf16 %v3727_v59, %v3718_v57  ;;  %v7848_v59 = vpack.c.bf16 %v3798_v52, %v3789_v50  ;;  %v3896_v50 = vld [vmem:[#allocation4 + $0x6e8] sm:$0xff]  ;;  %v3905_v52 = vld [vmem:[#allocation4 + $0x730] sm:$0xff] }
 0x750   :  { %8678 = vpow2.f32 %v5888_v11 }
 0x751   :  { %8680 = vrcp.f32 %v3631_v12  ;;  %v7832_v12 = vpack.c.bf16 %v3726_v6, %v3717_v3  ;;  %v3824_v3 = vld [vmem:[#allocation4 + $0x4a8] sm:$0xff]  ;;  %v3833_v6 = vld [vmem:[#allocation4 + $0x4f0] sm:$0xff] }
 0x752   :  { %8682 = vrcp.f32 %v3630_v14 }
 0x758   :  { %v8675_v9 = vpop.eup %8674 }
 0x759   :  { %v3656_v13 = vmul.f32 %v8675_v9, %v8669_v7  ;;  %v8677_v23 = vpop.eup %8676  ;;  %v3734_v7 = vld [vmem:[#allocation4 + $0x1d8] sm:$0xff]  ;;  %v3745_v9 = vld [vmem:[#allocation4 + $0x230] sm:$0xff] }
 0x75a   :  { %v3629_v27 = vadd.f32 1.0, %v8677_v23  ;;  %v8679_v28 = vpop.eup %8678  ;;  %v7770_v14 = vpack.c.bf16 %v3743_v8, %v3734_v7  ;;  %v3761_v23 = vld [vmem:[#allocation4 + $0x2b0] sm:$0xff]  ;;  %v3826_v7 = vld [vmem:[#allocation4 + $0x4b8] sm:$0xff]  ;;  %v3835_v8 = vld [vmem:[#allocation4 + $0x500] sm:$0xff] }
 0x75b   :  { %v6082_v26 = vpop.f32.mrb[24].mxu0  ;;  %v8681_v29 = vpop.eup %8680  ;;  %v3632_v32 = vadd.f32 1.0, %v8679_v28  ;;  %v3763_v28 = vld [vmem:[#allocation4 + $0x2c0] sm:$0xff] }
 0x75c   :  { %v6083_v21 = vpop.f32.mrb[25].mxu0  ;;  %v8683_v55 = vpop.eup %8682  ;;  %v3652_v33 = vmul.f32 %v8809_v56, %v8681_v29  ;;  %v3725_v56 = vld [vmem:[#allocation4 + $0x190] sm:$0xff] }
 0x75d   :  { %v6084_v22 = vadd.f32 %v6083_v21, %v6082_v26  ;;  %v7766_v2 = vpack.c.bf16 %v3725_v56, %v3716_v53  ;;  %v3742_v26 = vld [vmem:[#allocation4 + $0x218] sm:$0xff]  ;;  %v3735_v21 = vld [vmem:[#allocation4 + $0x1e0] sm:$0xff]  ;;  %v3817_v56 = vld [vmem:[#allocation4 + $0x470] sm:$0xff] }
 0x75e   :  { %v3806_v53 = vld [vmem:[#allocation4 + $0x418] sm:$0xff] }
 0x75f   :  { %v3602_v4 = vadd.f32 %v6084_v22, %v3250_v20  ;;  %v7834_v20 = vpack.c.bf16 %v3745_v9, %v3736_v18  ;;  %v3744_v22 = vld [vmem:[#allocation4 + $0x228] sm:$0xff] }
 0x761   :  { %8684 = vtanh.f32 %v3602_v4  ;;  %v3752_v4 = vld [vmem:[#allocation4 + $0x268] sm:$0xff] }
 0x762   :  { %8686 = vrcp.f32 %v3629_v27  ;;  %v3754_v27 = vld [vmem:[#allocation4 + $0x278] sm:$0xff] }
 0x763   :  { %8688 = vrcp.f32 %v3632_v32  ;;  %v3760_v32 = vld [vmem:[#allocation4 + $0x2a8] sm:$0xff] }
 0x76b   :  { %v8685_v30 = vpop.eup %8684 }
 0x76c   :  { %v3653_v34 = vmul.f32 %v8685_v30, %v8683_v55  ;;  %v8687_v37 = vpop.eup %8686  ;;  %v7836_v55 = vpack.c.bf16 %v3744_v22, %v3735_v21  ;;  %v3751_v30 = vld [vmem:[#allocation4 + $0x260] sm:$0xff]  ;;  %v3842_v21 = vld [vmem:[#allocation4 + $0x538] sm:$0xff] }
 0x76d   :  { %v8689_v38 = vpop.eup %8688  ;;  %v3851_v22 = vld [vmem:[#allocation4 + $0x580] sm:$0xff] }
 0x76e   :  { %v3654_v35 = vadd.f32 %v3653_v34, %v3652_v33  ;;  %v7774_v33 = vpack.c.bf16 %v3761_v23, %v3752_v4  ;;  %v7838_v34 = vpack.c.bf16 %v3763_v28, %v3754_v27  ;;  %v3844_v4 = vld [vmem:[#allocation4 + $0x548] sm:$0xff]  ;;  %v3853_v23 = vld [vmem:[#allocation4 + $0x590] sm:$0xff] }
 0x770   :  { %8690 = vtanh.f32 %v3654_v35  ;;  %v3659_v63 = vsub.f32 %v3651_v1, %v3654_v35  ;;  %v3724_v1 = vld [vmem:[#allocation4 + $0x188] sm:$0xff] }
 0x771   :  { %v7768_v11 = vpack.c.bf16 %v3724_v1, %v3715_v0 }
 0x772   :  { %v3660_v17 = vmul.f32 %v8687_v37, %v3659_v63  ;;  %v3762_v63 = vld [vmem:[#allocation4 + $0x2b8] sm:$0xff] }
 0x774   :  { %v3661_v36 = vadd.f32 %v3660_v17, %v3654_v35  ;;  %v3753_v35 = vld [vmem:[#allocation4 + $0x270] sm:$0xff]  ;;  %v3779_v17 = vld [vmem:[#allocation4 + $0x340] sm:$0xff] }
 0x776   :  { %3669 = vst [vmem:[#allocation10 + $0x48] sm:$0xff] %v3661_v36  ;;  %v3772_v36 = vld [vmem:[#allocation4 + $0x308] sm:$0xff] }
 0x77a   :  { %v8691_v39 = vpop.eup %8690 }
 0x77b   :  { %v3658_v40 = vmul.f32 %v8691_v39, %v8689_v38  ;;  %v3781_v38 = vld [vmem:[#allocation4 + $0x350] sm:$0xff]  ;;  %v7776_v39 = vpack.c.bf16 %v3760_v32, %v3751_v30  ;;  %v7794_v30 = vpack.c.bf16 %v3851_v22, %v3842_v21  ;;  %v7858_v32 = vpack.c.bf16 %v3853_v23, %v3844_v4  ;;  %v3934_v21 = vld [vmem:[#allocation4 + $0x818] sm:$0xff]  ;;  %v3943_v22 = vld [vmem:[#allocation4 + $0x860] sm:$0xff] }
 0x77c   :  { %v7842_v25 = vpack.c.bf16 %v3781_v38, %v3772_v36 }
 0x77d   :  { %v3662_v41 = vsub.f32 %v3656_v13, %v3658_v40  ;;  %v3733_v13 = vld [vmem:[#allocation4 + $0x1d0] sm:$0xff] }
 0x77e   :  { %v7772_v29 = vpack.c.bf16 %v3742_v26, %v3733_v13  ;;  %v7790_v13 = vpack.c.bf16 %v3833_v6, %v3824_v3  ;;  %v7854_v26 = vpack.c.bf16 %v3835_v8, %v3826_v7  ;;  %v3916_v3 = vld [vmem:[#allocation4 + $0x788] sm:$0xff]  ;;  %v3925_v6 = vld [vmem:[#allocation4 + $0x7d0] sm:$0xff] }
 0x77f   :  { %v3663_v10 = vmul.f32 %v8687_v37, %v3662_v41  ;;  %v3770_v37 = vld [vmem:[#allocation4 + $0x2f8] sm:$0xff]  ;;  %v3769_v41 = vld [vmem:[#allocation4 + $0x2f0] sm:$0xff] }
 0x781   :  { %v9118_v58 = vadd.f32 %v3663_v10, %v3658_v40  ;;  %v7840_v40 = vpack.c.bf16 %v3762_v63, %v3753_v35  ;;  %v3778_v10 = vld [vmem:[#allocation4 + $0x338] sm:$0xff]  ;;  %v3860_v35 = vld [vmem:[#allocation4 + $0x5c8] sm:$0xff]  ;;  %v3869_v63 = vld [vmem:[#allocation4 + $0x610] sm:$0xff] }
 0x782   :  { %v7780_v47 = vpack.c.bf16 %v3778_v10, %v3769_v41  ;;  %v7798_v41 = vpack.c.bf16 %v3869_v63, %v3860_v35  ;;  %v3952_v35 = vld [vmem:[#allocation4 + $0x8a8] sm:$0xff]  ;;  %v3961_v63 = vld [vmem:[#allocation4 + $0x8f0] sm:$0xff] }
 0x783   :  { %3668 = vst [vmem:[#allocation10 + $0x40] sm:$0xff] %v9118_v58  ;;  %v3672_v42 = vadd.f32 1e-06, %v9118_v58 }
 0x785   :  { %8692 = vlog2.f32 %v3672_v42  ;;  %v7778_v42 = vpack.c.bf16 %v3779_v17, %v3770_v37  ;;  %v3862_v37 = vld [vmem:[#allocation4 + $0x5d8] sm:$0xff]  ;;  %v3871_v17 = vld [vmem:[#allocation4 + $0x620] sm:$0xff] }
 0x786   :  { %v7862_v10 = vpack.c.bf16 %v3871_v17, %v3862_v37 }
 0x78f   :  { %v8693_v19 = vpop.eup %8692 }
 0x790   :  { %v9122_v24 = vmul.f32 0.6931472, %v8693_v19  ;;  %v3790_v19 = vld [vmem:[#allocation4 + $0x398] sm:$0xff] }
 0x791   :  { %v7846_v51 = vpack.c.bf16 %v3799_v46, %v3790_v19 }
 0x792   :  { %4037 = vmatprep.mubr.f32.mxu1 %v9122_v24  ;;  %4108 = vmatprep.mubr.f32.mxu0 %v9122_v24 }
 0x793   :  { %4038 = vmatmul.mubr.f32.vlgmr.msra.gmra.mrb[24].mxu1 %v9118_v58  ;;  %4109 = vmatmul.mubr.f32.vlgmr.msra.gmra.mrb[26].mxu0 %v9118_v58 }
 0x794   :  { %7761 = vmatpush1.bf16.msra.mxu1 %v7760_v62  ;;  %7825 = vmatpush1.bf16.msra.mxu0 %v7824_v48  ;;  %v3787_v62 = vld [vmem:[#allocation4 + $0x380] sm:$0xff]  ;;  %v3796_v48 = vld [vmem:[#allocation4 + $0x3c8] sm:$0xff] }
 0x795   :  { %4179 = vmatprep.mubr.f32.mxu1 %v9122_v24  ;;  %4250 = vmatprep.mubr.f32.mxu0 %v9122_v24  ;;  %v7784_v57 = vpack.c.bf16 %v3796_v48, %v3787_v62  ;;  %v7802_v62 = vpack.c.bf16 %v3887_v43, %v3878_v54  ;;  %v7866_v48 = vpack.c.bf16 %v3889_v45, %v3880_v44  ;;  %v3683_v45 = vld [vmem:[#allocation4 + $0x40] sm:$0xff] }
 0x796   :  { %7763 = vmatprep.subr.bf16.mxu1 %v7762_v16  ;;  %7827 = vmatprep.subr.bf16.mxu0 %v7826_v61  ;;  %v3815_v16 = vld [vmem:[#allocation4 + $0x460] sm:$0xff]  ;;  %v3808_v61 = vld [vmem:[#allocation4 + $0x428] sm:$0xff] }
 0x797   :  { %v7786_v0 = vpack.c.bf16 %v3815_v16, %v3806_v53  ;;  %v7850_v1 = vpack.c.bf16 %v3817_v56, %v3808_v61  ;;  %v3898_v53 = vld [vmem:[#allocation4 + $0x6f8] sm:$0xff]  ;;  %v3907_v16 = vld [vmem:[#allocation4 + $0x740] sm:$0xff] }
 0x798   :  { %7765 = vmatpush1.bf16.msra.mxu1 %v7764_v60  ;;  %7829 = vmatpush1.bf16.msra.mxu0 %v7828_v15  ;;  %v3805_v60 = vld [vmem:[#allocation4 + $0x410] sm:$0xff]  ;;  %v3814_v15 = vld [vmem:[#allocation4 + $0x458] sm:$0xff] }
 0x799   :  { %7767 = vmatprep.subr.bf16.mxu1 %v7766_v2  ;;  %7831 = vmatprep.subr.bf16.mxu0 %v7830_v5  ;;  %v3807_v2 = vld [vmem:[#allocation4 + $0x420] sm:$0xff]  ;;  %v3816_v5 = vld [vmem:[#allocation4 + $0x468] sm:$0xff]  ;;  %v7788_v18 = vpack.c.bf16 %v3814_v15, %v3805_v60  ;;  %v7806_v60 = vpack.c.bf16 %v3905_v52, %v3896_v50  ;;  %v7870_v15 = vpack.c.bf16 %v3907_v16, %v3898_v53 }
 0x79a   :  { %v7852_v9 = vpack.c.bf16 %v3816_v5, %v3807_v2  ;;  %v3914_v2 = vld [vmem:[#allocation4 + $0x778] sm:$0xff]  ;;  %v3923_v5 = vld [vmem:[#allocation4 + $0x7c0] sm:$0xff]  ;;  %v3872_v50 = vld [vmem:[#allocation4 + $0x628] sm:$0xff] }
 0x79b   :  { %v3719_v16 = vld [vmem:[#allocation4 + $0x160] sm:$0xff] }
 0x79c   :  { %7769 = vmatpush1.bf16.msra.mxu1 %v7768_v11  ;;  %7833 = vmatpush1.bf16.msra.mxu0 %v7832_v12  ;;  %v3823_v11 = vld [vmem:[#allocation4 + $0x4a0] sm:$0xff]  ;;  %v3832_v12 = vld [vmem:[#allocation4 + $0x4e8] sm:$0xff] }
 0x79d   :  { %7771 = vmatprep.subr.bf16.mxu1 %v7770_v14  ;;  %7835 = vmatprep.subr.bf16.mxu0 %v7834_v20  ;;  %v3825_v14 = vld [vmem:[#allocation4 + $0x4b0] sm:$0xff]  ;;  %v3834_v20 = vld [vmem:[#allocation4 + $0x4f8] sm:$0xff]  ;;  %v7792_v27 = vpack.c.bf16 %v3832_v12, %v3823_v11  ;;  %v7810_v11 = vpack.c.bf16 %v3923_v5, %v3914_v2  ;;  %v7874_v12 = vpack.c.bf16 %v3925_v6, %v3916_v3  ;;  %v3908_v2 = vld [vmem:[#allocation4 + $0x748] sm:$0xff] }
 0x79e   :  { %v7856_v28 = vpack.c.bf16 %v3834_v20, %v3825_v14  ;;  %v3932_v14 = vld [vmem:[#allocation4 + $0x808] sm:$0xff]  ;;  %v3941_v20 = vld [vmem:[#allocation4 + $0x850] sm:$0xff] }
 0x79f   :  { %v3764_v6 = vld [vmem:[#allocation4 + $0x2c8] sm:$0xff] }
 0x7a0   :  { %7773 = vmatpush1.bf16.msra.mxu1 %v7772_v29  ;;  %7837 = vmatpush1.bf16.msra.mxu0 %v7836_v55  ;;  %v3841_v29 = vld [vmem:[#allocation4 + $0x530] sm:$0xff]  ;;  %v3850_v55 = vld [vmem:[#allocation4 + $0x578] sm:$0xff] }
 0x7a1   :  { %7775 = vmatprep.subr.bf16.mxu1 %v7774_v33  ;;  %7839 = vmatprep.subr.bf16.mxu0 %v7838_v34  ;;  %v3843_v33 = vld [vmem:[#allocation4 + $0x540] sm:$0xff]  ;;  %v3852_v34 = vld [vmem:[#allocation4 + $0x588] sm:$0xff]  ;;  %v7796_v36 = vpack.c.bf16 %v3850_v55, %v3841_v29  ;;  %v7814_v29 = vpack.c.bf16 %v3941_v20, %v3932_v14  ;;  %v7878_v55 = vpack.c.bf16 %v3943_v22, %v3934_v21 }
 0x7a2   :  { %v7860_v38 = vpack.c.bf16 %v3852_v34, %v3843_v33  ;;  %v3950_v33 = vld [vmem:[#allocation4 + $0x898] sm:$0xff]  ;;  %v3959_v34 = vld [vmem:[#allocation4 + $0x8e0] sm:$0xff]  ;;  %v3800_v22 = vld [vmem:[#allocation4 + $0x3e8] sm:$0xff] }
 0x7a3   :  { %v3791_v21 = vld [vmem:[#allocation4 + $0x3a0] sm:$0xff] }
 0x7a4   :  { %7777 = vmatpush1.bf16.msra.mxu1 %v7776_v39  ;;  %7841 = vmatpush1.bf16.msra.mxu0 %v7840_v40  ;;  %v3859_v39 = vld [vmem:[#allocation4 + $0x5c0] sm:$0xff]  ;;  %v3868_v40 = vld [vmem:[#allocation4 + $0x608] sm:$0xff] }
 0x7a5   :  { %7779 = vmatprep.subr.bf16.mxu1 %v7778_v42  ;;  %7843 = vmatprep.subr.bf16.mxu0 %v7842_v25  ;;  %v3861_v42 = vld [vmem:[#allocation4 + $0x5d0] sm:$0xff]  ;;  %v3870_v25 = vld [vmem:[#allocation4 + $0x618] sm:$0xff]  ;;  %v7800_v19 = vpack.c.bf16 %v3868_v40, %v3859_v39  ;;  %v7882_v39 = vpack.c.bf16 %v3961_v63, %v3952_v35  ;;  %v4409_v63 = vld [vmem:[#allocation4 + $0x60] sm:$0xff] }
 0x7a6   :  { %v7864_v46 = vpack.c.bf16 %v3870_v25, %v3861_v42  ;;  %v3958_v40 = vld [vmem:[#allocation4 + $0x8d8] sm:$0xff]  ;;  %v3827_v42 = vld [vmem:[#allocation4 + $0x4c0] sm:$0xff]  ;;  %v3836_v25 = vld [vmem:[#allocation4 + $0x508] sm:$0xff] }
 0x7a7   :  { %v7886_v44 = vpack.c.bf16 %v3836_v25, %v3827_v42  ;;  %v4425_v42 = vld [vmem:[#allocation4 + $0xe0] sm:$0xff]  ;;  %v4418_v25 = vld [vmem:[#allocation4 + $0xa8] sm:$0xff] }
 0x7a8   :  { %7781 = vmatpush1.bf16.msra.mxu1 %v7780_v47  ;;  %7845 = vmatpush1.bf16.msra.mxu0 %v7844_v31  ;;  %v3877_v47 = vld [vmem:[#allocation4 + $0x650] sm:$0xff]  ;;  %v3886_v31 = vld [vmem:[#allocation4 + $0x698] sm:$0xff] }
 0x7a9   :  { %7783 = vmatprep.subr.bf16.mxu1 %v7782_v49  ;;  %7847 = vmatprep.subr.bf16.mxu0 %v7846_v51  ;;  %v3879_v49 = vld [vmem:[#allocation4 + $0x660] sm:$0xff]  ;;  %v3888_v51 = vld [vmem:[#allocation4 + $0x6a8] sm:$0xff]  ;;  %v7804_v61 = vpack.c.bf16 %v3886_v31, %v3877_v47  ;;  %v3854_v47 = vld [vmem:[#allocation4 + $0x598] sm:$0xff] }
 0x7aa   :  { %v7868_v56 = vpack.c.bf16 %v3888_v51, %v3879_v49  ;;  %v3710_v49 = vld [vmem:[#allocation4 + $0x118] sm:$0xff]  ;;  %v3863_v51 = vld [vmem:[#allocation4 + $0x5e0] sm:$0xff] }
 0x7ab   :  { %v7894_v53 = vpack.c.bf16 %v3872_v50, %v3863_v51  ;;  %v4445_v50 = vld [vmem:[#allocation4 + $0x180] sm:$0xff] }
 0x7ac   :  { %7785 = vmatpush1.bf16.msra.mxu1 %v7784_v57  ;;  %7849 = vmatpush1.bf16.msra.mxu0 %v7848_v59  ;;  %v3895_v57 = vld [vmem:[#allocation4 + $0x6e0] sm:$0xff]  ;;  %v3904_v59 = vld [vmem:[#allocation4 + $0x728] sm:$0xff] }
 0x7ad   :  { %7787 = vmatprep.subr.bf16.mxu1 %v7786_v0  ;;  %7851 = vmatprep.subr.bf16.mxu0 %v7850_v1  ;;  %v3897_v0 = vld [vmem:[#allocation4 + $0x6f0] sm:$0xff]  ;;  %v3906_v1 = vld [vmem:[#allocation4 + $0x738] sm:$0xff]  ;;  %v7808_v7 = vpack.c.bf16 %v3904_v59, %v3895_v57 }
 0x7ae   :  { %v7872_v8 = vpack.c.bf16 %v3906_v1, %v3897_v0  ;;  %v3890_v57 = vld [vmem:[#allocation4 + $0x6b8] sm:$0xff]  ;;  %v3899_v1 = vld [vmem:[#allocation4 + $0x700] sm:$0xff] }
 0x7af   :  { %v3746_v0 = vld [vmem:[#allocation4 + $0x238] sm:$0xff]  ;;  %v7902_v3 = vpack.c.bf16 %v3908_v2, %v3899_v1  ;;  %v4463_v2 = vld [vmem:[#allocation4 + $0x210] sm:$0xff] }
 0x7b0   :  { %7789 = vmatpush1.bf16.msra.mxu1 %v7788_v18  ;;  %7853 = vmatpush1.bf16.msra.mxu0 %v7852_v9  ;;  %v3913_v18 = vld [vmem:[#allocation4 + $0x770] sm:$0xff]  ;;  %v3922_v9 = vld [vmem:[#allocation4 + $0x7b8] sm:$0xff] }
 0x7b1   :  { %7791 = vmatprep.subr.bf16.mxu1 %v7790_v13  ;;  %7855 = vmatprep.subr.bf16.mxu0 %v7854_v26  ;;  %v3915_v13 = vld [vmem:[#allocation4 + $0x780] sm:$0xff]  ;;  %v3924_v26 = vld [vmem:[#allocation4 + $0x7c8] sm:$0xff]  ;;  %v7812_v4 = vpack.c.bf16 %v3922_v9, %v3913_v18 }
 0x7b2   :  { %v7876_v23 = vpack.c.bf16 %v3924_v26, %v3915_v13  ;;  %v3935_v13 = vld [vmem:[#allocation4 + $0x820] sm:$0xff]  ;;  %v3944_v26 = vld [vmem:[#allocation4 + $0x868] sm:$0xff] }
 0x7b3   :  { %v7910_v20 = vpack.c.bf16 %v3944_v26, %v3935_v13  ;;  %v4481_v26 = vld [vmem:[#allocation4 + $0x2a0] sm:$0xff] }
 0x7b4   :  { %7793 = vmatpush1.bf16.msra.mxu1 %v7792_v27  ;;  %7857 = vmatpush1.bf16.msra.mxu0 %v7856_v28  ;;  %v3931_v27 = vld [vmem:[#allocation4 + $0x800] sm:$0xff]  ;;  %v3940_v28 = vld [vmem:[#allocation4 + $0x848] sm:$0xff] }
 0x7b5   :  { %7795 = vmatprep.subr.bf16.mxu1 %v7794_v30  ;;  %7859 = vmatprep.subr.bf16.mxu0 %v7858_v32  ;;  %v3933_v30 = vld [vmem:[#allocation4 + $0x810] sm:$0xff]  ;;  %v3942_v32 = vld [vmem:[#allocation4 + $0x858] sm:$0xff]  ;;  %v7816_v37 = vpack.c.bf16 %v3940_v28, %v3931_v27  ;;  %v7912_v27 = vpack.c.bf16 %v3800_v22, %v3791_v21 }
 0x7b6   :  { %v7880_v17 = vpack.c.bf16 %v3942_v32, %v3933_v30  ;;  %v4398_v32 = vld [vmem:[#allocation4 + $0x8] sm:$0xff] }
 0x7b8   :  { %7797 = vmatpush1.bf16.msra.mxu1 %v7796_v36  ;;  %7861 = vmatpush1.bf16.msra.mxu0 %v7860_v38  ;;  %v3949_v36 = vld [vmem:[#allocation4 + $0x890] sm:$0xff]  ;;  %v7818_v38 = vpack.c.bf16 %v3959_v34, %v3950_v33  ;;  %v4400_v34 = vld [vmem:[#allocation4 + $0x18] sm:$0xff] }
 0x7b9   :  { %7799 = vmatprep.subr.bf16.mxu1 %v7798_v41  ;;  %7863 = vmatprep.subr.bf16.mxu0 %v7862_v10  ;;  %v3951_v41 = vld [vmem:[#allocation4 + $0x8a0] sm:$0xff]  ;;  %v3960_v10 = vld [vmem:[#allocation4 + $0x8e8] sm:$0xff]  ;;  %v7820_v54 = vpack.c.bf16 %v3958_v40, %v3949_v36  ;;  %v4407_v33 = vld [vmem:[#allocation4 + $0x50] sm:$0xff]  ;;  %v7982_v36 = vpack.c.bf16 %v4409_v63, %v4400_v34 }
 0x7ba   :  { %v7884_v43 = vpack.c.bf16 %v3960_v10, %v3951_v41  ;;  %v7918_v35 = vpack.c.bf16 %v4407_v33, %v4398_v32  ;;  %v4408_v40 = vld [vmem:[#allocation4 + $0x58] sm:$0xff]  ;;  %v4499_v32 = vld [vmem:[#allocation4 + $0x330] sm:$0xff] }
 0x7bb   :  { %v4416_v10 = vld [vmem:[#allocation4 + $0x98] sm:$0xff]  ;;  %v4487_v33 = vld [vmem:[#allocation4 + $0x2d0] sm:$0xff] }
 0x7bc   :  { %7801 = vmatpush1.bf16.msra.mxu1 %v7800_v19  ;;  %7865 = vmatpush1.bf16.msra.mxu0 %v7864_v46  ;;  %v3692_v19 = vld [vmem:[#allocation4 + $0x88] sm:$0xff]  ;;  %v3845_v46 = vld [vmem:[#allocation4 + $0x550] sm:$0xff]  ;;  %v4496_v34 = vld [vmem:[#allocation4 + $0x318] sm:$0xff] }
 0x7bd   :  { %7803 = vmatprep.subr.bf16.mxu1 %v7802_v62  ;;  %7867 = vmatprep.subr.bf16.mxu0 %v7866_v48  ;;  %v7888_v31 = vpack.c.bf16 %v3692_v19, %v3683_v45  ;;  %v7890_v62 = vpack.c.bf16 %v3854_v47, %v3845_v46  ;;  %v3701_v48 = vld [vmem:[#allocation4 + $0xd0] sm:$0xff]  ;;  %v4417_v46 = vld [vmem:[#allocation4 + $0xa0] sm:$0xff]  ;;  %v4426_v47 = vld [vmem:[#allocation4 + $0xe8] sm:$0xff]  ;;  %v7940_v63 = vpack.c.bf16 %v4496_v34, %v4487_v33 }
 0x7be   :  { %v7892_v52 = vpack.c.bf16 %v3710_v49, %v3701_v48  ;;  %v4443_v48 = vld [vmem:[#allocation4 + $0x170] sm:$0xff]  ;;  %v4436_v49 = vld [vmem:[#allocation4 + $0x138] sm:$0xff] }
 0x7c0   :  { %7805 = vmatpush1.bf16.msra.mxu1 %v7804_v61  ;;  %7869 = vmatpush1.bf16.msra.mxu0 %v7868_v56  ;;  %v3728_v61 = vld [vmem:[#allocation4 + $0x1a8] sm:$0xff]  ;;  %v3881_v56 = vld [vmem:[#allocation4 + $0x670] sm:$0xff] }
 0x7c1   :  { %7807 = vmatprep.subr.bf16.mxu1 %v7806_v60  ;;  %7871 = vmatprep.subr.bf16.mxu0 %v7870_v15  ;;  %v7896_v59 = vpack.c.bf16 %v3728_v61, %v3719_v16  ;;  %v7898_v60 = vpack.c.bf16 %v3890_v57, %v3881_v56  ;;  %v3737_v15 = vld [vmem:[#allocation4 + $0x1f0] sm:$0xff]  ;;  %v7990_v16 = vpack.c.bf16 %v4445_v50, %v4436_v49  ;;  %v4444_v57 = vld [vmem:[#allocation4 + $0x178] sm:$0xff] }
 0x7c2   :  { %v7900_v5 = vpack.c.bf16 %v3746_v0, %v3737_v15  ;;  %v4435_v56 = vld [vmem:[#allocation4 + $0x130] sm:$0xff]  ;;  %v4461_v15 = vld [vmem:[#allocation4 + $0x200] sm:$0xff]  ;;  %v4454_v0 = vld [vmem:[#allocation4 + $0x1c8] sm:$0xff] }
 0x7c3   :  { %v4532_v49 = vld [vmem:[#allocation4 + $0x438] sm:$0xff] }
 0x7c4   :  { %7809 = vmatpush1.bf16.msra.mxu1 %v7808_v7  ;;  %7873 = vmatpush1.bf16.msra.mxu0 %v7872_v8  ;;  %v3917_v7 = vld [vmem:[#allocation4 + $0x790] sm:$0xff]  ;;  %v3926_v8 = vld [vmem:[#allocation4 + $0x7d8] sm:$0xff] }
 0x7c5   :  { %7811 = vmatprep.subr.bf16.mxu1 %v7810_v11  ;;  %7875 = vmatprep.subr.bf16.mxu0 %v7874_v12  ;;  %v7906_v9 = vpack.c.bf16 %v3926_v8, %v3917_v7  ;;  %v3773_v11 = vld [vmem:[#allocation4 + $0x310] sm:$0xff]  ;;  %v3782_v12 = vld [vmem:[#allocation4 + $0x358] sm:$0xff]  ;;  %v4453_v7 = vld [vmem:[#allocation4 + $0x1c0] sm:$0xff] }
 0x7c6   :  { %v7908_v14 = vpack.c.bf16 %v3782_v12, %v3773_v11  ;;  %v4462_v8 = vld [vmem:[#allocation4 + $0x208] sm:$0xff]  ;;  %v4479_v11 = vld [vmem:[#allocation4 + $0x290] sm:$0xff]  ;;  %v4472_v12 = vld [vmem:[#allocation4 + $0x258] sm:$0xff] }
 0x7c7   :  { %v7998_v21 = vpack.c.bf16 %v4481_v26, %v4472_v12  ;;  %v4568_v12 = vld [vmem:[#allocation4 + $0x558] sm:$0xff] }
 0x7c8   :  { %7813 = vmatpush1.bf16.msra.mxu1 %v7812_v4  ;;  %7877 = vmatpush1.bf16.msra.mxu0 %v7876_v23  ;;  %v3953_v4 = vld [vmem:[#allocation4 + $0x8b0] sm:$0xff]  ;;  %v3962_v23 = vld [vmem:[#allocation4 + $0x8f8] sm:$0xff] }
 0x7c9   :  { %7815 = vmatprep.subr.bf16.mxu1 %v7814_v29  ;;  %7879 = vmatprep.subr.bf16.mxu0 %v7878_v55  ;;  %v7914_v28 = vpack.c.bf16 %v3962_v23, %v3953_v4  ;;  %v3809_v29 = vld [vmem:[#allocation4 + $0x430] sm:$0xff]  ;;  %v3818_v55 = vld [vmem:[#allocation4 + $0x478] sm:$0xff] }
 0x7ca   :  { %v7916_v30 = vpack.c.bf16 %v3818_v55, %v3809_v29  ;;  %v4471_v4 = vld [vmem:[#allocation4 + $0x250] sm:$0xff]  ;;  %v4480_v23 = vld [vmem:[#allocation4 + $0x298] sm:$0xff]  ;;  %v4497_v29 = vld [vmem:[#allocation4 + $0x320] sm:$0xff] }
 0x7cb   :  { %v4490_v55 = vld [vmem:[#allocation4 + $0x2e8] sm:$0xff] }
 0x7cc   :  { %7817 = vmatpush1.bf16.msra.mxu1 %v7816_v37  ;;  %7881 = vmatpush1.bf16.msra.mxu0 %v7880_v17  ;;  %v4397_v37 = vld [vmem:[#allocation4] sm:$0xff]  ;;  %v4406_v17 = vld [vmem:[#allocation4 + $0x48] sm:$0xff] }
 0x7cd   :  { %7819 = vmatprep.subr.bf16.mxu1 %v7818_v38  ;;  %7883 = vmatprep.subr.bf16.mxu0 %v7882_v39  ;;  %v7920_v38 = vpack.c.bf16 %v4406_v17, %v4397_v37  ;;  %v4399_v39 = vld [vmem:[#allocation4 + $0x10] sm:$0xff]  ;;  %v4489_v37 = vld [vmem:[#allocation4 + $0x2e0] sm:$0xff]  ;;  %v4498_v17 = vld [vmem:[#allocation4 + $0x328] sm:$0xff] }
 0x7ce   :  { %v7984_v41 = vpack.c.bf16 %v4408_v40, %v4399_v39  ;;  %v4515_v39 = vld [vmem:[#allocation4 + $0x3b0] sm:$0xff]  ;;  %v4508_v40 = vld [vmem:[#allocation4 + $0x378] sm:$0xff] }
 0x7d0   :  { %7821 = vmatpush1.bf16.msra.mxu1 %v7820_v54  ;;  %7885 = vmatpush1.bf16.msra.mxu0 %v7884_v43  ;;  %v4427_v54 = vld [vmem:[#allocation4 + $0xf0] sm:$0xff] }
 0x7d1   :  { %7887 = vmatprep.subr.bf16.mxu1 %v7886_v44  ;;  %7919 = vmatprep.subr.bf16.mxu0 %v7918_v35  ;;  %v4415_v43 = vld [vmem:[#allocation4 + $0x90] sm:$0xff]  ;;  %v4424_v44 = vld [vmem:[#allocation4 + $0xd8] sm:$0xff]  ;;  %v7986_v45 = vpack.c.bf16 %v4427_v54, %v4418_v25  ;;  %v8002_v35 = vpack.c.bf16 %v4499_v32, %v4490_v55  ;;  %v4514_v25 = vld [vmem:[#allocation4 + $0x3a8] sm:$0xff] }
 0x7d2   :  { %v7924_v19 = vpack.c.bf16 %v4424_v44, %v4415_v43  ;;  %v4507_v43 = vld [vmem:[#allocation4 + $0x370] sm:$0xff]  ;;  %v4516_v44 = vld [vmem:[#allocation4 + $0x3b8] sm:$0xff]  ;;  %v4586_v55 = vld [vmem:[#allocation4 + $0x5e8] sm:$0xff] }
 0x7d3   :  { %4180 = vmatmul.mubr.f32.vlgmr.msra.gmra.mrb[26].mxu1 %v9118_v58  ;;  %4251 = vmatmul.mubr.f32.vlgmr.msra.gmra.mrb[28].mxu0 %v9118_v58 }
 0x7d4   :  { %7889 = vmatpush3.bf16.msra.mxu1 %v7888_v31  ;;  %4321 = vmatprep.mubr.f32.mxu1 %v9122_v24  ;;  %v3755_v24 = vld [vmem:[#allocation4 + $0x280] sm:$0xff]  ;;  %v7988_v31 = vpack.c.bf16 %v4426_v47, %v4417_v46  ;;  %v4526_v47 = vld [vmem:[#allocation4 + $0x408] sm:$0xff] }
 0x7d5   :  { %7891 = vmatprep.subr.bf16.mxu1 %v7890_v62  ;;  %v7904_v18 = vpack.c.bf16 %v3764_v6, %v3755_v24  ;;  %7921 = vmatpush1.bf16.msra.mxu0 %v7920_v38  ;;  %v4434_v62 = vld [vmem:[#allocation4 + $0x128] sm:$0xff]  ;;  %v7994_v24 = vpack.c.bf16 %v4463_v2, %v4454_v0  ;;  %v4533_v46 = vld [vmem:[#allocation4 + $0x440] sm:$0xff] }
 0x7d6   :  { %v7926_v51 = vpack.c.bf16 %v4443_v48, %v4434_v62  ;;  %v4506_v38 = vld [vmem:[#allocation4 + $0x368] sm:$0xff]  ;;  %v4535_v62 = vld [vmem:[#allocation4 + $0x450] sm:$0xff] }
 0x7d7   :  { %v4523_v48 = vld [vmem:[#allocation4 + $0x3f0] sm:$0xff]  ;;  %v4550_v0 = vld [vmem:[#allocation4 + $0x4c8] sm:$0xff] }
 0x7d8   :  { %7893 = vmatpush3.bf16.msra.mxu1 %v7892_v52  ;;  %v4433_v52 = vld [vmem:[#allocation4 + $0x120] sm:$0xff]  ;;  %v7948_v50 = vpack.c.bf16 %v4532_v49, %v4523_v48  ;;  %v4622_v49 = vld [vmem:[#allocation4 + $0x708] sm:$0xff] }
 0x7d9   :  { %7895 = vmatprep.subr.bf16.mxu1 %v7894_v53  ;;  %v4442_v53 = vld [vmem:[#allocation4 + $0x168] sm:$0xff]  ;;  %v4613_v48 = vld [vmem:[#allocation4 + $0x6c0] sm:$0xff] }
 0x7da   :  { %v7928_v61 = vpack.c.bf16 %v4442_v53, %v4433_v52  ;;  %v4525_v52 = vld [vmem:[#allocation4 + $0x400] sm:$0xff]  ;;  %v4534_v53 = vld [vmem:[#allocation4 + $0x448] sm:$0xff] }
 0x7dc   :  { %7897 = vmatpush3.bf16.msra.mxu1 %v7896_v59  ;;  %v7992_v59 = vpack.c.bf16 %v4444_v57, %v4435_v56  ;;  %v4551_v56 = vld [vmem:[#allocation4 + $0x4d0] sm:$0xff]  ;;  %v4544_v57 = vld [vmem:[#allocation4 + $0x498] sm:$0xff] }
 0x7dd   :  { %7899 = vmatprep.subr.bf16.mxu1 %v7898_v60  ;;  %v4452_v60 = vld [vmem:[#allocation4 + $0x1b8] sm:$0xff] }
 0x7de   :  { %v7930_v1 = vpack.c.bf16 %v4461_v15, %v4452_v60  ;;  %v4553_v60 = vld [vmem:[#allocation4 + $0x4e0] sm:$0xff] }
 0x7df   :  { %v4541_v15 = vld [vmem:[#allocation4 + $0x480] sm:$0xff] }
 0x7e0   :  { %7901 = vmatpush3.bf16.msra.mxu1 %v7900_v5  ;;  %v4451_v5 = vld [vmem:[#allocation4 + $0x1b0] sm:$0xff]  ;;  %v7952_v2 = vpack.c.bf16 %v4550_v0, %v4541_v15 }
 0x7e1   :  { %7903 = vmatprep.subr.bf16.mxu1 %v7902_v3  ;;  %v4460_v3 = vld [vmem:[#allocation4 + $0x1f8] sm:$0xff]  ;;  %v4631_v0 = vld [vmem:[#allocation4 + $0x750] sm:$0xff] }
 0x7e2   :  { %v7932_v6 = vpack.c.bf16 %v4460_v3, %v4451_v5  ;;  %v4543_v5 = vld [vmem:[#allocation4 + $0x490] sm:$0xff]  ;;  %v4552_v3 = vld [vmem:[#allocation4 + $0x4d8] sm:$0xff] }
 0x7e4   :  { %7905 = vmatpush3.bf16.msra.mxu1 %v7904_v18  ;;  %v7996_v18 = vpack.c.bf16 %v4462_v8, %v4453_v7  ;;  %v4569_v7 = vld [vmem:[#allocation4 + $0x560] sm:$0xff]  ;;  %v4562_v8 = vld [vmem:[#allocation4 + $0x528] sm:$0xff] }
 0x7e5   :  { %7907 = vmatprep.subr.bf16.mxu1 %v7906_v9  ;;  %v4470_v9 = vld [vmem:[#allocation4 + $0x248] sm:$0xff] }
 0x7e6   :  { %v7934_v13 = vpack.c.bf16 %v4479_v11, %v4470_v9  ;;  %v4571_v9 = vld [vmem:[#allocation4 + $0x570] sm:$0xff] }
 0x7e7   :  { %v4559_v11 = vld [vmem:[#allocation4 + $0x510] sm:$0xff] }
 0x7e8   :  { %7909 = vmatpush3.bf16.msra.mxu1 %v7908_v14  ;;  %v4469_v14 = vld [vmem:[#allocation4 + $0x240] sm:$0xff]  ;;  %v7956_v26 = vpack.c.bf16 %v4568_v12, %v4559_v11 }
 0x7e9   :  { %7911 = vmatprep.subr.bf16.mxu1 %v7910_v20  ;;  %v4478_v20 = vld [vmem:[#allocation4 + $0x288] sm:$0xff]  ;;  %v4649_v11 = vld [vmem:[#allocation4 + $0x7e0] sm:$0xff] }
 0x7ea   :  { %v7936_v22 = vpack.c.bf16 %v4478_v20, %v4469_v14  ;;  %v4561_v14 = vld [vmem:[#allocation4 + $0x520] sm:$0xff]  ;;  %v4570_v20 = vld [vmem:[#allocation4 + $0x568] sm:$0xff] }
 0x7ec   :  { %7913 = vmatpush3.bf16.msra.mxu1 %v7912_v27  ;;  %v8000_v27 = vpack.c.bf16 %v4480_v23, %v4471_v4  ;;  %v4587_v4 = vld [vmem:[#allocation4 + $0x5f0] sm:$0xff]  ;;  %v4580_v23 = vld [vmem:[#allocation4 + $0x5b8] sm:$0xff] }
 0x7ed   :  { %7915 = vmatprep.subr.bf16.mxu1 %v7914_v28  ;;  %v4488_v28 = vld [vmem:[#allocation4 + $0x2d8] sm:$0xff] }
 0x7f0   :  { %7917 = vmatpush3.bf16.msra.mxu1 %v7916_v30  ;;  %v7938_v30 = vpack.c.bf16 %v4497_v29, %v4488_v28  ;;  %v4589_v28 = vld [vmem:[#allocation4 + $0x600] sm:$0xff] }
 0x7f1   :  { %7983 = vmatprep.subr.bf16.mxu1 %v7982_v36  ;;  %v8004_v36 = vpack.c.bf16 %v4498_v17, %v4489_v37  ;;  %v4577_v29 = vld [vmem:[#allocation4 + $0x5a0] sm:$0xff]  ;;  %v8022_v33 = vpack.c.bf16 %v4589_v28, %v4580_v23  ;;  %v4679_v23 = vld [vmem:[#allocation4 + $0x8d0] sm:$0xff] }
 0x7f2   :  { %v7960_v34 = vpack.c.bf16 %v4586_v55, %v4577_v29  ;;  %v4667_v29 = vld [vmem:[#allocation4 + $0x870] sm:$0xff]  ;;  %v4676_v55 = vld [vmem:[#allocation4 + $0x8b8] sm:$0xff] }
 0x7f3   :  { %4322 = vmatmul.mubr.f32.vlgmr.msra.gmra.mrb[28].mxu1 %v9118_v58  ;;  %v7922_v58 = vpack.c.bf16 %v4425_v42, %v4416_v10  ;;  %v4517_v10 = vld [vmem:[#allocation4 + $0x3c0] sm:$0xff] }
 0x7f4   :  { %7985 = vmatpush1.bf16.msra.mxu1 %v7984_v41  ;;  %v7942_v41 = vpack.c.bf16 %v4515_v39, %v4506_v38  ;;  %v4505_v42 = vld [vmem:[#allocation4 + $0x360] sm:$0xff]  ;;  %v4596_v38 = vld [vmem:[#allocation4 + $0x638] sm:$0xff] }
 0x7f5   :  { %7923 = vmatprep.subr.bf16.mxu0 %v7922_v58  ;;  %7987 = vmatprep.subr.bf16.mxu1 %v7986_v45  ;;  %v8006_v58 = vpack.c.bf16 %v4517_v10, %v4508_v40  ;;  %v7944_v54 = vpack.c.bf16 %v4514_v25, %v4505_v42  ;;  %v8008_v45 = vpack.c.bf16 %v4516_v44, %v4507_v43  ;;  %v4605_v39 = vld [vmem:[#allocation4 + $0x680] sm:$0xff]  ;;  %v4598_v40 = vld [vmem:[#allocation4 + $0x648] sm:$0xff]  ;;  %v4607_v10 = vld [vmem:[#allocation4 + $0x690] sm:$0xff] }
 0x7f6   :  { %7925 = vmatpush1.bf16.msra.mxu0 %v7924_v19  ;;  %v4524_v19 = vld [vmem:[#allocation4 + $0x3f8] sm:$0xff]  ;;  %v4595_v42 = vld [vmem:[#allocation4 + $0x630] sm:$0xff]  ;;  %v8026_v25 = vpack.c.bf16 %v4607_v10, %v4598_v40  ;;  %v4606_v44 = vld [vmem:[#allocation4 + $0x688] sm:$0xff] }
 0x7f7   :  { %7927 = vmatprep.subr.bf16.mxu0 %v7926_v51  ;;  %v8010_v51 = vpack.c.bf16 %v4535_v62, %v4526_v47  ;;  %v4616_v47 = vld [vmem:[#allocation4 + $0x6d8] sm:$0xff]  ;;  %v4625_v62 = vld [vmem:[#allocation4 + $0x720] sm:$0xff] }
 0x7f8   :  { %7989 = vmatpush1.bf16.msra.mxu1 %v7988_v31  ;;  %v7946_v31 = vpack.c.bf16 %v4533_v46, %v4524_v19  ;;  %v4614_v19 = vld [vmem:[#allocation4 + $0x6c8] sm:$0xff]  ;;  %v4623_v46 = vld [vmem:[#allocation4 + $0x710] sm:$0xff]  ;;  %v4404_v40 = vld [vmem:[#allocation4 + $0x38] sm:$0xff] }
 0x7f9   :  { %7991 = vmatprep.subr.bf16.mxu1 %v7990_v16  ;;  %v8012_v16 = vpack.c.bf16 %v4534_v53, %v4525_v52  ;;  %v4615_v52 = vld [vmem:[#allocation4 + $0x6d0] sm:$0xff]  ;;  %v4624_v53 = vld [vmem:[#allocation4 + $0x718] sm:$0xff]  ;;  %v4413_v10 = vld [vmem:[#allocation4 + $0x80] sm:$0xff] }
 0x7fa   :  { %7929 = vmatpush1.bf16.msra.mxu0 %v7928_v61  ;;  %v4542_v61 = vld [vmem:[#allocation4 + $0x488] sm:$0xff] }
 0x7fb   :  { %7931 = vmatprep.subr.bf16.mxu0 %v7930_v1  ;;  %v8014_v1 = vpack.c.bf16 %v4553_v60, %v4544_v57  ;;  %v4634_v57 = vld [vmem:[#allocation4 + $0x768] sm:$0xff] }
 0x7fc   :  { %7993 = vmatpush1.bf16.msra.mxu1 %v7992_v59  ;;  %v7950_v59 = vpack.c.bf16 %v4551_v56, %v4542_v61  ;;  %v8032_v61 = vpack.c.bf16 %v4624_v53, %v4615_v52  ;;  %v4641_v56 = vld [vmem:[#allocation4 + $0x7a0] sm:$0xff] }
 0x7fd   :  { %7995 = vmatprep.subr.bf16.mxu1 %v7994_v24  ;;  %v8016_v24 = vpack.c.bf16 %v4552_v3, %v4543_v5  ;;  %v4642_v3 = vld [vmem:[#allocation4 + $0x7a8] sm:$0xff] }
 0x7fe   :  { %7933 = vmatpush1.bf16.msra.mxu0 %v7932_v6  ;;  %v4560_v6 = vld [vmem:[#allocation4 + $0x518] sm:$0xff] }
 0x7ff   :  { %7935 = vmatprep.subr.bf16.mxu0 %v7934_v13  ;;  %v8018_v13 = vpack.c.bf16 %v4571_v9, %v4562_v8  ;;  %v4661_v9 = vld [vmem:[#allocation4 + $0x840] sm:$0xff] }
 0x800   :  { %7997 = vmatpush1.bf16.msra.mxu1 %v7996_v18  ;;  %v7954_v18 = vpack.c.bf16 %v4569_v7, %v4560_v6  ;;  %v4659_v6 = vld [vmem:[#allocation4 + $0x830] sm:$0xff] }
 0x801   :  { %7999 = vmatprep.subr.bf16.mxu1 %v7998_v21  ;;  %v8020_v21 = vpack.c.bf16 %v4570_v20, %v4561_v14  ;;  %v4660_v14 = vld [vmem:[#allocation4 + $0x838] sm:$0xff] }
 0x802   :  { %7937 = vmatpush1.bf16.msra.mxu0 %v7936_v22  ;;  %v4578_v22 = vld [vmem:[#allocation4 + $0x5a8] sm:$0xff]  ;;  %v4668_v20 = vld [vmem:[#allocation4 + $0x878] sm:$0xff] }
 0x803   :  { %7939 = vmatprep.subr.bf16.mxu0 %v7938_v30 }
 0x804   :  { %8001 = vmatpush1.bf16.msra.mxu1 %v8000_v27  ;;  %v7958_v27 = vpack.c.bf16 %v4587_v4, %v4578_v22  ;;  %v4670_v22 = vld [vmem:[#allocation4 + $0x888] sm:$0xff] }
 0x805   :  { %8003 = vmatprep.subr.bf16.mxu1 %v8002_v35  ;;  %v4579_v35 = vld [vmem:[#allocation4 + $0x5b0] sm:$0xff] }
 0x806   :  { %7941 = vmatpush1.bf16.msra.mxu0 %v7940_v63  ;;  %v4588_v63 = vld [vmem:[#allocation4 + $0x5f8] sm:$0xff] }
 0x807   :  { %7943 = vmatprep.subr.bf16.mxu0 %v7942_v41  ;;  %v7962_v41 = vpack.c.bf16 %v4605_v39, %v4596_v38  ;;  %v4402_v38 = vld [vmem:[#allocation4 + $0x28] sm:$0xff]  ;;  %v4411_v39 = vld [vmem:[#allocation4 + $0x70] sm:$0xff] }
 0x808   :  { %8005 = vmatpush1.bf16.msra.mxu1 %v8004_v36  ;;  %v8024_v36 = vpack.c.bf16 %v4588_v63, %v4579_v35  ;;  %v4678_v35 = vld [vmem:[#allocation4 + $0x8c8] sm:$0xff]  ;;  %v7980_v63 = vpack.c.bf16 %v4676_v55, %v4667_v29 }
 0x809   :  { %8007 = vmatprep.subr.bf16.mxu1 %v8006_v58  ;;  %v4604_v58 = vld [vmem:[#allocation4 + $0x678] sm:$0xff] }
 0x80a   :  { %7945 = vmatpush1.bf16.msra.mxu0 %v7944_v54  ;;  %v4597_v54 = vld [vmem:[#allocation4 + $0x640] sm:$0xff]  ;;  %v7964_v43 = vpack.c.bf16 %v4604_v58, %v4595_v42  ;;  %v8110_v42 = vpack.c.bf16 %v4413_v10, %v4404_v40  ;;  %v3964_v58 = vld [vmem:[#allocation8 + $0x168] sm:$0xff] }
 0x80b   :  { %7947 = vmatprep.subr.bf16.mxu0 %v7946_v31  ;;  %v7966_v31 = vpack.c.bf16 %v4623_v46, %v4614_v19  ;;  %v3966_v19 = vld [vmem:[#allocation8 + $0x178] sm:$0xff] }
 0x80c   :  { %8009 = vmatpush1.bf16.msra.mxu1 %v8008_v45  ;;  %v8028_v45 = vpack.c.bf16 %v4606_v44, %v4597_v54 }
 0x80d   :  { %8011 = vmatprep.subr.bf16.mxu1 %v8010_v51  ;;  %v8030_v51 = vpack.c.bf16 %v4625_v62, %v4616_v47 }
 0x80e   :  { %7949 = vmatpush1.bf16.msra.mxu0 %v7948_v50  ;;  %v7968_v50 = vpack.c.bf16 %v4622_v49, %v4613_v48 }
 0x80f   :  { %7951 = vmatprep.subr.bf16.mxu0 %v7950_v59  ;;  %v4643_v59 = vld [vmem:[#allocation4 + $0x7b0] sm:$0xff] }
 0x810   :  { %8013 = vmatpush1.bf16.msra.mxu1 %v8012_v16  ;;  %v4632_v16 = vld [vmem:[#allocation4 + $0x758] sm:$0xff]  ;;  %v8034_v15 = vpack.c.bf16 %v4643_v59, %v4634_v57 }
 0x811   :  { %8015 = vmatprep.subr.bf16.mxu1 %v8014_v1  ;;  %v7970_v60 = vpack.c.bf16 %v4641_v56, %v4632_v16  ;;  %v4640_v1 = vld [vmem:[#allocation4 + $0x798] sm:$0xff]  ;;  %v3969_v16 = vld [vmem:[#allocation8 + $0x190] sm:$0xff] }
 0x812   :  { %7953 = vmatpush1.bf16.msra.mxu0 %v7952_v2  ;;  %v4633_v2 = vld [vmem:[#allocation4 + $0x760] sm:$0xff]  ;;  %v7972_v5 = vpack.c.bf16 %v4640_v1, %v4631_v0  ;;  %v8810_v1 = vld [vmem:[#allocation10 + $0x48] sm:$0xff] }
 0x813   :  { %7955 = vmatprep.subr.bf16.mxu0 %v7954_v18  ;;  %v8036_v7 = vpack.c.bf16 %v4642_v3, %v4633_v2  ;;  %v4652_v18 = vld [vmem:[#allocation4 + $0x7f8] sm:$0xff] }
 0x814   :  { %8017 = vmatpush1.bf16.msra.mxu1 %v8016_v24  ;;  %v4650_v24 = vld [vmem:[#allocation4 + $0x7e8] sm:$0xff]  ;;  %v8038_v12 = vpack.c.bf16 %v4661_v9, %v4652_v18 }
 0x815   :  { %8019 = vmatprep.subr.bf16.mxu1 %v8018_v13  ;;  %v7974_v8 = vpack.c.bf16 %v4659_v6, %v4650_v24  ;;  %v4658_v13 = vld [vmem:[#allocation4 + $0x828] sm:$0xff]  ;;  %v3967_v24 = vld [vmem:[#allocation8 + $0x180] sm:$0xff] }
 0x816   :  { %7957 = vmatpush1.bf16.msra.mxu0 %v7956_v26  ;;  %v4651_v26 = vld [vmem:[#allocation4 + $0x7f0] sm:$0xff]  ;;  %v7976_v4 = vpack.c.bf16 %v4658_v13, %v4649_v11  ;;  %v3970_v9 = vld [vmem:[#allocation8 + $0x198] sm:$0xff] }
 0x817   :  { %7959 = vmatprep.subr.bf16.mxu0 %v7958_v27  ;;  %v8040_v27 = vpack.c.bf16 %v4660_v14, %v4651_v26 }
 0x818   :  { %8021 = vmatpush1.bf16.msra.mxu1 %v8020_v21  ;;  %v4677_v21 = vld [vmem:[#allocation4 + $0x8c0] sm:$0xff] }
 0x819   :  { %8023 = vmatprep.subr.bf16.mxu1 %v8022_v33  ;;  %v7978_v28 = vpack.c.bf16 %v4677_v21, %v4668_v20  ;;  %v8042_v33 = vpack.c.bf16 %v4679_v23, %v4670_v22 }
 0x81a   :  { %7961 = vmatpush1.bf16.msra.mxu0 %v7960_v34  ;;  %v4669_v34 = vld [vmem:[#allocation4 + $0x880] sm:$0xff] }
 0x81b   :  { %7963 = vmatprep.subr.bf16.mxu0 %v7962_v41  ;;  %v8046_v41 = vpack.c.bf16 %v4411_v39, %v4402_v38 }
 0x81c   :  { %8025 = vmatpush1.bf16.msra.mxu1 %v8024_v36  ;;  %v8044_v36 = vpack.c.bf16 %v4678_v35, %v4669_v34 }
 0x81d   :  { %8027 = vmatprep.subr.bf16.mxu1 %v8026_v25  ;;  %v3965_v25 = vld [vmem:[#allocation8 + $0x170] sm:$0xff] }
 0x81e   :  { %7965 = vmatpush1.bf16.msra.mxu0 %v7964_v43 }
 0x81f   :  { %7967 = vmatprep.subr.bf16.mxu0 %v7966_v31 }
 0x820   :  { %8029 = vmatpush1.bf16.msra.mxu1 %v8028_v45 }
 0x821   :  { %8031 = vmatprep.subr.bf16.mxu1 %v8030_v51  ;;  %v3971_v51 = vld [vmem:[#allocation8 + $0x1a0] sm:$0xff] }
 0x822   :  { %7969 = vmatpush1.bf16.msra.mxu0 %v7968_v50 }
 0x823   :  { %7971 = vmatprep.subr.bf16.mxu0 %v7970_v60 }
 0x824   :  { %8033 = vmatpush1.bf16.msra.mxu1 %v8032_v61  ;;  %v3968_v61 = vld [vmem:[#allocation8 + $0x188] sm:$0xff] }
 0x825   :  { %8035 = vmatprep.subr.bf16.mxu1 %v8034_v15 }
 0x826   :  { %7973 = vmatpush1.bf16.msra.mxu0 %v7972_v5 }
 0x827   :  { %7975 = vmatprep.subr.bf16.mxu0 %v7974_v8 }
 0x828   :  { %8037 = vmatpush1.bf16.msra.mxu1 %v8036_v7 }
 0x829   :  { %8039 = vmatprep.subr.bf16.mxu1 %v8038_v12 }
 0x82a   :  { %7977 = vmatpush1.bf16.msra.mxu0 %v7976_v4 }
 0x82b   :  { %7979 = vmatprep.subr.bf16.mxu0 %v7978_v28 }
 0x82c   :  { %8041 = vmatpush1.bf16.msra.mxu1 %v8040_v27  ;;  %v3972_v27 = vld [vmem:[#allocation8 + $0x1a8] sm:$0xff] }
 0x82d   :  { %8043 = vmatprep.subr.bf16.mxu1 %v8042_v33 }
 0x82e   :  { %7981 = vmatpush1.bf16.msra.mxu0 %v7980_v63 }
 0x82f   :  { %8047 = vmatprep.subr.bf16.mxu0 %v8046_v41 }
 0x830   :  { %8045 = vmatpush1.bf16.msra.mxu1 %v8044_v36 }
 0x831   :  { %8111 = vmatprep.subr.bf16.mxu1 %v8110_v42 }
 0x866   :  { %v9134_v30 = vpop.f32.mrb[24].mxu1  ;;  %v9136_v32 = vpop.f32.mrb[26].mxu0 }
 0x867   :  { %v9138_v37 = vpop.f32.mrb[25].mxu1  ;;  %v9140_v17 = vpop.f32.mrb[27].mxu0  ;;  %v4040_v43 = vadd.f32 %v9134_v30, %v3964_v58  ;;  %v4111_v46 = vadd.f32 %v9136_v32, %v3966_v19 }
 0x868   :  { %v4042_v54 = vadd.f32 %v9138_v37, %v3965_v25  ;;  %v4113_v8 = vadd.f32 %v9140_v17, %v3967_v24 }
 0x869   :  { %v5889_v45 = vmul.f32 -1.442695, %v4040_v43  ;;  %v5891_v62 = vmul.f32 -1.442695, %v4111_v46 }
 0x86a   :  { %v5890_v44 = vmul.f32 -1.442695, %v4042_v54  ;;  %v5892_v18 = vmul.f32 -1.442695, %v4113_v8 }
 0x86c   :  { %8694 = vpow2.f32 %v5890_v44 }
 0x86d   :  { %8696 = vpow2.f32 %v5889_v45 }
 0x86e   :  { %8698 = vpow2.f32 %v5891_v62  ;;  %v4410_v62 = vld [vmem:[#allocation4 + $0x68] sm:$0xff] }
 0x876   :  { %v8695_v47 = vpop.eup %8694 }
 0x877   :  { %v8697_v31 = vpop.eup %8696  ;;  %v4349_v48 = vadd.f32 1.0, %v8695_v47 }
 0x878   :  { %v4348_v49 = vadd.f32 1.0, %v8697_v31  ;;  %v8699_v56 = vpop.eup %8698  ;;  %v4401_v31 = vld [vmem:[#allocation4 + $0x20] sm:$0xff] }
 0x879   :  { %8700 = vrcp.f32 %v4349_v48  ;;  %v4350_v0 = vadd.f32 1.0, %v8699_v56  ;;  %v4403_v48 = vld [vmem:[#allocation4 + $0x30] sm:$0xff] }
 0x87a   :  { %8702 = vrcp.f32 %v4348_v49  ;;  %v4412_v49 = vld [vmem:[#allocation4 + $0x78] sm:$0xff]  ;;  %v4419_v56 = vld [vmem:[#allocation4 + $0xb0] sm:$0xff] }
 0x883   :  { %v8701_v32 = vpop.eup %8700 }
 0x884   :  { %v8703_v60 = vpop.eup %8702  ;;  %v4371_v2 = vmul.f32 %v8810_v1, %v8701_v32  ;;  %v4421_v32 = vld [vmem:[#allocation4 + $0xc0] sm:$0xff] }
 0x8a6   :  { %v4181_v50 = vpop.f32.mrb[26].mxu1  ;;  %v4252_v52 = vpop.f32.mrb[28].mxu0 }
 0x8a7   :  { %v4183_v53 = vpop.f32.mrb[27].mxu1  ;;  %v4254_v37 = vpop.f32.mrb[29].mxu0  ;;  %v4182_v59 = vadd.f32 %v4181_v50, %v3968_v61  ;;  %v4253_v11 = vadd.f32 %v4252_v52, %v3970_v9  ;;  %v4429_v52 = vld [vmem:[#allocation4 + $0x100] sm:$0xff]  ;;  %v8112_v61 = vpack.c.bf16 %v4412_v49, %v4403_v48  ;;  %v4439_v9 = vld [vmem:[#allocation4 + $0x150] sm:$0xff]  ;;  %v4502_v48 = vld [vmem:[#allocation4 + $0x348] sm:$0xff] }
 0x8a8   :  { %v4255_v30 = vadd.f32 %v4254_v37, %v3971_v51  ;;  %v4184_v57 = vadd.f32 %v4183_v53, %v3969_v16  ;;  %v4420_v51 = vld [vmem:[#allocation4 + $0xb8] sm:$0xff]  ;;  %v4422_v53 = vld [vmem:[#allocation4 + $0xc8] sm:$0xff]  ;;  %v4431_v37 = vld [vmem:[#allocation4 + $0x110] sm:$0xff]  ;;  %v8048_v16 = vpack.c.bf16 %v4410_v62, %v4401_v31 }
 0x8a9   :  { %v5893_v6 = vmul.f32 -1.442695, %v4182_v59  ;;  %v5895_v20 = vmul.f32 -1.442695, %v4253_v11  ;;  %v4430_v59 = vld [vmem:[#allocation4 + $0x108] sm:$0xff]  ;;  %v4448_v11 = vld [vmem:[#allocation4 + $0x198] sm:$0xff] }
 0x8aa   :  { %8704 = vtanh.f32 %v4255_v30  ;;  %v5894_v5 = vmul.f32 -1.442695, %v4184_v57  ;;  %v4428_v57 = vld [vmem:[#allocation4 + $0xf8] sm:$0xff]  ;;  %v8116_v24 = vpack.c.bf16 %v4430_v59, %v4421_v32  ;;  %v4493_v62 = vld [vmem:[#allocation4 + $0x300] sm:$0xff]  ;;  %v4510_v49 = vld [vmem:[#allocation4 + $0x388] sm:$0xff] }
 0x8ab   :  { %8706 = vrcp.f32 %v4350_v0  ;;  %v8114_v0 = vpack.c.bf16 %v4431_v37, %v4422_v53  ;;  %v8132_v37 = vpack.c.bf16 %v4502_v48, %v4493_v62  ;;  %v4511_v32 = vld [vmem:[#allocation4 + $0x390] sm:$0xff]  ;;  %v4520_v59 = vld [vmem:[#allocation4 + $0x3d8] sm:$0xff]  ;;  %v4609_v48 = vld [vmem:[#allocation4 + $0x6a0] sm:$0xff] }
 0x8ac   :  { %8708 = vpow2.f32 %v5894_v5  ;;  %v4449_v5 = vld [vmem:[#allocation4 + $0x1a0] sm:$0xff]  ;;  %v4600_v62 = vld [vmem:[#allocation4 + $0x658] sm:$0xff] }
 0x8ad   :  { %8710 = vpow2.f32 %v5893_v6  ;;  %v4437_v6 = vld [vmem:[#allocation4 + $0x140] sm:$0xff] }
 0x8b4   :  { %v8705_v15 = vpop.eup %8704 }
 0x8b5   :  { %v4372_v3 = vmul.f32 %v8705_v15, %v8703_v60  ;;  %v8707_v12 = vpop.eup %8706  ;;  %v4438_v60 = vld [vmem:[#allocation4 + $0x148] sm:$0xff]  ;;  %v8050_v15 = vpack.c.bf16 %v4429_v52, %v4420_v51  ;;  %v4519_v51 = vld [vmem:[#allocation4 + $0x3d0] sm:$0xff]  ;;  %v4521_v52 = vld [vmem:[#allocation4 + $0x3e0] sm:$0xff] }
 0x8b6   :  { %v8709_v13 = vpop.eup %8708 }
 0x8b7   :  { %v4373_v7 = vadd.f32 %v4372_v3, %v4371_v2  ;;  %v8711_v26 = vpop.eup %8710  ;;  %v4353_v21 = vadd.f32 1.0, %v8709_v13  ;;  %v4440_v2 = vld [vmem:[#allocation4 + $0x158] sm:$0xff]  ;;  %v8052_v3 = vpack.c.bf16 %v4428_v57, %v4419_v56  ;;  %v4465_v13 = vld [vmem:[#allocation4 + $0x220] sm:$0xff]  ;;  %v8070_v56 = vpack.c.bf16 %v4519_v51, %v4510_v49  ;;  %v4602_v49 = vld [vmem:[#allocation4 + $0x668] sm:$0xff] }
 0x8b8   :  { %v4352_v23 = vadd.f32 1.0, %v8711_v26  ;;  %v4458_v26 = vld [vmem:[#allocation4 + $0x1e8] sm:$0xff]  ;;  %v4611_v51 = vld [vmem:[#allocation4 + $0x6b0] sm:$0xff] }
 0x8b9   :  { %8712 = vtanh.f32 %v4373_v7 }
 0x8ba   :  { %8714 = vpow2.f32 %v5892_v18  ;;  %v8118_v18 = vpack.c.bf16 %v4449_v5, %v4440_v2  ;;  %v8136_v5 = vpack.c.bf16 %v4520_v59, %v4511_v32  ;;  %v4618_v32 = vld [vmem:[#allocation4 + $0x6e8] sm:$0xff]  ;;  %v4627_v59 = vld [vmem:[#allocation4 + $0x730] sm:$0xff] }
 0x8bb   :  { %8716 = vpow2.f32 %v5895_v20 }
 0x8bc   :  { %8718 = vrcp.f32 %v4353_v21  ;;  %v8120_v21 = vpack.c.bf16 %v4448_v11, %v4439_v9  ;;  %v4546_v9 = vld [vmem:[#allocation4 + $0x4a8] sm:$0xff]  ;;  %v4555_v11 = vld [vmem:[#allocation4 + $0x4f0] sm:$0xff] }
 0x8bd   :  { %8720 = vrcp.f32 %v4352_v23 }
 0x8c3   :  { %v8713_v14 = vpop.eup %8712 }
 0x8c4   :  { %v4378_v22 = vmul.f32 %v8713_v14, %v8707_v12  ;;  %v8715_v55 = vpop.eup %8714  ;;  %v4456_v12 = vld [vmem:[#allocation4 + $0x1d8] sm:$0xff]  ;;  %v4467_v14 = vld [vmem:[#allocation4 + $0x230] sm:$0xff] }
 0x8c5   :  { %v4351_v33 = vadd.f32 1.0, %v8715_v55  ;;  %v8717_v34 = vpop.eup %8716  ;;  %v8058_v23 = vpack.c.bf16 %v4465_v13, %v4456_v12  ;;  %v4483_v55 = vld [vmem:[#allocation4 + $0x2b0] sm:$0xff]  ;;  %v4548_v12 = vld [vmem:[#allocation4 + $0x4b8] sm:$0xff]  ;;  %v4557_v13 = vld [vmem:[#allocation4 + $0x500] sm:$0xff] }
 0x8c6   :  { %v6117_v4 = vpop.f32.mrb[28].mxu1  ;;  %v8719_v35 = vpop.eup %8718  ;;  %v4354_v38 = vadd.f32 1.0, %v8717_v34  ;;  %v4485_v34 = vld [vmem:[#allocation4 + $0x2c0] sm:$0xff] }
 0x8c7   :  { %v6118_v28 = vpop.f32.mrb[29].mxu1  ;;  %v8721_v63 = vpop.eup %8720  ;;  %v4374_v39 = vmul.f32 %v8810_v1, %v8719_v35  ;;  %v4447_v1 = vld [vmem:[#allocation4 + $0x190] sm:$0xff] }
 0x8c8   :  { %v6119_v29 = vadd.f32 %v6118_v28, %v6117_v4  ;;  %v8054_v8 = vpack.c.bf16 %v4447_v1, %v4438_v60  ;;  %v4464_v4 = vld [vmem:[#allocation4 + $0x218] sm:$0xff]  ;;  %v4457_v28 = vld [vmem:[#allocation4 + $0x1e0] sm:$0xff]  ;;  %v4539_v1 = vld [vmem:[#allocation4 + $0x470] sm:$0xff] }
 0x8c9   :  { %v4528_v60 = vld [vmem:[#allocation4 + $0x418] sm:$0xff] }
 0x8ca   :  { %v4324_v17 = vadd.f32 %v6119_v29, %v3972_v27  ;;  %v8122_v27 = vpack.c.bf16 %v4467_v14, %v4458_v26  ;;  %v4466_v29 = vld [vmem:[#allocation4 + $0x228] sm:$0xff] }
 0x8cc   :  { %8722 = vtanh.f32 %v4324_v17  ;;  %v4474_v17 = vld [vmem:[#allocation4 + $0x268] sm:$0xff] }
 0x8cd   :  { %8724 = vrcp.f32 %v4351_v33  ;;  %v4476_v33 = vld [vmem:[#allocation4 + $0x278] sm:$0xff] }
 0x8ce   :  { %8726 = vrcp.f32 %v4354_v38  ;;  %v4482_v38 = vld [vmem:[#allocation4 + $0x2a8] sm:$0xff] }
 0x8d6   :  { %v8723_v36 = vpop.eup %8722 }
 0x8d7   :  { %v4375_v40 = vmul.f32 %v8723_v36, %v8721_v63  ;;  %v8725_v42 = vpop.eup %8724  ;;  %v8124_v63 = vpack.c.bf16 %v4466_v29, %v4457_v28  ;;  %v4473_v36 = vld [vmem:[#allocation4 + $0x260] sm:$0xff]  ;;  %v4564_v28 = vld [vmem:[#allocation4 + $0x538] sm:$0xff] }
 0x8d8   :  { %v8727_v54 = vpop.eup %8726  ;;  %v4573_v29 = vld [vmem:[#allocation4 + $0x580] sm:$0xff] }
 0x8d9   :  { %v4376_v41 = vadd.f32 %v4375_v40, %v4374_v39  ;;  %v8062_v39 = vpack.c.bf16 %v4483_v55, %v4474_v17  ;;  %v8126_v40 = vpack.c.bf16 %v4485_v34, %v4476_v33  ;;  %v4566_v17 = vld [vmem:[#allocation4 + $0x548] sm:$0xff]  ;;  %v4575_v55 = vld [vmem:[#allocation4 + $0x590] sm:$0xff] }
 0x8db   :  { %8728 = vtanh.f32 %v4376_v41  ;;  %v4381_v10 = vsub.f32 %v4373_v7, %v4376_v41  ;;  %v4446_v7 = vld [vmem:[#allocation4 + $0x188] sm:$0xff] }
 0x8dc   :  { %v8056_v20 = vpack.c.bf16 %v4446_v7, %v4437_v6 }
 0x8dd   :  { %v4382_v25 = vmul.f32 %v8725_v42, %v4381_v10  ;;  %v4484_v10 = vld [vmem:[#allocation4 + $0x2b8] sm:$0xff] }
 0x8df   :  { %v4383_v58 = vadd.f32 %v4382_v25, %v4376_v41  ;;  %v4475_v41 = vld [vmem:[#allocation4 + $0x270] sm:$0xff]  ;;  %v4501_v25 = vld [vmem:[#allocation4 + $0x340] sm:$0xff] }
 0x8e1   :  { %4391 = vst [vmem:[#allocation10 + $0x58] sm:$0xff] %v4383_v58  ;;  %v4494_v58 = vld [vmem:[#allocation4 + $0x308] sm:$0xff] }
 0x8e5   :  { %v8729_v43 = vpop.eup %8728 }
 0x8e6   :  { %v4380_v44 = vmul.f32 %v8729_v43, %v8727_v54  ;;  %v4503_v54 = vld [vmem:[#allocation4 + $0x350] sm:$0xff]  ;;  %v8064_v43 = vpack.c.bf16 %v4482_v38, %v4473_v36  ;;  %v8082_v36 = vpack.c.bf16 %v4573_v29, %v4564_v28  ;;  %v8146_v38 = vpack.c.bf16 %v4575_v55, %v4566_v17  ;;  %v4656_v28 = vld [vmem:[#allocation4 + $0x818] sm:$0xff]  ;;  %v4665_v29 = vld [vmem:[#allocation4 + $0x860] sm:$0xff] }
 0x8e7   :  { %v8130_v31 = vpack.c.bf16 %v4503_v54, %v4494_v58 }
 0x8e8   :  { %v4384_v45 = vsub.f32 %v4378_v22, %v4380_v44  ;;  %v4455_v22 = vld [vmem:[#allocation4 + $0x1d0] sm:$0xff] }
 0x8e9   :  { %v8060_v35 = vpack.c.bf16 %v4464_v4, %v4455_v22  ;;  %v8078_v22 = vpack.c.bf16 %v4555_v11, %v4546_v9  ;;  %v8142_v4 = vpack.c.bf16 %v4557_v13, %v4548_v12  ;;  %v4638_v9 = vld [vmem:[#allocation4 + $0x788] sm:$0xff]  ;;  %v4647_v11 = vld [vmem:[#allocation4 + $0x7d0] sm:$0xff] }
 0x8ea   :  { %v4385_v19 = vmul.f32 %v8725_v42, %v4384_v45  ;;  %v4492_v42 = vld [vmem:[#allocation4 + $0x2f8] sm:$0xff]  ;;  %v4491_v45 = vld [vmem:[#allocation4 + $0x2f0] sm:$0xff] }
 0x8ec   :  { %v9146_v46 = vadd.f32 %v4385_v19, %v4380_v44  ;;  %v8128_v44 = vpack.c.bf16 %v4484_v10, %v4475_v41  ;;  %v4500_v19 = vld [vmem:[#allocation4 + $0x338] sm:$0xff]  ;;  %v4582_v41 = vld [vmem:[#allocation4 + $0x5c8] sm:$0xff]  ;;  %v4591_v10 = vld [vmem:[#allocation4 + $0x610] sm:$0xff] }
 0x8ed   :  { %v8068_v53 = vpack.c.bf16 %v4500_v19, %v4491_v45  ;;  %v8086_v45 = vpack.c.bf16 %v4591_v10, %v4582_v41  ;;  %v4674_v41 = vld [vmem:[#allocation4 + $0x8a8] sm:$0xff]  ;;  %v4683_v10 = vld [vmem:[#allocation4 + $0x8f0] sm:$0xff] }
 0x8ee   :  { %4390 = vst [vmem:[#allocation10 + $0x50] sm:$0xff] %v9146_v46  ;;  %v4394_v47 = vadd.f32 1e-06, %v9146_v46 }
 0x8f0   :  { %8730 = vlog2.f32 %v4394_v47  ;;  %v8066_v47 = vpack.c.bf16 %v4501_v25, %v4492_v42  ;;  %v4584_v42 = vld [vmem:[#allocation4 + $0x5d8] sm:$0xff]  ;;  %v4593_v25 = vld [vmem:[#allocation4 + $0x620] sm:$0xff] }
 0x8f1   :  { %v8150_v19 = vpack.c.bf16 %v4593_v25, %v4584_v42 }
 0x8fa   :  { %v8731_v50 = vpop.eup %8730 }
 0x8fb   :  { %v9150_v30 = vmul.f32 0.6931472, %v8731_v50  ;;  %v4512_v50 = vld [vmem:[#allocation4 + $0x398] sm:$0xff] }
 0x8fc   :  { %v8134_v57 = vpack.c.bf16 %v4521_v52, %v4512_v50 }
 0x8fd   :  { %4759 = vmatprep.mubr.f32.mxu0 %v9150_v30  ;;  %4830 = vmatprep.mubr.f32.mxu1 %v9150_v30 }
 0x8fe   :  { %4760 = vmatmul.mubr.f32.vlgmr.msra.gmra.mrb[30].mxu0 %v9146_v46  ;;  %4831 = vmatmul.mubr.f32.vlgmr.msra.gmra.mrb[30].mxu1 %v9146_v46 }
 0x8ff   :  { %8049 = vmatpush1.bf16.msra.mxu0 %v8048_v16  ;;  %8113 = vmatpush1.bf16.msra.mxu1 %v8112_v61  ;;  %v4509_v16 = vld [vmem:[#allocation4 + $0x380] sm:$0xff]  ;;  %v4518_v61 = vld [vmem:[#allocation4 + $0x3c8] sm:$0xff] }
 0x900   :  { %4901 = vmatprep.mubr.f32.mxu0 %v9150_v30  ;;  %4972 = vmatprep.mubr.f32.mxu1 %v9150_v30  ;;  %v8072_v2 = vpack.c.bf16 %v4518_v61, %v4509_v16  ;;  %v8090_v16 = vpack.c.bf16 %v4609_v48, %v4600_v62  ;;  %v8154_v61 = vpack.c.bf16 %v4611_v51, %v4602_v49  ;;  %v4405_v51 = vld [vmem:[#allocation4 + $0x40] sm:$0xff] }
 0x901   :  { %8051 = vmatprep.subr.bf16.mxu0 %v8050_v15  ;;  %8115 = vmatprep.subr.bf16.mxu1 %v8114_v0  ;;  %v4537_v15 = vld [vmem:[#allocation4 + $0x460] sm:$0xff]  ;;  %v4530_v0 = vld [vmem:[#allocation4 + $0x428] sm:$0xff] }
 0x902   :  { %v8074_v6 = vpack.c.bf16 %v4537_v15, %v4528_v60  ;;  %v8138_v7 = vpack.c.bf16 %v4539_v1, %v4530_v0  ;;  %v4620_v60 = vld [vmem:[#allocation4 + $0x6f8] sm:$0xff]  ;;  %v4629_v15 = vld [vmem:[#allocation4 + $0x740] sm:$0xff] }
 0x903   :  { %8053 = vmatpush1.bf16.msra.mxu0 %v8052_v3  ;;  %8117 = vmatpush1.bf16.msra.mxu1 %v8116_v24  ;;  %v4527_v3 = vld [vmem:[#allocation4 + $0x410] sm:$0xff]  ;;  %v4536_v24 = vld [vmem:[#allocation4 + $0x458] sm:$0xff] }
 0x904   :  { %8055 = vmatprep.subr.bf16.mxu0 %v8054_v8  ;;  %8119 = vmatprep.subr.bf16.mxu1 %v8118_v18  ;;  %v4529_v8 = vld [vmem:[#allocation4 + $0x420] sm:$0xff]  ;;  %v4538_v18 = vld [vmem:[#allocation4 + $0x468] sm:$0xff]  ;;  %v8076_v26 = vpack.c.bf16 %v4536_v24, %v4527_v3  ;;  %v8094_v3 = vpack.c.bf16 %v4627_v59, %v4618_v32  ;;  %v8158_v24 = vpack.c.bf16 %v4629_v15, %v4620_v60 }
 0x905   :  { %v8140_v14 = vpack.c.bf16 %v4538_v18, %v4529_v8  ;;  %v4636_v8 = vld [vmem:[#allocation4 + $0x778] sm:$0xff]  ;;  %v4645_v18 = vld [vmem:[#allocation4 + $0x7c0] sm:$0xff]  ;;  %v4594_v32 = vld [vmem:[#allocation4 + $0x628] sm:$0xff] }
 0x906   :  { %v4441_v15 = vld [vmem:[#allocation4 + $0x160] sm:$0xff] }
 0x907   :  { %8057 = vmatpush1.bf16.msra.mxu0 %v8056_v20  ;;  %8121 = vmatpush1.bf16.msra.mxu1 %v8120_v21  ;;  %v4545_v20 = vld [vmem:[#allocation4 + $0x4a0] sm:$0xff]  ;;  %v4554_v21 = vld [vmem:[#allocation4 + $0x4e8] sm:$0xff] }
 0x908   :  { %8059 = vmatprep.subr.bf16.mxu0 %v8058_v23  ;;  %8123 = vmatprep.subr.bf16.mxu1 %v8122_v27  ;;  %v4547_v23 = vld [vmem:[#allocation4 + $0x4b0] sm:$0xff]  ;;  %v4556_v27 = vld [vmem:[#allocation4 + $0x4f8] sm:$0xff]  ;;  %v8080_v33 = vpack.c.bf16 %v4554_v21, %v4545_v20  ;;  %v8098_v20 = vpack.c.bf16 %v4645_v18, %v4636_v8  ;;  %v8162_v21 = vpack.c.bf16 %v4647_v11, %v4638_v9  ;;  %v4630_v8 = vld [vmem:[#allocation4 + $0x748] sm:$0xff] }
 0x909   :  { %v8144_v34 = vpack.c.bf16 %v4556_v27, %v4547_v23  ;;  %v4654_v23 = vld [vmem:[#allocation4 + $0x808] sm:$0xff]  ;;  %v4663_v27 = vld [vmem:[#allocation4 + $0x850] sm:$0xff] }
 0x90a   :  { %v4486_v11 = vld [vmem:[#allocation4 + $0x2c8] sm:$0xff] }
 0x90b   :  { %8061 = vmatpush1.bf16.msra.mxu0 %v8060_v35  ;;  %8125 = vmatpush1.bf16.msra.mxu1 %v8124_v63  ;;  %v4563_v35 = vld [vmem:[#allocation4 + $0x530] sm:$0xff]  ;;  %v4572_v63 = vld [vmem:[#allocation4 + $0x578] sm:$0xff] }
 0x90c   :  { %8063 = vmatprep.subr.bf16.mxu0 %v8062_v39  ;;  %8127 = vmatprep.subr.bf16.mxu1 %v8126_v40  ;;  %v4565_v39 = vld [vmem:[#allocation4 + $0x540] sm:$0xff]  ;;  %v4574_v40 = vld [vmem:[#allocation4 + $0x588] sm:$0xff]  ;;  %v8084_v58 = vpack.c.bf16 %v4572_v63, %v4563_v35  ;;  %v8102_v35 = vpack.c.bf16 %v4663_v27, %v4654_v23  ;;  %v8166_v63 = vpack.c.bf16 %v4665_v29, %v4656_v28 }
 0x90d   :  { %v8148_v54 = vpack.c.bf16 %v4574_v40, %v4565_v39  ;;  %v4672_v39 = vld [vmem:[#allocation4 + $0x898] sm:$0xff]  ;;  %v4681_v40 = vld [vmem:[#allocation4 + $0x8e0] sm:$0xff]  ;;  %v4522_v29 = vld [vmem:[#allocation4 + $0x3e8] sm:$0xff] }
 0x90e   :  { %v4513_v28 = vld [vmem:[#allocation4 + $0x3a0] sm:$0xff] }
 0x90f   :  { %8065 = vmatpush1.bf16.msra.mxu0 %v8064_v43  ;;  %8129 = vmatpush1.bf16.msra.mxu1 %v8128_v44  ;;  %v4581_v43 = vld [vmem:[#allocation4 + $0x5c0] sm:$0xff]  ;;  %v4590_v44 = vld [vmem:[#allocation4 + $0x608] sm:$0xff] }
 0x910   :  { %8067 = vmatprep.subr.bf16.mxu0 %v8066_v47  ;;  %8131 = vmatprep.subr.bf16.mxu1 %v8130_v31  ;;  %v4583_v47 = vld [vmem:[#allocation4 + $0x5d0] sm:$0xff]  ;;  %v4592_v31 = vld [vmem:[#allocation4 + $0x618] sm:$0xff]  ;;  %v8088_v50 = vpack.c.bf16 %v4590_v44, %v4581_v43  ;;  %v8170_v43 = vpack.c.bf16 %v4683_v10, %v4674_v41  ;;  %v5131_v10 = vld [vmem:[#allocation4 + $0x60] sm:$0xff] }
 0x911   :  { %v8152_v52 = vpack.c.bf16 %v4592_v31, %v4583_v47  ;;  %v4680_v44 = vld [vmem:[#allocation4 + $0x8d8] sm:$0xff]  ;;  %v4549_v47 = vld [vmem:[#allocation4 + $0x4c0] sm:$0xff]  ;;  %v4558_v31 = vld [vmem:[#allocation4 + $0x508] sm:$0xff] }
 0x912   :  { %v8174_v49 = vpack.c.bf16 %v4558_v31, %v4549_v47  ;;  %v5147_v47 = vld [vmem:[#allocation4 + $0xe0] sm:$0xff]  ;;  %v5140_v31 = vld [vmem:[#allocation4 + $0xa8] sm:$0xff] }
 0x913   :  { %8069 = vmatpush1.bf16.msra.mxu0 %v8068_v53  ;;  %8133 = vmatpush1.bf16.msra.mxu1 %v8132_v37  ;;  %v4599_v53 = vld [vmem:[#allocation4 + $0x650] sm:$0xff]  ;;  %v4608_v37 = vld [vmem:[#allocation4 + $0x698] sm:$0xff] }
 0x914   :  { %8071 = vmatprep.subr.bf16.mxu0 %v8070_v56  ;;  %8135 = vmatprep.subr.bf16.mxu1 %v8134_v57  ;;  %v4601_v56 = vld [vmem:[#allocation4 + $0x660] sm:$0xff]  ;;  %v4610_v57 = vld [vmem:[#allocation4 + $0x6a8] sm:$0xff]  ;;  %v8092_v0 = vpack.c.bf16 %v4608_v37, %v4599_v53  ;;  %v4576_v53 = vld [vmem:[#allocation4 + $0x598] sm:$0xff] }
 0x915   :  { %v8156_v1 = vpack.c.bf16 %v4610_v57, %v4601_v56  ;;  %v4432_v56 = vld [vmem:[#allocation4 + $0x118] sm:$0xff]  ;;  %v4585_v57 = vld [vmem:[#allocation4 + $0x5e0] sm:$0xff] }
 0x916   :  { %v8182_v60 = vpack.c.bf16 %v4594_v32, %v4585_v57  ;;  %v5167_v32 = vld [vmem:[#allocation4 + $0x180] sm:$0xff] }
 0x917   :  { %8073 = vmatpush1.bf16.msra.mxu0 %v8072_v2  ;;  %8137 = vmatpush1.bf16.msra.mxu1 %v8136_v5  ;;  %v4617_v2 = vld [vmem:[#allocation4 + $0x6e0] sm:$0xff]  ;;  %v4626_v5 = vld [vmem:[#allocation4 + $0x728] sm:$0xff] }
 0x918   :  { %8075 = vmatprep.subr.bf16.mxu0 %v8074_v6  ;;  %8139 = vmatprep.subr.bf16.mxu1 %v8138_v7  ;;  %v4619_v6 = vld [vmem:[#allocation4 + $0x6f0] sm:$0xff]  ;;  %v4628_v7 = vld [vmem:[#allocation4 + $0x738] sm:$0xff]  ;;  %v8096_v12 = vpack.c.bf16 %v4626_v5, %v4617_v2 }
 0x919   :  { %v8160_v13 = vpack.c.bf16 %v4628_v7, %v4619_v6  ;;  %v4612_v2 = vld [vmem:[#allocation4 + $0x6b8] sm:$0xff]  ;;  %v4621_v7 = vld [vmem:[#allocation4 + $0x700] sm:$0xff] }
 0x91a   :  { %v4468_v6 = vld [vmem:[#allocation4 + $0x238] sm:$0xff]  ;;  %v8190_v9 = vpack.c.bf16 %v4630_v8, %v4621_v7  ;;  %v5185_v8 = vld [vmem:[#allocation4 + $0x210] sm:$0xff] }
 0x91b   :  { %8077 = vmatpush1.bf16.msra.mxu0 %v8076_v26  ;;  %8141 = vmatpush1.bf16.msra.mxu1 %v8140_v14  ;;  %v4635_v26 = vld [vmem:[#allocation4 + $0x770] sm:$0xff]  ;;  %v4644_v14 = vld [vmem:[#allocation4 + $0x7b8] sm:$0xff] }
 0x91c   :  { %8079 = vmatprep.subr.bf16.mxu0 %v8078_v22  ;;  %8143 = vmatprep.subr.bf16.mxu1 %v8142_v4  ;;  %v4637_v22 = vld [vmem:[#allocation4 + $0x780] sm:$0xff]  ;;  %v4646_v4 = vld [vmem:[#allocation4 + $0x7c8] sm:$0xff]  ;;  %v8100_v17 = vpack.c.bf16 %v4644_v14, %v4635_v26 }
 0x91d   :  { %v8164_v55 = vpack.c.bf16 %v4646_v4, %v4637_v22  ;;  %v4657_v22 = vld [vmem:[#allocation4 + $0x820] sm:$0xff]  ;;  %v4666_v4 = vld [vmem:[#allocation4 + $0x868] sm:$0xff] }
 0x91e   :  { %v8198_v27 = vpack.c.bf16 %v4666_v4, %v4657_v22  ;;  %v5203_v4 = vld [vmem:[#allocation4 + $0x2a0] sm:$0xff] }
 0x91f   :  { %8081 = vmatpush1.bf16.msra.mxu0 %v8080_v33  ;;  %8145 = vmatpush1.bf16.msra.mxu1 %v8144_v34  ;;  %v4653_v33 = vld [vmem:[#allocation4 + $0x800] sm:$0xff]  ;;  %v4662_v34 = vld [vmem:[#allocation4 + $0x848] sm:$0xff] }
 0x920   :  { %8083 = vmatprep.subr.bf16.mxu0 %v8082_v36  ;;  %8147 = vmatprep.subr.bf16.mxu1 %v8146_v38  ;;  %v4655_v36 = vld [vmem:[#allocation4 + $0x810] sm:$0xff]  ;;  %v4664_v38 = vld [vmem:[#allocation4 + $0x858] sm:$0xff]  ;;  %v8104_v42 = vpack.c.bf16 %v4662_v34, %v4653_v33  ;;  %v8200_v33 = vpack.c.bf16 %v4522_v29, %v4513_v28 }
 0x921   :  { %v8168_v25 = vpack.c.bf16 %v4664_v38, %v4655_v36  ;;  %v5120_v38 = vld [vmem:[#allocation4 + $0x8] sm:$0xff] }
 0x923   :  { %8085 = vmatpush1.bf16.msra.mxu0 %v8084_v58  ;;  %8149 = vmatpush1.bf16.msra.mxu1 %v8148_v54  ;;  %v4671_v58 = vld [vmem:[#allocation4 + $0x890] sm:$0xff]  ;;  %v8106_v54 = vpack.c.bf16 %v4681_v40, %v4672_v39  ;;  %v5122_v40 = vld [vmem:[#allocation4 + $0x18] sm:$0xff] }
 0x924   :  { %8087 = vmatprep.subr.bf16.mxu0 %v8086_v45  ;;  %8151 = vmatprep.subr.bf16.mxu1 %v8150_v19  ;;  %v4673_v45 = vld [vmem:[#allocation4 + $0x8a0] sm:$0xff]  ;;  %v4682_v19 = vld [vmem:[#allocation4 + $0x8e8] sm:$0xff]  ;;  %v8108_v62 = vpack.c.bf16 %v4680_v44, %v4671_v58  ;;  %v5129_v39 = vld [vmem:[#allocation4 + $0x50] sm:$0xff]  ;;  %v8270_v58 = vpack.c.bf16 %v5131_v10, %v5122_v40 }
 0x925   :  { %v8172_v48 = vpack.c.bf16 %v4682_v19, %v4673_v45  ;;  %v8206_v41 = vpack.c.bf16 %v5129_v39, %v5120_v38  ;;  %v5130_v44 = vld [vmem:[#allocation4 + $0x58] sm:$0xff]  ;;  %v5221_v38 = vld [vmem:[#allocation4 + $0x330] sm:$0xff] }
 0x926   :  { %v5138_v19 = vld [vmem:[#allocation4 + $0x98] sm:$0xff]  ;;  %v5209_v39 = vld [vmem:[#allocation4 + $0x2d0] sm:$0xff] }
 0x927   :  { %8089 = vmatpush1.bf16.msra.mxu0 %v8088_v50  ;;  %8153 = vmatpush1.bf16.msra.mxu1 %v8152_v52  ;;  %v4414_v50 = vld [vmem:[#allocation4 + $0x88] sm:$0xff]  ;;  %v4567_v52 = vld [vmem:[#allocation4 + $0x550] sm:$0xff]  ;;  %v5218_v40 = vld [vmem:[#allocation4 + $0x318] sm:$0xff] }
 0x928   :  { %8091 = vmatprep.subr.bf16.mxu0 %v8090_v16  ;;  %8155 = vmatprep.subr.bf16.mxu1 %v8154_v61  ;;  %v8176_v37 = vpack.c.bf16 %v4414_v50, %v4405_v51  ;;  %v8178_v16 = vpack.c.bf16 %v4576_v53, %v4567_v52  ;;  %v4423_v61 = vld [vmem:[#allocation4 + $0xd0] sm:$0xff]  ;;  %v5139_v52 = vld [vmem:[#allocation4 + $0xa0] sm:$0xff]  ;;  %v5148_v53 = vld [vmem:[#allocation4 + $0xe8] sm:$0xff]  ;;  %v8228_v10 = vpack.c.bf16 %v5218_v40, %v5209_v39 }
 0x929   :  { %v8180_v59 = vpack.c.bf16 %v4432_v56, %v4423_v61  ;;  %v5165_v61 = vld [vmem:[#allocation4 + $0x170] sm:$0xff]  ;;  %v5158_v56 = vld [vmem:[#allocation4 + $0x138] sm:$0xff] }
 0x92b   :  { %8093 = vmatpush1.bf16.msra.mxu0 %v8092_v0  ;;  %8157 = vmatpush1.bf16.msra.mxu1 %v8156_v1  ;;  %v4450_v0 = vld [vmem:[#allocation4 + $0x1a8] sm:$0xff]  ;;  %v4603_v1 = vld [vmem:[#allocation4 + $0x670] sm:$0xff] }
 0x92c   :  { %8095 = vmatprep.subr.bf16.mxu0 %v8094_v3  ;;  %8159 = vmatprep.subr.bf16.mxu1 %v8158_v24  ;;  %v8184_v5 = vpack.c.bf16 %v4450_v0, %v4441_v15  ;;  %v8186_v3 = vpack.c.bf16 %v4612_v2, %v4603_v1  ;;  %v4459_v24 = vld [vmem:[#allocation4 + $0x1f0] sm:$0xff]  ;;  %v8278_v15 = vpack.c.bf16 %v5167_v32, %v5158_v56  ;;  %v5166_v2 = vld [vmem:[#allocation4 + $0x178] sm:$0xff] }
 0x92d   :  { %v8188_v18 = vpack.c.bf16 %v4468_v6, %v4459_v24  ;;  %v5157_v1 = vld [vmem:[#allocation4 + $0x130] sm:$0xff]  ;;  %v5183_v24 = vld [vmem:[#allocation4 + $0x200] sm:$0xff]  ;;  %v5176_v6 = vld [vmem:[#allocation4 + $0x1c8] sm:$0xff] }
 0x92e   :  { %v5254_v56 = vld [vmem:[#allocation4 + $0x438] sm:$0xff] }
 0x92f   :  { %8097 = vmatpush1.bf16.msra.mxu0 %v8096_v12  ;;  %8161 = vmatpush1.bf16.msra.mxu1 %v8160_v13  ;;  %v4639_v12 = vld [vmem:[#allocation4 + $0x790] sm:$0xff]  ;;  %v4648_v13 = vld [vmem:[#allocation4 + $0x7d8] sm:$0xff] }
 0x930   :  { %8099 = vmatprep.subr.bf16.mxu0 %v8098_v20  ;;  %8163 = vmatprep.subr.bf16.mxu1 %v8162_v21  ;;  %v8194_v14 = vpack.c.bf16 %v4648_v13, %v4639_v12  ;;  %v4495_v20 = vld [vmem:[#allocation4 + $0x310] sm:$0xff]  ;;  %v4504_v21 = vld [vmem:[#allocation4 + $0x358] sm:$0xff]  ;;  %v5175_v12 = vld [vmem:[#allocation4 + $0x1c0] sm:$0xff] }
 0x931   :  { %v8196_v23 = vpack.c.bf16 %v4504_v21, %v4495_v20  ;;  %v5184_v13 = vld [vmem:[#allocation4 + $0x208] sm:$0xff]  ;;  %v5201_v20 = vld [vmem:[#allocation4 + $0x290] sm:$0xff]  ;;  %v5194_v21 = vld [vmem:[#allocation4 + $0x258] sm:$0xff] }
 0x932   :  { %v8286_v28 = vpack.c.bf16 %v5203_v4, %v5194_v21  ;;  %v5290_v21 = vld [vmem:[#allocation4 + $0x558] sm:$0xff] }
 0x933   :  { %8101 = vmatpush1.bf16.msra.mxu0 %v8100_v17  ;;  %8165 = vmatpush1.bf16.msra.mxu1 %v8164_v55  ;;  %v4675_v17 = vld [vmem:[#allocation4 + $0x8b0] sm:$0xff]  ;;  %v4684_v55 = vld [vmem:[#allocation4 + $0x8f8] sm:$0xff] }
 0x934   :  { %8103 = vmatprep.subr.bf16.mxu0 %v8102_v35  ;;  %8167 = vmatprep.subr.bf16.mxu1 %v8166_v63  ;;  %v8202_v34 = vpack.c.bf16 %v4684_v55, %v4675_v17  ;;  %v4531_v35 = vld [vmem:[#allocation4 + $0x430] sm:$0xff]  ;;  %v4540_v63 = vld [vmem:[#allocation4 + $0x478] sm:$0xff] }
 0x935   :  { %v8204_v36 = vpack.c.bf16 %v4540_v63, %v4531_v35  ;;  %v5193_v17 = vld [vmem:[#allocation4 + $0x250] sm:$0xff]  ;;  %v5202_v55 = vld [vmem:[#allocation4 + $0x298] sm:$0xff]  ;;  %v5219_v35 = vld [vmem:[#allocation4 + $0x320] sm:$0xff] }
 0x936   :  { %v5212_v63 = vld [vmem:[#allocation4 + $0x2e8] sm:$0xff] }
 0x937   :  { %8105 = vmatpush1.bf16.msra.mxu0 %v8104_v42  ;;  %8169 = vmatpush1.bf16.msra.mxu1 %v8168_v25  ;;  %v5119_v42 = vld [vmem:[#allocation4] sm:$0xff]  ;;  %v5128_v25 = vld [vmem:[#allocation4 + $0x48] sm:$0xff] }
 0x938   :  { %8107 = vmatprep.subr.bf16.mxu0 %v8106_v54  ;;  %8171 = vmatprep.subr.bf16.mxu1 %v8170_v43  ;;  %v8208_v54 = vpack.c.bf16 %v5128_v25, %v5119_v42  ;;  %v5121_v43 = vld [vmem:[#allocation4 + $0x10] sm:$0xff]  ;;  %v5211_v42 = vld [vmem:[#allocation4 + $0x2e0] sm:$0xff]  ;;  %v5220_v25 = vld [vmem:[#allocation4 + $0x328] sm:$0xff] }
 0x939   :  { %v8272_v45 = vpack.c.bf16 %v5130_v44, %v5121_v43  ;;  %v5237_v43 = vld [vmem:[#allocation4 + $0x3b0] sm:$0xff]  ;;  %v5230_v44 = vld [vmem:[#allocation4 + $0x378] sm:$0xff] }
 0x93b   :  { %8109 = vmatpush1.bf16.msra.mxu0 %v8108_v62  ;;  %8173 = vmatpush1.bf16.msra.mxu1 %v8172_v48  ;;  %v5149_v62 = vld [vmem:[#allocation4 + $0xf0] sm:$0xff] }
 0x93c   :  { %8175 = vmatprep.subr.bf16.mxu0 %v8174_v49  ;;  %8207 = vmatprep.subr.bf16.mxu1 %v8206_v41  ;;  %v5137_v48 = vld [vmem:[#allocation4 + $0x90] sm:$0xff]  ;;  %v5146_v49 = vld [vmem:[#allocation4 + $0xd8] sm:$0xff]  ;;  %v8274_v51 = vpack.c.bf16 %v5149_v62, %v5140_v31  ;;  %v8290_v41 = vpack.c.bf16 %v5221_v38, %v5212_v63  ;;  %v5236_v31 = vld [vmem:[#allocation4 + $0x3a8] sm:$0xff] }
 0x93d   :  { %v8212_v50 = vpack.c.bf16 %v5146_v49, %v5137_v48  ;;  %v5229_v48 = vld [vmem:[#allocation4 + $0x370] sm:$0xff]  ;;  %v5238_v49 = vld [vmem:[#allocation4 + $0x3b8] sm:$0xff]  ;;  %v5308_v63 = vld [vmem:[#allocation4 + $0x5e8] sm:$0xff] }
 0x93e   :  { %4902 = vmatmul.mubr.f32.vlgmr.msra.gmra.mrb[32].mxu0 %v9146_v46  ;;  %4973 = vmatmul.mubr.f32.vlgmr.msra.gmra.mrb[32].mxu1 %v9146_v46 }
 0x93f   :  { %8177 = vmatpush3.bf16.msra.mxu0 %v8176_v37  ;;  %5043 = vmatprep.mubr.f32.mxu0 %v9150_v30  ;;  %v4477_v30 = vld [vmem:[#allocation4 + $0x280] sm:$0xff]  ;;  %v8276_v37 = vpack.c.bf16 %v5148_v53, %v5139_v52  ;;  %v5248_v53 = vld [vmem:[#allocation4 + $0x408] sm:$0xff] }
 0x940   :  { %8179 = vmatprep.subr.bf16.mxu0 %v8178_v16  ;;  %v8192_v26 = vpack.c.bf16 %v4486_v11, %v4477_v30  ;;  %8209 = vmatpush1.bf16.msra.mxu1 %v8208_v54  ;;  %v5156_v16 = vld [vmem:[#allocation4 + $0x128] sm:$0xff]  ;;  %v8282_v30 = vpack.c.bf16 %v5185_v8, %v5176_v6  ;;  %v5255_v52 = vld [vmem:[#allocation4 + $0x440] sm:$0xff] }
 0x941   :  { %v8214_v57 = vpack.c.bf16 %v5165_v61, %v5156_v16  ;;  %v5228_v54 = vld [vmem:[#allocation4 + $0x368] sm:$0xff]  ;;  %v5257_v16 = vld [vmem:[#allocation4 + $0x450] sm:$0xff] }
 0x942   :  { %v5245_v61 = vld [vmem:[#allocation4 + $0x3f0] sm:$0xff]  ;;  %v5272_v6 = vld [vmem:[#allocation4 + $0x4c8] sm:$0xff] }
 0x943   :  { %8181 = vmatpush3.bf16.msra.mxu0 %v8180_v59  ;;  %v5155_v59 = vld [vmem:[#allocation4 + $0x120] sm:$0xff]  ;;  %v8236_v32 = vpack.c.bf16 %v5254_v56, %v5245_v61  ;;  %v5344_v56 = vld [vmem:[#allocation4 + $0x708] sm:$0xff] }
 0x944   :  { %8183 = vmatprep.subr.bf16.mxu0 %v8182_v60  ;;  %v5164_v60 = vld [vmem:[#allocation4 + $0x168] sm:$0xff]  ;;  %v5335_v61 = vld [vmem:[#allocation4 + $0x6c0] sm:$0xff] }
 0x945   :  { %v8216_v0 = vpack.c.bf16 %v5164_v60, %v5155_v59  ;;  %v5247_v59 = vld [vmem:[#allocation4 + $0x400] sm:$0xff]  ;;  %v5256_v60 = vld [vmem:[#allocation4 + $0x448] sm:$0xff] }
 0x947   :  { %8185 = vmatpush3.bf16.msra.mxu0 %v8184_v5  ;;  %v8280_v5 = vpack.c.bf16 %v5166_v2, %v5157_v1  ;;  %v5273_v1 = vld [vmem:[#allocation4 + $0x4d0] sm:$0xff]  ;;  %v5266_v2 = vld [vmem:[#allocation4 + $0x498] sm:$0xff] }
 0x948   :  { %8187 = vmatprep.subr.bf16.mxu0 %v8186_v3  ;;  %v5174_v3 = vld [vmem:[#allocation4 + $0x1b8] sm:$0xff] }
 0x949   :  { %v8218_v7 = vpack.c.bf16 %v5183_v24, %v5174_v3  ;;  %v5275_v3 = vld [vmem:[#allocation4 + $0x4e0] sm:$0xff] }
 0x94a   :  { %v5263_v24 = vld [vmem:[#allocation4 + $0x480] sm:$0xff] }
 0x94b   :  { %8189 = vmatpush3.bf16.msra.mxu0 %v8188_v18  ;;  %v5173_v18 = vld [vmem:[#allocation4 + $0x1b0] sm:$0xff]  ;;  %v8240_v8 = vpack.c.bf16 %v5272_v6, %v5263_v24 }
 0x94c   :  { %8191 = vmatprep.subr.bf16.mxu0 %v8190_v9  ;;  %v5182_v9 = vld [vmem:[#allocation4 + $0x1f8] sm:$0xff]  ;;  %v5353_v6 = vld [vmem:[#allocation4 + $0x750] sm:$0xff] }
 0x94d   :  { %v8220_v11 = vpack.c.bf16 %v5182_v9, %v5173_v18  ;;  %v5265_v18 = vld [vmem:[#allocation4 + $0x490] sm:$0xff]  ;;  %v5274_v9 = vld [vmem:[#allocation4 + $0x4d8] sm:$0xff] }
 0x94f   :  { %8193 = vmatpush3.bf16.msra.mxu0 %v8192_v26  ;;  %v8284_v26 = vpack.c.bf16 %v5184_v13, %v5175_v12  ;;  %v5291_v12 = vld [vmem:[#allocation4 + $0x560] sm:$0xff]  ;;  %v5284_v13 = vld [vmem:[#allocation4 + $0x528] sm:$0xff] }
 0x950   :  { %8195 = vmatprep.subr.bf16.mxu0 %v8194_v14  ;;  %v5192_v14 = vld [vmem:[#allocation4 + $0x248] sm:$0xff] }
 0x951   :  { %v8222_v22 = vpack.c.bf16 %v5201_v20, %v5192_v14  ;;  %v5293_v14 = vld [vmem:[#allocation4 + $0x570] sm:$0xff] }
 0x952   :  { %v5281_v20 = vld [vmem:[#allocation4 + $0x510] sm:$0xff] }
 0x953   :  { %8197 = vmatpush3.bf16.msra.mxu0 %v8196_v23  ;;  %v5191_v23 = vld [vmem:[#allocation4 + $0x240] sm:$0xff]  ;;  %v8244_v4 = vpack.c.bf16 %v5290_v21, %v5281_v20 }
 0x954   :  { %8199 = vmatprep.subr.bf16.mxu0 %v8198_v27  ;;  %v5200_v27 = vld [vmem:[#allocation4 + $0x288] sm:$0xff]  ;;  %v5371_v20 = vld [vmem:[#allocation4 + $0x7e0] sm:$0xff] }
 0x955   :  { %v8224_v29 = vpack.c.bf16 %v5200_v27, %v5191_v23  ;;  %v5283_v23 = vld [vmem:[#allocation4 + $0x520] sm:$0xff]  ;;  %v5292_v27 = vld [vmem:[#allocation4 + $0x568] sm:$0xff] }
 0x957   :  { %8201 = vmatpush3.bf16.msra.mxu0 %v8200_v33  ;;  %v8288_v33 = vpack.c.bf16 %v5202_v55, %v5193_v17  ;;  %v5309_v17 = vld [vmem:[#allocation4 + $0x5f0] sm:$0xff]  ;;  %v5302_v55 = vld [vmem:[#allocation4 + $0x5b8] sm:$0xff] }
 0x958   :  { %8203 = vmatprep.subr.bf16.mxu0 %v8202_v34  ;;  %v5210_v34 = vld [vmem:[#allocation4 + $0x2d8] sm:$0xff] }
 0x95b   :  { %8205 = vmatpush3.bf16.msra.mxu0 %v8204_v36  ;;  %v8226_v36 = vpack.c.bf16 %v5219_v35, %v5210_v34  ;;  %v5311_v34 = vld [vmem:[#allocation4 + $0x600] sm:$0xff] }
 0x95c   :  { %8271 = vmatprep.subr.bf16.mxu0 %v8270_v58  ;;  %v8292_v58 = vpack.c.bf16 %v5220_v25, %v5211_v42  ;;  %v5299_v35 = vld [vmem:[#allocation4 + $0x5a0] sm:$0xff]  ;;  %v8310_v39 = vpack.c.bf16 %v5311_v34, %v5302_v55  ;;  %v5401_v55 = vld [vmem:[#allocation4 + $0x8d0] sm:$0xff] }
 0x95d   :  { %v8248_v40 = vpack.c.bf16 %v5308_v63, %v5299_v35  ;;  %v5389_v35 = vld [vmem:[#allocation4 + $0x870] sm:$0xff]  ;;  %v5398_v63 = vld [vmem:[#allocation4 + $0x8b8] sm:$0xff] }
 0x95e   :  { %5044 = vmatmul.mubr.f32.vlgmr.msra.gmra.mrb[34].mxu0 %v9146_v46  ;;  %v8210_v46 = vpack.c.bf16 %v5147_v47, %v5138_v19  ;;  %v5239_v19 = vld [vmem:[#allocation4 + $0x3c0] sm:$0xff] }
 0x95f   :  { %8273 = vmatpush1.bf16.msra.mxu0 %v8272_v45  ;;  %v8230_v45 = vpack.c.bf16 %v5237_v43, %v5228_v54  ;;  %v5227_v47 = vld [vmem:[#allocation4 + $0x360] sm:$0xff]  ;;  %v5318_v54 = vld [vmem:[#allocation4 + $0x638] sm:$0xff] }
 0x960   :  { %8211 = vmatprep.subr.bf16.mxu1 %v8210_v46  ;;  %8275 = vmatprep.subr.bf16.mxu0 %v8274_v51  ;;  %v8294_v46 = vpack.c.bf16 %v5239_v19, %v5230_v44  ;;  %v8232_v62 = vpack.c.bf16 %v5236_v31, %v5227_v47  ;;  %v8296_v51 = vpack.c.bf16 %v5238_v49, %v5229_v48  ;;  %v5327_v43 = vld [vmem:[#allocation4 + $0x680] sm:$0xff]  ;;  %v5320_v44 = vld [vmem:[#allocation4 + $0x648] sm:$0xff]  ;;  %v5329_v19 = vld [vmem:[#allocation4 + $0x690] sm:$0xff] }
 0x961   :  { %8213 = vmatpush1.bf16.msra.mxu1 %v8212_v50  ;;  %v5246_v50 = vld [vmem:[#allocation4 + $0x3f8] sm:$0xff]  ;;  %v5317_v47 = vld [vmem:[#allocation4 + $0x630] sm:$0xff]  ;;  %v8314_v31 = vpack.c.bf16 %v5329_v19, %v5320_v44  ;;  %v5328_v49 = vld [vmem:[#allocation4 + $0x688] sm:$0xff] }
 0x962   :  { %8215 = vmatprep.subr.bf16.mxu1 %v8214_v57  ;;  %v8298_v57 = vpack.c.bf16 %v5257_v16, %v5248_v53  ;;  %v5338_v53 = vld [vmem:[#allocation4 + $0x6d8] sm:$0xff]  ;;  %v5347_v16 = vld [vmem:[#allocation4 + $0x720] sm:$0xff] }
 0x963   :  { %8277 = vmatpush1.bf16.msra.mxu0 %v8276_v37  ;;  %v8234_v37 = vpack.c.bf16 %v5255_v52, %v5246_v50  ;;  %v5336_v50 = vld [vmem:[#allocation4 + $0x6c8] sm:$0xff]  ;;  %v5345_v52 = vld [vmem:[#allocation4 + $0x710] sm:$0xff]  ;;  %v5126_v44 = vld [vmem:[#allocation4 + $0x38] sm:$0xff] }
 0x964   :  { %8279 = vmatprep.subr.bf16.mxu0 %v8278_v15  ;;  %v8300_v15 = vpack.c.bf16 %v5256_v60, %v5247_v59  ;;  %v5337_v59 = vld [vmem:[#allocation4 + $0x6d0] sm:$0xff]  ;;  %v5346_v60 = vld [vmem:[#allocation4 + $0x718] sm:$0xff]  ;;  %v5135_v19 = vld [vmem:[#allocation4 + $0x80] sm:$0xff] }
 0x965   :  { %8217 = vmatpush1.bf16.msra.mxu1 %v8216_v0  ;;  %v5264_v0 = vld [vmem:[#allocation4 + $0x488] sm:$0xff] }
 0x966   :  { %8219 = vmatprep.subr.bf16.mxu1 %v8218_v7  ;;  %v8302_v7 = vpack.c.bf16 %v5275_v3, %v5266_v2  ;;  %v5356_v2 = vld [vmem:[#allocation4 + $0x768] sm:$0xff] }
 0x967   :  { %8281 = vmatpush1.bf16.msra.mxu0 %v8280_v5  ;;  %v8238_v5 = vpack.c.bf16 %v5273_v1, %v5264_v0  ;;  %v8320_v0 = vpack.c.bf16 %v5346_v60, %v5337_v59  ;;  %v5363_v1 = vld [vmem:[#allocation4 + $0x7a0] sm:$0xff] }
 0x968   :  { %8283 = vmatprep.subr.bf16.mxu0 %v8282_v30  ;;  %v8304_v30 = vpack.c.bf16 %v5274_v9, %v5265_v18  ;;  %v5364_v9 = vld [vmem:[#allocation4 + $0x7a8] sm:$0xff] }
 0x969   :  { %8221 = vmatpush1.bf16.msra.mxu1 %v8220_v11  ;;  %v5282_v11 = vld [vmem:[#allocation4 + $0x518] sm:$0xff] }
 0x96a   :  { %8223 = vmatprep.subr.bf16.mxu1 %v8222_v22  ;;  %v8306_v22 = vpack.c.bf16 %v5293_v14, %v5284_v13  ;;  %v5383_v14 = vld [vmem:[#allocation4 + $0x840] sm:$0xff] }
 0x96b   :  { %8285 = vmatpush1.bf16.msra.mxu0 %v8284_v26  ;;  %v8242_v26 = vpack.c.bf16 %v5291_v12, %v5282_v11  ;;  %v5381_v11 = vld [vmem:[#allocation4 + $0x830] sm:$0xff] }
 0x96c   :  { %8287 = vmatprep.subr.bf16.mxu0 %v8286_v28  ;;  %v8308_v28 = vpack.c.bf16 %v5292_v27, %v5283_v23  ;;  %v5382_v23 = vld [vmem:[#allocation4 + $0x838] sm:$0xff] }
 0x96d   :  { %8225 = vmatpush1.bf16.msra.mxu1 %v8224_v29  ;;  %v5300_v29 = vld [vmem:[#allocation4 + $0x5a8] sm:$0xff]  ;;  %v5390_v27 = vld [vmem:[#allocation4 + $0x878] sm:$0xff] }
 0x96e   :  { %8227 = vmatprep.subr.bf16.mxu1 %v8226_v36 }
 0x96f   :  { %8289 = vmatpush1.bf16.msra.mxu0 %v8288_v33  ;;  %v8246_v33 = vpack.c.bf16 %v5309_v17, %v5300_v29  ;;  %v5392_v29 = vld [vmem:[#allocation4 + $0x888] sm:$0xff] }
 0x970   :  { %8291 = vmatprep.subr.bf16.mxu0 %v8290_v41  ;;  %v5301_v41 = vld [vmem:[#allocation4 + $0x5b0] sm:$0xff] }
 0x971   :  { %8229 = vmatpush1.bf16.msra.mxu1 %v8228_v10  ;;  %v5310_v10 = vld [vmem:[#allocation4 + $0x5f8] sm:$0xff] }
 0x972   :  { %8231 = vmatprep.subr.bf16.mxu1 %v8230_v45  ;;  %v8250_v45 = vpack.c.bf16 %v5327_v43, %v5318_v54  ;;  %v5124_v54 = vld [vmem:[#allocation4 + $0x28] sm:$0xff]  ;;  %v5133_v43 = vld [vmem:[#allocation4 + $0x70] sm:$0xff] }
 0x973   :  { %8293 = vmatpush1.bf16.msra.mxu0 %v8292_v58  ;;  %v8312_v58 = vpack.c.bf16 %v5310_v10, %v5301_v41  ;;  %v5400_v41 = vld [vmem:[#allocation4 + $0x8c8] sm:$0xff]  ;;  %v8268_v10 = vpack.c.bf16 %v5398_v63, %v5389_v35 }
 0x974   :  { %8295 = vmatprep.subr.bf16.mxu0 %v8294_v46  ;;  %v5326_v46 = vld [vmem:[#allocation4 + $0x678] sm:$0xff] }
 0x975   :  { %8233 = vmatpush1.bf16.msra.mxu1 %v8232_v62  ;;  %v5319_v62 = vld [vmem:[#allocation4 + $0x640] sm:$0xff]  ;;  %v8252_v48 = vpack.c.bf16 %v5326_v46, %v5317_v47  ;;  %v8398_v47 = vpack.c.bf16 %v5135_v19, %v5126_v44 }
 0x976   :  { %8235 = vmatprep.subr.bf16.mxu1 %v8234_v37  ;;  %v8254_v37 = vpack.c.bf16 %v5345_v52, %v5336_v50  ;;  %v4686_v46 = vld [vmem:[#allocation8 + $0x1b0] sm:$0xff]  ;;  %v4688_v50 = vld [vmem:[#allocation8 + $0x1c0] sm:$0xff] }
 0x977   :  { %8297 = vmatpush1.bf16.msra.mxu0 %v8296_v51  ;;  %v8316_v51 = vpack.c.bf16 %v5328_v49, %v5319_v62 }
 0x978   :  { %8299 = vmatprep.subr.bf16.mxu0 %v8298_v57  ;;  %v8318_v57 = vpack.c.bf16 %v5347_v16, %v5338_v53 }
 0x979   :  { %8237 = vmatpush1.bf16.msra.mxu1 %v8236_v32  ;;  %v8256_v32 = vpack.c.bf16 %v5344_v56, %v5335_v61 }
 0x97a   :  { %8239 = vmatprep.subr.bf16.mxu1 %v8238_v5  ;;  %v5365_v5 = vld [vmem:[#allocation4 + $0x7b0] sm:$0xff] }
 0x97b   :  { %8301 = vmatpush1.bf16.msra.mxu0 %v8300_v15  ;;  %v5354_v15 = vld [vmem:[#allocation4 + $0x758] sm:$0xff]  ;;  %v8322_v24 = vpack.c.bf16 %v5365_v5, %v5356_v2 }
 0x97c   :  { %8303 = vmatprep.subr.bf16.mxu0 %v8302_v7  ;;  %v8258_v3 = vpack.c.bf16 %v5363_v1, %v5354_v15  ;;  %v5362_v7 = vld [vmem:[#allocation4 + $0x798] sm:$0xff]  ;;  %v4691_v15 = vld [vmem:[#allocation8 + $0x1d8] sm:$0xff] }
 0x97d   :  { %8241 = vmatpush1.bf16.msra.mxu1 %v8240_v8  ;;  %v5355_v8 = vld [vmem:[#allocation4 + $0x760] sm:$0xff]  ;;  %v8260_v18 = vpack.c.bf16 %v5362_v7, %v5353_v6  ;;  %v8811_v7 = vld [vmem:[#allocation10 + $0x58] sm:$0xff] }
 0x97e   :  { %8243 = vmatprep.subr.bf16.mxu1 %v8242_v26  ;;  %v8324_v12 = vpack.c.bf16 %v5364_v9, %v5355_v8  ;;  %v5374_v26 = vld [vmem:[#allocation4 + $0x7f8] sm:$0xff] }
 0x97f   :  { %8305 = vmatpush1.bf16.msra.mxu0 %v8304_v30  ;;  %v5372_v30 = vld [vmem:[#allocation4 + $0x7e8] sm:$0xff]  ;;  %v8326_v21 = vpack.c.bf16 %v5383_v14, %v5374_v26  ;;  %v4692_v14 = vld [vmem:[#allocation8 + $0x1e0] sm:$0xff] }
 0x980   :  { %8307 = vmatprep.subr.bf16.mxu0 %v8306_v22  ;;  %v8262_v13 = vpack.c.bf16 %v5381_v11, %v5372_v30  ;;  %v5380_v22 = vld [vmem:[#allocation4 + $0x828] sm:$0xff]  ;;  %v4689_v30 = vld [vmem:[#allocation8 + $0x1c8] sm:$0xff] }
 0x981   :  { %8245 = vmatpush1.bf16.msra.mxu1 %v8244_v4  ;;  %v5373_v4 = vld [vmem:[#allocation4 + $0x7f0] sm:$0xff]  ;;  %v8264_v17 = vpack.c.bf16 %v5380_v22, %v5371_v20 }
 0x982   :  { %8247 = vmatprep.subr.bf16.mxu1 %v8246_v33  ;;  %v8328_v33 = vpack.c.bf16 %v5382_v23, %v5373_v4 }
 0x983   :  { %8309 = vmatpush1.bf16.msra.mxu0 %v8308_v28  ;;  %v5399_v28 = vld [vmem:[#allocation4 + $0x8c0] sm:$0xff] }
 0x984   :  { %8311 = vmatprep.subr.bf16.mxu0 %v8310_v39  ;;  %v8266_v34 = vpack.c.bf16 %v5399_v28, %v5390_v27  ;;  %v8330_v39 = vpack.c.bf16 %v5401_v55, %v5392_v29 }
 0x985   :  { %8249 = vmatpush1.bf16.msra.mxu1 %v8248_v40  ;;  %v5391_v40 = vld [vmem:[#allocation4 + $0x880] sm:$0xff] }
 0x986   :  { %8251 = vmatprep.subr.bf16.mxu1 %v8250_v45  ;;  %v8334_v45 = vpack.c.bf16 %v5133_v43, %v5124_v54 }
 0x987   :  { %8313 = vmatpush1.bf16.msra.mxu0 %v8312_v58  ;;  %v8332_v58 = vpack.c.bf16 %v5400_v41, %v5391_v40 }
 0x988   :  { %8315 = vmatprep.subr.bf16.mxu0 %v8314_v31  ;;  %v4687_v31 = vld [vmem:[#allocation8 + $0x1b8] sm:$0xff] }
 0x989   :  { %8253 = vmatpush1.bf16.msra.mxu1 %v8252_v48 }
 0x98a   :  { %8255 = vmatprep.subr.bf16.mxu1 %v8254_v37 }
 0x98b   :  { %8317 = vmatpush1.bf16.msra.mxu0 %v8316_v51 }
 0x98c   :  { %8319 = vmatprep.subr.bf16.mxu0 %v8318_v57  ;;  %v4693_v57 = vld [vmem:[#allocation8 + $0x1e8] sm:$0xff] }
 0x98d   :  { %8257 = vmatpush1.bf16.msra.mxu1 %v8256_v32 }
 0x98e   :  { %8259 = vmatprep.subr.bf16.mxu1 %v8258_v3 }
 0x98f   :  { %8321 = vmatpush1.bf16.msra.mxu0 %v8320_v0  ;;  %v4690_v0 = vld [vmem:[#allocation8 + $0x1d0] sm:$0xff] }
 0x990   :  { %8323 = vmatprep.subr.bf16.mxu0 %v8322_v24 }
 0x991   :  { %8261 = vmatpush1.bf16.msra.mxu1 %v8260_v18 }
 0x992   :  { %8263 = vmatprep.subr.bf16.mxu1 %v8262_v13 }
 0x993   :  { %8325 = vmatpush1.bf16.msra.mxu0 %v8324_v12 }
 0x994   :  { %8327 = vmatprep.subr.bf16.mxu0 %v8326_v21 }
 0x995   :  { %8265 = vmatpush1.bf16.msra.mxu1 %v8264_v17 }
 0x996   :  { %8267 = vmatprep.subr.bf16.mxu1 %v8266_v34 }
 0x997   :  { %8329 = vmatpush1.bf16.msra.mxu0 %v8328_v33  ;;  %v4694_v33 = vld [vmem:[#allocation8 + $0x1f0] sm:$0xff] }
 0x998   :  { %8331 = vmatprep.subr.bf16.mxu0 %v8330_v39 }
 0x999   :  { %8269 = vmatpush1.bf16.msra.mxu1 %v8268_v10 }
 0x99a   :  { %8335 = vmatprep.subr.bf16.mxu1 %v8334_v45 }
 0x99b   :  { %8333 = vmatpush1.bf16.msra.mxu0 %v8332_v58 }
 0x99c   :  { %8399 = vmatprep.subr.bf16.mxu0 %v8398_v47 }
 0x9d1   :  { %v9162_v36 = vpop.f32.mrb[30].mxu0  ;;  %v9164_v38 = vpop.f32.mrb[30].mxu1 }
 0x9d2   :  { %v9166_v42 = vpop.f32.mrb[31].mxu0  ;;  %v9168_v25 = vpop.f32.mrb[31].mxu1  ;;  %v4762_v48 = vadd.f32 %v9162_v36, %v4686_v46  ;;  %v4833_v52 = vadd.f32 %v9164_v38, %v4688_v50 }
 0x9d3   :  { %v4764_v62 = vadd.f32 %v9166_v42, %v4687_v31  ;;  %v4835_v13 = vadd.f32 %v9168_v25, %v4689_v30 }
 0x9d4   :  { %v5896_v51 = vmul.f32 -1.442695, %v4762_v48  ;;  %v5898_v16 = vmul.f32 -1.442695, %v4833_v52 }
 0x9d5   :  { %v5897_v49 = vmul.f32 -1.442695, %v4764_v62  ;;  %v5899_v26 = vmul.f32 -1.442695, %v4835_v13 }
 0x9d7   :  { %8732 = vpow2.f32 %v5897_v49 }
 0x9d8   :  { %8734 = vpow2.f32 %v5896_v51 }
 0x9d9   :  { %8736 = vpow2.f32 %v5898_v16  ;;  %v5132_v16 = vld [vmem:[#allocation4 + $0x68] sm:$0xff] }
 0x9e1   :  { %v8733_v53 = vpop.eup %8732 }
 0x9e2   :  { %v8735_v37 = vpop.eup %8734  ;;  %v5071_v61 = vadd.f32 1.0, %v8733_v53 }
 0x9e3   :  { %v5070_v56 = vadd.f32 1.0, %v8735_v37  ;;  %v8737_v1 = vpop.eup %8736  ;;  %v5123_v37 = vld [vmem:[#allocation4 + $0x20] sm:$0xff] }
 0x9e4   :  { %8738 = vrcp.f32 %v5071_v61  ;;  %v5072_v6 = vadd.f32 1.0, %v8737_v1  ;;  %v5125_v61 = vld [vmem:[#allocation4 + $0x30] sm:$0xff] }
 0x9e5   :  { %8740 = vrcp.f32 %v5070_v56  ;;  %v5134_v56 = vld [vmem:[#allocation4 + $0x78] sm:$0xff]  ;;  %v5141_v1 = vld [vmem:[#allocation4 + $0xb0] sm:$0xff] }
 0x9ee   :  { %v8739_v38 = vpop.eup %8738 }
 0x9ef   :  { %v8741_v3 = vpop.eup %8740  ;;  %v5093_v8 = vmul.f32 %v8811_v7, %v8739_v38  ;;  %v5143_v38 = vld [vmem:[#allocation4 + $0xc0] sm:$0xff] }
 0xa11   :  { %v4903_v32 = vpop.f32.mrb[32].mxu0  ;;  %v4974_v59 = vpop.f32.mrb[32].mxu1 }
 0xa12   :  { %v4905_v60 = vpop.f32.mrb[33].mxu0  ;;  %v4976_v42 = vpop.f32.mrb[33].mxu1  ;;  %v4904_v5 = vadd.f32 %v4903_v32, %v4690_v0  ;;  %v4975_v20 = vadd.f32 %v4974_v59, %v4692_v14  ;;  %v5151_v59 = vld [vmem:[#allocation4 + $0x100] sm:$0xff]  ;;  %v8400_v0 = vpack.c.bf16 %v5134_v56, %v5125_v61  ;;  %v5161_v14 = vld [vmem:[#allocation4 + $0x150] sm:$0xff]  ;;  %v5224_v56 = vld [vmem:[#allocation4 + $0x348] sm:$0xff] }
 0xa13   :  { %v4977_v36 = vadd.f32 %v4976_v42, %v4693_v57  ;;  %v4906_v2 = vadd.f32 %v4905_v60, %v4691_v15  ;;  %v5142_v57 = vld [vmem:[#allocation4 + $0xb8] sm:$0xff]  ;;  %v5144_v60 = vld [vmem:[#allocation4 + $0xc8] sm:$0xff]  ;;  %v5153_v42 = vld [vmem:[#allocation4 + $0x110] sm:$0xff]  ;;  %v8336_v15 = vpack.c.bf16 %v5132_v16, %v5123_v37 }
 0xa14   :  { %v5900_v11 = vmul.f32 -1.442695, %v4904_v5  ;;  %v5902_v27 = vmul.f32 -1.442695, %v4975_v20  ;;  %v5152_v5 = vld [vmem:[#allocation4 + $0x108] sm:$0xff]  ;;  %v5170_v20 = vld [vmem:[#allocation4 + $0x198] sm:$0xff] }
 0xa15   :  { %8742 = vtanh.f32 %v4977_v36  ;;  %v5901_v18 = vmul.f32 -1.442695, %v4906_v2  ;;  %v5150_v2 = vld [vmem:[#allocation4 + $0xf8] sm:$0xff]  ;;  %v8404_v30 = vpack.c.bf16 %v5152_v5, %v5143_v38  ;;  %v5215_v61 = vld [vmem:[#allocation4 + $0x300] sm:$0xff]  ;;  %v5233_v5 = vld [vmem:[#allocation4 + $0x390] sm:$0xff] }
 0xa16   :  { %8744 = vrcp.f32 %v5072_v6  ;;  %v8402_v6 = vpack.c.bf16 %v5153_v42, %v5144_v60  ;;  %v5243_v60 = vld [vmem:[#allocation4 + $0x3e0] sm:$0xff] }
 0xa17   :  { %8746 = vpow2.f32 %v5901_v18  ;;  %v5171_v18 = vld [vmem:[#allocation4 + $0x1a0] sm:$0xff] }
 0xa18   :  { %8748 = vpow2.f32 %v5900_v11  ;;  %v5159_v11 = vld [vmem:[#allocation4 + $0x140] sm:$0xff] }
 0xa1f   :  { %v8743_v24 = vpop.eup %8742 }
 0xa20   :  { %v5094_v9 = vmul.f32 %v8743_v24, %v8741_v3  ;;  %v8745_v21 = vpop.eup %8744  ;;  %v5160_v3 = vld [vmem:[#allocation4 + $0x148] sm:$0xff]  ;;  %v8338_v24 = vpack.c.bf16 %v5151_v59, %v5142_v57  ;;  %v5234_v59 = vld [vmem:[#allocation4 + $0x398] sm:$0xff] }
 0xa21   :  { %v8747_v22 = vpop.eup %8746  ;;  %v5232_v57 = vld [vmem:[#allocation4 + $0x388] sm:$0xff]  ;;  %v8422_v38 = vpack.c.bf16 %v5243_v60, %v5234_v59  ;;  %v5333_v59 = vld [vmem:[#allocation4 + $0x6b0] sm:$0xff] }
 0xa22   :  { %v5095_v12 = vadd.f32 %v5094_v9, %v5093_v8  ;;  %v8749_v4 = vpop.eup %8748  ;;  %v5075_v28 = vadd.f32 1.0, %v8747_v22  ;;  %v5162_v8 = vld [vmem:[#allocation4 + $0x158] sm:$0xff]  ;;  %v8340_v9 = vpack.c.bf16 %v5150_v2, %v5141_v1  ;;  %v5187_v22 = vld [vmem:[#allocation4 + $0x220] sm:$0xff]  ;;  %v5240_v1 = vld [vmem:[#allocation4 + $0x3c8] sm:$0xff] }
 0xa23   :  { %v5074_v55 = vadd.f32 1.0, %v8749_v4  ;;  %v5180_v4 = vld [vmem:[#allocation4 + $0x1e8] sm:$0xff] }
 0xa24   :  { %8750 = vtanh.f32 %v5095_v12 }
 0xa25   :  { %8752 = vpow2.f32 %v5899_v26  ;;  %v8406_v26 = vpack.c.bf16 %v5171_v18, %v5162_v8  ;;  %v5261_v8 = vld [vmem:[#allocation4 + $0x470] sm:$0xff] }
 0xa26   :  { %8754 = vpow2.f32 %v5902_v27 }
 0xa27   :  { %8756 = vrcp.f32 %v5075_v28  ;;  %v8408_v28 = vpack.c.bf16 %v5170_v20, %v5161_v14  ;;  %v5260_v14 = vld [vmem:[#allocation4 + $0x468] sm:$0xff] }
 0xa28   :  { %8758 = vrcp.f32 %v5074_v55  ;;  %v5268_v20 = vld [vmem:[#allocation4 + $0x4a8] sm:$0xff] }
 0xa2e   :  { %v8751_v23 = vpop.eup %8750 }
 0xa2f   :  { %v5100_v29 = vmul.f32 %v8751_v23, %v8745_v21  ;;  %v8753_v63 = vpop.eup %8752  ;;  %v5178_v21 = vld [vmem:[#allocation4 + $0x1d8] sm:$0xff]  ;;  %v5189_v23 = vld [vmem:[#allocation4 + $0x230] sm:$0xff] }
 0xa30   :  { %v5073_v39 = vadd.f32 1.0, %v8753_v63  ;;  %v8755_v40 = vpop.eup %8754  ;;  %v8346_v55 = vpack.c.bf16 %v5187_v22, %v5178_v21  ;;  %v5205_v63 = vld [vmem:[#allocation4 + $0x2b0] sm:$0xff]  ;;  %v5270_v22 = vld [vmem:[#allocation4 + $0x4b8] sm:$0xff] }
 0xa31   :  { %v6152_v17 = vpop.f32.mrb[34].mxu0  ;;  %v8757_v41 = vpop.eup %8756  ;;  %v5076_v54 = vadd.f32 1.0, %v8755_v40  ;;  %v5207_v40 = vld [vmem:[#allocation4 + $0x2c0] sm:$0xff]  ;;  %v5277_v21 = vld [vmem:[#allocation4 + $0x4f0] sm:$0xff] }
 0xa32   :  { %v6153_v34 = vpop.f32.mrb[35].mxu0  ;;  %v8759_v10 = vpop.eup %8758  ;;  %v5096_v43 = vmul.f32 %v8811_v7, %v8757_v41  ;;  %v5169_v7 = vld [vmem:[#allocation4 + $0x190] sm:$0xff] }
 0xa33   :  { %v6154_v35 = vadd.f32 %v6153_v34, %v6152_v17  ;;  %v8342_v13 = vpack.c.bf16 %v5169_v7, %v5160_v3  ;;  %v5186_v17 = vld [vmem:[#allocation4 + $0x218] sm:$0xff]  ;;  %v5179_v34 = vld [vmem:[#allocation4 + $0x1e0] sm:$0xff]  ;;  %v5252_v7 = vld [vmem:[#allocation4 + $0x428] sm:$0xff] }
 0xa34   :  { %v5242_v3 = vld [vmem:[#allocation4 + $0x3d8] sm:$0xff] }
 0xa35   :  { %v5046_v25 = vadd.f32 %v6154_v35, %v4694_v33  ;;  %v8410_v33 = vpack.c.bf16 %v5189_v23, %v5180_v4  ;;  %v5188_v35 = vld [vmem:[#allocation4 + $0x228] sm:$0xff]  ;;  %v5279_v4 = vld [vmem:[#allocation4 + $0x500] sm:$0xff] }
 0xa37   :  { %8760 = vtanh.f32 %v5046_v25  ;;  %v5196_v25 = vld [vmem:[#allocation4 + $0x268] sm:$0xff] }
 0xa38   :  { %8762 = vrcp.f32 %v5073_v39  ;;  %v5198_v39 = vld [vmem:[#allocation4 + $0x278] sm:$0xff] }
 0xa39   :  { %8764 = vrcp.f32 %v5076_v54  ;;  %v5204_v54 = vld [vmem:[#allocation4 + $0x2a8] sm:$0xff] }
 0xa41   :  { %v8761_v58 = vpop.eup %8760 }
 0xa42   :  { %v5097_v44 = vmul.f32 %v8761_v58, %v8759_v10  ;;  %v8763_v47 = vpop.eup %8762  ;;  %v8412_v10 = vpack.c.bf16 %v5188_v35, %v5179_v34  ;;  %v5195_v58 = vld [vmem:[#allocation4 + $0x260] sm:$0xff]  ;;  %v5278_v34 = vld [vmem:[#allocation4 + $0x4f8] sm:$0xff] }
 0xa43   :  { %v8765_v62 = vpop.eup %8764  ;;  %v5286_v35 = vld [vmem:[#allocation4 + $0x538] sm:$0xff] }
 0xa44   :  { %v5098_v45 = vadd.f32 %v5097_v44, %v5096_v43  ;;  %v8350_v43 = vpack.c.bf16 %v5205_v63, %v5196_v25  ;;  %v8414_v44 = vpack.c.bf16 %v5207_v40, %v5198_v39  ;;  %v5295_v25 = vld [vmem:[#allocation4 + $0x580] sm:$0xff]  ;;  %v5288_v63 = vld [vmem:[#allocation4 + $0x548] sm:$0xff]  ;;  %v5297_v39 = vld [vmem:[#allocation4 + $0x590] sm:$0xff] }
 0xa46   :  { %8766 = vtanh.f32 %v5098_v45  ;;  %v5103_v19 = vsub.f32 %v5095_v12, %v5098_v45  ;;  %v5168_v12 = vld [vmem:[#allocation4 + $0x188] sm:$0xff] }
 0xa47   :  { %v8344_v27 = vpack.c.bf16 %v5168_v12, %v5159_v11  ;;  %v5258_v11 = vld [vmem:[#allocation4 + $0x458] sm:$0xff] }
 0xa48   :  { %v5104_v31 = vmul.f32 %v8763_v47, %v5103_v19  ;;  %v5206_v19 = vld [vmem:[#allocation4 + $0x2b8] sm:$0xff] }
 0xa4a   :  { %v9174_v46 = vadd.f32 %v5104_v31, %v5098_v45  ;;  %v5197_v45 = vld [vmem:[#allocation4 + $0x270] sm:$0xff]  ;;  %v5223_v31 = vld [vmem:[#allocation4 + $0x340] sm:$0xff] }
 0xa4c   :  { %5113 = vst [vmem:[#allocation10 + $0x68] sm:$0xff] %v9174_v46 }
 0xa50   :  { %v8767_v48 = vpop.eup %8766 }
 0xa51   :  { %v5102_v49 = vmul.f32 %v8767_v48, %v8765_v62  ;;  %v5216_v62 = vld [vmem:[#allocation4 + $0x308] sm:$0xff]  ;;  %v5225_v48 = vld [vmem:[#allocation4 + $0x350] sm:$0xff] }
 0xa52   :  { %v8418_v16 = vpack.c.bf16 %v5225_v48, %v5216_v62  ;;  %v5315_v62 = vld [vmem:[#allocation4 + $0x620] sm:$0xff] }
 0xa53   :  { %v5106_v51 = vsub.f32 %v5100_v29, %v5102_v49  ;;  %v5177_v29 = vld [vmem:[#allocation4 + $0x1d0] sm:$0xff] }
 0xa54   :  { %v8348_v41 = vpack.c.bf16 %v5186_v17, %v5177_v29  ;;  %v5276_v29 = vld [vmem:[#allocation4 + $0x4e8] sm:$0xff]  ;;  %v8366_v17 = vpack.c.bf16 %v5277_v21, %v5268_v20  ;;  %v5367_v20 = vld [vmem:[#allocation4 + $0x7c0] sm:$0xff] }
 0xa55   :  { %v5107_v50 = vmul.f32 %v8763_v47, %v5106_v51  ;;  %v5214_v47 = vld [vmem:[#allocation4 + $0x2f8] sm:$0xff]  ;;  %v8416_v51 = vpack.c.bf16 %v5206_v19, %v5197_v45  ;;  %v5296_v45 = vld [vmem:[#allocation4 + $0x588] sm:$0xff] }
 0xa56   :  { %v8354_v37 = vpack.c.bf16 %v5223_v31, %v5214_v47  ;;  %v5304_v19 = vld [vmem:[#allocation4 + $0x5c8] sm:$0xff]  ;;  %v5313_v47 = vld [vmem:[#allocation4 + $0x610] sm:$0xff]  ;;  %v5306_v31 = vld [vmem:[#allocation4 + $0x5d8] sm:$0xff] }
 0xa57   :  { %v9177_v52 = vadd.f32 %v5107_v50, %v5102_v49  ;;  %v8352_v49 = vpack.c.bf16 %v5204_v54, %v5195_v58  ;;  %v5213_v50 = vld [vmem:[#allocation4 + $0x2f0] sm:$0xff]  ;;  %v5294_v58 = vld [vmem:[#allocation4 + $0x578] sm:$0xff]  ;;  %v8370_v54 = vpack.c.bf16 %v5295_v25, %v5286_v35  ;;  %v5360_v21 = vld [vmem:[#allocation4 + $0x788] sm:$0xff] }
 0xa58   :  { %v5385_v35 = vld [vmem:[#allocation4 + $0x850] sm:$0xff]  ;;  %v5378_v25 = vld [vmem:[#allocation4 + $0x818] sm:$0xff] }
 0xa59   :  { %5112 = vst [vmem:[#allocation10 + $0x60] sm:$0xff] %v9177_v52  ;;  %v5116_v53 = vadd.f32 1e-06, %v9177_v52 }
 0xa5b   :  { %8768 = vlog2.f32 %v5116_v53  ;;  %v5222_v53 = vld [vmem:[#allocation4 + $0x338] sm:$0xff] }
 0xa5c   :  { %v8356_v42 = vpack.c.bf16 %v5222_v53, %v5213_v50  ;;  %v5312_v50 = vld [vmem:[#allocation4 + $0x608] sm:$0xff]  ;;  %v8374_v53 = vpack.c.bf16 %v5313_v47, %v5304_v19  ;;  %v5403_v19 = vld [vmem:[#allocation4 + $0x8e0] sm:$0xff] }
 0xa5d   :  { %v5396_v47 = vld [vmem:[#allocation4 + $0x8a8] sm:$0xff] }
 0xa65   :  { %v8769_v32 = vpop.eup %8768 }
 0xa66   :  { %v9181_v36 = vmul.f32 0.6931472, %v8769_v32  ;;  %v5241_v32 = vld [vmem:[#allocation4 + $0x3d0] sm:$0xff] }
 0xa67   :  { %v8358_v2 = vpack.c.bf16 %v5241_v32, %v5232_v57  ;;  %v5331_v57 = vld [vmem:[#allocation4 + $0x6a0] sm:$0xff]  ;;  %v5324_v32 = vld [vmem:[#allocation4 + $0x668] sm:$0xff] }
 0xa68   :  { %5481 = vmatprep.mubr.f32.mxu1 %v9181_v36  ;;  %5552 = vmatprep.mubr.f32.mxu0 %v9181_v36 }
 0xa69   :  { %5482 = vmatmul.mubr.f32.vlgmr.msra.gmra.mrb[34].mxu1 %v9177_v52  ;;  %5553 = vmatmul.mubr.f32.vlgmr.msra.gmra.mrb[36].mxu0 %v9177_v52 }
 0xa6a   :  { %8337 = vmatpush1.bf16.msra.mxu1 %v8336_v15  ;;  %8401 = vmatpush1.bf16.msra.mxu0 %v8400_v0  ;;  %v8420_v15 = vpack.c.bf16 %v5224_v56, %v5215_v61  ;;  %v5231_v0 = vld [vmem:[#allocation4 + $0x380] sm:$0xff]  ;;  %v5314_v61 = vld [vmem:[#allocation4 + $0x618] sm:$0xff] }
 0xa6b   :  { %5623 = vmatprep.mubr.f32.mxu1 %v9181_v36  ;;  %5694 = vmatprep.mubr.f32.mxu0 %v9181_v36  ;;  %v8360_v18 = vpack.c.bf16 %v5240_v1, %v5231_v0  ;;  %v5322_v56 = vld [vmem:[#allocation4 + $0x658] sm:$0xff] }
 0xa6c   :  { %8339 = vmatprep.subr.bf16.mxu1 %v8338_v24  ;;  %8403 = vmatprep.subr.bf16.mxu0 %v8402_v6  ;;  %v5250_v24 = vld [vmem:[#allocation4 + $0x418] sm:$0xff]  ;;  %v5259_v6 = vld [vmem:[#allocation4 + $0x460] sm:$0xff]  ;;  %v8378_v1 = vpack.c.bf16 %v5331_v57, %v5322_v56  ;;  %v5280_v56 = vld [vmem:[#allocation4 + $0x508] sm:$0xff] }
 0xa6d   :  { %v8362_v12 = vpack.c.bf16 %v5259_v6, %v5250_v24  ;;  %v5330_v0 = vld [vmem:[#allocation4 + $0x698] sm:$0xff]  ;;  %v5349_v24 = vld [vmem:[#allocation4 + $0x730] sm:$0xff] }
 0xa6e   :  { %8341 = vmatpush1.bf16.msra.mxu1 %v8340_v9  ;;  %8405 = vmatpush1.bf16.msra.mxu0 %v8404_v30  ;;  %v8424_v9 = vpack.c.bf16 %v5242_v3, %v5233_v5  ;;  %v5249_v30 = vld [vmem:[#allocation4 + $0x410] sm:$0xff]  ;;  %v5332_v5 = vld [vmem:[#allocation4 + $0x6a8] sm:$0xff]  ;;  %v5342_v6 = vld [vmem:[#allocation4 + $0x6f8] sm:$0xff] }
 0xa6f   :  { %8343 = vmatprep.subr.bf16.mxu1 %v8342_v13  ;;  %8407 = vmatprep.subr.bf16.mxu0 %v8406_v26  ;;  %v8426_v13 = vpack.c.bf16 %v5261_v8, %v5252_v7  ;;  %v5251_v26 = vld [vmem:[#allocation4 + $0x420] sm:$0xff]  ;;  %v8364_v23 = vpack.c.bf16 %v5258_v11, %v5249_v30  ;;  %v5340_v3 = vld [vmem:[#allocation4 + $0x6e8] sm:$0xff] }
 0xa70   :  { %v5351_v7 = vld [vmem:[#allocation4 + $0x740] sm:$0xff]  ;;  %v5348_v30 = vld [vmem:[#allocation4 + $0x728] sm:$0xff]  ;;  %v8382_v11 = vpack.c.bf16 %v5349_v24, %v5340_v3 }
 0xa71   :  { %v5307_v3 = vld [vmem:[#allocation4 + $0x5e0] sm:$0xff]  ;;  %v5316_v24 = vld [vmem:[#allocation4 + $0x628] sm:$0xff] }
 0xa72   :  { %8345 = vmatpush1.bf16.msra.mxu1 %v8344_v27  ;;  %8409 = vmatpush1.bf16.msra.mxu0 %v8408_v28  ;;  %v8428_v27 = vpack.c.bf16 %v5260_v14, %v5251_v26  ;;  %v5267_v28 = vld [vmem:[#allocation4 + $0x4a0] sm:$0xff]  ;;  %v5350_v26 = vld [vmem:[#allocation4 + $0x738] sm:$0xff] }
 0xa73   :  { %8347 = vmatprep.subr.bf16.mxu1 %v8346_v55  ;;  %8411 = vmatprep.subr.bf16.mxu0 %v8410_v33  ;;  %v8430_v55 = vpack.c.bf16 %v5279_v4, %v5270_v22  ;;  %v5269_v33 = vld [vmem:[#allocation4 + $0x4b0] sm:$0xff]  ;;  %v8368_v40 = vpack.c.bf16 %v5276_v29, %v5267_v28  ;;  %v5358_v14 = vld [vmem:[#allocation4 + $0x778] sm:$0xff] }
 0xa74   :  { %v5369_v22 = vld [vmem:[#allocation4 + $0x7d0] sm:$0xff]  ;;  %v5366_v28 = vld [vmem:[#allocation4 + $0x7b8] sm:$0xff]  ;;  %v8386_v29 = vpack.c.bf16 %v5367_v20, %v5358_v14  ;;  %v5343_v14 = vld [vmem:[#allocation4 + $0x700] sm:$0xff] }
 0xa75   :  { %v5352_v20 = vld [vmem:[#allocation4 + $0x748] sm:$0xff] }
 0xa76   :  { %8349 = vmatpush1.bf16.msra.mxu1 %v8348_v41  ;;  %8413 = vmatpush1.bf16.msra.mxu0 %v8412_v10  ;;  %v8432_v41 = vpack.c.bf16 %v5278_v34, %v5269_v33  ;;  %v5285_v10 = vld [vmem:[#allocation4 + $0x530] sm:$0xff]  ;;  %v5368_v33 = vld [vmem:[#allocation4 + $0x7c8] sm:$0xff] }
 0xa77   :  { %8351 = vmatprep.subr.bf16.mxu1 %v8350_v43  ;;  %8415 = vmatprep.subr.bf16.mxu0 %v8414_v44  ;;  %v8434_v43 = vpack.c.bf16 %v5297_v39, %v5288_v63  ;;  %v5287_v44 = vld [vmem:[#allocation4 + $0x540] sm:$0xff]  ;;  %v8372_v48 = vpack.c.bf16 %v5294_v58, %v5285_v10  ;;  %v5376_v34 = vld [vmem:[#allocation4 + $0x808] sm:$0xff] }
 0xa78   :  { %v5387_v63 = vld [vmem:[#allocation4 + $0x860] sm:$0xff]  ;;  %v5384_v10 = vld [vmem:[#allocation4 + $0x848] sm:$0xff]  ;;  %v8390_v58 = vpack.c.bf16 %v5385_v35, %v5376_v34 }
 0xa79   :  { %v5388_v34 = vld [vmem:[#allocation4 + $0x868] sm:$0xff] }
 0xa7a   :  { %8353 = vmatpush1.bf16.msra.mxu1 %v8352_v49  ;;  %8417 = vmatpush1.bf16.msra.mxu0 %v8416_v51  ;;  %v8436_v49 = vpack.c.bf16 %v5296_v45, %v5287_v44  ;;  %v5303_v51 = vld [vmem:[#allocation4 + $0x5c0] sm:$0xff]  ;;  %v5386_v44 = vld [vmem:[#allocation4 + $0x858] sm:$0xff] }
 0xa7b   :  { %8355 = vmatprep.subr.bf16.mxu1 %v8354_v37  ;;  %8419 = vmatprep.subr.bf16.mxu0 %v8418_v16  ;;  %v8438_v37 = vpack.c.bf16 %v5315_v62, %v5306_v31  ;;  %v5305_v16 = vld [vmem:[#allocation4 + $0x5d0] sm:$0xff]  ;;  %v8376_v60 = vpack.c.bf16 %v5312_v50, %v5303_v51  ;;  %v5394_v45 = vld [vmem:[#allocation4 + $0x898] sm:$0xff] }
 0xa7c   :  { %v5405_v31 = vld [vmem:[#allocation4 + $0x8f0] sm:$0xff]  ;;  %v8394_v51 = vpack.c.bf16 %v5403_v19, %v5394_v45 }
 0xa7d   :  { %v8458_v50 = vpack.c.bf16 %v5405_v31, %v5396_v47 }
 0xa7e   :  { %8357 = vmatpush1.bf16.msra.mxu1 %v8356_v42  ;;  %8421 = vmatpush1.bf16.msra.mxu0 %v8420_v15  ;;  %v8440_v42 = vpack.c.bf16 %v5314_v61, %v5305_v16  ;;  %v5321_v15 = vld [vmem:[#allocation4 + $0x650] sm:$0xff]  ;;  %v5404_v16 = vld [vmem:[#allocation4 + $0x8e8] sm:$0xff]  ;;  %v5271_v61 = vld [vmem:[#allocation4 + $0x4c0] sm:$0xff] }
 0xa7f   :  { %8359 = vmatprep.subr.bf16.mxu1 %v8358_v2  ;;  %8423 = vmatprep.subr.bf16.mxu0 %v8422_v38  ;;  %v8442_v2 = vpack.c.bf16 %v5333_v59, %v5324_v32  ;;  %v5323_v38 = vld [vmem:[#allocation4 + $0x660] sm:$0xff]  ;;  %v8380_v8 = vpack.c.bf16 %v5330_v0, %v5321_v15  ;;  %v8462_v59 = vpack.c.bf16 %v5280_v56, %v5271_v61  ;;  %v5289_v15 = vld [vmem:[#allocation4 + $0x550] sm:$0xff]  ;;  %v5298_v0 = vld [vmem:[#allocation4 + $0x598] sm:$0xff] }
 0xa82   :  { %8361 = vmatpush1.bf16.msra.mxu1 %v8360_v18  ;;  %8425 = vmatpush1.bf16.msra.mxu0 %v8424_v9  ;;  %v8444_v18 = vpack.c.bf16 %v5332_v5, %v5323_v38  ;;  %v5339_v9 = vld [vmem:[#allocation4 + $0x6e0] sm:$0xff]  ;;  %v5145_v38 = vld [vmem:[#allocation4 + $0xd0] sm:$0xff]  ;;  %v5154_v5 = vld [vmem:[#allocation4 + $0x118] sm:$0xff] }
 0xa83   :  { %8363 = vmatprep.subr.bf16.mxu1 %v8362_v12  ;;  %8427 = vmatprep.subr.bf16.mxu0 %v8426_v13  ;;  %v8446_v12 = vpack.c.bf16 %v5351_v7, %v5342_v6  ;;  %v5341_v13 = vld [vmem:[#allocation4 + $0x6f0] sm:$0xff]  ;;  %v8384_v4 = vpack.c.bf16 %v5348_v30, %v5339_v9  ;;  %v8468_v6 = vpack.c.bf16 %v5154_v5, %v5145_v38  ;;  %v5334_v30 = vld [vmem:[#allocation4 + $0x6b8] sm:$0xff]  ;;  %v5412_v38 = vld [vmem:[#allocation8 + $0x218] sm:$0xff] }
 0xa84   :  { %v8470_v7 = vpack.c.bf16 %v5316_v24, %v5307_v3  ;;  %v5325_v9 = vld [vmem:[#allocation4 + $0x670] sm:$0xff] }
 0xa86   :  { %8365 = vmatpush1.bf16.msra.mxu1 %v8364_v23  ;;  %8429 = vmatpush1.bf16.msra.mxu0 %v8428_v27  ;;  %v8448_v23 = vpack.c.bf16 %v5350_v26, %v5341_v13  ;;  %v5357_v27 = vld [vmem:[#allocation4 + $0x770] sm:$0xff]  ;;  %v5190_v26 = vld [vmem:[#allocation4 + $0x238] sm:$0xff] }
 0xa87   :  { %8367 = vmatprep.subr.bf16.mxu1 %v8366_v17  ;;  %8431 = vmatprep.subr.bf16.mxu0 %v8430_v55  ;;  %v8450_v17 = vpack.c.bf16 %v5369_v22, %v5360_v21  ;;  %v5359_v55 = vld [vmem:[#allocation4 + $0x780] sm:$0xff]  ;;  %v8388_v39 = vpack.c.bf16 %v5366_v28, %v5357_v27  ;;  %v5181_v13 = vld [vmem:[#allocation4 + $0x1f0] sm:$0xff]  ;;  %v8478_v22 = vpack.c.bf16 %v5352_v20, %v5343_v14  ;;  %v5370_v27 = vld [vmem:[#allocation4 + $0x7d8] sm:$0xff] }
 0xa88   :  { %v8476_v21 = vpack.c.bf16 %v5190_v26, %v5181_v13 }
 0xa8a   :  { %8369 = vmatpush1.bf16.msra.mxu1 %v8368_v40  ;;  %8433 = vmatpush1.bf16.msra.mxu0 %v8432_v41  ;;  %v8452_v40 = vpack.c.bf16 %v5368_v33, %v5359_v55  ;;  %v5375_v41 = vld [vmem:[#allocation4 + $0x800] sm:$0xff]  ;;  %v5226_v55 = vld [vmem:[#allocation4 + $0x358] sm:$0xff] }
 0xa8b   :  { %8371 = vmatprep.subr.bf16.mxu1 %v8370_v54  ;;  %8435 = vmatprep.subr.bf16.mxu0 %v8434_v43  ;;  %v8454_v54 = vpack.c.bf16 %v5387_v63, %v5378_v25  ;;  %v5377_v43 = vld [vmem:[#allocation4 + $0x810] sm:$0xff]  ;;  %v8392_v62 = vpack.c.bf16 %v5384_v10, %v5375_v41  ;;  %v5379_v33 = vld [vmem:[#allocation4 + $0x820] sm:$0xff]  ;;  %v5406_v41 = vld [vmem:[#allocation4 + $0x8f8] sm:$0xff] }
 0xa8c   :  { %v8486_v25 = vpack.c.bf16 %v5388_v34, %v5379_v33  ;;  %v5235_v63 = vld [vmem:[#allocation4 + $0x3a0] sm:$0xff]  ;;  %v5416_v34 = vld [vmem:[#allocation8 + $0x238] sm:$0xff] }
 0xa8e   :  { %8373 = vmatpush1.bf16.msra.mxu1 %v8372_v48  ;;  %8437 = vmatpush1.bf16.msra.mxu0 %v8436_v49  ;;  %v8456_v48 = vpack.c.bf16 %v5386_v44, %v5377_v43  ;;  %v5393_v49 = vld [vmem:[#allocation4 + $0x890] sm:$0xff]  ;;  %v5262_v43 = vld [vmem:[#allocation4 + $0x478] sm:$0xff] }
 0xa8f   :  { %8375 = vmatprep.subr.bf16.mxu1 %v8374_v53  ;;  %8439 = vmatprep.subr.bf16.mxu0 %v8438_v37  ;;  %v5402_v53 = vld [vmem:[#allocation4 + $0x8d8] sm:$0xff]  ;;  %v5395_v37 = vld [vmem:[#allocation4 + $0x8a0] sm:$0xff] }
 0xa90   :  { %v8396_v57 = vpack.c.bf16 %v5402_v53, %v5393_v49  ;;  %v8460_v32 = vpack.c.bf16 %v5404_v16, %v5395_v37  ;;  %v5410_v37 = vld [vmem:[#allocation8 + $0x208] sm:$0xff] }
 0xa92   :  { %8377 = vmatpush1.bf16.msra.mxu1 %v8376_v60  ;;  %8441 = vmatpush1.bf16.msra.mxu0 %v8440_v42  ;;  %v5127_v60 = vld [vmem:[#allocation4 + $0x40] sm:$0xff]  ;;  %v5136_v42 = vld [vmem:[#allocation4 + $0x88] sm:$0xff] }
 0xa93   :  { %8379 = vmatprep.subr.bf16.mxu1 %v8378_v1  ;;  %8443 = vmatprep.subr.bf16.mxu0 %v8442_v2  ;;  %v8464_v1 = vpack.c.bf16 %v5136_v42, %v5127_v60  ;;  %v8466_v2 = vpack.c.bf16 %v5298_v0, %v5289_v15 }
 0xa96   :  { %8381 = vmatpush1.bf16.msra.mxu1 %v8380_v8  ;;  %8445 = vmatpush1.bf16.msra.mxu0 %v8444_v18  ;;  %v5163_v8 = vld [vmem:[#allocation4 + $0x160] sm:$0xff]  ;;  %v5172_v18 = vld [vmem:[#allocation4 + $0x1a8] sm:$0xff] }
 0xa97   :  { %8383 = vmatprep.subr.bf16.mxu1 %v8382_v11  ;;  %8447 = vmatprep.subr.bf16.mxu0 %v8446_v12  ;;  %v8472_v11 = vpack.c.bf16 %v5172_v18, %v5163_v8  ;;  %v8474_v12 = vpack.c.bf16 %v5334_v30, %v5325_v9 }
 0xa9a   :  { %8385 = vmatpush1.bf16.msra.mxu1 %v8384_v4  ;;  %8449 = vmatpush1.bf16.msra.mxu0 %v8448_v23  ;;  %v5208_v4 = vld [vmem:[#allocation4 + $0x2c8] sm:$0xff]  ;;  %v5361_v23 = vld [vmem:[#allocation4 + $0x790] sm:$0xff] }
 0xa9b   :  { %8387 = vmatprep.subr.bf16.mxu1 %v8386_v29  ;;  %8451 = vmatprep.subr.bf16.mxu0 %v8450_v17  ;;  %v8482_v29 = vpack.c.bf16 %v5370_v27, %v5361_v23  ;;  %v5217_v17 = vld [vmem:[#allocation4 + $0x310] sm:$0xff] }
 0xa9c   :  { %v8484_v35 = vpack.c.bf16 %v5226_v55, %v5217_v17 }
 0xa9e   :  { %8389 = vmatpush1.bf16.msra.mxu1 %v8388_v39  ;;  %8453 = vmatpush1.bf16.msra.mxu0 %v8452_v40  ;;  %v5244_v39 = vld [vmem:[#allocation4 + $0x3e8] sm:$0xff]  ;;  %v5397_v40 = vld [vmem:[#allocation4 + $0x8b0] sm:$0xff] }
 0xa9f   :  { %8391 = vmatprep.subr.bf16.mxu1 %v8390_v58  ;;  %8455 = vmatprep.subr.bf16.mxu0 %v8454_v54  ;;  %v8488_v10 = vpack.c.bf16 %v5244_v39, %v5235_v63  ;;  %v8490_v58 = vpack.c.bf16 %v5406_v41, %v5397_v40  ;;  %v5253_v54 = vld [vmem:[#allocation4 + $0x430] sm:$0xff] }
 0xaa0   :  { %v8492_v44 = vpack.c.bf16 %v5262_v43, %v5253_v54 }
 0xaa2   :  { %8393 = vmatpush1.bf16.msra.mxu1 %v8392_v62  ;;  %8457 = vmatpush1.bf16.msra.mxu0 %v8456_v48  ;;  %v5409_v62 = vld [vmem:[#allocation8 + $0x200] sm:$0xff]  ;;  %v5408_v48 = vld [vmem:[#allocation8 + $0x1f8] sm:$0xff] }
 0xaa3   :  { %8395 = vmatprep.subr.bf16.mxu1 %v8394_v51  ;;  %8459 = vmatprep.subr.bf16.mxu0 %v8458_v50 }
 0xaa6   :  { %8397 = vmatpush1.bf16.msra.mxu1 %v8396_v57  ;;  %8461 = vmatpush1.bf16.msra.mxu0 %v8460_v32 }
 0xaa7   :  { %8463 = vmatprep.subr.bf16.mxu1 %v8462_v59 }
 0xaa9   :  { %5624 = vmatmul.mubr.f32.vlgmr.msra.gmra.mrb[36].mxu1 %v9177_v52  ;;  %5695 = vmatmul.mubr.f32.vlgmr.msra.gmra.mrb[38].mxu0 %v9177_v52 }
 0xaaa   :  { %8465 = vmatpush3.bf16.msra.mxu1 %v8464_v1  ;;  %5765 = vmatprep.mubr.f32.mxu1 %v9181_v36  ;;  %v5199_v36 = vld [vmem:[#allocation4 + $0x280] sm:$0xff] }
 0xaab   :  { %8467 = vmatprep.subr.bf16.mxu1 %v8466_v2  ;;  %v8480_v28 = vpack.c.bf16 %v5208_v4, %v5199_v36  ;;  %v5413_v2 = vld [vmem:[#allocation8 + $0x220] sm:$0xff] }
 0xaae   :  { %8469 = vmatpush3.bf16.msra.mxu1 %v8468_v6 }
 0xaaf   :  { %8471 = vmatprep.subr.bf16.mxu1 %v8470_v7 }
 0xab2   :  { %8473 = vmatpush3.bf16.msra.mxu1 %v8472_v11 }
 0xab3   :  { %8475 = vmatprep.subr.bf16.mxu1 %v8474_v12  ;;  %v5411_v12 = vld [vmem:[#allocation8 + $0x210] sm:$0xff] }
 0xab6   :  { %8477 = vmatpush3.bf16.msra.mxu1 %v8476_v21  ;;  %v5414_v21 = vld [vmem:[#allocation8 + $0x228] sm:$0xff] }
 0xab7   :  { %8479 = vmatprep.subr.bf16.mxu1 %v8478_v22 }
 0xaba   :  { %8481 = vmatpush3.bf16.msra.mxu1 %v8480_v28 }
 0xabb   :  { %8483 = vmatprep.subr.bf16.mxu1 %v8482_v29 }
 0xabe   :  { %8485 = vmatpush3.bf16.msra.mxu1 %v8484_v35 }
 0xabf   :  { %8487 = vmatprep.subr.bf16.mxu1 %v8486_v25 }
 0xac2   :  { %8489 = vmatpush3.bf16.msra.mxu1 %v8488_v10 }
 0xac3   :  { %8491 = vmatprep.subr.bf16.mxu1 %v8490_v58 }
 0xac6   :  { %8493 = vmatpush3.bf16.msra.mxu1 %v8492_v44 }
 0xac9   :  { %5766 = vmatmul.mubr.f32.vlgmr.msra.gmra.mrb[38].mxu1 %v9177_v52  ;;  %v5415_v52 = vld [vmem:[#allocation8 + $0x230] sm:$0xff] }
 0xb3c   :  { %v5483_v45 = vpop.f32.mrb[34].mxu1  ;;  %v5554_v19 = vpop.f32.mrb[36].mxu0 }
 0xb3d   :  { %v5485_v47 = vpop.f32.mrb[35].mxu1  ;;  %v5556_v31 = vpop.f32.mrb[37].mxu0  ;;  %v5484_v51 = vadd.f32 %v5483_v45, %v5408_v48  ;;  %v5555_v16 = vadd.f32 %v5554_v19, %v5410_v37 }
 0xb3e   :  { %v5486_v49 = vadd.f32 %v5485_v47, %v5409_v62  ;;  %v5557_v14 = vadd.f32 %v5556_v31, %v5411_v12 }
 0xb3f   :  { %v5903_v53 = vmul.f32 -1.442695, %v5484_v51  ;;  %v5905_v57 = vmul.f32 -1.442695, %v5555_v16 }
 0xb40   :  { %v5904_v50 = vmul.f32 -1.442695, %v5486_v49  ;;  %v5906_v20 = vmul.f32 -1.442695, %v5557_v14 }
 0xb42   :  { %8770 = vpow2.f32 %v5904_v50 }
 0xb43   :  { %8772 = vpow2.f32 %v5903_v53 }
 0xb44   :  { %8774 = vpow2.f32 %v5905_v57 }
 0xb4c   :  { %v8771_v61 = vpop.eup %8770 }
 0xb4d   :  { %v8773_v56 = vpop.eup %8772  ;;  %v5793_v32 = vadd.f32 1.0, %v8771_v61 }
 0xb4e   :  { %v5792_v59 = vadd.f32 1.0, %v8773_v56  ;;  %v8775_v5 = vpop.eup %8774 }
 0xb4f   :  { %8776 = vrcp.f32 %v5793_v32  ;;  %v5794_v18 = vadd.f32 1.0, %v8775_v5 }
 0xb50   :  { %8778 = vrcp.f32 %v5792_v59 }
 0xb59   :  { %v8777_v24 = vpop.eup %8776 }
 0xb5a   :  { %v8779_v7 = vpop.eup %8778  ;;  %v5815_v9 = vmul.f32 %v8777_v24, %v9174_v46 }
 0xb7c   :  { %v5625_v60 = vpop.f32.mrb[36].mxu1  ;;  %v5696_v42 = vpop.f32.mrb[38].mxu0 }
 0xb7d   :  { %v5627_v15 = vpop.f32.mrb[37].mxu1  ;;  %v5698_v0 = vpop.f32.mrb[39].mxu0  ;;  %v5626_v6 = vadd.f32 %v5625_v60, %v5412_v38  ;;  %v5697_v22 = vadd.f32 %v5696_v42, %v5414_v21 }
 0xb7e   :  { %v5699_v1 = vadd.f32 %v5698_v0, %v5415_v52  ;;  %v5628_v3 = vadd.f32 %v5627_v15, %v5413_v2 }
 0xb7f   :  { %v5907_v13 = vmul.f32 -1.442695, %v5626_v6  ;;  %v5909_v28 = vmul.f32 -1.442695, %v5697_v22 }
 0xb80   :  { %8780 = vtanh.f32 %v5699_v1  ;;  %v5908_v30 = vmul.f32 -1.442695, %v5628_v3 }
 0xb81   :  { %8782 = vrcp.f32 %v5794_v18 }
 0xb82   :  { %8784 = vpow2.f32 %v5908_v30 }
 0xb83   :  { %8786 = vpow2.f32 %v5907_v13 }
 0xb8a   :  { %v8781_v8 = vpop.eup %8780 }
 0xb8b   :  { %v5816_v11 = vmul.f32 %v8781_v8, %v8779_v7  ;;  %v8783_v36 = vpop.eup %8782 }
 0xb8c   :  { %v8785_v4 = vpop.eup %8784 }
 0xb8d   :  { %v5817_v26 = vadd.f32 %v5816_v11, %v5815_v9  ;;  %v8787_v23 = vpop.eup %8786  ;;  %v5797_v29 = vadd.f32 1.0, %v8785_v4 }
 0xb8e   :  { %v5796_v33 = vadd.f32 1.0, %v8787_v23 }
 0xb8f   :  { %8788 = vtanh.f32 %v5817_v26 }
 0xb90   :  { %8790 = vpow2.f32 %v5906_v20 }
 0xb91   :  { %8792 = vpow2.f32 %v5909_v28 }
 0xb92   :  { %8794 = vrcp.f32 %v5797_v29 }
 0xb93   :  { %8796 = vrcp.f32 %v5796_v33 }
 0xb99   :  { %v8789_v27 = vpop.eup %8788 }
 0xb9a   :  { %v5822_v17 = vmul.f32 %v8789_v27, %v8783_v36  ;;  %v8791_v39 = vpop.eup %8790 }
 0xb9b   :  { %v5795_v40 = vadd.f32 1.0, %v8791_v39  ;;  %v8793_v41 = vpop.eup %8792 }
 0xb9c   :  { %v6187_v55 = vpop.f32.mrb[38].mxu1  ;;  %v8795_v10 = vpop.eup %8794  ;;  %v5798_v43 = vadd.f32 1.0, %v8793_v41 }
 0xb9d   :  { %v6188_v35 = vpop.f32.mrb[39].mxu1  ;;  %v8797_v58 = vpop.eup %8796  ;;  %v5818_v44 = vmul.f32 %v8795_v10, %v9174_v46 }
 0xb9e   :  { %v6189_v25 = vadd.f32 %v6188_v35, %v6187_v55 }
 0xba0   :  { %v5768_v63 = vadd.f32 %v6189_v25, %v5416_v34 }
 0xba2   :  { %8798 = vtanh.f32 %v5768_v63 }
 0xba3   :  { %8800 = vrcp.f32 %v5795_v40 }
 0xba4   :  { %8802 = vrcp.f32 %v5798_v43 }
 0xbac   :  { %v8799_v54 = vpop.eup %8798 }
 0xbad   :  { %v5819_v45 = vmul.f32 %v8799_v54, %v8797_v58  ;;  %v8801_v31 = vpop.eup %8800 }
 0xbae   :  { %v8803_v49 = vpop.eup %8802 }
 0xbaf   :  { %v5820_v19 = vadd.f32 %v5819_v45, %v5818_v44 }
 0xbb1   :  { %8804 = vtanh.f32 %v5820_v19  ;;  %v5825_v47 = vsub.f32 %v5817_v26, %v5820_v19 }
 0xbb3   :  { %v5826_v62 = vmul.f32 %v8801_v31, %v5825_v47 }
 0xbb5   :  { %v5827_v48 = vadd.f32 %v5826_v62, %v5820_v19 }
 0xbb7   :  { %5835 = vst [vmem:[#allocation10 + $0x78] sm:$0xff] %v5827_v48 }
 0xbbb   :  { %v8805_v51 = vpop.eup %8804 }
 0xbbc   :  { %v5824_v50 = vmul.f32 %v8805_v51, %v8803_v49 }
 0xbbe   :  { %v5828_v53 = vsub.f32 %v5822_v17, %v5824_v50 }
 0xbc0   :  { %v5829_v37 = vmul.f32 %v8801_v31, %v5828_v53 }
 0xbc2   :  { %v5830_v16 = vadd.f32 %v5829_v37, %v5824_v50 }
 0xbc4   :  { %5834 = vst [vmem:[#allocation10 + $0x70] sm:$0xff] %v5830_v16 }
 0xbc5   :  { %8889 = shalt.err (!%p8886_p0)
}
 0xbc6   :  { %s8890_s25 = scalar_lea.hbm %s9210_s3, 2048 }
 0xbc7   :  { %p8891_p1 = scmp.ne.s32.totalorder %s9210_s3, %s8890_s25  ;;  %p8894_p2 = scmp.lt.u32.totalorder %s8890_s25, %s9210_s3 }
 0xbc9   :  { %p8896_p3 = pnand %p8894_p2, %p8891_p1 }
 0xbcb   :  { %8899 = shalt.err (!%p8896_p3)
}
 0xbcc   :  { %s8914_s30 = smov 256   ;;  %s8915_s4 = smov 16  }
 0xbcd   :  { %5847 = dma.vmem_to_hbm [thread:$0]  %s5842_s21, 2048, %s9210_s3, [#allocation7], %s8914_s30, %s8914_s30, %s8915_s4  }
 0xbce   :  { %8906 = dma.done.wait [#allocation7], 2048  }
 0xbcf   :  { %8907 = vsyncadd [#allocation7], 4294965248 }
 0xbd0   :  { %5851 = vsyncpa [#allocation6], 1 }
 0xbd1   :  { %5852 = vsyncpa [#allocation9], 1 }
 0xbd2   :  { %5853 = vsyncpa [#allocation7], 1 }

</bundles_post_ra>
